<compile_context>
chip_gen: v5e
topology: v5e:2x2
jax: 0.10.0
libtpu: 0.0.40
codegen_flags: <defaults>
</compile_context>

<pallas_src>
import jax
import jax.numpy as jnp
from jax import lax
from jax.experimental import pallas as pl
from jax.experimental.pallas import tpu as pltpu

# --- hyperparameters (mirror PatternAwareSTGAT defaults) ---------------------
NODE_FEATURES = 5
SPATIAL_HIDDEN = 32
NUM_HEADS = 8
HEAD_DIM = SPATIAL_HIDDEN // NUM_HEADS            # 4
TEMPORAL_HIDDEN = 64
TCOMP = TEMPORAL_HIDDEN // 3                      # 21  (per-LSTM hidden)
TREM = TEMPORAL_HIDDEN - 2 * TCOMP                # 22  (residual MLP width)
SEQ_LEN = 14
NUM_GAT_LAYERS = 3
CV_THRESHOLD = 1.5
FUSION_IN = SPATIAL_HIDDEN + TEMPORAL_HIDDEN      # 96

NPAD = 16                                         # nodes padded so H*NPAD == 128
HN = NUM_HEADS * NPAD                             # 128 (one full lane tile)
LOG_NPAD = 4                                      # log2(NPAD)
LOG_HEAD_DIM = 2                                  # log2(HEAD_DIM)
HC = 2 * TCOMP                                    # 42  merged LSTM hidden
GC = 4 * HC                                       # 168 merged gate width

VSPEC = pl.BlockSpec(memory_space=pltpu.MemorySpace.VMEM)
SSPEC = pl.BlockSpec(memory_space=pltpu.MemorySpace.SMEM)


# ======================= fused forward kernel ================================
def fused_forward_kernel(idx_ref, cv_ref, x0_ref, adjt_ref, seqs_ref,
                         gat_ref, lstm_ref, fus_ref, out_ref):
    f32 = jnp.float32
    N = NPAD
    H = NUM_HEADS

    def dot(a, b):
        return jnp.dot(a, b, preferred_element_type=f32)

    # ---- selector constants, generated in-kernel (no input DMAs) -----------
    r_h = lax.broadcasted_iota(jnp.int32, (H, HN), 0)
    k_h = lax.broadcasted_iota(jnp.int32, (H, HN), 1)
    b_rep = ((k_h >> LOG_NPAD) == r_h).astype(f32)                 # (H, 128)
    k_s = lax.broadcasted_iota(jnp.int32, (HN, H), 0)
    c_s = lax.broadcasted_iota(jnp.int32, (HN, H), 1)
    sum_mat = ((k_s >> LOG_NPAD) == c_s).astype(f32)               # (128, H)
    r_d = lax.broadcasted_iota(jnp.int32, (N, HN), 0)
    k_d = lax.broadcasted_iota(jnp.int32, (N, HN), 1)
    d_mask = ((k_d & (N - 1)) == r_d).astype(f32)                  # (16, 128)
    k_r = lax.broadcasted_iota(jnp.int32, (HN, N), 0)
    c_r = lax.broadcasted_iota(jnp.int32, (HN, N), 1)
    rep_v = ((k_r & (N - 1)) == c_r).astype(f32)                   # (128, 16)
    k_b = lax.broadcasted_iota(jnp.int32, (HN, SPATIAL_HIDDEN), 0)
    c_b = lax.broadcasted_iota(jnp.int32, (HN, SPATIAL_HIDDEN), 1)
    blk_mask = ((c_b >> LOG_HEAD_DIM) == (k_b >> LOG_NPAD)).astype(f32)   # (128, 32)

    adj_t = adjt_ref[...]                                          # (16, 128)

    # ---- spatial branch: 3 fused, head-packed GAT layers --------------------
    x = x0_ref[...]                                                # (16, 32)
    for l in range(NUM_GAT_LAYERS):
        w = gat_ref[l, 0:SPATIAL_HIDDEN, :]                        # (32, 32)
        att = gat_ref[l, SPATIAL_HIDDEN:2 * SPATIAL_HIDDEN, 0:2 * H]   # (32, 16)
        bias = gat_ref[l, 2 * SPATIAL_HIDDEN:2 * SPATIAL_HIDDEN + 1, :]  # (1, 32)

        hW = dot(x, w)                                             # (16, 32)
        s = dot(hW, att)                                           # (16, 16)
        s_dst = s[:, 0:H]                                          # (16, 8)
        s_src = s[:, H:2 * H]                                      # (16, 8)

        # e[i, h*N + j] = LeakyReLU(s_dst[i,h] + s_src[j,h]), masked by adjacency
        dst_part = dot(s_dst, b_rep)                               # (16, 128)
        src_row = jnp.sum(dot(s_src, b_rep) * d_mask, axis=0, keepdims=True)  # (1, 128)
        e = dst_part + src_row
        e = jnp.where(e > 0, e, 0.2 * e)                           # LeakyReLU(0.2)
        e = jnp.where(adj_t > 0, e, f32(-1e9))                     # mask non-edges

        # exact per-(row, head) softmax shift: leakyrelu(s_dst + max_j s_src)
        ub = s_dst + jnp.max(s_src, axis=0, keepdims=True)
        ub = jnp.where(ub > 0, ub, 0.2 * ub)                       # (16, 8)
        m_full = dot(ub, b_rep)                                    # (16, 128), const per head grp
        p = jnp.exp(e - m_full)                                    # masked -> exactly 0
        denom = jnp.maximum(dot(p, sum_mat), f32(1e-30))           # (16, 8)
        alpha = p * dot(1.0 / denom, b_rep)                        # per-head softmax (16, 128)

        h_blk = dot(rep_v, hW) * blk_mask                          # (128, 32) block-diag values
        o = dot(alpha, h_blk) + bias                               # aggregate + bias
        x = jnp.where(o > 0, o, jnp.exp(jnp.minimum(o, 0.0)) - 1.0)  # ELU
    spatial = x                                                    # (16, 32)

    # target-node row select via one-hot matmul (idx from SMEM)
    idx = idx_ref[0]
    onehot = (lax.broadcasted_iota(jnp.int32, (1, N), 1) == idx).astype(f32)
    target_spatial = dot(onehot, spatial)                          # (1, 32)

    # ---- temporal branch: trend + seasonal LSTMs merged block-diagonally ----
    wih0 = lstm_ref[0:2, :]                                        # (2, 168)
    whh0 = lstm_ref[8:50, :]                                       # (42, 168)
    wih1 = lstm_ref[56:98, :]                                      # (42, 168)
    whh1 = lstm_ref[104:146, :]                                    # (42, 168)
    b0 = lstm_ref[146:147, :]                                      # (1, 168)
    b1 = lstm_ref[147:148, :]                                      # (1, 168)

    def cell(g, c_prev):                                           # PyTorch gate order i,f,g,o
        i = jax.nn.sigmoid(g[:, 0:HC])
        f = jax.nn.sigmoid(g[:, HC:2 * HC])
        gg = jnp.tanh(g[:, 2 * HC:3 * HC])
        o = jax.nn.sigmoid(g[:, 3 * HC:4 * HC])
        c = f * c_prev + i * gg
        return o * jnp.tanh(c), c

    gins = dot(seqs_ref[:, 0:2], wih0) + b0                        # hoisted input proj (T, 168)
    z = jnp.zeros((1, HC), f32)
    h0, c0, h1c, c1c = z, z, z, z
    for t in range(SEQ_LEN):                                       # fully unrolled recurrence
        g0 = gins[t:t + 1, :] + dot(h0, whh0)
        h0, c0 = cell(g0, c0)
        g1 = dot(h0, wih1) + dot(h1c, whh1) + b1
        h1c, c1c = cell(g1, c1c)
    # h1c = [trend_h (21) | seasonal_h (21)]

    res_w = fus_ref[295:296, 0:TREM]
    res_b = fus_ref[296:297, 0:TREM]
    res_last = seqs_ref[SEQ_LEN - 1:SEQ_LEN, 2:3]                  # (1, 1)
    resid_h = jnp.maximum(res_last * res_w + res_b, 0.0)           # (1, 22)

    # ---- concat via iota-built placement matmuls ----------------------------
    def placement(width, offset):
        r = lax.broadcasted_iota(jnp.int32, (width, FUSION_IN), 0)
        c = lax.broadcasted_iota(jnp.int32, (width, FUSION_IN), 1)
        return (c == r + offset).astype(f32)

    comb = (dot(target_spatial, placement(SPATIAL_HIDDEN, 0))
            + dot(h1c, placement(HC, SPATIAL_HIDDEN))
            + dot(resid_h, placement(TREM, SPATIAL_HIDDEN + HC)))  # (1, 96)

    # ---- pattern gate + fusion head -----------------------------------------
    wgc = fus_ref[0:FUSION_IN, 0:FUSION_IN]
    w1f = fus_ref[96:192, 0:TEMPORAL_HIDDEN]
    w2f = fus_ref[192:256, 0:TEMPORAL_HIDDEN // 2]
    w3f = fus_ref[256:288, 0:SEQ_LEN]
    wgv = fus_ref[288:289, 0:FUSION_IN]
    bg = fus_ref[289:290, 0:FUSION_IN]
    b1f = fus_ref[290:291, 0:TEMPORAL_HIDDEN]
    gamma = fus_ref[291:292, 0:TEMPORAL_HIDDEN]
    beta = fus_ref[292:293, 0:TEMPORAL_HIDDEN]
    b2f = fus_ref[293:294, 0:TEMPORAL_HIDDEN // 2]
    b3f = fus_ref[294:295, 0:SEQ_LEN]

    cv = cv_ref[0]
    glogit = dot(comb, wgc) + cv * wgv + bg
    gate = jax.nn.sigmoid(glogit)                                  # (1, 96)
    gated = comb * gate
    hf = dot(gated, w1f) + b1f                                     # (1, 64)
    mu = jnp.mean(hf, axis=-1, keepdims=True)
    var = jnp.mean((hf - mu) * (hf - mu), axis=-1, keepdims=True)
    hf = (hf - mu) * lax.rsqrt(var + 1e-5) * gamma + beta          # LayerNorm
    hf = jnp.maximum(hf, 0.0)
    h2 = jnp.maximum(dot(hf, w2f) + b2f, 0.0)
    pred = dot(h2, w3f) + b3f                                      # (1, 14)

    # ---- pack outputs into one lane-dense (16, 128) slab ---------------------
    out_ref[...] = jnp.zeros((N, HN), f32)
    out_ref[:, 0:SPATIAL_HIDDEN] = spatial
    out_ref[0:1, SPATIAL_HIDDEN:SPATIAL_HIDDEN + FUSION_IN] = gate
    out_ref[1:2, SPATIAL_HIDDEN:SPATIAL_HIDDEN + SEQ_LEN] = pred


# ============================ parameters =====================================
def init_params(key):
    def nrm(k, shape, scale=0.2):
        return scale * jax.random.normal(k, shape, dtype=jnp.float32)

    keys = iter(jax.random.split(key, 64))
    f32 = jnp.float32

    # --- GAT slab: per layer rows 0:32 = W (layer 0 embedded in zero rows),
    #     rows 32:64 cols 0:8 = att_dst block, cols 8:16 = att_src block, row 64 = bias.
    gat = jnp.zeros((NUM_GAT_LAYERS, 72, SPATIAL_HIDDEN), f32)
    for l in range(NUM_GAT_LAYERS):
        in_f = NODE_FEATURES if l == 0 else SPATIAL_HIDDEN
        w = nrm(next(keys), (in_f, SPATIAL_HIDDEN))
        gat = gat.at[l, 0:in_f, :].set(w)
        att_dst = nrm(next(keys), (NUM_HEADS, HEAD_DIM))
        att_src = nrm(next(keys), (NUM_HEADS, HEAD_DIM))
        for hd in range(NUM_HEADS):
            r0 = SPATIAL_HIDDEN + hd * HEAD_DIM
            gat = gat.at[l, r0:r0 + HEAD_DIM, hd].set(att_dst[hd])
            gat = gat.at[l, r0:r0 + HEAD_DIM, NUM_HEADS + hd].set(att_src[hd])
        bias = nrm(next(keys), (SPATIAL_HIDDEN,))
        gat = gat.at[l, 2 * SPATIAL_HIDDEN, :].set(bias)

    # --- merged (block-diagonal) trend+seasonal 2-layer LSTM slab -------------
    def lstm_branch():
        return dict(
            wih0=nrm(next(keys), (1, 4 * TCOMP)),
            whh0=nrm(next(keys), (TCOMP, 4 * TCOMP)),
            b0=nrm(next(keys), (1, 4 * TCOMP)),
            wih1=nrm(next(keys), (TCOMP, 4 * TCOMP)),
            whh1=nrm(next(keys), (TCOMP, 4 * TCOMP)),
            b1=nrm(next(keys), (1, 4 * TCOMP)),
        )

    tr, se = lstm_branch(), lstm_branch()
    Ht = TCOMP

    def merge_cols(a, b):
        # per gate block q: [trend cols (21) | seasonal cols (21)]
        parts = []
        for q in range(4):
            parts.append(a[:, q * Ht:(q + 1) * Ht])
            parts.append(b[:, q * Ht:(q + 1) * Ht])
        return jnp.concatenate(parts, axis=-1)

    z1 = jnp.zeros((1, 4 * Ht), f32)
    zH = jnp.zeros((Ht, 4 * Ht), f32)
    wih0_m = jnp.concatenate([merge_cols(tr["wih0"], z1), merge_cols(z1, se["wih0"])], axis=0)
    whh0_m = jnp.concatenate([merge_cols(tr["whh0"], zH), merge_cols(zH, se["whh0"])], axis=0)
    wih1_m = jnp.concatenate([merge_cols(tr["wih1"], zH), merge_cols(zH, se["wih1"])], axis=0)
    whh1_m = jnp.concatenate([merge_cols(tr["whh1"], zH), merge_cols(zH, se["whh1"])], axis=0)
    b0_m = merge_cols(tr["b0"], se["b0"])
    b1_m = merge_cols(tr["b1"], se["b1"])

    lstm = jnp.zeros((152, GC), f32)
    lstm = lstm.at[0:2].set(wih0_m)
    lstm = lstm.at[8:50].set(whh0_m)
    lstm = lstm.at[56:98].set(wih1_m)
    lstm = lstm.at[104:146].set(whh1_m)
    lstm = lstm.at[146].set(b0_m[0])
    lstm = lstm.at[147].set(b1_m[0])

    # --- fusion slab: gate + fusion head + residual MLP ------------------------
    wgc = nrm(next(keys), (FUSION_IN, FUSION_IN))
    wgv = nrm(next(keys), (1, FUSION_IN))
    bg = nrm(next(keys), (1, FUSION_IN))
    w1 = nrm(next(keys), (FUSION_IN, TEMPORAL_HIDDEN))
    b1 = nrm(next(keys), (1, TEMPORAL_HIDDEN))
    gamma = jnp.ones((1, TEMPORAL_HIDDEN), f32)
    beta = jnp.zeros((1, TEMPORAL_HIDDEN), f32)
    w2 = nrm(next(keys), (TEMPORAL_HIDDEN, TEMPORAL_HIDDEN // 2))
    b2 = nrm(next(keys), (1, TEMPORAL_HIDDEN // 2))
    w3 = nrm(next(keys), (TEMPORAL_HIDDEN // 2, SEQ_LEN))
    b3 = nrm(next(keys), (1, SEQ_LEN))
    res_w = nrm(next(keys), (1, TREM))
    res_b = nrm(next(keys), (1, TREM))

    fus = jnp.zeros((304, FUSION_IN), f32)
    fus = fus.at[0:96, 0:96].set(wgc)
    fus = fus.at[96:192, 0:64].set(w1)
    fus = fus.at[192:256, 0:32].set(w2)
    fus = fus.at[256:288, 0:SEQ_LEN].set(w3)
    fus = fus.at[288, 0:96].set(wgv[0])
    fus = fus.at[289, 0:96].set(bg[0])
    fus = fus.at[290, 0:64].set(b1[0])
    fus = fus.at[291, 0:64].set(gamma[0])
    fus = fus.at[292, 0:64].set(beta[0])
    fus = fus.at[293, 0:32].set(b2[0])
    fus = fus.at[294, 0:SEQ_LEN].set(b3[0])
    fus = fus.at[295, 0:TREM].set(res_w[0])
    fus = fus.at[296, 0:TREM].set(res_b[0])

    return {"gat": gat, "lstm": lstm, "fusion": fus}


# ============================== forward ======================================
def forward(params, node_x, adj, temporal_sequences, cv_value, target_store_idx):
    f32 = jnp.float32
    n = node_x.shape[0]
    assert n <= NPAD

    # pad node features into (16, 32); features 5:32 are zero (matching zero W rows)
    x0 = jnp.zeros((NPAD, SPATIAL_HIDDEN), f32).at[:n, :NODE_FEATURES].set(node_x.astype(f32))
    # padded adjacency: padded rows get a self-loop only (GATConv adds self-loops anyway)
    adj_p = jnp.zeros((NPAD, NPAD), f32).at[:n, :n].set(adj.astype(f32))
    diag = jnp.arange(NPAD)
    adj_p = adj_p.at[diag, diag].set(1.0)
    adj_t = jnp.tile(adj_p, (1, NUM_HEADS))                        # (16, 128)

    seqs = jnp.stack([temporal_sequences["trend"][0],
                      temporal_sequences["seasonal"][0],
                      temporal_sequences["residual"][0]], axis=1).astype(f32)   # (T, 3)

    idx = jnp.asarray(target_store_idx, jnp.int32).reshape(1)
    cv = jnp.asarray(cv_value, f32).reshape(1)

    out = pl.pallas_call(
        fused_forward_kernel,
        out_shape=jax.ShapeDtypeStruct((NPAD, HN), f32),
        in_specs=[SSPEC, SSPEC, VSPEC, VSPEC, VSPEC, VSPEC, VSPEC, VSPEC],
        out_specs=VSPEC,
    )(idx, cv, x0, adj_t, seqs, params["gat"], params["lstm"], params["fusion"])

    spatial = out[:n, :SPATIAL_HIDDEN]
    pattern_gate = out[0:1, SPATIAL_HIDDEN:SPATIAL_HIDDEN + FUSION_IN]
    prediction = out[1:2, SPATIAL_HIDDEN:SPATIAL_HIDDEN + SEQ_LEN]

    # on-device confidence (mirrors the torch python branching; keeps forward jittable)
    cvf = jnp.asarray(cv_value, f32)
    base = jnp.where(cvf < CV_THRESHOLD, jnp.float32(0.8), jnp.float32(0.3))
    conf = base + jnp.minimum(jnp.float32(0.2), jnp.abs(cvf - CV_THRESHOLD) * 0.1)
    confidence = conf.reshape(1, 1)

    aux = {"spatial_embeddings": spatial, "pattern_gate": pattern_gate,
           "confidence": confidence, "cv_value": cvf.reshape(1)}
    return prediction, aux


# ================================ main =======================================
if __name__ == "__main__":
    key = jax.random.PRNGKey(0)
    k_param, k_x, k_t, k_s, k_r = jax.random.split(key, 5)

    N = 10                                                      # number of graph nodes (stores)
    params = init_params(k_param)
    node_x = jax.random.normal(k_x, (N, NODE_FEATURES), dtype=jnp.float32)

    # bidirectional ring graph; GATConv adds self-loops, so include them in the mask
    idx = jnp.arange(N)
    src = jnp.concatenate([idx, (idx + 1) % N])
    dst = jnp.concatenate([(idx + 1) % N, idx])
    adj = jnp.zeros((N, N), jnp.float32).at[dst, src].set(1.0)
    adj = adj.at[idx, idx].set(1.0)

    temporal_sequences = {
        "trend": jax.random.normal(k_t, (1, SEQ_LEN), dtype=jnp.float32),
        "seasonal": jax.random.normal(k_s, (1, SEQ_LEN), dtype=jnp.float32),
        "residual": jax.random.normal(k_r, (1, SEQ_LEN), dtype=jnp.float32),
    }
    cv_value = 1.2
    target_store_idx = 3

    fwd = jax.jit(forward)
    pred, aux = fwd(params, node_x, adj, temporal_sequences, cv_value, target_store_idx)
    jax.block_until_ready((pred, aux["pattern_gate"], aux["spatial_embeddings"]))

    assert pred.shape == (1, SEQ_LEN)
    assert aux["pattern_gate"].shape == (1, FUSION_IN)
    assert aux["spatial_embeddings"].shape == (N, SPATIAL_HIDDEN)
    assert bool(jnp.all(jnp.isfinite(pred)))
    print("KERNEL_OK")
</pallas_src>

<mosaic_0001>
module attributes {stable_mosaic.version = 11 : i64} {
  func.func @fused_forward_kernel(%arg0: memref<1xi32, #tpu.memory_space<smem>>, %arg1: memref<1xf32, #tpu.memory_space<smem>>, %arg2: memref<16x32xf32, #tpu.memory_space<vmem>>, %arg3: memref<16x128xf32, #tpu.memory_space<vmem>>, %arg4: memref<14x3xf32, #tpu.memory_space<vmem>>, %arg5: memref<3x72x32xf32, #tpu.memory_space<vmem>>, %arg6: memref<152x168xf32, #tpu.memory_space<vmem>>, %arg7: memref<304x96xf32, #tpu.memory_space<vmem>>, %arg8: memref<16x128xf32, #tpu.memory_space<vmem>>) attributes {dimension_semantics = [], scalar_prefetch = 0 : i64, scratch_operands = 0 : i64, tpu.core_type = #tpu.core_type<tc>} {
    %0 = tpu.iota {dimensions = array<i32: 0>} : vector<8x128xi32>
    %1 = tpu.iota {dimensions = array<i32: 1>} : vector<8x128xi32>
    %c4_i32 = arith.constant 4 : i32
    %2 = vector.broadcast %c4_i32 : i32 to vector<8x128xi32>
    %3 = arith.shrsi %1, %2 : vector<8x128xi32>
    %4 = arith.cmpi eq, %3, %0 : vector<8x128xi32>
    %5 = arith.extui %4 : vector<8x128xi1> to vector<8x128xi32>
    %6 = arith.sitofp %5 : vector<8x128xi32> to vector<8x128xf32>
    %7 = tpu.iota {dimensions = array<i32: 0>} : vector<128x8xi32>
    %8 = tpu.iota {dimensions = array<i32: 1>} : vector<128x8xi32>
    %c4_i32_0 = arith.constant 4 : i32
    %9 = vector.broadcast %c4_i32_0 : i32 to vector<128x8xi32>
    %10 = arith.shrsi %7, %9 : vector<128x8xi32>
    %11 = arith.cmpi eq, %10, %8 : vector<128x8xi32>
    %12 = arith.extui %11 : vector<128x8xi1> to vector<128x8xi32>
    %13 = arith.sitofp %12 : vector<128x8xi32> to vector<128x8xf32>
    %14 = tpu.iota {dimensions = array<i32: 0>} : vector<16x128xi32>
    %15 = tpu.iota {dimensions = array<i32: 1>} : vector<16x128xi32>
    %c15_i32 = arith.constant 15 : i32
    %16 = vector.broadcast %c15_i32 : i32 to vector<16x128xi32>
    %17 = arith.andi %15, %16 : vector<16x128xi32>
    %18 = arith.cmpi eq, %17, %14 : vector<16x128xi32>
    %19 = arith.extui %18 : vector<16x128xi1> to vector<16x128xi32>
    %20 = arith.sitofp %19 : vector<16x128xi32> to vector<16x128xf32>
    %21 = tpu.iota {dimensions = array<i32: 0>} : vector<128x16xi32>
    %22 = tpu.iota {dimensions = array<i32: 1>} : vector<128x16xi32>
    %c15_i32_1 = arith.constant 15 : i32
    %23 = vector.broadcast %c15_i32_1 : i32 to vector<128x16xi32>
    %24 = arith.andi %21, %23 : vector<128x16xi32>
    %25 = arith.cmpi eq, %24, %22 : vector<128x16xi32>
    %26 = arith.extui %25 : vector<128x16xi1> to vector<128x16xi32>
    %27 = arith.sitofp %26 : vector<128x16xi32> to vector<128x16xf32>
    %28 = tpu.iota {dimensions = array<i32: 0>} : vector<128x32xi32>
    %29 = tpu.iota {dimensions = array<i32: 1>} : vector<128x32xi32>
    %c2_i32 = arith.constant 2 : i32
    %30 = vector.broadcast %c2_i32 : i32 to vector<128x32xi32>
    %31 = arith.shrsi %29, %30 : vector<128x32xi32>
    %c4_i32_2 = arith.constant 4 : i32
    %32 = vector.broadcast %c4_i32_2 : i32 to vector<128x32xi32>
    %33 = arith.shrsi %28, %32 : vector<128x32xi32>
    %34 = arith.cmpi eq, %31, %33 : vector<128x32xi32>
    %35 = arith.extui %34 : vector<128x32xi1> to vector<128x32xi32>
    %36 = arith.sitofp %35 : vector<128x32xi32> to vector<128x32xf32>
    %c0 = arith.constant 0 : index
    %c0_3 = arith.constant 0 : index
    %37 = vector.load %arg3[%c0, %c0_3] : memref<16x128xf32, #tpu.memory_space<vmem>>, vector<16x128xf32>
    %c0_4 = arith.constant 0 : index
    %c0_5 = arith.constant 0 : index
    %38 = vector.load %arg2[%c0_4, %c0_5] : memref<16x32xf32, #tpu.memory_space<vmem>>, vector<16x32xf32>
    %c0_6 = arith.constant 0 : index
    %c0_7 = arith.constant 0 : index
    %c0_8 = arith.constant 0 : index
    %39 = vector.load %arg5[%c0_6, %c0_7, %c0_8] : memref<3x72x32xf32, #tpu.memory_space<vmem>>, vector<1x32x32xf32>
    %40 = vector.shape_cast %39 : vector<1x32x32xf32> to vector<32x32xf32>
    %c0_9 = arith.constant 0 : index
    %c32 = arith.constant 32 : index
    %c0_10 = arith.constant 0 : index
    %41 = vector.load %arg5[%c0_9, %c32, %c0_10] : memref<3x72x32xf32, #tpu.memory_space<vmem>>, vector<1x32x16xf32>
    %42 = vector.shape_cast %41 : vector<1x32x16xf32> to vector<32x16xf32>
    %c0_11 = arith.constant 0 : index
    %c64 = arith.constant 64 : index
    %c0_12 = arith.constant 0 : index
    %43 = vector.load %arg5[%c0_11, %c64, %c0_12] : memref<3x72x32xf32, #tpu.memory_space<vmem>>, vector<1x1x32xf32>
    %44 = vector.shape_cast %43 : vector<1x1x32xf32> to vector<1x32xf32>
    %cst = arith.constant dense<0.000000e+00> : vector<16x32xf32>
    %45 = tpu.matmul %38, %40, %cst {dimension_numbers = #tpu.dot_dimension_numbers<[1], [0], [0], [1], [0, 0, 1, 1], [], []>} : vector<16x32xf32>, vector<32x32xf32>, vector<16x32xf32> -> vector<16x32xf32>
    %cst_13 = arith.constant dense<0.000000e+00> : vector<16x16xf32>
    %46 = tpu.matmul %45, %42, %cst_13 {dimension_numbers = #tpu.dot_dimension_numbers<[1], [0], [0], [1], [0, 0, 1, 1], [], []>} : vector<16x32xf32>, vector<32x16xf32>, vector<16x16xf32> -> vector<16x16xf32>
    %47 = vector.extract_strided_slice %46 {offsets = [0, 0], sizes = [16, 8], strides = [1, 1]} : vector<16x16xf32> to vector<16x8xf32>
    %48 = vector.extract_strided_slice %46 {offsets = [0, 8], sizes = [16, 8], strides = [1, 1]} : vector<16x16xf32> to vector<16x8xf32>
    %cst_14 = arith.constant dense<0.000000e+00> : vector<16x128xf32>
    %49 = tpu.matmul %47, %6, %cst_14 {dimension_numbers = #tpu.dot_dimension_numbers<[1], [0], [0], [1], [0, 0, 1, 1], [], []>} : vector<16x8xf32>, vector<8x128xf32>, vector<16x128xf32> -> vector<16x128xf32>
    %cst_15 = arith.constant dense<0.000000e+00> : vector<16x128xf32>
    %50 = tpu.matmul %48, %6, %cst_15 {dimension_numbers = #tpu.dot_dimension_numbers<[1], [0], [0], [1], [0, 0, 1, 1], [], []>} : vector<16x8xf32>, vector<8x128xf32>, vector<16x128xf32> -> vector<16x128xf32>
    %51 = arith.mulf %50, %20 : vector<16x128xf32>
    %cst_16 = arith.constant dense<0.000000e+00> : vector<128xf32>
    %52 = vector.multi_reduction <add>, %51, %cst_16 [0] : vector<16x128xf32> to vector<128xf32>
    %53 = vector.shape_cast %52 : vector<128xf32> to vector<1x128xf32>
    %54 = vector.broadcast %53 : vector<1x128xf32> to vector<16x128xf32>
    %55 = arith.addf %49, %54 : vector<16x128xf32>
    %cst_17 = arith.constant 0.000000e+00 : f32
    %56 = vector.broadcast %cst_17 : f32 to vector<16x128xf32>
    %57 = arith.cmpf ogt, %55, %56 : vector<16x128xf32>
    %cst_18 = arith.constant 2.000000e-01 : f32
    %58 = vector.broadcast %cst_18 : f32 to vector<16x128xf32>
    %59 = arith.mulf %58, %55 : vector<16x128xf32>
    %60 = arith.select %57, %55, %59 : vector<16x128xi1>, vector<16x128xf32>
    %cst_19 = arith.constant 0.000000e+00 : f32
    %61 = vector.broadcast %cst_19 : f32 to vector<16x128xf32>
    %62 = arith.cmpf ogt, %37, %61 : vector<16x128xf32>
    %cst_20 = arith.constant -1.000000e+09 : f32
    %63 = vector.broadcast %cst_20 : f32 to vector<16x128xf32>
    %64 = arith.select %62, %60, %63 : vector<16x128xi1>, vector<16x128xf32>
    %cst_21 = arith.constant dense<0xFF800000> : vector<8xf32>
    %65 = vector.multi_reduction <maximumf>, %48, %cst_21 [0] : vector<16x8xf32> to vector<8xf32>
    %66 = vector.shape_cast %65 : vector<8xf32> to vector<1x8xf32>
    %67 = vector.broadcast %66 : vector<1x8xf32> to vector<16x8xf32>
    %68 = arith.addf %47, %67 : vector<16x8xf32>
    %cst_22 = arith.constant 0.000000e+00 : f32
    %69 = vector.broadcast %cst_22 : f32 to vector<16x8xf32>
    %70 = arith.cmpf ogt, %68, %69 : vector<16x8xf32>
    %cst_23 = arith.constant 2.000000e-01 : f32
    %71 = vector.broadcast %cst_23 : f32 to vector<16x8xf32>
    %72 = arith.mulf %71, %68 : vector<16x8xf32>
    %73 = arith.select %70, %68, %72 : vector<16x8xi1>, vector<16x8xf32>
    %cst_24 = arith.constant dense<0.000000e+00> : vector<16x128xf32>
    %74 = tpu.matmul %73, %6, %cst_24 {dimension_numbers = #tpu.dot_dimension_numbers<[1], [0], [0], [1], [0, 0, 1, 1], [], []>} : vector<16x8xf32>, vector<8x128xf32>, vector<16x128xf32> -> vector<16x128xf32>
    %75 = arith.subf %64, %74 : vector<16x128xf32>
    %76 = math.exp %75 : vector<16x128xf32>
    %cst_25 = arith.constant dense<0.000000e+00> : vector<16x8xf32>
    %77 = tpu.matmul %76, %13, %cst_25 {dimension_numbers = #tpu.dot_dimension_numbers<[1], [0], [0], [1], [0, 0, 1, 1], [], []>} : vector<16x128xf32>, vector<128x8xf32>, vector<16x8xf32> -> vector<16x8xf32>
    %cst_26 = arith.constant 1.000000e-30 : f32
    %78 = vector.broadcast %cst_26 : f32 to vector<16x8xf32>
    %79 = arith.maximumf %77, %78 : vector<16x8xf32>
    %cst_27 = arith.constant 1.000000e+00 : f32
    %80 = vector.broadcast %cst_27 : f32 to vector<16x8xf32>
    %81 = arith.divf %80, %79 : vector<16x8xf32>
    %cst_28 = arith.constant dense<0.000000e+00> : vector<16x128xf32>
    %82 = tpu.matmul %81, %6, %cst_28 {dimension_numbers = #tpu.dot_dimension_numbers<[1], [0], [0], [1], [0, 0, 1, 1], [], []>} : vector<16x8xf32>, vector<8x128xf32>, vector<16x128xf32> -> vector<16x128xf32>
    %83 = arith.mulf %76, %82 : vector<16x128xf32>
    %cst_29 = arith.constant dense<0.000000e+00> : vector<128x32xf32>
    %84 = tpu.matmul %27, %45, %cst_29 {dimension_numbers = #tpu.dot_dimension_numbers<[1], [0], [0], [1], [0, 0, 1, 1], [], []>} : vector<128x16xf32>, vector<16x32xf32>, vector<128x32xf32> -> vector<128x32xf32>
    %85 = arith.mulf %84, %36 : vector<128x32xf32>
    %cst_30 = arith.constant dense<0.000000e+00> : vector<16x32xf32>
    %86 = tpu.matmul %83, %85, %cst_30 {dimension_numbers = #tpu.dot_dimension_numbers<[1], [0], [0], [1], [0, 0, 1, 1], [], []>} : vector<16x128xf32>, vector<128x32xf32>, vector<16x32xf32> -> vector<16x32xf32>
    %87 = vector.broadcast %44 : vector<1x32xf32> to vector<16x32xf32>
    %88 = arith.addf %86, %87 : vector<16x32xf32>
    %cst_31 = arith.constant 0.000000e+00 : f32
    %89 = vector.broadcast %cst_31 : f32 to vector<16x32xf32>
    %90 = arith.cmpf ogt, %88, %89 : vector<16x32xf32>
    %cst_32 = arith.constant 0.000000e+00 : f32
    %91 = vector.broadcast %cst_32 : f32 to vector<16x32xf32>
    %92 = arith.minimumf %88, %91 : vector<16x32xf32>
    %93 = math.exp %92 : vector<16x32xf32>
    %cst_33 = arith.constant 1.000000e+00 : f32
    %94 = vector.broadcast %cst_33 : f32 to vector<16x32xf32>
    %95 = arith.subf %93, %94 : vector<16x32xf32>
    %96 = arith.select %90, %88, %95 : vector<16x32xi1>, vector<16x32xf32>
    %c1 = arith.constant 1 : index
    %c0_34 = arith.constant 0 : index
    %c0_35 = arith.constant 0 : index
    %97 = vector.load %arg5[%c1, %c0_34, %c0_35] : memref<3x72x32xf32, #tpu.memory_space<vmem>>, vector<1x32x32xf32>
    %98 = vector.shape_cast %97 : vector<1x32x32xf32> to vector<32x32xf32>
    %c1_36 = arith.constant 1 : index
    %c32_37 = arith.constant 32 : index
    %c0_38 = arith.constant 0 : index
    %99 = vector.load %arg5[%c1_36, %c32_37, %c0_38] : memref<3x72x32xf32, #tpu.memory_space<vmem>>, vector<1x32x16xf32>
    %100 = vector.shape_cast %99 : vector<1x32x16xf32> to vector<32x16xf32>
    %c1_39 = arith.constant 1 : index
    %c64_40 = arith.constant 64 : index
    %c0_41 = arith.constant 0 : index
    %101 = vector.load %arg5[%c1_39, %c64_40, %c0_41] : memref<3x72x32xf32, #tpu.memory_space<vmem>>, vector<1x1x32xf32>
    %102 = vector.shape_cast %101 : vector<1x1x32xf32> to vector<1x32xf32>
    %cst_42 = arith.constant dense<0.000000e+00> : vector<16x32xf32>
    %103 = tpu.matmul %96, %98, %cst_42 {dimension_numbers = #tpu.dot_dimension_numbers<[1], [0], [0], [1], [0, 0, 1, 1], [], []>} : vector<16x32xf32>, vector<32x32xf32>, vector<16x32xf32> -> vector<16x32xf32>
    %cst_43 = arith.constant dense<0.000000e+00> : vector<16x16xf32>
    %104 = tpu.matmul %103, %100, %cst_43 {dimension_numbers = #tpu.dot_dimension_numbers<[1], [0], [0], [1], [0, 0, 1, 1], [], []>} : vector<16x32xf32>, vector<32x16xf32>, vector<16x16xf32> -> vector<16x16xf32>
    %105 = vector.extract_strided_slice %104 {offsets = [0, 0], sizes = [16, 8], strides = [1, 1]} : vector<16x16xf32> to vector<16x8xf32>
    %106 = vector.extract_strided_slice %104 {offsets = [0, 8], sizes = [16, 8], strides = [1, 1]} : vector<16x16xf32> to vector<16x8xf32>
    %cst_44 = arith.constant dense<0.000000e+00> : vector<16x128xf32>
    %107 = tpu.matmul %105, %6, %cst_44 {dimension_numbers = #tpu.dot_dimension_numbers<[1], [0], [0], [1], [0, 0, 1, 1], [], []>} : vector<16x8xf32>, vector<8x128xf32>, vector<16x128xf32> -> vector<16x128xf32>
    %cst_45 = arith.constant dense<0.000000e+00> : vector<16x128xf32>
    %108 = tpu.matmul %106, %6, %cst_45 {dimension_numbers = #tpu.dot_dimension_numbers<[1], [0], [0], [1], [0, 0, 1, 1], [], []>} : vector<16x8xf32>, vector<8x128xf32>, vector<16x128xf32> -> vector<16x128xf32>
    %109 = arith.mulf %108, %20 : vector<16x128xf32>
    %cst_46 = arith.constant dense<0.000000e+00> : vector<128xf32>
    %110 = vector.multi_reduction <add>, %109, %cst_46 [0] : vector<16x128xf32> to vector<128xf32>
    %111 = vector.shape_cast %110 : vector<128xf32> to vector<1x128xf32>
    %112 = vector.broadcast %111 : vector<1x128xf32> to vector<16x128xf32>
    %113 = arith.addf %107, %112 : vector<16x128xf32>
    %cst_47 = arith.constant 0.000000e+00 : f32
    %114 = vector.broadcast %cst_47 : f32 to vector<16x128xf32>
    %115 = arith.cmpf ogt, %113, %114 : vector<16x128xf32>
    %cst_48 = arith.constant 2.000000e-01 : f32
    %116 = vector.broadcast %cst_48 : f32 to vector<16x128xf32>
    %117 = arith.mulf %116, %113 : vector<16x128xf32>
    %118 = arith.select %115, %113, %117 : vector<16x128xi1>, vector<16x128xf32>
    %cst_49 = arith.constant 0.000000e+00 : f32
    %119 = vector.broadcast %cst_49 : f32 to vector<16x128xf32>
    %120 = arith.cmpf ogt, %37, %119 : vector<16x128xf32>
    %cst_50 = arith.constant -1.000000e+09 : f32
    %121 = vector.broadcast %cst_50 : f32 to vector<16x128xf32>
    %122 = arith.select %120, %118, %121 : vector<16x128xi1>, vector<16x128xf32>
    %cst_51 = arith.constant dense<0xFF800000> : vector<8xf32>
    %123 = vector.multi_reduction <maximumf>, %106, %cst_51 [0] : vector<16x8xf32> to vector<8xf32>
    %124 = vector.shape_cast %123 : vector<8xf32> to vector<1x8xf32>
    %125 = vector.broadcast %124 : vector<1x8xf32> to vector<16x8xf32>
    %126 = arith.addf %105, %125 : vector<16x8xf32>
    %cst_52 = arith.constant 0.000000e+00 : f32
    %127 = vector.broadcast %cst_52 : f32 to vector<16x8xf32>
    %128 = arith.cmpf ogt, %126, %127 : vector<16x8xf32>
    %cst_53 = arith.constant 2.000000e-01 : f32
    %129 = vector.broadcast %cst_53 : f32 to vector<16x8xf32>
    %130 = arith.mulf %129, %126 : vector<16x8xf32>
    %131 = arith.select %128, %126, %130 : vector<16x8xi1>, vector<16x8xf32>
    %cst_54 = arith.constant dense<0.000000e+00> : vector<16x128xf32>
    %132 = tpu.matmul %131, %6, %cst_54 {dimension_numbers = #tpu.dot_dimension_numbers<[1], [0], [0], [1], [0, 0, 1, 1], [], []>} : vector<16x8xf32>, vector<8x128xf32>, vector<16x128xf32> -> vector<16x128xf32>
    %133 = arith.subf %122, %132 : vector<16x128xf32>
    %134 = math.exp %133 : vector<16x128xf32>
    %cst_55 = arith.constant dense<0.000000e+00> : vector<16x8xf32>
    %135 = tpu.matmul %134, %13, %cst_55 {dimension_numbers = #tpu.dot_dimension_numbers<[1], [0], [0], [1], [0, 0, 1, 1], [], []>} : vector<16x128xf32>, vector<128x8xf32>, vector<16x8xf32> -> vector<16x8xf32>
    %cst_56 = arith.constant 1.000000e-30 : f32
    %136 = vector.broadcast %cst_56 : f32 to vector<16x8xf32>
    %137 = arith.maximumf %135, %136 : vector<16x8xf32>
    %cst_57 = arith.constant 1.000000e+00 : f32
    %138 = vector.broadcast %cst_57 : f32 to vector<16x8xf32>
    %139 = arith.divf %138, %137 : vector<16x8xf32>
    %cst_58 = arith.constant dense<0.000000e+00> : vector<16x128xf32>
    %140 = tpu.matmul %139, %6, %cst_58 {dimension_numbers = #tpu.dot_dimension_numbers<[1], [0], [0], [1], [0, 0, 1, 1], [], []>} : vector<16x8xf32>, vector<8x128xf32>, vector<16x128xf32> -> vector<16x128xf32>
    %141 = arith.mulf %134, %140 : vector<16x128xf32>
    %cst_59 = arith.constant dense<0.000000e+00> : vector<128x32xf32>
    %142 = tpu.matmul %27, %103, %cst_59 {dimension_numbers = #tpu.dot_dimension_numbers<[1], [0], [0], [1], [0, 0, 1, 1], [], []>} : vector<128x16xf32>, vector<16x32xf32>, vector<128x32xf32> -> vector<128x32xf32>
    %143 = arith.mulf %142, %36 : vector<128x32xf32>
    %cst_60 = arith.constant dense<0.000000e+00> : vector<16x32xf32>
    %144 = tpu.matmul %141, %143, %cst_60 {dimension_numbers = #tpu.dot_dimension_numbers<[1], [0], [0], [1], [0, 0, 1, 1], [], []>} : vector<16x128xf32>, vector<128x32xf32>, vector<16x32xf32> -> vector<16x32xf32>
    %145 = vector.broadcast %102 : vector<1x32xf32> to vector<16x32xf32>
    %146 = arith.addf %144, %145 : vector<16x32xf32>
    %cst_61 = arith.constant 0.000000e+00 : f32
    %147 = vector.broadcast %cst_61 : f32 to vector<16x32xf32>
    %148 = arith.cmpf ogt, %146, %147 : vector<16x32xf32>
    %cst_62 = arith.constant 0.000000e+00 : f32
    %149 = vector.broadcast %cst_62 : f32 to vector<16x32xf32>
    %150 = arith.minimumf %146, %149 : vector<16x32xf32>
    %151 = math.exp %150 : vector<16x32xf32>
    %cst_63 = arith.constant 1.000000e+00 : f32
    %152 = vector.broadcast %cst_63 : f32 to vector<16x32xf32>
    %153 = arith.subf %151, %152 : vector<16x32xf32>
    %154 = arith.select %148, %146, %153 : vector<16x32xi1>, vector<16x32xf32>
    %c2 = arith.constant 2 : index
    %c0_64 = arith.constant 0 : index
    %c0_65 = arith.constant 0 : index
    %155 = vector.load %arg5[%c2, %c0_64, %c0_65] : memref<3x72x32xf32, #tpu.memory_space<vmem>>, vector<1x32x32xf32>
    %156 = vector.shape_cast %155 : vector<1x32x32xf32> to vector<32x32xf32>
    %c2_66 = arith.constant 2 : index
    %c32_67 = arith.constant 32 : index
    %c0_68 = arith.constant 0 : index
    %157 = vector.load %arg5[%c2_66, %c32_67, %c0_68] : memref<3x72x32xf32, #tpu.memory_space<vmem>>, vector<1x32x16xf32>
    %158 = vector.shape_cast %157 : vector<1x32x16xf32> to vector<32x16xf32>
    %c2_69 = arith.constant 2 : index
    %c64_70 = arith.constant 64 : index
    %c0_71 = arith.constant 0 : index
    %159 = vector.load %arg5[%c2_69, %c64_70, %c0_71] : memref<3x72x32xf32, #tpu.memory_space<vmem>>, vector<1x1x32xf32>
    %160 = vector.shape_cast %159 : vector<1x1x32xf32> to vector<1x32xf32>
    %cst_72 = arith.constant dense<0.000000e+00> : vector<16x32xf32>
    %161 = tpu.matmul %154, %156, %cst_72 {dimension_numbers = #tpu.dot_dimension_numbers<[1], [0], [0], [1], [0, 0, 1, 1], [], []>} : vector<16x32xf32>, vector<32x32xf32>, vector<16x32xf32> -> vector<16x32xf32>
    %cst_73 = arith.constant dense<0.000000e+00> : vector<16x16xf32>
    %162 = tpu.matmul %161, %158, %cst_73 {dimension_numbers = #tpu.dot_dimension_numbers<[1], [0], [0], [1], [0, 0, 1, 1], [], []>} : vector<16x32xf32>, vector<32x16xf32>, vector<16x16xf32> -> vector<16x16xf32>
    %163 = vector.extract_strided_slice %162 {offsets = [0, 0], sizes = [16, 8], strides = [1, 1]} : vector<16x16xf32> to vector<16x8xf32>
    %164 = vector.extract_strided_slice %162 {offsets = [0, 8], sizes = [16, 8], strides = [1, 1]} : vector<16x16xf32> to vector<16x8xf32>
    %cst_74 = arith.constant dense<0.000000e+00> : vector<16x128xf32>
    %165 = tpu.matmul %163, %6, %cst_74 {dimension_numbers = #tpu.dot_dimension_numbers<[1], [0], [0], [1], [0, 0, 1, 1], [], []>} : vector<16x8xf32>, vector<8x128xf32>, vector<16x128xf32> -> vector<16x128xf32>
    %cst_75 = arith.constant dense<0.000000e+00> : vector<16x128xf32>
    %166 = tpu.matmul %164, %6, %cst_75 {dimension_numbers = #tpu.dot_dimension_numbers<[1], [0], [0], [1], [0, 0, 1, 1], [], []>} : vector<16x8xf32>, vector<8x128xf32>, vector<16x128xf32> -> vector<16x128xf32>
    %167 = arith.mulf %166, %20 : vector<16x128xf32>
    %cst_76 = arith.constant dense<0.000000e+00> : vector<128xf32>
    %168 = vector.multi_reduction <add>, %167, %cst_76 [0] : vector<16x128xf32> to vector<128xf32>
    %169 = vector.shape_cast %168 : vector<128xf32> to vector<1x128xf32>
    %170 = vector.broadcast %169 : vector<1x128xf32> to vector<16x128xf32>
    %171 = arith.addf %165, %170 : vector<16x128xf32>
    %cst_77 = arith.constant 0.000000e+00 : f32
    %172 = vector.broadcast %cst_77 : f32 to vector<16x128xf32>
    %173 = arith.cmpf ogt, %171, %172 : vector<16x128xf32>
    %cst_78 = arith.constant 2.000000e-01 : f32
    %174 = vector.broadcast %cst_78 : f32 to vector<16x128xf32>
    %175 = arith.mulf %174, %171 : vector<16x128xf32>
    %176 = arith.select %173, %171, %175 : vector<16x128xi1>, vector<16x128xf32>
    %cst_79 = arith.constant 0.000000e+00 : f32
    %177 = vector.broadcast %cst_79 : f32 to vector<16x128xf32>
    %178 = arith.cmpf ogt, %37, %177 : vector<16x128xf32>
    %cst_80 = arith.constant -1.000000e+09 : f32
    %179 = vector.broadcast %cst_80 : f32 to vector<16x128xf32>
    %180 = arith.select %178, %176, %179 : vector<16x128xi1>, vector<16x128xf32>
    %cst_81 = arith.constant dense<0xFF800000> : vector<8xf32>
    %181 = vector.multi_reduction <maximumf>, %164, %cst_81 [0] : vector<16x8xf32> to vector<8xf32>
    %182 = vector.shape_cast %181 : vector<8xf32> to vector<1x8xf32>
    %183 = vector.broadcast %182 : vector<1x8xf32> to vector<16x8xf32>
    %184 = arith.addf %163, %183 : vector<16x8xf32>
    %cst_82 = arith.constant 0.000000e+00 : f32
    %185 = vector.broadcast %cst_82 : f32 to vector<16x8xf32>
    %186 = arith.cmpf ogt, %184, %185 : vector<16x8xf32>
    %cst_83 = arith.constant 2.000000e-01 : f32
    %187 = vector.broadcast %cst_83 : f32 to vector<16x8xf32>
    %188 = arith.mulf %187, %184 : vector<16x8xf32>
    %189 = arith.select %186, %184, %188 : vector<16x8xi1>, vector<16x8xf32>
    %cst_84 = arith.constant dense<0.000000e+00> : vector<16x128xf32>
    %190 = tpu.matmul %189, %6, %cst_84 {dimension_numbers = #tpu.dot_dimension_numbers<[1], [0], [0], [1], [0, 0, 1, 1], [], []>} : vector<16x8xf32>, vector<8x128xf32>, vector<16x128xf32> -> vector<16x128xf32>
    %191 = arith.subf %180, %190 : vector<16x128xf32>
    %192 = math.exp %191 : vector<16x128xf32>
    %cst_85 = arith.constant dense<0.000000e+00> : vector<16x8xf32>
    %193 = tpu.matmul %192, %13, %cst_85 {dimension_numbers = #tpu.dot_dimension_numbers<[1], [0], [0], [1], [0, 0, 1, 1], [], []>} : vector<16x128xf32>, vector<128x8xf32>, vector<16x8xf32> -> vector<16x8xf32>
    %cst_86 = arith.constant 1.000000e-30 : f32
    %194 = vector.broadcast %cst_86 : f32 to vector<16x8xf32>
    %195 = arith.maximumf %193, %194 : vector<16x8xf32>
    %cst_87 = arith.constant 1.000000e+00 : f32
    %196 = vector.broadcast %cst_87 : f32 to vector<16x8xf32>
    %197 = arith.divf %196, %195 : vector<16x8xf32>
    %cst_88 = arith.constant dense<0.000000e+00> : vector<16x128xf32>
    %198 = tpu.matmul %197, %6, %cst_88 {dimension_numbers = #tpu.dot_dimension_numbers<[1], [0], [0], [1], [0, 0, 1, 1], [], []>} : vector<16x8xf32>, vector<8x128xf32>, vector<16x128xf32> -> vector<16x128xf32>
    %199 = arith.mulf %192, %198 : vector<16x128xf32>
    %cst_89 = arith.constant dense<0.000000e+00> : vector<128x32xf32>
    %200 = tpu.matmul %27, %161, %cst_89 {dimension_numbers = #tpu.dot_dimension_numbers<[1], [0], [0], [1], [0, 0, 1, 1], [], []>} : vector<128x16xf32>, vector<16x32xf32>, vector<128x32xf32> -> vector<128x32xf32>
    %201 = arith.mulf %200, %36 : vector<128x32xf32>
    %cst_90 = arith.constant dense<0.000000e+00> : vector<16x32xf32>
    %202 = tpu.matmul %199, %201, %cst_90 {dimension_numbers = #tpu.dot_dimension_numbers<[1], [0], [0], [1], [0, 0, 1, 1], [], []>} : vector<16x128xf32>, vector<128x32xf32>, vector<16x32xf32> -> vector<16x32xf32>
    %203 = vector.broadcast %160 : vector<1x32xf32> to vector<16x32xf32>
    %204 = arith.addf %202, %203 : vector<16x32xf32>
    %cst_91 = arith.constant 0.000000e+00 : f32
    %205 = vector.broadcast %cst_91 : f32 to vector<16x32xf32>
    %206 = arith.cmpf ogt, %204, %205 : vector<16x32xf32>
    %cst_92 = arith.constant 0.000000e+00 : f32
    %207 = vector.broadcast %cst_92 : f32 to vector<16x32xf32>
    %208 = arith.minimumf %204, %207 : vector<16x32xf32>
    %209 = math.exp %208 : vector<16x32xf32>
    %cst_93 = arith.constant 1.000000e+00 : f32
    %210 = vector.broadcast %cst_93 : f32 to vector<16x32xf32>
    %211 = arith.subf %209, %210 : vector<16x32xf32>
    %212 = arith.select %206, %204, %211 : vector<16x32xi1>, vector<16x32xf32>
    %c0_94 = arith.constant 0 : index
    %213 = memref.load %arg0[%c0_94] : memref<1xi32, #tpu.memory_space<smem>>
    %214 = tpu.iota {dimensions = array<i32: 1>} : vector<1x16xi32>
    %215 = vector.broadcast %213 : i32 to vector<1x16xi32>
    %216 = arith.cmpi eq, %214, %215 : vector<1x16xi32>
    %217 = arith.extui %216 : vector<1x16xi1> to vector<1x16xi32>
    %218 = arith.sitofp %217 : vector<1x16xi32> to vector<1x16xf32>
    %cst_95 = arith.constant dense<0.000000e+00> : vector<1x32xf32>
    %219 = tpu.matmul %218, %212, %cst_95 {dimension_numbers = #tpu.dot_dimension_numbers<[1], [0], [0], [1], [0, 0, 1, 1], [], []>} : vector<1x16xf32>, vector<16x32xf32>, vector<1x32xf32> -> vector<1x32xf32>
    %c0_96 = arith.constant 0 : index
    %c0_97 = arith.constant 0 : index
    %220 = vector.load %arg6[%c0_96, %c0_97] : memref<152x168xf32, #tpu.memory_space<vmem>>, vector<2x168xf32>
    %c8 = arith.constant 8 : index
    %c0_98 = arith.constant 0 : index
    %221 = vector.load %arg6[%c8, %c0_98] : memref<152x168xf32, #tpu.memory_space<vmem>>, vector<42x168xf32>
    %c56 = arith.constant 56 : index
    %c0_99 = arith.constant 0 : index
    %222 = vector.load %arg6[%c56, %c0_99] : memref<152x168xf32, #tpu.memory_space<vmem>>, vector<42x168xf32>
    %c104 = arith.constant 104 : index
    %c0_100 = arith.constant 0 : index
    %223 = vector.load %arg6[%c104, %c0_100] : memref<152x168xf32, #tpu.memory_space<vmem>>, vector<42x168xf32>
    %c146 = arith.constant 146 : index
    %c0_101 = arith.constant 0 : index
    %224 = vector.load %arg6[%c146, %c0_101] : memref<152x168xf32, #tpu.memory_space<vmem>>, vector<1x168xf32>
    %c147 = arith.constant 147 : index
    %c0_102 = arith.constant 0 : index
    %225 = vector.load %arg6[%c147, %c0_102] : memref<152x168xf32, #tpu.memory_space<vmem>>, vector<1x168xf32>
    %c0_103 = arith.constant 0 : index
    %c0_104 = arith.constant 0 : index
    %226 = vector.load %arg4[%c0_103, %c0_104] : memref<14x3xf32, #tpu.memory_space<vmem>>, vector<14x2xf32>
    %cst_105 = arith.constant dense<0.000000e+00> : vector<14x168xf32>
    %227 = tpu.matmul %226, %220, %cst_105 {dimension_numbers = #tpu.dot_dimension_numbers<[1], [0], [0], [1], [0, 0, 1, 1], [], []>} : vector<14x2xf32>, vector<2x168xf32>, vector<14x168xf32> -> vector<14x168xf32>
    %228 = vector.broadcast %224 : vector<1x168xf32> to vector<14x168xf32>
    %229 = arith.addf %227, %228 : vector<14x168xf32>
    %cst_106 = arith.constant 0.000000e+00 : f32
    %230 = vector.broadcast %cst_106 : f32 to vector<1x42xf32>
    %231 = vector.extract_strided_slice %229 {offsets = [0, 0], sizes = [1, 168], strides = [1, 1]} : vector<14x168xf32> to vector<1x168xf32>
    %cst_107 = arith.constant dense<0.000000e+00> : vector<1x168xf32>
    %232 = tpu.matmul %230, %221, %cst_107 {dimension_numbers = #tpu.dot_dimension_numbers<[1], [0], [0], [1], [0, 0, 1, 1], [], []>} : vector<1x42xf32>, vector<42x168xf32>, vector<1x168xf32> -> vector<1x168xf32>
    %233 = arith.addf %231, %232 : vector<1x168xf32>
    %234 = vector.extract_strided_slice %233 {offsets = [0, 0], sizes = [1, 42], strides = [1, 1]} : vector<1x168xf32> to vector<1x42xf32>
    %235 = arith.negf %234 : vector<1x42xf32>
    %236 = math.exp %235 : vector<1x42xf32>
    %cst_108 = arith.constant 1.000000e+00 : f32
    %237 = vector.broadcast %cst_108 : f32 to vector<1x42xf32>
    %238 = arith.addf %237, %236 : vector<1x42xf32>
    %239 = arith.divf %237, %238 : vector<1x42xf32>
    %240 = vector.extract_strided_slice %233 {offsets = [0, 42], sizes = [1, 42], strides = [1, 1]} : vector<1x168xf32> to vector<1x42xf32>
    %241 = arith.negf %240 : vector<1x42xf32>
    %242 = math.exp %241 : vector<1x42xf32>
    %cst_109 = arith.constant 1.000000e+00 : f32
    %243 = vector.broadcast %cst_109 : f32 to vector<1x42xf32>
    %244 = arith.addf %243, %242 : vector<1x42xf32>
    %245 = arith.divf %243, %244 : vector<1x42xf32>
    %246 = vector.extract_strided_slice %233 {offsets = [0, 84], sizes = [1, 42], strides = [1, 1]} : vector<1x168xf32> to vector<1x42xf32>
    %247 = math.tanh %246 : vector<1x42xf32>
    %248 = vector.extract_strided_slice %233 {offsets = [0, 126], sizes = [1, 42], strides = [1, 1]} : vector<1x168xf32> to vector<1x42xf32>
    %249 = arith.negf %248 : vector<1x42xf32>
    %250 = math.exp %249 : vector<1x42xf32>
    %cst_110 = arith.constant 1.000000e+00 : f32
    %251 = vector.broadcast %cst_110 : f32 to vector<1x42xf32>
    %252 = arith.addf %251, %250 : vector<1x42xf32>
    %253 = arith.divf %251, %252 : vector<1x42xf32>
    %254 = arith.mulf %245, %230 : vector<1x42xf32>
    %255 = arith.mulf %239, %247 : vector<1x42xf32>
    %256 = arith.addf %254, %255 : vector<1x42xf32>
    %257 = math.tanh %256 : vector<1x42xf32>
    %258 = arith.mulf %253, %257 : vector<1x42xf32>
    %cst_111 = arith.constant dense<0.000000e+00> : vector<1x168xf32>
    %259 = tpu.matmul %258, %222, %cst_111 {dimension_numbers = #tpu.dot_dimension_numbers<[1], [0], [0], [1], [0, 0, 1, 1], [], []>} : vector<1x42xf32>, vector<42x168xf32>, vector<1x168xf32> -> vector<1x168xf32>
    %cst_112 = arith.constant dense<0.000000e+00> : vector<1x168xf32>
    %260 = tpu.matmul %230, %223, %cst_112 {dimension_numbers = #tpu.dot_dimension_numbers<[1], [0], [0], [1], [0, 0, 1, 1], [], []>} : vector<1x42xf32>, vector<42x168xf32>, vector<1x168xf32> -> vector<1x168xf32>
    %261 = arith.addf %259, %260 : vector<1x168xf32>
    %262 = arith.addf %261, %225 : vector<1x168xf32>
    %263 = vector.extract_strided_slice %262 {offsets = [0, 0], sizes = [1, 42], strides = [1, 1]} : vector<1x168xf32> to vector<1x42xf32>
    %264 = arith.negf %263 : vector<1x42xf32>
    %265 = math.exp %264 : vector<1x42xf32>
    %cst_113 = arith.constant 1.000000e+00 : f32
    %266 = vector.broadcast %cst_113 : f32 to vector<1x42xf32>
    %267 = arith.addf %266, %265 : vector<1x42xf32>
    %268 = arith.divf %266, %267 : vector<1x42xf32>
    %269 = vector.extract_strided_slice %262 {offsets = [0, 42], sizes = [1, 42], strides = [1, 1]} : vector<1x168xf32> to vector<1x42xf32>
    %270 = arith.negf %269 : vector<1x42xf32>
    %271 = math.exp %270 : vector<1x42xf32>
    %cst_114 = arith.constant 1.000000e+00 : f32
    %272 = vector.broadcast %cst_114 : f32 to vector<1x42xf32>
    %273 = arith.addf %272, %271 : vector<1x42xf32>
    %274 = arith.divf %272, %273 : vector<1x42xf32>
    %275 = vector.extract_strided_slice %262 {offsets = [0, 84], sizes = [1, 42], strides = [1, 1]} : vector<1x168xf32> to vector<1x42xf32>
    %276 = math.tanh %275 : vector<1x42xf32>
    %277 = vector.extract_strided_slice %262 {offsets = [0, 126], sizes = [1, 42], strides = [1, 1]} : vector<1x168xf32> to vector<1x42xf32>
    %278 = arith.negf %277 : vector<1x42xf32>
    %279 = math.exp %278 : vector<1x42xf32>
    %cst_115 = arith.constant 1.000000e+00 : f32
    %280 = vector.broadcast %cst_115 : f32 to vector<1x42xf32>
    %281 = arith.addf %280, %279 : vector<1x42xf32>
    %282 = arith.divf %280, %281 : vector<1x42xf32>
    %283 = arith.mulf %274, %230 : vector<1x42xf32>
    %284 = arith.mulf %268, %276 : vector<1x42xf32>
    %285 = arith.addf %283, %284 : vector<1x42xf32>
    %286 = math.tanh %285 : vector<1x42xf32>
    %287 = arith.mulf %282, %286 : vector<1x42xf32>
    %288 = vector.extract_strided_slice %229 {offsets = [1, 0], sizes = [1, 168], strides = [1, 1]} : vector<14x168xf32> to vector<1x168xf32>
    %cst_116 = arith.constant dense<0.000000e+00> : vector<1x168xf32>
    %289 = tpu.matmul %258, %221, %cst_116 {dimension_numbers = #tpu.dot_dimension_numbers<[1], [0], [0], [1], [0, 0, 1, 1], [], []>} : vector<1x42xf32>, vector<42x168xf32>, vector<1x168xf32> -> vector<1x168xf32>
    %290 = arith.addf %288, %289 : vector<1x168xf32>
    %291 = vector.extract_strided_slice %290 {offsets = [0, 0], sizes = [1, 42], strides = [1, 1]} : vector<1x168xf32> to vector<1x42xf32>
    %292 = arith.negf %291 : vector<1x42xf32>
    %293 = math.exp %292 : vector<1x42xf32>
    %cst_117 = arith.constant 1.000000e+00 : f32
    %294 = vector.broadcast %cst_117 : f32 to vector<1x42xf32>
    %295 = arith.addf %294, %293 : vector<1x42xf32>
    %296 = arith.divf %294, %295 : vector<1x42xf32>
    %297 = vector.extract_strided_slice %290 {offsets = [0, 42], sizes = [1, 42], strides = [1, 1]} : vector<1x168xf32> to vector<1x42xf32>
    %298 = arith.negf %297 : vector<1x42xf32>
    %299 = math.exp %298 : vector<1x42xf32>
    %cst_118 = arith.constant 1.000000e+00 : f32
    %300 = vector.broadcast %cst_118 : f32 to vector<1x42xf32>
    %301 = arith.addf %300, %299 : vector<1x42xf32>
    %302 = arith.divf %300, %301 : vector<1x42xf32>
    %303 = vector.extract_strided_slice %290 {offsets = [0, 84], sizes = [1, 42], strides = [1, 1]} : vector<1x168xf32> to vector<1x42xf32>
    %304 = math.tanh %303 : vector<1x42xf32>
    %305 = vector.extract_strided_slice %290 {offsets = [0, 126], sizes = [1, 42], strides = [1, 1]} : vector<1x168xf32> to vector<1x42xf32>
    %306 = arith.negf %305 : vector<1x42xf32>
    %307 = math.exp %306 : vector<1x42xf32>
    %cst_119 = arith.constant 1.000000e+00 : f32
    %308 = vector.broadcast %cst_119 : f32 to vector<1x42xf32>
    %309 = arith.addf %308, %307 : vector<1x42xf32>
    %310 = arith.divf %308, %309 : vector<1x42xf32>
    %311 = arith.mulf %302, %256 : vector<1x42xf32>
    %312 = arith.mulf %296, %304 : vector<1x42xf32>
    %313 = arith.addf %311, %312 : vector<1x42xf32>
    %314 = math.tanh %313 : vector<1x42xf32>
    %315 = arith.mulf %310, %314 : vector<1x42xf32>
    %cst_120 = arith.constant dense<0.000000e+00> : vector<1x168xf32>
    %316 = tpu.matmul %315, %222, %cst_120 {dimension_numbers = #tpu.dot_dimension_numbers<[1], [0], [0], [1], [0, 0, 1, 1], [], []>} : vector<1x42xf32>, vector<42x168xf32>, vector<1x168xf32> -> vector<1x168xf32>
    %cst_121 = arith.constant dense<0.000000e+00> : vector<1x168xf32>
    %317 = tpu.matmul %287, %223, %cst_121 {dimension_numbers = #tpu.dot_dimension_numbers<[1], [0], [0], [1], [0, 0, 1, 1], [], []>} : vector<1x42xf32>, vector<42x168xf32>, vector<1x168xf32> -> vector<1x168xf32>
    %318 = arith.addf %316, %317 : vector<1x168xf32>
    %319 = arith.addf %318, %225 : vector<1x168xf32>
    %320 = vector.extract_strided_slice %319 {offsets = [0, 0], sizes = [1, 42], strides = [1, 1]} : vector<1x168xf32> to vector<1x42xf32>
    %321 = arith.negf %320 : vector<1x42xf32>
    %322 = math.exp %321 : vector<1x42xf32>
    %cst_122 = arith.constant 1.000000e+00 : f32
    %323 = vector.broadcast %cst_122 : f32 to vector<1x42xf32>
    %324 = arith.addf %323, %322 : vector<1x42xf32>
    %325 = arith.divf %323, %324 : vector<1x42xf32>
    %326 = vector.extract_strided_slice %319 {offsets = [0, 42], sizes = [1, 42], strides = [1, 1]} : vector<1x168xf32> to vector<1x42xf32>
    %327 = arith.negf %326 : vector<1x42xf32>
    %328 = math.exp %327 : vector<1x42xf32>
    %cst_123 = arith.constant 1.000000e+00 : f32
    %329 = vector.broadcast %cst_123 : f32 to vector<1x42xf32>
    %330 = arith.addf %329, %328 : vector<1x42xf32>
    %331 = arith.divf %329, %330 : vector<1x42xf32>
    %332 = vector.extract_strided_slice %319 {offsets = [0, 84], sizes = [1, 42], strides = [1, 1]} : vector<1x168xf32> to vector<1x42xf32>
    %333 = math.tanh %332 : vector<1x42xf32>
    %334 = vector.extract_strided_slice %319 {offsets = [0, 126], sizes = [1, 42], strides = [1, 1]} : vector<1x168xf32> to vector<1x42xf32>
    %335 = arith.negf %334 : vector<1x42xf32>
    %336 = math.exp %335 : vector<1x42xf32>
    %cst_124 = arith.constant 1.000000e+00 : f32
    %337 = vector.broadcast %cst_124 : f32 to vector<1x42xf32>
    %338 = arith.addf %337, %336 : vector<1x42xf32>
    %339 = arith.divf %337, %338 : vector<1x42xf32>
    %340 = arith.mulf %331, %285 : vector<1x42xf32>
    %341 = arith.mulf %325, %333 : vector<1x42xf32>
    %342 = arith.addf %340, %341 : vector<1x42xf32>
    %343 = math.tanh %342 : vector<1x42xf32>
    %344 = arith.mulf %339, %343 : vector<1x42xf32>
    %345 = vector.extract_strided_slice %229 {offsets = [2, 0], sizes = [1, 168], strides = [1, 1]} : vector<14x168xf32> to vector<1x168xf32>
    %cst_125 = arith.constant dense<0.000000e+00> : vector<1x168xf32>
    %346 = tpu.matmul %315, %221, %cst_125 {dimension_numbers = #tpu.dot_dimension_numbers<[1], [0], [0], [1], [0, 0, 1, 1], [], []>} : vector<1x42xf32>, vector<42x168xf32>, vector<1x168xf32> -> vector<1x168xf32>
    %347 = arith.addf %345, %346 : vector<1x168xf32>
    %348 = vector.extract_strided_slice %347 {offsets = [0, 0], sizes = [1, 42], strides = [1, 1]} : vector<1x168xf32> to vector<1x42xf32>
    %349 = arith.negf %348 : vector<1x42xf32>
    %350 = math.exp %349 : vector<1x42xf32>
    %cst_126 = arith.constant 1.000000e+00 : f32
    %351 = vector.broadcast %cst_126 : f32 to vector<1x42xf32>
    %352 = arith.addf %351, %350 : vector<1x42xf32>
    %353 = arith.divf %351, %352 : vector<1x42xf32>
    %354 = vector.extract_strided_slice %347 {offsets = [0, 42], sizes = [1, 42], strides = [1, 1]} : vector<1x168xf32> to vector<1x42xf32>
    %355 = arith.negf %354 : vector<1x42xf32>
    %356 = math.exp %355 : vector<1x42xf32>
    %cst_127 = arith.constant 1.000000e+00 : f32
    %357 = vector.broadcast %cst_127 : f32 to vector<1x42xf32>
    %358 = arith.addf %357, %356 : vector<1x42xf32>
    %359 = arith.divf %357, %358 : vector<1x42xf32>
    %360 = vector.extract_strided_slice %347 {offsets = [0, 84], sizes = [1, 42], strides = [1, 1]} : vector<1x168xf32> to vector<1x42xf32>
    %361 = math.tanh %360 : vector<1x42xf32>
    %362 = vector.extract_strided_slice %347 {offsets = [0, 126], sizes = [1, 42], strides = [1, 1]} : vector<1x168xf32> to vector<1x42xf32>
    %363 = arith.negf %362 : vector<1x42xf32>
    %364 = math.exp %363 : vector<1x42xf32>
    %cst_128 = arith.constant 1.000000e+00 : f32
    %365 = vector.broadcast %cst_128 : f32 to vector<1x42xf32>
    %366 = arith.addf %365, %364 : vector<1x42xf32>
    %367 = arith.divf %365, %366 : vector<1x42xf32>
    %368 = arith.mulf %359, %313 : vector<1x42xf32>
    %369 = arith.mulf %353, %361 : vector<1x42xf32>
    %370 = arith.addf %368, %369 : vector<1x42xf32>
    %371 = math.tanh %370 : vector<1x42xf32>
    %372 = arith.mulf %367, %371 : vector<1x42xf32>
    %cst_129 = arith.constant dense<0.000000e+00> : vector<1x168xf32>
    %373 = tpu.matmul %372, %222, %cst_129 {dimension_numbers = #tpu.dot_dimension_numbers<[1], [0], [0], [1], [0, 0, 1, 1], [], []>} : vector<1x42xf32>, vector<42x168xf32>, vector<1x168xf32> -> vector<1x168xf32>
    %cst_130 = arith.constant dense<0.000000e+00> : vector<1x168xf32>
    %374 = tpu.matmul %344, %223, %cst_130 {dimension_numbers = #tpu.dot_dimension_numbers<[1], [0], [0], [1], [0, 0, 1, 1], [], []>} : vector<1x42xf32>, vector<42x168xf32>, vector<1x168xf32> -> vector<1x168xf32>
    %375 = arith.addf %373, %374 : vector<1x168xf32>
    %376 = arith.addf %375, %225 : vector<1x168xf32>
    %377 = vector.extract_strided_slice %376 {offsets = [0, 0], sizes = [1, 42], strides = [1, 1]} : vector<1x168xf32> to vector<1x42xf32>
    %378 = arith.negf %377 : vector<1x42xf32>
    %379 = math.exp %378 : vector<1x42xf32>
    %cst_131 = arith.constant 1.000000e+00 : f32
    %380 = vector.broadcast %cst_131 : f32 to vector<1x42xf32>
    %381 = arith.addf %380, %379 : vector<1x42xf32>
    %382 = arith.divf %380, %381 : vector<1x42xf32>
    %383 = vector.extract_strided_slice %376 {offsets = [0, 42], sizes = [1, 42], strides = [1, 1]} : vector<1x168xf32> to vector<1x42xf32>
    %384 = arith.negf %383 : vector<1x42xf32>
    %385 = math.exp %384 : vector<1x42xf32>
    %cst_132 = arith.constant 1.000000e+00 : f32
    %386 = vector.broadcast %cst_132 : f32 to vector<1x42xf32>
    %387 = arith.addf %386, %385 : vector<1x42xf32>
    %388 = arith.divf %386, %387 : vector<1x42xf32>
    %389 = vector.extract_strided_slice %376 {offsets = [0, 84], sizes = [1, 42], strides = [1, 1]} : vector<1x168xf32> to vector<1x42xf32>
    %390 = math.tanh %389 : vector<1x42xf32>
    %391 = vector.extract_strided_slice %376 {offsets = [0, 126], sizes = [1, 42], strides = [1, 1]} : vector<1x168xf32> to vector<1x42xf32>
    %392 = arith.negf %391 : vector<1x42xf32>
    %393 = math.exp %392 : vector<1x42xf32>
    %cst_133 = arith.constant 1.000000e+00 : f32
    %394 = vector.broadcast %cst_133 : f32 to vector<1x42xf32>
    %395 = arith.addf %394, %393 : vector<1x42xf32>
    %396 = arith.divf %394, %395 : vector<1x42xf32>
    %397 = arith.mulf %388, %342 : vector<1x42xf32>
    %398 = arith.mulf %382, %390 : vector<1x42xf32>
    %399 = arith.addf %397, %398 : vector<1x42xf32>
    %400 = math.tanh %399 : vector<1x42xf32>
    %401 = arith.mulf %396, %400 : vector<1x42xf32>
    %402 = vector.extract_strided_slice %229 {offsets = [3, 0], sizes = [1, 168], strides = [1, 1]} : vector<14x168xf32> to vector<1x168xf32>
    %cst_134 = arith.constant dense<0.000000e+00> : vector<1x168xf32>
    %403 = tpu.matmul %372, %221, %cst_134 {dimension_numbers = #tpu.dot_dimension_numbers<[1], [0], [0], [1], [0, 0, 1, 1], [], []>} : vector<1x42xf32>, vector<42x168xf32>, vector<1x168xf32> -> vector<1x168xf32>
    %404 = arith.addf %402, %403 : vector<1x168xf32>
    %405 = vector.extract_strided_slice %404 {offsets = [0, 0], sizes = [1, 42], strides = [1, 1]} : vector<1x168xf32> to vector<1x42xf32>
    %406 = arith.negf %405 : vector<1x42xf32>
    %407 = math.exp %406 : vector<1x42xf32>
    %cst_135 = arith.constant 1.000000e+00 : f32
    %408 = vector.broadcast %cst_135 : f32 to vector<1x42xf32>
    %409 = arith.addf %408, %407 : vector<1x42xf32>
    %410 = arith.divf %408, %409 : vector<1x42xf32>
    %411 = vector.extract_strided_slice %404 {offsets = [0, 42], sizes = [1, 42], strides = [1, 1]} : vector<1x168xf32> to vector<1x42xf32>
    %412 = arith.negf %411 : vector<1x42xf32>
    %413 = math.exp %412 : vector<1x42xf32>
    %cst_136 = arith.constant 1.000000e+00 : f32
    %414 = vector.broadcast %cst_136 : f32 to vector<1x42xf32>
    %415 = arith.addf %414, %413 : vector<1x42xf32>
    %416 = arith.divf %414, %415 : vector<1x42xf32>
    %417 = vector.extract_strided_slice %404 {offsets = [0, 84], sizes = [1, 42], strides = [1, 1]} : vector<1x168xf32> to vector<1x42xf32>
    %418 = math.tanh %417 : vector<1x42xf32>
    %419 = vector.extract_strided_slice %404 {offsets = [0, 126], sizes = [1, 42], strides = [1, 1]} : vector<1x168xf32> to vector<1x42xf32>
    %420 = arith.negf %419 : vector<1x42xf32>
    %421 = math.exp %420 : vector<1x42xf32>
    %cst_137 = arith.constant 1.000000e+00 : f32
    %422 = vector.broadcast %cst_137 : f32 to vector<1x42xf32>
    %423 = arith.addf %422, %421 : vector<1x42xf32>
    %424 = arith.divf %422, %423 : vector<1x42xf32>
    %425 = arith.mulf %416, %370 : vector<1x42xf32>
    %426 = arith.mulf %410, %418 : vector<1x42xf32>
    %427 = arith.addf %425, %426 : vector<1x42xf32>
    %428 = math.tanh %427 : vector<1x42xf32>
    %429 = arith.mulf %424, %428 : vector<1x42xf32>
    %cst_138 = arith.constant dense<0.000000e+00> : vector<1x168xf32>
    %430 = tpu.matmul %429, %222, %cst_138 {dimension_numbers = #tpu.dot_dimension_numbers<[1], [0], [0], [1], [0, 0, 1, 1], [], []>} : vector<1x42xf32>, vector<42x168xf32>, vector<1x168xf32> -> vector<1x168xf32>
    %cst_139 = arith.constant dense<0.000000e+00> : vector<1x168xf32>
    %431 = tpu.matmul %401, %223, %cst_139 {dimension_numbers = #tpu.dot_dimension_numbers<[1], [0], [0], [1], [0, 0, 1, 1], [], []>} : vector<1x42xf32>, vector<42x168xf32>, vector<1x168xf32> -> vector<1x168xf32>
    %432 = arith.addf %430, %431 : vector<1x168xf32>
    %433 = arith.addf %432, %225 : vector<1x168xf32>
    %434 = vector.extract_strided_slice %433 {offsets = [0, 0], sizes = [1, 42], strides = [1, 1]} : vector<1x168xf32> to vector<1x42xf32>
    %435 = arith.negf %434 : vector<1x42xf32>
    %436 = math.exp %435 : vector<1x42xf32>
    %cst_140 = arith.constant 1.000000e+00 : f32
    %437 = vector.broadcast %cst_140 : f32 to vector<1x42xf32>
    %438 = arith.addf %437, %436 : vector<1x42xf32>
    %439 = arith.divf %437, %438 : vector<1x42xf32>
    %440 = vector.extract_strided_slice %433 {offsets = [0, 42], sizes = [1, 42], strides = [1, 1]} : vector<1x168xf32> to vector<1x42xf32>
    %441 = arith.negf %440 : vector<1x42xf32>
    %442 = math.exp %441 : vector<1x42xf32>
    %cst_141 = arith.constant 1.000000e+00 : f32
    %443 = vector.broadcast %cst_141 : f32 to vector<1x42xf32>
    %444 = arith.addf %443, %442 : vector<1x42xf32>
    %445 = arith.divf %443, %444 : vector<1x42xf32>
    %446 = vector.extract_strided_slice %433 {offsets = [0, 84], sizes = [1, 42], strides = [1, 1]} : vector<1x168xf32> to vector<1x42xf32>
    %447 = math.tanh %446 : vector<1x42xf32>
    %448 = vector.extract_strided_slice %433 {offsets = [0, 126], sizes = [1, 42], strides = [1, 1]} : vector<1x168xf32> to vector<1x42xf32>
    %449 = arith.negf %448 : vector<1x42xf32>
    %450 = math.exp %449 : vector<1x42xf32>
    %cst_142 = arith.constant 1.000000e+00 : f32
    %451 = vector.broadcast %cst_142 : f32 to vector<1x42xf32>
    %452 = arith.addf %451, %450 : vector<1x42xf32>
    %453 = arith.divf %451, %452 : vector<1x42xf32>
    %454 = arith.mulf %445, %399 : vector<1x42xf32>
    %455 = arith.mulf %439, %447 : vector<1x42xf32>
    %456 = arith.addf %454, %455 : vector<1x42xf32>
    %457 = math.tanh %456 : vector<1x42xf32>
    %458 = arith.mulf %453, %457 : vector<1x42xf32>
    %459 = vector.extract_strided_slice %229 {offsets = [4, 0], sizes = [1, 168], strides = [1, 1]} : vector<14x168xf32> to vector<1x168xf32>
    %cst_143 = arith.constant dense<0.000000e+00> : vector<1x168xf32>
    %460 = tpu.matmul %429, %221, %cst_143 {dimension_numbers = #tpu.dot_dimension_numbers<[1], [0], [0], [1], [0, 0, 1, 1], [], []>} : vector<1x42xf32>, vector<42x168xf32>, vector<1x168xf32> -> vector<1x168xf32>
    %461 = arith.addf %459, %460 : vector<1x168xf32>
    %462 = vector.extract_strided_slice %461 {offsets = [0, 0], sizes = [1, 42], strides = [1, 1]} : vector<1x168xf32> to vector<1x42xf32>
    %463 = arith.negf %462 : vector<1x42xf32>
    %464 = math.exp %463 : vector<1x42xf32>
    %cst_144 = arith.constant 1.000000e+00 : f32
    %465 = vector.broadcast %cst_144 : f32 to vector<1x42xf32>
    %466 = arith.addf %465, %464 : vector<1x42xf32>
    %467 = arith.divf %465, %466 : vector<1x42xf32>
    %468 = vector.extract_strided_slice %461 {offsets = [0, 42], sizes = [1, 42], strides = [1, 1]} : vector<1x168xf32> to vector<1x42xf32>
    %469 = arith.negf %468 : vector<1x42xf32>
    %470 = math.exp %469 : vector<1x42xf32>
    %cst_145 = arith.constant 1.000000e+00 : f32
    %471 = vector.broadcast %cst_145 : f32 to vector<1x42xf32>
    %472 = arith.addf %471, %470 : vector<1x42xf32>
    %473 = arith.divf %471, %472 : vector<1x42xf32>
    %474 = vector.extract_strided_slice %461 {offsets = [0, 84], sizes = [1, 42], strides = [1, 1]} : vector<1x168xf32> to vector<1x42xf32>
    %475 = math.tanh %474 : vector<1x42xf32>
    %476 = vector.extract_strided_slice %461 {offsets = [0, 126], sizes = [1, 42], strides = [1, 1]} : vector<1x168xf32> to vector<1x42xf32>
    %477 = arith.negf %476 : vector<1x42xf32>
    %478 = math.exp %477 : vector<1x42xf32>
    %cst_146 = arith.constant 1.000000e+00 : f32
    %479 = vector.broadcast %cst_146 : f32 to vector<1x42xf32>
    %480 = arith.addf %479, %478 : vector<1x42xf32>
    %481 = arith.divf %479, %480 : vector<1x42xf32>
    %482 = arith.mulf %473, %427 : vector<1x42xf32>
    %483 = arith.mulf %467, %475 : vector<1x42xf32>
    %484 = arith.addf %482, %483 : vector<1x42xf32>
    %485 = math.tanh %484 : vector<1x42xf32>
    %486 = arith.mulf %481, %485 : vector<1x42xf32>
    %cst_147 = arith.constant dense<0.000000e+00> : vector<1x168xf32>
    %487 = tpu.matmul %486, %222, %cst_147 {dimension_numbers = #tpu.dot_dimension_numbers<[1], [0], [0], [1], [0, 0, 1, 1], [], []>} : vector<1x42xf32>, vector<42x168xf32>, vector<1x168xf32> -> vector<1x168xf32>
    %cst_148 = arith.constant dense<0.000000e+00> : vector<1x168xf32>
    %488 = tpu.matmul %458, %223, %cst_148 {dimension_numbers = #tpu.dot_dimension_numbers<[1], [0], [0], [1], [0, 0, 1, 1], [], []>} : vector<1x42xf32>, vector<42x168xf32>, vector<1x168xf32> -> vector<1x168xf32>
    %489 = arith.addf %487, %488 : vector<1x168xf32>
    %490 = arith.addf %489, %225 : vector<1x168xf32>
    %491 = vector.extract_strided_slice %490 {offsets = [0, 0], sizes = [1, 42], strides = [1, 1]} : vector<1x168xf32> to vector<1x42xf32>
    %492 = arith.negf %491 : vector<1x42xf32>
    %493 = math.exp %492 : vector<1x42xf32>
    %cst_149 = arith.constant 1.000000e+00 : f32
    %494 = vector.broadcast %cst_149 : f32 to vector<1x42xf32>
    %495 = arith.addf %494, %493 : vector<1x42xf32>
    %496 = arith.divf %494, %495 : vector<1x42xf32>
    %497 = vector.extract_strided_slice %490 {offsets = [0, 42], sizes = [1, 42], strides = [1, 1]} : vector<1x168xf32> to vector<1x42xf32>
    %498 = arith.negf %497 : vector<1x42xf32>
    %499 = math.exp %498 : vector<1x42xf32>
    %cst_150 = arith.constant 1.000000e+00 : f32
    %500 = vector.broadcast %cst_150 : f32 to vector<1x42xf32>
    %501 = arith.addf %500, %499 : vector<1x42xf32>
    %502 = arith.divf %500, %501 : vector<1x42xf32>
    %503 = vector.extract_strided_slice %490 {offsets = [0, 84], sizes = [1, 42], strides = [1, 1]} : vector<1x168xf32> to vector<1x42xf32>
    %504 = math.tanh %503 : vector<1x42xf32>
    %505 = vector.extract_strided_slice %490 {offsets = [0, 126], sizes = [1, 42], strides = [1, 1]} : vector<1x168xf32> to vector<1x42xf32>
    %506 = arith.negf %505 : vector<1x42xf32>
    %507 = math.exp %506 : vector<1x42xf32>
    %cst_151 = arith.constant 1.000000e+00 : f32
    %508 = vector.broadcast %cst_151 : f32 to vector<1x42xf32>
    %509 = arith.addf %508, %507 : vector<1x42xf32>
    %510 = arith.divf %508, %509 : vector<1x42xf32>
    %511 = arith.mulf %502, %456 : vector<1x42xf32>
    %512 = arith.mulf %496, %504 : vector<1x42xf32>
    %513 = arith.addf %511, %512 : vector<1x42xf32>
    %514 = math.tanh %513 : vector<1x42xf32>
    %515 = arith.mulf %510, %514 : vector<1x42xf32>
    %516 = vector.extract_strided_slice %229 {offsets = [5, 0], sizes = [1, 168], strides = [1, 1]} : vector<14x168xf32> to vector<1x168xf32>
    %cst_152 = arith.constant dense<0.000000e+00> : vector<1x168xf32>
    %517 = tpu.matmul %486, %221, %cst_152 {dimension_numbers = #tpu.dot_dimension_numbers<[1], [0], [0], [1], [0, 0, 1, 1], [], []>} : vector<1x42xf32>, vector<42x168xf32>, vector<1x168xf32> -> vector<1x168xf32>
    %518 = arith.addf %516, %517 : vector<1x168xf32>
    %519 = vector.extract_strided_slice %518 {offsets = [0, 0], sizes = [1, 42], strides = [1, 1]} : vector<1x168xf32> to vector<1x42xf32>
    %520 = arith.negf %519 : vector<1x42xf32>
    %521 = math.exp %520 : vector<1x42xf32>
    %cst_153 = arith.constant 1.000000e+00 : f32
    %522 = vector.broadcast %cst_153 : f32 to vector<1x42xf32>
    %523 = arith.addf %522, %521 : vector<1x42xf32>
    %524 = arith.divf %522, %523 : vector<1x42xf32>
    %525 = vector.extract_strided_slice %518 {offsets = [0, 42], sizes = [1, 42], strides = [1, 1]} : vector<1x168xf32> to vector<1x42xf32>
    %526 = arith.negf %525 : vector<1x42xf32>
    %527 = math.exp %526 : vector<1x42xf32>
    %cst_154 = arith.constant 1.000000e+00 : f32
    %528 = vector.broadcast %cst_154 : f32 to vector<1x42xf32>
    %529 = arith.addf %528, %527 : vector<1x42xf32>
    %530 = arith.divf %528, %529 : vector<1x42xf32>
    %531 = vector.extract_strided_slice %518 {offsets = [0, 84], sizes = [1, 42], strides = [1, 1]} : vector<1x168xf32> to vector<1x42xf32>
    %532 = math.tanh %531 : vector<1x42xf32>
    %533 = vector.extract_strided_slice %518 {offsets = [0, 126], sizes = [1, 42], strides = [1, 1]} : vector<1x168xf32> to vector<1x42xf32>
    %534 = arith.negf %533 : vector<1x42xf32>
    %535 = math.exp %534 : vector<1x42xf32>
    %cst_155 = arith.constant 1.000000e+00 : f32
    %536 = vector.broadcast %cst_155 : f32 to vector<1x42xf32>
    %537 = arith.addf %536, %535 : vector<1x42xf32>
    %538 = arith.divf %536, %537 : vector<1x42xf32>
    %539 = arith.mulf %530, %484 : vector<1x42xf32>
    %540 = arith.mulf %524, %532 : vector<1x42xf32>
    %541 = arith.addf %539, %540 : vector<1x42xf32>
    %542 = math.tanh %541 : vector<1x42xf32>
    %543 = arith.mulf %538, %542 : vector<1x42xf32>
    %cst_156 = arith.constant dense<0.000000e+00> : vector<1x168xf32>
    %544 = tpu.matmul %543, %222, %cst_156 {dimension_numbers = #tpu.dot_dimension_numbers<[1], [0], [0], [1], [0, 0, 1, 1], [], []>} : vector<1x42xf32>, vector<42x168xf32>, vector<1x168xf32> -> vector<1x168xf32>
    %cst_157 = arith.constant dense<0.000000e+00> : vector<1x168xf32>
    %545 = tpu.matmul %515, %223, %cst_157 {dimension_numbers = #tpu.dot_dimension_numbers<[1], [0], [0], [1], [0, 0, 1, 1], [], []>} : vector<1x42xf32>, vector<42x168xf32>, vector<1x168xf32> -> vector<1x168xf32>
    %546 = arith.addf %544, %545 : vector<1x168xf32>
    %547 = arith.addf %546, %225 : vector<1x168xf32>
    %548 = vector.extract_strided_slice %547 {offsets = [0, 0], sizes = [1, 42], strides = [1, 1]} : vector<1x168xf32> to vector<1x42xf32>
    %549 = arith.negf %548 : vector<1x42xf32>
    %550 = math.exp %549 : vector<1x42xf32>
    %cst_158 = arith.constant 1.000000e+00 : f32
    %551 = vector.broadcast %cst_158 : f32 to vector<1x42xf32>
    %552 = arith.addf %551, %550 : vector<1x42xf32>
    %553 = arith.divf %551, %552 : vector<1x42xf32>
    %554 = vector.extract_strided_slice %547 {offsets = [0, 42], sizes = [1, 42], strides = [1, 1]} : vector<1x168xf32> to vector<1x42xf32>
    %555 = arith.negf %554 : vector<1x42xf32>
    %556 = math.exp %555 : vector<1x42xf32>
    %cst_159 = arith.constant 1.000000e+00 : f32
    %557 = vector.broadcast %cst_159 : f32 to vector<1x42xf32>
    %558 = arith.addf %557, %556 : vector<1x42xf32>
    %559 = arith.divf %557, %558 : vector<1x42xf32>
    %560 = vector.extract_strided_slice %547 {offsets = [0, 84], sizes = [1, 42], strides = [1, 1]} : vector<1x168xf32> to vector<1x42xf32>
    %561 = math.tanh %560 : vector<1x42xf32>
    %562 = vector.extract_strided_slice %547 {offsets = [0, 126], sizes = [1, 42], strides = [1, 1]} : vector<1x168xf32> to vector<1x42xf32>
    %563 = arith.negf %562 : vector<1x42xf32>
    %564 = math.exp %563 : vector<1x42xf32>
    %cst_160 = arith.constant 1.000000e+00 : f32
    %565 = vector.broadcast %cst_160 : f32 to vector<1x42xf32>
    %566 = arith.addf %565, %564 : vector<1x42xf32>
    %567 = arith.divf %565, %566 : vector<1x42xf32>
    %568 = arith.mulf %559, %513 : vector<1x42xf32>
    %569 = arith.mulf %553, %561 : vector<1x42xf32>
    %570 = arith.addf %568, %569 : vector<1x42xf32>
    %571 = math.tanh %570 : vector<1x42xf32>
    %572 = arith.mulf %567, %571 : vector<1x42xf32>
    %573 = vector.extract_strided_slice %229 {offsets = [6, 0], sizes = [1, 168], strides = [1, 1]} : vector<14x168xf32> to vector<1x168xf32>
    %cst_161 = arith.constant dense<0.000000e+00> : vector<1x168xf32>
    %574 = tpu.matmul %543, %221, %cst_161 {dimension_numbers = #tpu.dot_dimension_numbers<[1], [0], [0], [1], [0, 0, 1, 1], [], []>} : vector<1x42xf32>, vector<42x168xf32>, vector<1x168xf32> -> vector<1x168xf32>
    %575 = arith.addf %573, %574 : vector<1x168xf32>
    %576 = vector.extract_strided_slice %575 {offsets = [0, 0], sizes = [1, 42], strides = [1, 1]} : vector<1x168xf32> to vector<1x42xf32>
    %577 = arith.negf %576 : vector<1x42xf32>
    %578 = math.exp %577 : vector<1x42xf32>
    %cst_162 = arith.constant 1.000000e+00 : f32
    %579 = vector.broadcast %cst_162 : f32 to vector<1x42xf32>
    %580 = arith.addf %579, %578 : vector<1x42xf32>
    %581 = arith.divf %579, %580 : vector<1x42xf32>
    %582 = vector.extract_strided_slice %575 {offsets = [0, 42], sizes = [1, 42], strides = [1, 1]} : vector<1x168xf32> to vector<1x42xf32>
    %583 = arith.negf %582 : vector<1x42xf32>
    %584 = math.exp %583 : vector<1x42xf32>
    %cst_163 = arith.constant 1.000000e+00 : f32
    %585 = vector.broadcast %cst_163 : f32 to vector<1x42xf32>
    %586 = arith.addf %585, %584 : vector<1x42xf32>
    %587 = arith.divf %585, %586 : vector<1x42xf32>
    %588 = vector.extract_strided_slice %575 {offsets = [0, 84], sizes = [1, 42], strides = [1, 1]} : vector<1x168xf32> to vector<1x42xf32>
    %589 = math.tanh %588 : vector<1x42xf32>
    %590 = vector.extract_strided_slice %575 {offsets = [0, 126], sizes = [1, 42], strides = [1, 1]} : vector<1x168xf32> to vector<1x42xf32>
    %591 = arith.negf %590 : vector<1x42xf32>
    %592 = math.exp %591 : vector<1x42xf32>
    %cst_164 = arith.constant 1.000000e+00 : f32
    %593 = vector.broadcast %cst_164 : f32 to vector<1x42xf32>
    %594 = arith.addf %593, %592 : vector<1x42xf32>
    %595 = arith.divf %593, %594 : vector<1x42xf32>
    %596 = arith.mulf %587, %541 : vector<1x42xf32>
    %597 = arith.mulf %581, %589 : vector<1x42xf32>
    %598 = arith.addf %596, %597 : vector<1x42xf32>
    %599 = math.tanh %598 : vector<1x42xf32>
    %600 = arith.mulf %595, %599 : vector<1x42xf32>
    %cst_165 = arith.constant dense<0.000000e+00> : vector<1x168xf32>
    %601 = tpu.matmul %600, %222, %cst_165 {dimension_numbers = #tpu.dot_dimension_numbers<[1], [0], [0], [1], [0, 0, 1, 1], [], []>} : vector<1x42xf32>, vector<42x168xf32>, vector<1x168xf32> -> vector<1x168xf32>
    %cst_166 = arith.constant dense<0.000000e+00> : vector<1x168xf32>
    %602 = tpu.matmul %572, %223, %cst_166 {dimension_numbers = #tpu.dot_dimension_numbers<[1], [0], [0], [1], [0, 0, 1, 1], [], []>} : vector<1x42xf32>, vector<42x168xf32>, vector<1x168xf32> -> vector<1x168xf32>
    %603 = arith.addf %601, %602 : vector<1x168xf32>
    %604 = arith.addf %603, %225 : vector<1x168xf32>
    %605 = vector.extract_strided_slice %604 {offsets = [0, 0], sizes = [1, 42], strides = [1, 1]} : vector<1x168xf32> to vector<1x42xf32>
    %606 = arith.negf %605 : vector<1x42xf32>
    %607 = math.exp %606 : vector<1x42xf32>
    %cst_167 = arith.constant 1.000000e+00 : f32
    %608 = vector.broadcast %cst_167 : f32 to vector<1x42xf32>
    %609 = arith.addf %608, %607 : vector<1x42xf32>
    %610 = arith.divf %608, %609 : vector<1x42xf32>
    %611 = vector.extract_strided_slice %604 {offsets = [0, 42], sizes = [1, 42], strides = [1, 1]} : vector<1x168xf32> to vector<1x42xf32>
    %612 = arith.negf %611 : vector<1x42xf32>
    %613 = math.exp %612 : vector<1x42xf32>
    %cst_168 = arith.constant 1.000000e+00 : f32
    %614 = vector.broadcast %cst_168 : f32 to vector<1x42xf32>
    %615 = arith.addf %614, %613 : vector<1x42xf32>
    %616 = arith.divf %614, %615 : vector<1x42xf32>
    %617 = vector.extract_strided_slice %604 {offsets = [0, 84], sizes = [1, 42], strides = [1, 1]} : vector<1x168xf32> to vector<1x42xf32>
    %618 = math.tanh %617 : vector<1x42xf32>
    %619 = vector.extract_strided_slice %604 {offsets = [0, 126], sizes = [1, 42], strides = [1, 1]} : vector<1x168xf32> to vector<1x42xf32>
    %620 = arith.negf %619 : vector<1x42xf32>
    %621 = math.exp %620 : vector<1x42xf32>
    %cst_169 = arith.constant 1.000000e+00 : f32
    %622 = vector.broadcast %cst_169 : f32 to vector<1x42xf32>
    %623 = arith.addf %622, %621 : vector<1x42xf32>
    %624 = arith.divf %622, %623 : vector<1x42xf32>
    %625 = arith.mulf %616, %570 : vector<1x42xf32>
    %626 = arith.mulf %610, %618 : vector<1x42xf32>
    %627 = arith.addf %625, %626 : vector<1x42xf32>
    %628 = math.tanh %627 : vector<1x42xf32>
    %629 = arith.mulf %624, %628 : vector<1x42xf32>
    %630 = vector.extract_strided_slice %229 {offsets = [7, 0], sizes = [1, 168], strides = [1, 1]} : vector<14x168xf32> to vector<1x168xf32>
    %cst_170 = arith.constant dense<0.000000e+00> : vector<1x168xf32>
    %631 = tpu.matmul %600, %221, %cst_170 {dimension_numbers = #tpu.dot_dimension_numbers<[1], [0], [0], [1], [0, 0, 1, 1], [], []>} : vector<1x42xf32>, vector<42x168xf32>, vector<1x168xf32> -> vector<1x168xf32>
    %632 = arith.addf %630, %631 : vector<1x168xf32>
    %633 = vector.extract_strided_slice %632 {offsets = [0, 0], sizes = [1, 42], strides = [1, 1]} : vector<1x168xf32> to vector<1x42xf32>
    %634 = arith.negf %633 : vector<1x42xf32>
    %635 = math.exp %634 : vector<1x42xf32>
    %cst_171 = arith.constant 1.000000e+00 : f32
    %636 = vector.broadcast %cst_171 : f32 to vector<1x42xf32>
    %637 = arith.addf %636, %635 : vector<1x42xf32>
    %638 = arith.divf %636, %637 : vector<1x42xf32>
    %639 = vector.extract_strided_slice %632 {offsets = [0, 42], sizes = [1, 42], strides = [1, 1]} : vector<1x168xf32> to vector<1x42xf32>
    %640 = arith.negf %639 : vector<1x42xf32>
    %641 = math.exp %640 : vector<1x42xf32>
    %cst_172 = arith.constant 1.000000e+00 : f32
    %642 = vector.broadcast %cst_172 : f32 to vector<1x42xf32>
    %643 = arith.addf %642, %641 : vector<1x42xf32>
    %644 = arith.divf %642, %643 : vector<1x42xf32>
    %645 = vector.extract_strided_slice %632 {offsets = [0, 84], sizes = [1, 42], strides = [1, 1]} : vector<1x168xf32> to vector<1x42xf32>
    %646 = math.tanh %645 : vector<1x42xf32>
    %647 = vector.extract_strided_slice %632 {offsets = [0, 126], sizes = [1, 42], strides = [1, 1]} : vector<1x168xf32> to vector<1x42xf32>
    %648 = arith.negf %647 : vector<1x42xf32>
    %649 = math.exp %648 : vector<1x42xf32>
    %cst_173 = arith.constant 1.000000e+00 : f32
    %650 = vector.broadcast %cst_173 : f32 to vector<1x42xf32>
    %651 = arith.addf %650, %649 : vector<1x42xf32>
    %652 = arith.divf %650, %651 : vector<1x42xf32>
    %653 = arith.mulf %644, %598 : vector<1x42xf32>
    %654 = arith.mulf %638, %646 : vector<1x42xf32>
    %655 = arith.addf %653, %654 : vector<1x42xf32>
    %656 = math.tanh %655 : vector<1x42xf32>
    %657 = arith.mulf %652, %656 : vector<1x42xf32>
    %cst_174 = arith.constant dense<0.000000e+00> : vector<1x168xf32>
    %658 = tpu.matmul %657, %222, %cst_174 {dimension_numbers = #tpu.dot_dimension_numbers<[1], [0], [0], [1], [0, 0, 1, 1], [], []>} : vector<1x42xf32>, vector<42x168xf32>, vector<1x168xf32> -> vector<1x168xf32>
    %cst_175 = arith.constant dense<0.000000e+00> : vector<1x168xf32>
    %659 = tpu.matmul %629, %223, %cst_175 {dimension_numbers = #tpu.dot_dimension_numbers<[1], [0], [0], [1], [0, 0, 1, 1], [], []>} : vector<1x42xf32>, vector<42x168xf32>, vector<1x168xf32> -> vector<1x168xf32>
    %660 = arith.addf %658, %659 : vector<1x168xf32>
    %661 = arith.addf %660, %225 : vector<1x168xf32>
    %662 = vector.extract_strided_slice %661 {offsets = [0, 0], sizes = [1, 42], strides = [1, 1]} : vector<1x168xf32> to vector<1x42xf32>
    %663 = arith.negf %662 : vector<1x42xf32>
    %664 = math.exp %663 : vector<1x42xf32>
    %cst_176 = arith.constant 1.000000e+00 : f32
    %665 = vector.broadcast %cst_176 : f32 to vector<1x42xf32>
    %666 = arith.addf %665, %664 : vector<1x42xf32>
    %667 = arith.divf %665, %666 : vector<1x42xf32>
    %668 = vector.extract_strided_slice %661 {offsets = [0, 42], sizes = [1, 42], strides = [1, 1]} : vector<1x168xf32> to vector<1x42xf32>
    %669 = arith.negf %668 : vector<1x42xf32>
    %670 = math.exp %669 : vector<1x42xf32>
    %cst_177 = arith.constant 1.000000e+00 : f32
    %671 = vector.broadcast %cst_177 : f32 to vector<1x42xf32>
    %672 = arith.addf %671, %670 : vector<1x42xf32>
    %673 = arith.divf %671, %672 : vector<1x42xf32>
    %674 = vector.extract_strided_slice %661 {offsets = [0, 84], sizes = [1, 42], strides = [1, 1]} : vector<1x168xf32> to vector<1x42xf32>
    %675 = math.tanh %674 : vector<1x42xf32>
    %676 = vector.extract_strided_slice %661 {offsets = [0, 126], sizes = [1, 42], strides = [1, 1]} : vector<1x168xf32> to vector<1x42xf32>
    %677 = arith.negf %676 : vector<1x42xf32>
    %678 = math.exp %677 : vector<1x42xf32>
    %cst_178 = arith.constant 1.000000e+00 : f32
    %679 = vector.broadcast %cst_178 : f32 to vector<1x42xf32>
    %680 = arith.addf %679, %678 : vector<1x42xf32>
    %681 = arith.divf %679, %680 : vector<1x42xf32>
    %682 = arith.mulf %673, %627 : vector<1x42xf32>
    %683 = arith.mulf %667, %675 : vector<1x42xf32>
    %684 = arith.addf %682, %683 : vector<1x42xf32>
    %685 = math.tanh %684 : vector<1x42xf32>
    %686 = arith.mulf %681, %685 : vector<1x42xf32>
    %687 = vector.extract_strided_slice %229 {offsets = [8, 0], sizes = [1, 168], strides = [1, 1]} : vector<14x168xf32> to vector<1x168xf32>
    %cst_179 = arith.constant dense<0.000000e+00> : vector<1x168xf32>
    %688 = tpu.matmul %657, %221, %cst_179 {dimension_numbers = #tpu.dot_dimension_numbers<[1], [0], [0], [1], [0, 0, 1, 1], [], []>} : vector<1x42xf32>, vector<42x168xf32>, vector<1x168xf32> -> vector<1x168xf32>
    %689 = arith.addf %687, %688 : vector<1x168xf32>
    %690 = vector.extract_strided_slice %689 {offsets = [0, 0], sizes = [1, 42], strides = [1, 1]} : vector<1x168xf32> to vector<1x42xf32>
    %691 = arith.negf %690 : vector<1x42xf32>
    %692 = math.exp %691 : vector<1x42xf32>
    %cst_180 = arith.constant 1.000000e+00 : f32
    %693 = vector.broadcast %cst_180 : f32 to vector<1x42xf32>
    %694 = arith.addf %693, %692 : vector<1x42xf32>
    %695 = arith.divf %693, %694 : vector<1x42xf32>
    %696 = vector.extract_strided_slice %689 {offsets = [0, 42], sizes = [1, 42], strides = [1, 1]} : vector<1x168xf32> to vector<1x42xf32>
    %697 = arith.negf %696 : vector<1x42xf32>
    %698 = math.exp %697 : vector<1x42xf32>
    %cst_181 = arith.constant 1.000000e+00 : f32
    %699 = vector.broadcast %cst_181 : f32 to vector<1x42xf32>
    %700 = arith.addf %699, %698 : vector<1x42xf32>
    %701 = arith.divf %699, %700 : vector<1x42xf32>
    %702 = vector.extract_strided_slice %689 {offsets = [0, 84], sizes = [1, 42], strides = [1, 1]} : vector<1x168xf32> to vector<1x42xf32>
    %703 = math.tanh %702 : vector<1x42xf32>
    %704 = vector.extract_strided_slice %689 {offsets = [0, 126], sizes = [1, 42], strides = [1, 1]} : vector<1x168xf32> to vector<1x42xf32>
    %705 = arith.negf %704 : vector<1x42xf32>
    %706 = math.exp %705 : vector<1x42xf32>
    %cst_182 = arith.constant 1.000000e+00 : f32
    %707 = vector.broadcast %cst_182 : f32 to vector<1x42xf32>
    %708 = arith.addf %707, %706 : vector<1x42xf32>
    %709 = arith.divf %707, %708 : vector<1x42xf32>
    %710 = arith.mulf %701, %655 : vector<1x42xf32>
    %711 = arith.mulf %695, %703 : vector<1x42xf32>
    %712 = arith.addf %710, %711 : vector<1x42xf32>
    %713 = math.tanh %712 : vector<1x42xf32>
    %714 = arith.mulf %709, %713 : vector<1x42xf32>
    %cst_183 = arith.constant dense<0.000000e+00> : vector<1x168xf32>
    %715 = tpu.matmul %714, %222, %cst_183 {dimension_numbers = #tpu.dot_dimension_numbers<[1], [0], [0], [1], [0, 0, 1, 1], [], []>} : vector<1x42xf32>, vector<42x168xf32>, vector<1x168xf32> -> vector<1x168xf32>
    %cst_184 = arith.constant dense<0.000000e+00> : vector<1x168xf32>
    %716 = tpu.matmul %686, %223, %cst_184 {dimension_numbers = #tpu.dot_dimension_numbers<[1], [0], [0], [1], [0, 0, 1, 1], [], []>} : vector<1x42xf32>, vector<42x168xf32>, vector<1x168xf32> -> vector<1x168xf32>
    %717 = arith.addf %715, %716 : vector<1x168xf32>
    %718 = arith.addf %717, %225 : vector<1x168xf32>
    %719 = vector.extract_strided_slice %718 {offsets = [0, 0], sizes = [1, 42], strides = [1, 1]} : vector<1x168xf32> to vector<1x42xf32>
    %720 = arith.negf %719 : vector<1x42xf32>
    %721 = math.exp %720 : vector<1x42xf32>
    %cst_185 = arith.constant 1.000000e+00 : f32
    %722 = vector.broadcast %cst_185 : f32 to vector<1x42xf32>
    %723 = arith.addf %722, %721 : vector<1x42xf32>
    %724 = arith.divf %722, %723 : vector<1x42xf32>
    %725 = vector.extract_strided_slice %718 {offsets = [0, 42], sizes = [1, 42], strides = [1, 1]} : vector<1x168xf32> to vector<1x42xf32>
    %726 = arith.negf %725 : vector<1x42xf32>
    %727 = math.exp %726 : vector<1x42xf32>
    %cst_186 = arith.constant 1.000000e+00 : f32
    %728 = vector.broadcast %cst_186 : f32 to vector<1x42xf32>
    %729 = arith.addf %728, %727 : vector<1x42xf32>
    %730 = arith.divf %728, %729 : vector<1x42xf32>
    %731 = vector.extract_strided_slice %718 {offsets = [0, 84], sizes = [1, 42], strides = [1, 1]} : vector<1x168xf32> to vector<1x42xf32>
    %732 = math.tanh %731 : vector<1x42xf32>
    %733 = vector.extract_strided_slice %718 {offsets = [0, 126], sizes = [1, 42], strides = [1, 1]} : vector<1x168xf32> to vector<1x42xf32>
    %734 = arith.negf %733 : vector<1x42xf32>
    %735 = math.exp %734 : vector<1x42xf32>
    %cst_187 = arith.constant 1.000000e+00 : f32
    %736 = vector.broadcast %cst_187 : f32 to vector<1x42xf32>
    %737 = arith.addf %736, %735 : vector<1x42xf32>
    %738 = arith.divf %736, %737 : vector<1x42xf32>
    %739 = arith.mulf %730, %684 : vector<1x42xf32>
    %740 = arith.mulf %724, %732 : vector<1x42xf32>
    %741 = arith.addf %739, %740 : vector<1x42xf32>
    %742 = math.tanh %741 : vector<1x42xf32>
    %743 = arith.mulf %738, %742 : vector<1x42xf32>
    %744 = vector.extract_strided_slice %229 {offsets = [9, 0], sizes = [1, 168], strides = [1, 1]} : vector<14x168xf32> to vector<1x168xf32>
    %cst_188 = arith.constant dense<0.000000e+00> : vector<1x168xf32>
    %745 = tpu.matmul %714, %221, %cst_188 {dimension_numbers = #tpu.dot_dimension_numbers<[1], [0], [0], [1], [0, 0, 1, 1], [], []>} : vector<1x42xf32>, vector<42x168xf32>, vector<1x168xf32> -> vector<1x168xf32>
    %746 = arith.addf %744, %745 : vector<1x168xf32>
    %747 = vector.extract_strided_slice %746 {offsets = [0, 0], sizes = [1, 42], strides = [1, 1]} : vector<1x168xf32> to vector<1x42xf32>
    %748 = arith.negf %747 : vector<1x42xf32>
    %749 = math.exp %748 : vector<1x42xf32>
    %cst_189 = arith.constant 1.000000e+00 : f32
    %750 = vector.broadcast %cst_189 : f32 to vector<1x42xf32>
    %751 = arith.addf %750, %749 : vector<1x42xf32>
    %752 = arith.divf %750, %751 : vector<1x42xf32>
    %753 = vector.extract_strided_slice %746 {offsets = [0, 42], sizes = [1, 42], strides = [1, 1]} : vector<1x168xf32> to vector<1x42xf32>
    %754 = arith.negf %753 : vector<1x42xf32>
    %755 = math.exp %754 : vector<1x42xf32>
    %cst_190 = arith.constant 1.000000e+00 : f32
    %756 = vector.broadcast %cst_190 : f32 to vector<1x42xf32>
    %757 = arith.addf %756, %755 : vector<1x42xf32>
    %758 = arith.divf %756, %757 : vector<1x42xf32>
    %759 = vector.extract_strided_slice %746 {offsets = [0, 84], sizes = [1, 42], strides = [1, 1]} : vector<1x168xf32> to vector<1x42xf32>
    %760 = math.tanh %759 : vector<1x42xf32>
    %761 = vector.extract_strided_slice %746 {offsets = [0, 126], sizes = [1, 42], strides = [1, 1]} : vector<1x168xf32> to vector<1x42xf32>
    %762 = arith.negf %761 : vector<1x42xf32>
    %763 = math.exp %762 : vector<1x42xf32>
    %cst_191 = arith.constant 1.000000e+00 : f32
    %764 = vector.broadcast %cst_191 : f32 to vector<1x42xf32>
    %765 = arith.addf %764, %763 : vector<1x42xf32>
    %766 = arith.divf %764, %765 : vector<1x42xf32>
    %767 = arith.mulf %758, %712 : vector<1x42xf32>
    %768 = arith.mulf %752, %760 : vector<1x42xf32>
    %769 = arith.addf %767, %768 : vector<1x42xf32>
    %770 = math.tanh %769 : vector<1x42xf32>
    %771 = arith.mulf %766, %770 : vector<1x42xf32>
    %cst_192 = arith.constant dense<0.000000e+00> : vector<1x168xf32>
    %772 = tpu.matmul %771, %222, %cst_192 {dimension_numbers = #tpu.dot_dimension_numbers<[1], [0], [0], [1], [0, 0, 1, 1], [], []>} : vector<1x42xf32>, vector<42x168xf32>, vector<1x168xf32> -> vector<1x168xf32>
    %cst_193 = arith.constant dense<0.000000e+00> : vector<1x168xf32>
    %773 = tpu.matmul %743, %223, %cst_193 {dimension_numbers = #tpu.dot_dimension_numbers<[1], [0], [0], [1], [0, 0, 1, 1], [], []>} : vector<1x42xf32>, vector<42x168xf32>, vector<1x168xf32> -> vector<1x168xf32>
    %774 = arith.addf %772, %773 : vector<1x168xf32>
    %775 = arith.addf %774, %225 : vector<1x168xf32>
    %776 = vector.extract_strided_slice %775 {offsets = [0, 0], sizes = [1, 42], strides = [1, 1]} : vector<1x168xf32> to vector<1x42xf32>
    %777 = arith.negf %776 : vector<1x42xf32>
    %778 = math.exp %777 : vector<1x42xf32>
    %cst_194 = arith.constant 1.000000e+00 : f32
    %779 = vector.broadcast %cst_194 : f32 to vector<1x42xf32>
    %780 = arith.addf %779, %778 : vector<1x42xf32>
    %781 = arith.divf %779, %780 : vector<1x42xf32>
    %782 = vector.extract_strided_slice %775 {offsets = [0, 42], sizes = [1, 42], strides = [1, 1]} : vector<1x168xf32> to vector<1x42xf32>
    %783 = arith.negf %782 : vector<1x42xf32>
    %784 = math.exp %783 : vector<1x42xf32>
    %cst_195 = arith.constant 1.000000e+00 : f32
    %785 = vector.broadcast %cst_195 : f32 to vector<1x42xf32>
    %786 = arith.addf %785, %784 : vector<1x42xf32>
    %787 = arith.divf %785, %786 : vector<1x42xf32>
    %788 = vector.extract_strided_slice %775 {offsets = [0, 84], sizes = [1, 42], strides = [1, 1]} : vector<1x168xf32> to vector<1x42xf32>
    %789 = math.tanh %788 : vector<1x42xf32>
    %790 = vector.extract_strided_slice %775 {offsets = [0, 126], sizes = [1, 42], strides = [1, 1]} : vector<1x168xf32> to vector<1x42xf32>
    %791 = arith.negf %790 : vector<1x42xf32>
    %792 = math.exp %791 : vector<1x42xf32>
    %cst_196 = arith.constant 1.000000e+00 : f32
    %793 = vector.broadcast %cst_196 : f32 to vector<1x42xf32>
    %794 = arith.addf %793, %792 : vector<1x42xf32>
    %795 = arith.divf %793, %794 : vector<1x42xf32>
    %796 = arith.mulf %787, %741 : vector<1x42xf32>
    %797 = arith.mulf %781, %789 : vector<1x42xf32>
    %798 = arith.addf %796, %797 : vector<1x42xf32>
    %799 = math.tanh %798 : vector<1x42xf32>
    %800 = arith.mulf %795, %799 : vector<1x42xf32>
    %801 = vector.extract_strided_slice %229 {offsets = [10, 0], sizes = [1, 168], strides = [1, 1]} : vector<14x168xf32> to vector<1x168xf32>
    %cst_197 = arith.constant dense<0.000000e+00> : vector<1x168xf32>
    %802 = tpu.matmul %771, %221, %cst_197 {dimension_numbers = #tpu.dot_dimension_numbers<[1], [0], [0], [1], [0, 0, 1, 1], [], []>} : vector<1x42xf32>, vector<42x168xf32>, vector<1x168xf32> -> vector<1x168xf32>
    %803 = arith.addf %801, %802 : vector<1x168xf32>
    %804 = vector.extract_strided_slice %803 {offsets = [0, 0], sizes = [1, 42], strides = [1, 1]} : vector<1x168xf32> to vector<1x42xf32>
    %805 = arith.negf %804 : vector<1x42xf32>
    %806 = math.exp %805 : vector<1x42xf32>
    %cst_198 = arith.constant 1.000000e+00 : f32
    %807 = vector.broadcast %cst_198 : f32 to vector<1x42xf32>
    %808 = arith.addf %807, %806 : vector<1x42xf32>
    %809 = arith.divf %807, %808 : vector<1x42xf32>
    %810 = vector.extract_strided_slice %803 {offsets = [0, 42], sizes = [1, 42], strides = [1, 1]} : vector<1x168xf32> to vector<1x42xf32>
    %811 = arith.negf %810 : vector<1x42xf32>
    %812 = math.exp %811 : vector<1x42xf32>
    %cst_199 = arith.constant 1.000000e+00 : f32
    %813 = vector.broadcast %cst_199 : f32 to vector<1x42xf32>
    %814 = arith.addf %813, %812 : vector<1x42xf32>
    %815 = arith.divf %813, %814 : vector<1x42xf32>
    %816 = vector.extract_strided_slice %803 {offsets = [0, 84], sizes = [1, 42], strides = [1, 1]} : vector<1x168xf32> to vector<1x42xf32>
    %817 = math.tanh %816 : vector<1x42xf32>
    %818 = vector.extract_strided_slice %803 {offsets = [0, 126], sizes = [1, 42], strides = [1, 1]} : vector<1x168xf32> to vector<1x42xf32>
    %819 = arith.negf %818 : vector<1x42xf32>
    %820 = math.exp %819 : vector<1x42xf32>
    %cst_200 = arith.constant 1.000000e+00 : f32
    %821 = vector.broadcast %cst_200 : f32 to vector<1x42xf32>
    %822 = arith.addf %821, %820 : vector<1x42xf32>
    %823 = arith.divf %821, %822 : vector<1x42xf32>
    %824 = arith.mulf %815, %769 : vector<1x42xf32>
    %825 = arith.mulf %809, %817 : vector<1x42xf32>
    %826 = arith.addf %824, %825 : vector<1x42xf32>
    %827 = math.tanh %826 : vector<1x42xf32>
    %828 = arith.mulf %823, %827 : vector<1x42xf32>
    %cst_201 = arith.constant dense<0.000000e+00> : vector<1x168xf32>
    %829 = tpu.matmul %828, %222, %cst_201 {dimension_numbers = #tpu.dot_dimension_numbers<[1], [0], [0], [1], [0, 0, 1, 1], [], []>} : vector<1x42xf32>, vector<42x168xf32>, vector<1x168xf32> -> vector<1x168xf32>
    %cst_202 = arith.constant dense<0.000000e+00> : vector<1x168xf32>
    %830 = tpu.matmul %800, %223, %cst_202 {dimension_numbers = #tpu.dot_dimension_numbers<[1], [0], [0], [1], [0, 0, 1, 1], [], []>} : vector<1x42xf32>, vector<42x168xf32>, vector<1x168xf32> -> vector<1x168xf32>
    %831 = arith.addf %829, %830 : vector<1x168xf32>
    %832 = arith.addf %831, %225 : vector<1x168xf32>
    %833 = vector.extract_strided_slice %832 {offsets = [0, 0], sizes = [1, 42], strides = [1, 1]} : vector<1x168xf32> to vector<1x42xf32>
    %834 = arith.negf %833 : vector<1x42xf32>
    %835 = math.exp %834 : vector<1x42xf32>
    %cst_203 = arith.constant 1.000000e+00 : f32
    %836 = vector.broadcast %cst_203 : f32 to vector<1x42xf32>
    %837 = arith.addf %836, %835 : vector<1x42xf32>
    %838 = arith.divf %836, %837 : vector<1x42xf32>
    %839 = vector.extract_strided_slice %832 {offsets = [0, 42], sizes = [1, 42], strides = [1, 1]} : vector<1x168xf32> to vector<1x42xf32>
    %840 = arith.negf %839 : vector<1x42xf32>
    %841 = math.exp %840 : vector<1x42xf32>
    %cst_204 = arith.constant 1.000000e+00 : f32
    %842 = vector.broadcast %cst_204 : f32 to vector<1x42xf32>
    %843 = arith.addf %842, %841 : vector<1x42xf32>
    %844 = arith.divf %842, %843 : vector<1x42xf32>
    %845 = vector.extract_strided_slice %832 {offsets = [0, 84], sizes = [1, 42], strides = [1, 1]} : vector<1x168xf32> to vector<1x42xf32>
    %846 = math.tanh %845 : vector<1x42xf32>
    %847 = vector.extract_strided_slice %832 {offsets = [0, 126], sizes = [1, 42], strides = [1, 1]} : vector<1x168xf32> to vector<1x42xf32>
    %848 = arith.negf %847 : vector<1x42xf32>
    %849 = math.exp %848 : vector<1x42xf32>
    %cst_205 = arith.constant 1.000000e+00 : f32
    %850 = vector.broadcast %cst_205 : f32 to vector<1x42xf32>
    %851 = arith.addf %850, %849 : vector<1x42xf32>
    %852 = arith.divf %850, %851 : vector<1x42xf32>
    %853 = arith.mulf %844, %798 : vector<1x42xf32>
    %854 = arith.mulf %838, %846 : vector<1x42xf32>
    %855 = arith.addf %853, %854 : vector<1x42xf32>
    %856 = math.tanh %855 : vector<1x42xf32>
    %857 = arith.mulf %852, %856 : vector<1x42xf32>
    %858 = vector.extract_strided_slice %229 {offsets = [11, 0], sizes = [1, 168], strides = [1, 1]} : vector<14x168xf32> to vector<1x168xf32>
    %cst_206 = arith.constant dense<0.000000e+00> : vector<1x168xf32>
    %859 = tpu.matmul %828, %221, %cst_206 {dimension_numbers = #tpu.dot_dimension_numbers<[1], [0], [0], [1], [0, 0, 1, 1], [], []>} : vector<1x42xf32>, vector<42x168xf32>, vector<1x168xf32> -> vector<1x168xf32>
    %860 = arith.addf %858, %859 : vector<1x168xf32>
    %861 = vector.extract_strided_slice %860 {offsets = [0, 0], sizes = [1, 42], strides = [1, 1]} : vector<1x168xf32> to vector<1x42xf32>
    %862 = arith.negf %861 : vector<1x42xf32>
    %863 = math.exp %862 : vector<1x42xf32>
    %cst_207 = arith.constant 1.000000e+00 : f32
    %864 = vector.broadcast %cst_207 : f32 to vector<1x42xf32>
    %865 = arith.addf %864, %863 : vector<1x42xf32>
    %866 = arith.divf %864, %865 : vector<1x42xf32>
    %867 = vector.extract_strided_slice %860 {offsets = [0, 42], sizes = [1, 42], strides = [1, 1]} : vector<1x168xf32> to vector<1x42xf32>
    %868 = arith.negf %867 : vector<1x42xf32>
    %869 = math.exp %868 : vector<1x42xf32>
    %cst_208 = arith.constant 1.000000e+00 : f32
    %870 = vector.broadcast %cst_208 : f32 to vector<1x42xf32>
    %871 = arith.addf %870, %869 : vector<1x42xf32>
    %872 = arith.divf %870, %871 : vector<1x42xf32>
    %873 = vector.extract_strided_slice %860 {offsets = [0, 84], sizes = [1, 42], strides = [1, 1]} : vector<1x168xf32> to vector<1x42xf32>
    %874 = math.tanh %873 : vector<1x42xf32>
    %875 = vector.extract_strided_slice %860 {offsets = [0, 126], sizes = [1, 42], strides = [1, 1]} : vector<1x168xf32> to vector<1x42xf32>
    %876 = arith.negf %875 : vector<1x42xf32>
    %877 = math.exp %876 : vector<1x42xf32>
    %cst_209 = arith.constant 1.000000e+00 : f32
    %878 = vector.broadcast %cst_209 : f32 to vector<1x42xf32>
    %879 = arith.addf %878, %877 : vector<1x42xf32>
    %880 = arith.divf %878, %879 : vector<1x42xf32>
    %881 = arith.mulf %872, %826 : vector<1x42xf32>
    %882 = arith.mulf %866, %874 : vector<1x42xf32>
    %883 = arith.addf %881, %882 : vector<1x42xf32>
    %884 = math.tanh %883 : vector<1x42xf32>
    %885 = arith.mulf %880, %884 : vector<1x42xf32>
    %cst_210 = arith.constant dense<0.000000e+00> : vector<1x168xf32>
    %886 = tpu.matmul %885, %222, %cst_210 {dimension_numbers = #tpu.dot_dimension_numbers<[1], [0], [0], [1], [0, 0, 1, 1], [], []>} : vector<1x42xf32>, vector<42x168xf32>, vector<1x168xf32> -> vector<1x168xf32>
    %cst_211 = arith.constant dense<0.000000e+00> : vector<1x168xf32>
    %887 = tpu.matmul %857, %223, %cst_211 {dimension_numbers = #tpu.dot_dimension_numbers<[1], [0], [0], [1], [0, 0, 1, 1], [], []>} : vector<1x42xf32>, vector<42x168xf32>, vector<1x168xf32> -> vector<1x168xf32>
    %888 = arith.addf %886, %887 : vector<1x168xf32>
    %889 = arith.addf %888, %225 : vector<1x168xf32>
    %890 = vector.extract_strided_slice %889 {offsets = [0, 0], sizes = [1, 42], strides = [1, 1]} : vector<1x168xf32> to vector<1x42xf32>
    %891 = arith.negf %890 : vector<1x42xf32>
    %892 = math.exp %891 : vector<1x42xf32>
    %cst_212 = arith.constant 1.000000e+00 : f32
    %893 = vector.broadcast %cst_212 : f32 to vector<1x42xf32>
    %894 = arith.addf %893, %892 : vector<1x42xf32>
    %895 = arith.divf %893, %894 : vector<1x42xf32>
    %896 = vector.extract_strided_slice %889 {offsets = [0, 42], sizes = [1, 42], strides = [1, 1]} : vector<1x168xf32> to vector<1x42xf32>
    %897 = arith.negf %896 : vector<1x42xf32>
    %898 = math.exp %897 : vector<1x42xf32>
    %cst_213 = arith.constant 1.000000e+00 : f32
    %899 = vector.broadcast %cst_213 : f32 to vector<1x42xf32>
    %900 = arith.addf %899, %898 : vector<1x42xf32>
    %901 = arith.divf %899, %900 : vector<1x42xf32>
    %902 = vector.extract_strided_slice %889 {offsets = [0, 84], sizes = [1, 42], strides = [1, 1]} : vector<1x168xf32> to vector<1x42xf32>
    %903 = math.tanh %902 : vector<1x42xf32>
    %904 = vector.extract_strided_slice %889 {offsets = [0, 126], sizes = [1, 42], strides = [1, 1]} : vector<1x168xf32> to vector<1x42xf32>
    %905 = arith.negf %904 : vector<1x42xf32>
    %906 = math.exp %905 : vector<1x42xf32>
    %cst_214 = arith.constant 1.000000e+00 : f32
    %907 = vector.broadcast %cst_214 : f32 to vector<1x42xf32>
    %908 = arith.addf %907, %906 : vector<1x42xf32>
    %909 = arith.divf %907, %908 : vector<1x42xf32>
    %910 = arith.mulf %901, %855 : vector<1x42xf32>
    %911 = arith.mulf %895, %903 : vector<1x42xf32>
    %912 = arith.addf %910, %911 : vector<1x42xf32>
    %913 = math.tanh %912 : vector<1x42xf32>
    %914 = arith.mulf %909, %913 : vector<1x42xf32>
    %915 = vector.extract_strided_slice %229 {offsets = [12, 0], sizes = [1, 168], strides = [1, 1]} : vector<14x168xf32> to vector<1x168xf32>
    %cst_215 = arith.constant dense<0.000000e+00> : vector<1x168xf32>
    %916 = tpu.matmul %885, %221, %cst_215 {dimension_numbers = #tpu.dot_dimension_numbers<[1], [0], [0], [1], [0, 0, 1, 1], [], []>} : vector<1x42xf32>, vector<42x168xf32>, vector<1x168xf32> -> vector<1x168xf32>
    %917 = arith.addf %915, %916 : vector<1x168xf32>
    %918 = vector.extract_strided_slice %917 {offsets = [0, 0], sizes = [1, 42], strides = [1, 1]} : vector<1x168xf32> to vector<1x42xf32>
    %919 = arith.negf %918 : vector<1x42xf32>
    %920 = math.exp %919 : vector<1x42xf32>
    %cst_216 = arith.constant 1.000000e+00 : f32
    %921 = vector.broadcast %cst_216 : f32 to vector<1x42xf32>
    %922 = arith.addf %921, %920 : vector<1x42xf32>
    %923 = arith.divf %921, %922 : vector<1x42xf32>
    %924 = vector.extract_strided_slice %917 {offsets = [0, 42], sizes = [1, 42], strides = [1, 1]} : vector<1x168xf32> to vector<1x42xf32>
    %925 = arith.negf %924 : vector<1x42xf32>
    %926 = math.exp %925 : vector<1x42xf32>
    %cst_217 = arith.constant 1.000000e+00 : f32
    %927 = vector.broadcast %cst_217 : f32 to vector<1x42xf32>
    %928 = arith.addf %927, %926 : vector<1x42xf32>
    %929 = arith.divf %927, %928 : vector<1x42xf32>
    %930 = vector.extract_strided_slice %917 {offsets = [0, 84], sizes = [1, 42], strides = [1, 1]} : vector<1x168xf32> to vector<1x42xf32>
    %931 = math.tanh %930 : vector<1x42xf32>
    %932 = vector.extract_strided_slice %917 {offsets = [0, 126], sizes = [1, 42], strides = [1, 1]} : vector<1x168xf32> to vector<1x42xf32>
    %933 = arith.negf %932 : vector<1x42xf32>
    %934 = math.exp %933 : vector<1x42xf32>
    %cst_218 = arith.constant 1.000000e+00 : f32
    %935 = vector.broadcast %cst_218 : f32 to vector<1x42xf32>
    %936 = arith.addf %935, %934 : vector<1x42xf32>
    %937 = arith.divf %935, %936 : vector<1x42xf32>
    %938 = arith.mulf %929, %883 : vector<1x42xf32>
    %939 = arith.mulf %923, %931 : vector<1x42xf32>
    %940 = arith.addf %938, %939 : vector<1x42xf32>
    %941 = math.tanh %940 : vector<1x42xf32>
    %942 = arith.mulf %937, %941 : vector<1x42xf32>
    %cst_219 = arith.constant dense<0.000000e+00> : vector<1x168xf32>
    %943 = tpu.matmul %942, %222, %cst_219 {dimension_numbers = #tpu.dot_dimension_numbers<[1], [0], [0], [1], [0, 0, 1, 1], [], []>} : vector<1x42xf32>, vector<42x168xf32>, vector<1x168xf32> -> vector<1x168xf32>
    %cst_220 = arith.constant dense<0.000000e+00> : vector<1x168xf32>
    %944 = tpu.matmul %914, %223, %cst_220 {dimension_numbers = #tpu.dot_dimension_numbers<[1], [0], [0], [1], [0, 0, 1, 1], [], []>} : vector<1x42xf32>, vector<42x168xf32>, vector<1x168xf32> -> vector<1x168xf32>
    %945 = arith.addf %943, %944 : vector<1x168xf32>
    %946 = arith.addf %945, %225 : vector<1x168xf32>
    %947 = vector.extract_strided_slice %946 {offsets = [0, 0], sizes = [1, 42], strides = [1, 1]} : vector<1x168xf32> to vector<1x42xf32>
    %948 = arith.negf %947 : vector<1x42xf32>
    %949 = math.exp %948 : vector<1x42xf32>
    %cst_221 = arith.constant 1.000000e+00 : f32
    %950 = vector.broadcast %cst_221 : f32 to vector<1x42xf32>
    %951 = arith.addf %950, %949 : vector<1x42xf32>
    %952 = arith.divf %950, %951 : vector<1x42xf32>
    %953 = vector.extract_strided_slice %946 {offsets = [0, 42], sizes = [1, 42], strides = [1, 1]} : vector<1x168xf32> to vector<1x42xf32>
    %954 = arith.negf %953 : vector<1x42xf32>
    %955 = math.exp %954 : vector<1x42xf32>
    %cst_222 = arith.constant 1.000000e+00 : f32
    %956 = vector.broadcast %cst_222 : f32 to vector<1x42xf32>
    %957 = arith.addf %956, %955 : vector<1x42xf32>
    %958 = arith.divf %956, %957 : vector<1x42xf32>
    %959 = vector.extract_strided_slice %946 {offsets = [0, 84], sizes = [1, 42], strides = [1, 1]} : vector<1x168xf32> to vector<1x42xf32>
    %960 = math.tanh %959 : vector<1x42xf32>
    %961 = vector.extract_strided_slice %946 {offsets = [0, 126], sizes = [1, 42], strides = [1, 1]} : vector<1x168xf32> to vector<1x42xf32>
    %962 = arith.negf %961 : vector<1x42xf32>
    %963 = math.exp %962 : vector<1x42xf32>
    %cst_223 = arith.constant 1.000000e+00 : f32
    %964 = vector.broadcast %cst_223 : f32 to vector<1x42xf32>
    %965 = arith.addf %964, %963 : vector<1x42xf32>
    %966 = arith.divf %964, %965 : vector<1x42xf32>
    %967 = arith.mulf %958, %912 : vector<1x42xf32>
    %968 = arith.mulf %952, %960 : vector<1x42xf32>
    %969 = arith.addf %967, %968 : vector<1x42xf32>
    %970 = math.tanh %969 : vector<1x42xf32>
    %971 = arith.mulf %966, %970 : vector<1x42xf32>
    %972 = vector.extract_strided_slice %229 {offsets = [13, 0], sizes = [1, 168], strides = [1, 1]} : vector<14x168xf32> to vector<1x168xf32>
    %cst_224 = arith.constant dense<0.000000e+00> : vector<1x168xf32>
    %973 = tpu.matmul %942, %221, %cst_224 {dimension_numbers = #tpu.dot_dimension_numbers<[1], [0], [0], [1], [0, 0, 1, 1], [], []>} : vector<1x42xf32>, vector<42x168xf32>, vector<1x168xf32> -> vector<1x168xf32>
    %974 = arith.addf %972, %973 : vector<1x168xf32>
    %975 = vector.extract_strided_slice %974 {offsets = [0, 0], sizes = [1, 42], strides = [1, 1]} : vector<1x168xf32> to vector<1x42xf32>
    %976 = arith.negf %975 : vector<1x42xf32>
    %977 = math.exp %976 : vector<1x42xf32>
    %cst_225 = arith.constant 1.000000e+00 : f32
    %978 = vector.broadcast %cst_225 : f32 to vector<1x42xf32>
    %979 = arith.addf %978, %977 : vector<1x42xf32>
    %980 = arith.divf %978, %979 : vector<1x42xf32>
    %981 = vector.extract_strided_slice %974 {offsets = [0, 42], sizes = [1, 42], strides = [1, 1]} : vector<1x168xf32> to vector<1x42xf32>
    %982 = arith.negf %981 : vector<1x42xf32>
    %983 = math.exp %982 : vector<1x42xf32>
    %cst_226 = arith.constant 1.000000e+00 : f32
    %984 = vector.broadcast %cst_226 : f32 to vector<1x42xf32>
    %985 = arith.addf %984, %983 : vector<1x42xf32>
    %986 = arith.divf %984, %985 : vector<1x42xf32>
    %987 = vector.extract_strided_slice %974 {offsets = [0, 84], sizes = [1, 42], strides = [1, 1]} : vector<1x168xf32> to vector<1x42xf32>
    %988 = math.tanh %987 : vector<1x42xf32>
    %989 = vector.extract_strided_slice %974 {offsets = [0, 126], sizes = [1, 42], strides = [1, 1]} : vector<1x168xf32> to vector<1x42xf32>
    %990 = arith.negf %989 : vector<1x42xf32>
    %991 = math.exp %990 : vector<1x42xf32>
    %cst_227 = arith.constant 1.000000e+00 : f32
    %992 = vector.broadcast %cst_227 : f32 to vector<1x42xf32>
    %993 = arith.addf %992, %991 : vector<1x42xf32>
    %994 = arith.divf %992, %993 : vector<1x42xf32>
    %995 = arith.mulf %986, %940 : vector<1x42xf32>
    %996 = arith.mulf %980, %988 : vector<1x42xf32>
    %997 = arith.addf %995, %996 : vector<1x42xf32>
    %998 = math.tanh %997 : vector<1x42xf32>
    %999 = arith.mulf %994, %998 : vector<1x42xf32>
    %cst_228 = arith.constant dense<0.000000e+00> : vector<1x168xf32>
    %1000 = tpu.matmul %999, %222, %cst_228 {dimension_numbers = #tpu.dot_dimension_numbers<[1], [0], [0], [1], [0, 0, 1, 1], [], []>} : vector<1x42xf32>, vector<42x168xf32>, vector<1x168xf32> -> vector<1x168xf32>
    %cst_229 = arith.constant dense<0.000000e+00> : vector<1x168xf32>
    %1001 = tpu.matmul %971, %223, %cst_229 {dimension_numbers = #tpu.dot_dimension_numbers<[1], [0], [0], [1], [0, 0, 1, 1], [], []>} : vector<1x42xf32>, vector<42x168xf32>, vector<1x168xf32> -> vector<1x168xf32>
    %1002 = arith.addf %1000, %1001 : vector<1x168xf32>
    %1003 = arith.addf %1002, %225 : vector<1x168xf32>
    %1004 = vector.extract_strided_slice %1003 {offsets = [0, 0], sizes = [1, 42], strides = [1, 1]} : vector<1x168xf32> to vector<1x42xf32>
    %1005 = arith.negf %1004 : vector<1x42xf32>
    %1006 = math.exp %1005 : vector<1x42xf32>
    %cst_230 = arith.constant 1.000000e+00 : f32
    %1007 = vector.broadcast %cst_230 : f32 to vector<1x42xf32>
    %1008 = arith.addf %1007, %1006 : vector<1x42xf32>
    %1009 = arith.divf %1007, %1008 : vector<1x42xf32>
    %1010 = vector.extract_strided_slice %1003 {offsets = [0, 42], sizes = [1, 42], strides = [1, 1]} : vector<1x168xf32> to vector<1x42xf32>
    %1011 = arith.negf %1010 : vector<1x42xf32>
    %1012 = math.exp %1011 : vector<1x42xf32>
    %cst_231 = arith.constant 1.000000e+00 : f32
    %1013 = vector.broadcast %cst_231 : f32 to vector<1x42xf32>
    %1014 = arith.addf %1013, %1012 : vector<1x42xf32>
    %1015 = arith.divf %1013, %1014 : vector<1x42xf32>
    %1016 = vector.extract_strided_slice %1003 {offsets = [0, 84], sizes = [1, 42], strides = [1, 1]} : vector<1x168xf32> to vector<1x42xf32>
    %1017 = math.tanh %1016 : vector<1x42xf32>
    %1018 = vector.extract_strided_slice %1003 {offsets = [0, 126], sizes = [1, 42], strides = [1, 1]} : vector<1x168xf32> to vector<1x42xf32>
    %1019 = arith.negf %1018 : vector<1x42xf32>
    %1020 = math.exp %1019 : vector<1x42xf32>
    %cst_232 = arith.constant 1.000000e+00 : f32
    %1021 = vector.broadcast %cst_232 : f32 to vector<1x42xf32>
    %1022 = arith.addf %1021, %1020 : vector<1x42xf32>
    %1023 = arith.divf %1021, %1022 : vector<1x42xf32>
    %1024 = arith.mulf %1015, %969 : vector<1x42xf32>
    %1025 = arith.mulf %1009, %1017 : vector<1x42xf32>
    %1026 = arith.addf %1024, %1025 : vector<1x42xf32>
    %1027 = math.tanh %1026 : vector<1x42xf32>
    %1028 = arith.mulf %1023, %1027 : vector<1x42xf32>
    %c295 = arith.constant 295 : index
    %c0_233 = arith.constant 0 : index
    %1029 = vector.load %arg7[%c295, %c0_233] : memref<304x96xf32, #tpu.memory_space<vmem>>, vector<1x22xf32>
    %c296 = arith.constant 296 : index
    %c0_234 = arith.constant 0 : index
    %1030 = vector.load %arg7[%c296, %c0_234] : memref<304x96xf32, #tpu.memory_space<vmem>>, vector<1x22xf32>
    %c13 = arith.constant 13 : index
    %c2_235 = arith.constant 2 : index
    %1031 = vector.load %arg4[%c13, %c2_235] : memref<14x3xf32, #tpu.memory_space<vmem>>, vector<1x1xf32>
    %1032 = vector.broadcast %1031 : vector<1x1xf32> to vector<1x22xf32>
    %1033 = arith.mulf %1032, %1029 : vector<1x22xf32>
    %1034 = arith.addf %1033, %1030 : vector<1x22xf32>
    %cst_236 = arith.constant 0.000000e+00 : f32
    %1035 = vector.broadcast %cst_236 : f32 to vector<1x22xf32>
    %1036 = arith.maximumf %1034, %1035 : vector<1x22xf32>
    %1037 = tpu.iota {dimensions = array<i32: 0>} : vector<32x96xi32>
    %1038 = tpu.iota {dimensions = array<i32: 1>} : vector<32x96xi32>
    %c0_i32 = arith.constant 0 : i32
    %1039 = vector.broadcast %c0_i32 : i32 to vector<32x96xi32>
    %1040 = arith.addi %1037, %1039 : vector<32x96xi32>
    %1041 = arith.cmpi eq, %1038, %1040 : vector<32x96xi32>
    %1042 = arith.extui %1041 : vector<32x96xi1> to vector<32x96xi32>
    %1043 = arith.sitofp %1042 : vector<32x96xi32> to vector<32x96xf32>
    %cst_237 = arith.constant dense<0.000000e+00> : vector<1x96xf32>
    %1044 = tpu.matmul %219, %1043, %cst_237 {dimension_numbers = #tpu.dot_dimension_numbers<[1], [0], [0], [1], [0, 0, 1, 1], [], []>} : vector<1x32xf32>, vector<32x96xf32>, vector<1x96xf32> -> vector<1x96xf32>
    %1045 = tpu.iota {dimensions = array<i32: 0>} : vector<42x96xi32>
    %1046 = tpu.iota {dimensions = array<i32: 1>} : vector<42x96xi32>
    %c32_i32 = arith.constant 32 : i32
    %1047 = vector.broadcast %c32_i32 : i32 to vector<42x96xi32>
    %1048 = arith.addi %1045, %1047 : vector<42x96xi32>
    %1049 = arith.cmpi eq, %1046, %1048 : vector<42x96xi32>
    %1050 = arith.extui %1049 : vector<42x96xi1> to vector<42x96xi32>
    %1051 = arith.sitofp %1050 : vector<42x96xi32> to vector<42x96xf32>
    %cst_238 = arith.constant dense<0.000000e+00> : vector<1x96xf32>
    %1052 = tpu.matmul %1028, %1051, %cst_238 {dimension_numbers = #tpu.dot_dimension_numbers<[1], [0], [0], [1], [0, 0, 1, 1], [], []>} : vector<1x42xf32>, vector<42x96xf32>, vector<1x96xf32> -> vector<1x96xf32>
    %1053 = arith.addf %1044, %1052 : vector<1x96xf32>
    %1054 = tpu.iota {dimensions = array<i32: 0>} : vector<22x96xi32>
    %1055 = tpu.iota {dimensions = array<i32: 1>} : vector<22x96xi32>
    %c74_i32 = arith.constant 74 : i32
    %1056 = vector.broadcast %c74_i32 : i32 to vector<22x96xi32>
    %1057 = arith.addi %1054, %1056 : vector<22x96xi32>
    %1058 = arith.cmpi eq, %1055, %1057 : vector<22x96xi32>
    %1059 = arith.extui %1058 : vector<22x96xi1> to vector<22x96xi32>
    %1060 = arith.sitofp %1059 : vector<22x96xi32> to vector<22x96xf32>
    %cst_239 = arith.constant dense<0.000000e+00> : vector<1x96xf32>
    %1061 = tpu.matmul %1036, %1060, %cst_239 {dimension_numbers = #tpu.dot_dimension_numbers<[1], [0], [0], [1], [0, 0, 1, 1], [], []>} : vector<1x22xf32>, vector<22x96xf32>, vector<1x96xf32> -> vector<1x96xf32>
    %1062 = arith.addf %1053, %1061 : vector<1x96xf32>
    %c0_240 = arith.constant 0 : index
    %c0_241 = arith.constant 0 : index
    %1063 = vector.load %arg7[%c0_240, %c0_241] : memref<304x96xf32, #tpu.memory_space<vmem>>, vector<96x96xf32>
    %c96 = arith.constant 96 : index
    %c0_242 = arith.constant 0 : index
    %1064 = vector.load %arg7[%c96, %c0_242] : memref<304x96xf32, #tpu.memory_space<vmem>>, vector<96x64xf32>
    %c192 = arith.constant 192 : index
    %c0_243 = arith.constant 0 : index
    %1065 = vector.load %arg7[%c192, %c0_243] : memref<304x96xf32, #tpu.memory_space<vmem>>, vector<64x32xf32>
    %c256 = arith.constant 256 : index
    %c0_244 = arith.constant 0 : index
    %1066 = vector.load %arg7[%c256, %c0_244] : memref<304x96xf32, #tpu.memory_space<vmem>>, vector<32x14xf32>
    %c288 = arith.constant 288 : index
    %c0_245 = arith.constant 0 : index
    %1067 = vector.load %arg7[%c288, %c0_245] : memref<304x96xf32, #tpu.memory_space<vmem>>, vector<1x96xf32>
    %c289 = arith.constant 289 : index
    %c0_246 = arith.constant 0 : index
    %1068 = vector.load %arg7[%c289, %c0_246] : memref<304x96xf32, #tpu.memory_space<vmem>>, vector<1x96xf32>
    %c290 = arith.constant 290 : index
    %c0_247 = arith.constant 0 : index
    %1069 = vector.load %arg7[%c290, %c0_247] : memref<304x96xf32, #tpu.memory_space<vmem>>, vector<1x64xf32>
    %c291 = arith.constant 291 : index
    %c0_248 = arith.constant 0 : index
    %1070 = vector.load %arg7[%c291, %c0_248] : memref<304x96xf32, #tpu.memory_space<vmem>>, vector<1x64xf32>
    %c292 = arith.constant 292 : index
    %c0_249 = arith.constant 0 : index
    %1071 = vector.load %arg7[%c292, %c0_249] : memref<304x96xf32, #tpu.memory_space<vmem>>, vector<1x64xf32>
    %c293 = arith.constant 293 : index
    %c0_250 = arith.constant 0 : index
    %1072 = vector.load %arg7[%c293, %c0_250] : memref<304x96xf32, #tpu.memory_space<vmem>>, vector<1x32xf32>
    %c294 = arith.constant 294 : index
    %c0_251 = arith.constant 0 : index
    %1073 = vector.load %arg7[%c294, %c0_251] : memref<304x96xf32, #tpu.memory_space<vmem>>, vector<1x14xf32>
    %c0_252 = arith.constant 0 : index
    %1074 = memref.load %arg1[%c0_252] : memref<1xf32, #tpu.memory_space<smem>>
    %cst_253 = arith.constant dense<0.000000e+00> : vector<1x96xf32>
    %1075 = tpu.matmul %1062, %1063, %cst_253 {dimension_numbers = #tpu.dot_dimension_numbers<[1], [0], [0], [1], [0, 0, 1, 1], [], []>} : vector<1x96xf32>, vector<96x96xf32>, vector<1x96xf32> -> vector<1x96xf32>
    %1076 = vector.broadcast %1074 : f32 to vector<1x96xf32>
    %1077 = arith.mulf %1076, %1067 : vector<1x96xf32>
    %1078 = arith.addf %1075, %1077 : vector<1x96xf32>
    %1079 = arith.addf %1078, %1068 : vector<1x96xf32>
    %1080 = arith.negf %1079 : vector<1x96xf32>
    %1081 = math.exp %1080 : vector<1x96xf32>
    %cst_254 = arith.constant 1.000000e+00 : f32
    %1082 = vector.broadcast %cst_254 : f32 to vector<1x96xf32>
    %1083 = arith.addf %1082, %1081 : vector<1x96xf32>
    %1084 = arith.divf %1082, %1083 : vector<1x96xf32>
    %1085 = arith.mulf %1062, %1084 : vector<1x96xf32>
    %cst_255 = arith.constant dense<0.000000e+00> : vector<1x64xf32>
    %1086 = tpu.matmul %1085, %1064, %cst_255 {dimension_numbers = #tpu.dot_dimension_numbers<[1], [0], [0], [1], [0, 0, 1, 1], [], []>} : vector<1x96xf32>, vector<96x64xf32>, vector<1x64xf32> -> vector<1x64xf32>
    %1087 = arith.addf %1086, %1069 : vector<1x64xf32>
    %cst_256 = arith.constant dense<0.000000e+00> : vector<1xf32>
    %1088 = vector.multi_reduction <add>, %1087, %cst_256 [1] : vector<1x64xf32> to vector<1xf32>
    %1089 = vector.shape_cast %1088 : vector<1xf32> to vector<1x1xf32>
    %cst_257 = arith.constant 6.400000e+01 : f32
    %1090 = vector.broadcast %cst_257 : f32 to vector<1x1xf32>
    %1091 = arith.divf %1089, %1090 : vector<1x1xf32>
    %1092 = vector.broadcast %1091 : vector<1x1xf32> to vector<1x64xf32>
    %1093 = arith.subf %1087, %1092 : vector<1x64xf32>
    %1094 = vector.broadcast %1091 : vector<1x1xf32> to vector<1x64xf32>
    %1095 = arith.subf %1087, %1094 : vector<1x64xf32>
    %1096 = arith.mulf %1093, %1095 : vector<1x64xf32>
    %cst_258 = arith.constant dense<0.000000e+00> : vector<1xf32>
    %1097 = vector.multi_reduction <add>, %1096, %cst_258 [1] : vector<1x64xf32> to vector<1xf32>
    %1098 = vector.shape_cast %1097 : vector<1xf32> to vector<1x1xf32>
    %cst_259 = arith.constant 6.400000e+01 : f32
    %1099 = vector.broadcast %cst_259 : f32 to vector<1x1xf32>
    %1100 = arith.divf %1098, %1099 : vector<1x1xf32>
    %1101 = vector.broadcast %1091 : vector<1x1xf32> to vector<1x64xf32>
    %1102 = arith.subf %1087, %1101 : vector<1x64xf32>
    %cst_260 = arith.constant 9.99999974E-6 : f32
    %1103 = vector.broadcast %cst_260 : f32 to vector<1x1xf32>
    %1104 = arith.addf %1100, %1103 : vector<1x1xf32>
    %1105 = math.rsqrt %1104 : vector<1x1xf32>
    %1106 = vector.broadcast %1105 : vector<1x1xf32> to vector<1x64xf32>
    %1107 = arith.mulf %1102, %1106 : vector<1x64xf32>
    %1108 = arith.mulf %1107, %1070 : vector<1x64xf32>
    %1109 = arith.addf %1108, %1071 : vector<1x64xf32>
    %cst_261 = arith.constant 0.000000e+00 : f32
    %1110 = vector.broadcast %cst_261 : f32 to vector<1x64xf32>
    %1111 = arith.maximumf %1109, %1110 : vector<1x64xf32>
    %cst_262 = arith.constant dense<0.000000e+00> : vector<1x32xf32>
    %1112 = tpu.matmul %1111, %1065, %cst_262 {dimension_numbers = #tpu.dot_dimension_numbers<[1], [0], [0], [1], [0, 0, 1, 1], [], []>} : vector<1x64xf32>, vector<64x32xf32>, vector<1x32xf32> -> vector<1x32xf32>
    %1113 = arith.addf %1112, %1072 : vector<1x32xf32>
    %cst_263 = arith.constant 0.000000e+00 : f32
    %1114 = vector.broadcast %cst_263 : f32 to vector<1x32xf32>
    %1115 = arith.maximumf %1113, %1114 : vector<1x32xf32>
    %cst_264 = arith.constant dense<0.000000e+00> : vector<1x14xf32>
    %1116 = tpu.matmul %1115, %1066, %cst_264 {dimension_numbers = #tpu.dot_dimension_numbers<[1], [0], [0], [1], [0, 0, 1, 1], [], []>} : vector<1x32xf32>, vector<32x14xf32>, vector<1x14xf32> -> vector<1x14xf32>
    %1117 = arith.addf %1116, %1073 : vector<1x14xf32>
    %cst_265 = arith.constant 0.000000e+00 : f32
    %1118 = vector.broadcast %cst_265 : f32 to vector<16x128xf32>
    %c0_266 = arith.constant 0 : index
    %c0_267 = arith.constant 0 : index
    %1119 = vector.load %arg8[%c0_266, %c0_267] : memref<16x128xf32, #tpu.memory_space<vmem>>, vector<16x128xf32>
    tpu.vector_store %arg8[%c0_266, %c0_267], %1118 {strides = array<i32>} : memref<16x128xf32, #tpu.memory_space<vmem>>, vector<16x128xf32>,
    %c0_268 = arith.constant 0 : index
    %c0_269 = arith.constant 0 : index
    %1120 = vector.load %arg8[%c0_268, %c0_269] : memref<16x128xf32, #tpu.memory_space<vmem>>, vector<16x32xf32>
    tpu.vector_store %arg8[%c0_268, %c0_269], %212 {strides = array<i32>} : memref<16x128xf32, #tpu.memory_space<vmem>>, vector<16x32xf32>,
    %c0_270 = arith.constant 0 : index
    %c32_271 = arith.constant 32 : index
    %1121 = vector.load %arg8[%c0_270, %c32_271] : memref<16x128xf32, #tpu.memory_space<vmem>>, vector<1x96xf32>
    tpu.vector_store %arg8[%c0_270, %c32_271], %1084 {strides = array<i32>} : memref<16x128xf32, #tpu.memory_space<vmem>>, vector<1x96xf32>,
    %c1_272 = arith.constant 1 : index
    %c32_273 = arith.constant 32 : index
    %1122 = vector.load %arg8[%c1_272, %c32_273] : memref<16x128xf32, #tpu.memory_space<vmem>>, vector<1x14xf32>
    tpu.vector_store %arg8[%c1_272, %c32_273], %1117 {strides = array<i32>} : memref<16x128xf32, #tpu.memory_space<vmem>>, vector<1x14xf32>,
    return
  }
}

</mosaic_0001>

<bundles_post_ra>
// kernel: tile.9
= control target key start
LH: loop header
LB: loop body
LE: loop exit
PB: predicated region body
PF: predicated region fallthrough
CT: control target
= control target key end

     0   :  { %vm4_vm0 = vcmask 1047556   ;;  %s209_s14 = smov 96   ;;  %s210_s15 = smov 112   ;;  %vm6_vm1 = vcmask 130048   ;;  %vm25_vm2 = vcmask 1048448   ;;  %vm46_vm3 = vcmask 917248   ;;  %s386_s0 = inlined_call_operand.vmem [shape: f32[16,8,16], index: 0, kind: input, shape index: {}]   ;;  %s387_s1 = inlined_call_operand.vmem [shape: f32[16,128], index: 1, kind: output, shape index: {}]  }
   0x1   :  { %v172_v0 = vld [vmem:[%s386_s0 + $0x6] ss:$8 sm:$0xf]   ;;  %v167_v3 = vld [vmem:[%s386_s0 + $0x7] ss:$8 sm:$0xf]  }
   0x2   :  { %v173_v1 = vld [vmem:[%s386_s0 + $0x6] ss:$8 sm:$0xf0]   ;;  %v168_v4 = vld [vmem:[%s386_s0 + $0x7] ss:$8 sm:$0xf0]  }
   0x3   :  { %v43_v2 = vsel %vm4_vm0, %v173_v1, %v172_v0  ;;  %v22_v5 = vsel %vm4_vm0, %v168_v4, %v167_v3  ;;  %v174_v6 = vld [vmem:[%s386_s0 + $0x46] ss:$8 sm:$0xf]   ;;  %v169_v8 = vld [vmem:[%s386_s0 + $0x47] ss:$8 sm:$0xf]  }
   0x4   :  { %44 = vrot.lane.b32.xlu1 %v43_v2, %s209_s14  ;;  %23 = vrot.lane.b32.xlu0 %v22_v5, %s210_s15  ;;  %v175_v7 = vld [vmem:[%s386_s0 + $0x46] ss:$8 sm:$0xf0]   ;;  %v170_v9 = vld [vmem:[%s386_s0 + $0x47] ss:$8 sm:$0xf0]  }
   0x5   :  { %v53_v10 = vsel %vm4_vm0, %v175_v7, %v174_v6  ;;  %v32_v11 = vsel %vm4_vm0, %v170_v9, %v169_v8  ;;  %v177_v12 = vld [vmem:[%s386_s0 + $0x5] ss:$8 sm:$0xf]   ;;  %v184_v15 = vld [vmem:[%s386_s0 + $0x44] ss:$8 sm:$0xf]  }
   0x6   :  { %v178_v13 = vld [vmem:[%s386_s0 + $0x5] ss:$8 sm:$0xf0]   ;;  %v185_v16 = vld [vmem:[%s386_s0 + $0x44] ss:$8 sm:$0xf0]  }
   0x7   :  { %v64_v14 = vsel %vm4_vm0, %v178_v13, %v177_v12  ;;  %s211_s3 = smov 80   ;;  %v182_v17 = vld [vmem:[%s386_s0 + $0x4] ss:$8 sm:$0xf]   ;;  %v95_v21 = vsel %vm4_vm0, %v185_v16, %v184_v15  ;;  %s212_s12 = smov 64   ;;  %vm67_vm4 = vcmask 786048  }
   0x8   :  { %65 = vrot.lane.b32.xlu2 %v64_v14, %s211_s3  ;;  %v183_v18 = vld [vmem:[%s386_s0 + $0x4] ss:$8 sm:$0xf0]   ;;  %v179_v19 = vld [vmem:[%s386_s0 + $0x45] ss:$8 sm:$0xf]  }
   0x9   :  { %v180_v20 = vld [vmem:[%s386_s0 + $0x45] ss:$8 sm:$0xf0]   ;;  %v85_v22 = vsel %vm4_vm0, %v183_v18, %v182_v17  ;;  %v192_v24 = vld [vmem:[%s386_s0 + $0x2] ss:$8 sm:$0xf]  }
   0xa   :  { %v74_v23 = vsel %vm4_vm0, %v180_v20, %v179_v19  ;;  %v193_v25 = vld [vmem:[%s386_s0 + $0x2] ss:$8 sm:$0xf0]   ;;  %v189_v26 = vld [vmem:[%s386_s0 + $0x43] ss:$8 sm:$0xf]  }
   0xb   :  { %v190_v27 = vld [vmem:[%s386_s0 + $0x43] ss:$8 sm:$0xf0]   ;;  %v127_v30 = vsel %vm4_vm0, %v193_v25, %v192_v24  ;;  %s213_s25 = smov 32   ;;  %s214_s26 = smov 48   ;;  %vm88_vm5 = vcmask 654848  }
   0xc   :  { %54 = vrot.lane.b32.xlu1 %v53_v10, %s209_s14  ;;  %33 = vrot.lane.b32.xlu0 %v32_v11, %s210_s15  ;;  %v187_v28 = vld [vmem:[%s386_s0 + $0x3] ss:$8 sm:$0xf]   ;;  %v116_v31 = vsel %vm4_vm0, %v190_v27, %v189_v26  ;;  %v199_v33 = vld [vmem:[%s386_s0 + $0x41] ss:$8 sm:$0xf]  }
   0xd   :  { %v188_v29 = vld [vmem:[%s386_s0 + $0x3] ss:$8 sm:$0xf0]   ;;  %v200_v34 = vld [vmem:[%s386_s0 + $0x41] ss:$8 sm:$0xf0]  }
   0xe   :  { %v106_v32 = vsel %vm4_vm0, %v188_v29, %v187_v28  ;;  %v197_v35 = vld [vmem:[%s386_s0 + $0x1] ss:$8 sm:$0xf]   ;;  %v194_v37 = vld [vmem:[%s386_s0 + $0x42] ss:$8 sm:$0xf]   ;;  %v158_v39 = vsel %vm4_vm0, %v200_v34, %v199_v33 }
   0xf   :  { %v198_v36 = vld [vmem:[%s386_s0 + $0x1] ss:$8 sm:$0xf0]   ;;  %v195_v38 = vld [vmem:[%s386_s0 + $0x42] ss:$8 sm:$0xf0]  }
  0x10   :  { %75 = vrot.lane.b32.xlu2 %v74_v23, %s211_s3  ;;  %v148_v40 = vsel %vm4_vm0, %v198_v36, %v197_v35  ;;  %v137_v41 = vsel %vm4_vm0, %v195_v38, %v194_v37  ;;  %s215_s10 = smov 16   ;;  %v2_v42 = vld [vmem:[%s386_s0] ss:$8 sm:$0xf]   ;;  %vm109_vm6 = vcmask 523648   ;;  %vm130_vm7 = vcmask 392448  }
  0x11   :  { %v3_v43 = vld [vmem:[%s386_s0] ss:$8 sm:$0xf0]   ;;  %vm151_vm8 = vcmask 261248  }
  0x12   :  { %v5_v44 = vsel %vm4_vm0, %v3_v43, %v2_v42  ;;  %v164_v45 = vld [vmem:[%s386_s0 + $0x40] ss:$8 sm:$0xf]  }
  0x13   :  { %7 = vst.msk [vmem:[%s387_s1] sm:$0xff] %vm6_vm1, %v5_v44   ;;  %v165_v46 = vld [vmem:[%s386_s0 + $0x40] ss:$8 sm:$0xf0]  }
  0x14   :  { %96 = vrot.lane.b32.xlu1 %v95_v21, %s212_s12  ;;  %86 = vrot.lane.b32.xlu0 %v85_v22, %s212_s12  ;;  %v13_v47 = vsel %vm4_vm0, %v165_v46, %v164_v45 }
  0x15   :  { %166 = vst.msk [vmem:[%s387_s1 + $0x8] sm:$0xff] %vm6_vm1, %v13_v47  }
  0x18   :  { %107 = vrot.lane.b32.xlu2 %v106_v32, %s214_s26 }
  0x1c   :  { %128 = vrot.lane.b32.xlu1 %v127_v30, %s213_s25  ;;  %117 = vrot.lane.b32.xlu0 %v116_v31, %s214_s26 }
  0x20   :  { %138 = vrot.lane.b32.xlu2 %v137_v41, %s213_s25 }
  0x24   :  { %159 = vrot.lane.b32.xlu1 %v158_v39, %s215_s10  ;;  %149 = vrot.lane.b32.xlu0 %v148_v40, %s215_s10 }
  0x62   :  { %v66_v48 = vpop.permute.xlu2 %65  }
  0x6a   :  { %v76_v49 = vpop.permute.xlu2 %75  }
  0x72   :  { %v108_v52 = vpop.permute.xlu2 %107  }
  0x76   :  { %v45_v50 = vpop.permute.xlu1 %44   ;;  %v24_v51 = vpop.permute.xlu0 %23  }
  0x77   :  { %26 = vst.msk [vmem:[%s387_s1] sm:$0xff] %vm25_vm2, %v24_v51  }
  0x78   :  { %47 = vst.msk [vmem:[%s387_s1] sm:$0xff] %vm46_vm3, %v45_v50  }
  0x79   :  { %68 = vst.msk [vmem:[%s387_s1] sm:$0xff] %vm67_vm4, %v66_v48  }
  0x7a   :  { %v139_v55 = vpop.permute.xlu2 %138  }
  0x7e   :  { %v55_v53 = vpop.permute.xlu1 %54   ;;  %v34_v54 = vpop.permute.xlu0 %33  }
  0x7f   :  { %171 = vst.msk [vmem:[%s387_s1 + $0x8] sm:$0xff] %vm25_vm2, %v34_v54  }
  0x80   :  { %176 = vst.msk [vmem:[%s387_s1 + $0x8] sm:$0xff] %vm46_vm3, %v55_v53  }
  0x81   :  { %181 = vst.msk [vmem:[%s387_s1 + $0x8] sm:$0xff] %vm67_vm4, %v76_v49  }
  0x86   :  { %v97_v56 = vpop.permute.xlu1 %96   ;;  %v87_v57 = vpop.permute.xlu0 %86  }
  0x87   :  { %186 = vst.msk [vmem:[%s387_s1 + $0x8] sm:$0xff] %vm88_vm5, %v97_v56  }
  0x88   :  { %89 = vst.msk [vmem:[%s387_s1] sm:$0xff] %vm88_vm5, %v87_v57  }
  0x89   :  { %110 = vst.msk [vmem:[%s387_s1] sm:$0xff] %vm109_vm6, %v108_v52  }
  0x8e   :  { %v129_v58 = vpop.permute.xlu1 %128   ;;  %v118_v59 = vpop.permute.xlu0 %117  }
  0x8f   :  { %131 = vst.msk [vmem:[%s387_s1] sm:$0xff] %vm130_vm7, %v129_v58  }
  0x90   :  { %191 = vst.msk [vmem:[%s387_s1 + $0x8] sm:$0xff] %vm109_vm6, %v118_v59  }
  0x91   :  { %196 = vst.msk [vmem:[%s387_s1 + $0x8] sm:$0xff] %vm130_vm7, %v139_v55  }
  0x96   :  { %v160_v60 = vpop.permute.xlu1 %159   ;;  %v150_v61 = vpop.permute.xlu0 %149  }
  0x97   :  { %201 = vst.msk [vmem:[%s387_s1 + $0x8] sm:$0xff] %vm151_vm8, %v160_v60  }
  0x98   :  { %152 = vst.msk [vmem:[%s387_s1] sm:$0xff] %vm151_vm8, %v150_v61  }

// kernel: forward.1
= control target key start
LH: loop header
LB: loop body
LE: loop exit
PB: predicated region body
PF: predicated region fallthrough
CT: control target
= control target key end

     0   :  { %vm9882_vm0 = vcmask 261120   ;;  %v31_v12 = vlaneseq  ;;  %v9923_v17 = vmov 1.0   ;;  %vm9885_vm2 = vcmask 64512   ;;  %s6754_s22 = smov 44   ;;  %s6755_s15 = smov 42   ;;  %s9869_s5 = inlined_call_operand.vmem [shape: f32[3,72,32], index: 5, kind: input, shape index: {}]   ;;  %s9870_s2 = inlined_call_operand.vmem [shape: f32[16,32], index: 2, kind: input, shape index: {}]   ;;  %s9871_s3 = inlined_call_operand.vmem [shape: f32[16,128], index: 3, kind: input, shape index: {}]   ;;  %s9872_s8 = inlined_call_operand.vmem [shape: f32[16,128], index: 8, kind: output, shape index: {}]   ;;  %s9873_s6 = inlined_call_operand.vmem [shape: f32[152,168], index: 6, kind: input, shape index: {}]   ;;  %s9874_s0 = inlined_call_operand.<no memory space> [shape: s32[1], index: 0, kind: input, shape index: {}]   ;;  %s9875_s4 = inlined_call_operand.vmem [shape: f32[14,3], index: 4, kind: input, shape index: {}]   ;;  %s9876_s7 = inlined_call_operand.vmem [shape: f32[304,96], index: 7, kind: input, shape index: {}]   ;;  %s9877_s1 = inlined_call_operand.<no memory space> [shape: f32[1], index: 1, kind: input, shape index: {}]  }
   0x1   :  { %v245_v0 = vld [vmem:[%s9869_s5 + $0x18] sm:$0xff]  ;;  %v244_v1 = vld [vmem:[%s9869_s5 + $0x10] sm:$0xff]  ;;  %v243_v2 = vld [vmem:[%s9869_s5 + $0x8] sm:$0xff]  ;;  %vm9880_vm3 = vcmask 130112   ;;  %v9895_v30 = vmov 0.0   ;;  %vm9878_vm5 = vcmask 130048  }
   0x2   :  { %270 = vmatpush.msra.mxu0 %v245_v0  ;;  %v249_v3 = vld [vmem:[%s9869_s5 + $0x38] sm:$0xff]  ;;  %v248_v4 = vld [vmem:[%s9869_s5 + $0x30] sm:$0xff]  ;;  %v242_v5 = vld [vmem:[%s9869_s5] sm:$0xff]  ;;  %v6840_v13 = vand.u32 127, %v31_v12  ;;  %v6842_v14 = vshrl.u32 %v31_v12, 7  ;;  %s6756_s18 = smov 84  }
   0x3   :  { %299 = vmatpush.msra.mxu1 %v249_v3  ;;  %v247_v6 = vld [vmem:[%s9869_s5 + $0x28] sm:$0xff]  ;;  %v240_v7 = vld [vmem:[%s9870_s2] sm:$0xff]  ;;  %s6757_s16 = smov 2  }
   0x4   :  { %271 = vmatpush.msra.mxu0 %v244_v1  ;;  %v241_v8 = vld [vmem:[%s9870_s2 + $0x8] sm:$0xff]  ;;  %v246_v9 = vld [vmem:[%s9869_s5 + $0x20] sm:$0xff]  ;;  %9966 = vst [vmem:[#allocation4_spill] sm:$0xff] %v6840_v13  ;;  %v35_v15 = vshra.s32 %v6840_v13, 4  ;;  %s6752_s2 = smov 120   ;;  %v125_v29 = vand.u32 15, %v6842_v14 }
   0x5   :  { %300 = vmatpush.msra.mxu1 %v248_v4  ;;  %9967 = vst [vmem:[#allocation5_spill] sm:$0xff] %v6842_v14  ;;  %v6877_v32 = vadd.s32 8, %v6842_v14  ;;  %v6888_v36 = vadd.s32 16, %v6842_v14  ;;  %v6892_v38 = vadd.s32 24, %v6842_v14  ;;  %v6904_v42 = vadd.s32 32, %v6842_v14 }
   0x6   :  { %272 = vmatpush.msra.mxu0 %v243_v2  ;;  %vm6846_vm1 = vcmp.eq.s32.totalorder %v35_v15, %v6842_v14  ;;  %vm141_vm4 = vcmp.eq.s32.totalorder %v125_v29, %v6840_v13  ;;  %v6914_v45 = vadd.s32 40, %v6842_v14  ;;  %v6924_v51 = vadd.s32 48, %v6842_v14 }
   0x7   :  { %301 = vmatpush.msra.mxu1 %v247_v6  ;;  %5796 = vmatpush.msk.msra.mxu3 %vm6846_vm1, %v9923_v17  ;;  %v6872_v31 = vsel %vm141_vm4, 1.0, %v9895_v30  ;;  %9970 = vst [vmem:[#allocation6_spill] sm:$0xff] %v6877_v32  ;;  %v126_v33 = vand.u32 15, %v6877_v32  ;;  %v127_v37 = vand.u32 15, %v6888_v36  ;;  %v128_v39 = vand.u32 15, %v6892_v38 }
   0x8   :  { %273 = vmatpush.msra.mxu0 %v242_v5  ;;  %5793 = vmatpush.msk.msra.mxu2 %vm6846_vm1, %v9923_v17  ;;  %9971 = vst [vmem:[#allocation7_spill] sm:$0xff] %v6888_v36  ;;  %v129_v44 = vand.u32 15, %v6904_v42  ;;  %v130_v48 = vand.u32 15, %v6914_v45  ;;  %v131_v55 = vand.u32 15, %v6924_v51  ;;  %v6935_v57 = vadd.s32 56, %v6842_v14 }
   0x9   :  { %5789 = vmatmul.msk.f32.vlgmr.msra.gmra.mxu0 %vm9882_vm0, %v240_v7  ;;  %302 = vmatpush.msra.mxu1 %v246_v9  ;;  %vm142_vm6 = vcmp.eq.s32.totalorder %v126_v33, %v6840_v13  ;;  %9972 = vst [vmem:[#allocation8_spill] sm:$0xff] %v6892_v38  ;;  %vm143_vm7 = vcmp.eq.s32.totalorder %v127_v37, %v6840_v13  ;;  %v6946_v61 = vadd.s32 64, %v6842_v14  ;;  %v6956_v0 = vadd.s32 72, %v6842_v14 }
   0xa   :  { %5799 = vmatpush.msk.msrb.mxu2 %vm6846_vm1, %v9923_v17  ;;  %5818 = vmatpush.msk.msrb.mxu0 %vm6846_vm1, %v9923_v17  ;;  %v6882_v35 = vsel %vm142_vm6, 1.0, %v9895_v30  ;;  %v6897_v41 = vsel %vm143_vm7, 1.0, %v9895_v30  ;;  %vm144_vm8 = vcmp.eq.s32.totalorder %v128_v39, %v6840_v13  ;;  %9973 = vst [vmem:[#allocation9_spill] sm:$0xff] %v6904_v42  ;;  %vm145_vm9 = vcmp.eq.s32.totalorder %v129_v44, %v6840_v13 }
   0xb   :  { %v6907_v43 = vsel %vm144_vm8, 1.0, %v9895_v30  ;;  %9974 = vst [vmem:[#allocation10_spill] sm:$0xff] %v6914_v45  ;;  %v6917_v46 = vsel %vm145_vm9, 1.0, %v9895_v30  ;;  %vm146_vm11 = vcmp.eq.s32.totalorder %v130_v48, %v6840_v13  ;;  %vm147_vm13 = vcmp.eq.s32.totalorder %v131_v55, %v6840_v13 }
   0xc   :  { %9975 = vst [vmem:[#allocation11_spill] sm:$0xff] %v6917_v46  ;;  %v6928_v54 = vsel %vm146_vm11, 1.0, %v9895_v30  ;;  %v6939_v59 = vsel %vm147_vm13, 1.0, %v9895_v30  ;;  %v132_v60 = vand.u32 15, %v6935_v57  ;;  %v133_v63 = vand.u32 15, %v6946_v61 }
   0xd   :  { %9976 = vst [vmem:[#allocation12_spill] sm:$0xff] %v6928_v54  ;;  %v134_v2 = vand.u32 15, %v6956_v0  ;;  %v6966_v3 = vadd.s32 80, %v6842_v14  ;;  %v6976_v6 = vadd.s32 88, %v6842_v14  ;;  %v6986_v9 = vadd.s32 96, %v6842_v14 }
   0xe   :  { %9977 = vst [vmem:[#allocation13_spill] sm:$0xff] %v6939_v59  ;;  %vm148_vm14 = vcmp.eq.s32.totalorder %v132_v60, %v6840_v13  ;;  %vm149_vm15 = vcmp.eq.s32.totalorder %v133_v63, %v6840_v13  ;;  %v6996_v12 = vadd.s32 104, %v6842_v14  ;;  %v9884_v55 = vshra.s32 %v6935_v57, 4 }
   0xf   :  { %v6949_v62 = vsel %vm148_vm14, 1.0, %v9895_v30  ;;  %v6959_v1 = vsel %vm149_vm15, 1.0, %v9895_v30  ;;  %vm150_vm4 = vcmp.eq.s32.totalorder %v134_v2, %v6840_v13  ;;  %v135_v5 = vand.u32 15, %v6966_v3 }
  0x10   :  { %9978 = vst [vmem:[#allocation14_spill] sm:$0xff] %v6949_v62  ;;  %v6969_v4 = vsel %vm150_vm4, 1.0, %v9895_v30  ;;  %v9898_v33 = vshra.s32 %v6996_v12, 4  ;;  %v9894_v37 = vshra.s32 %v6986_v9, 4  ;;  %v9890_v48 = vshra.s32 %v6966_v3, 4 }
  0x11   :  { %5790 = vmatmul.msk.f32.gmra.mxu0 %vm9882_vm0, %v241_v8  ;;  %9979 = vst [vmem:[#allocation15_spill] sm:$0xff] %v6959_v1  ;;  %vm151_vm6 = vcmp.eq.s32.totalorder %v135_v5, %v6840_v13  ;;  %v136_v8 = vand.u32 15, %v6976_v6  ;;  %v10003_v60 = vmov 0  ;;  %v9881_v63 = vshra.s32 %v6924_v51, 4 }
  0x12   :  { %9980 = vst [vmem:[#allocation16_spill] sm:$0xff] %v6969_v4  ;;  %v6979_v7 = vsel %vm151_vm6, 1.0, %v9895_v30  ;;  %vm7062_vm14 = vcmp.eq.s32.totalorder %v9898_v33, %v6840_v13  ;;  %vm7076_vm15 = vcmp.eq.s32.totalorder %v9894_v37, %v6840_v13  ;;  %vm7106_vm6 = vcmp.eq.s32.totalorder %v9890_v48, %v6840_v13 }
  0x13   :  { %9981 = vst [vmem:[#allocation17_spill] sm:$0xff] %v6979_v7  ;;  %vm152_vm7 = vcmp.eq.s32.totalorder %v136_v8, %v6840_v13  ;;  %v10005_v2 = vmov 0  ;;  %v9879_v5 = vshra.s32 %v6914_v45, 4  ;;  %v118_v8 = vand.u32 15, %v6840_v13 }
  0x86   :  { %v275_v10 = vpop.f32.mrf.mxu0 }
  0x87   :  { %5791 = vmatmul.msk.f32.vlgmr.msra.gmra.mxu1 %vm9882_vm0, %v275_v10 }
  0x8e   :  { %v278_v11 = vpop.f32.mrf.mxu0 }
  0x8f   :  { %5792 = vmatmul.msk.f32.gmra.mxu1 %vm9882_vm0, %v278_v11  ;;  %vm120_vm0 = vcmp.eq.s32.totalorder %v118_v8, %v6877_v32 }
  0x90   :  { %596 = vmatpush.msrb.mxu1 %v278_v11  ;;  %v137_v11 = vand.u32 15, %v6986_v9  ;;  %v7235_v48 = vsel %vm120_vm0, 1.0, %v9895_v30 }
  0x91   :  { %10016 = vst [vmem:[#allocation24_spill] sm:$0xff] %v7235_v48 }
  0x92   :  { %597 = vmatpush.msrb.mxu1 %v275_v10  ;;  %v6989_v10 = vsel %vm152_vm7, 1.0, %v9895_v30  ;;  %vm153_vm8 = vcmp.eq.s32.totalorder %v137_v11, %v6840_v13  ;;  %v10007_v11 = vmov 0 }
  0x93   :  { %9982 = vst [vmem:[#allocation18_spill] sm:$0xff] %v6989_v10  ;;  %v6999_v15 = vsel %vm153_vm8, 1.0, %v9895_v30 }
  0x94   :  { %9983 = vst [vmem:[#allocation19_spill] sm:$0xff] %v6999_v15 }
  0x97   :  { %5821 = vmatmul.msk.f32.vlgmr.msrb.gmra.mxu1 %vm9878_vm5, %v6872_v31 }
  0x9f   :  { %5822 = vmatmul.msk.f32.gmra.mxu1 %vm9878_vm5, %v6882_v35 }
  0xa7   :  { %5823 = vmatmul.msk.f32.gmra.mxu1 %vm9878_vm5, %v6897_v41 }
  0xaf   :  { %5824 = vmatmul.msk.f32.gmra.mxu1 %vm9878_vm5, %v6907_v43 }
  0xb7   :  { %5825 = vmatmul.msk.f32.gmra.mxu1 %vm9878_vm5, %v6917_v46  ;;  %v10030_v46 = vshra.s32 %v6956_v0, 4 }
  0xbf   :  { %5826 = vmatmul.msk.f32.gmra.mxu1 %vm9878_vm5, %v6928_v54  ;;  %v10027_v54 = vshra.s32 %v6986_v9, 4 }
  0xc7   :  { %5827 = vmatmul.msk.f32.gmra.mxu1 %vm9878_vm5, %v6939_v59 }
  0xcf   :  { %5828 = vmatmul.msk.f32.gmra.mxu1 %vm9878_vm5, %v6949_v62 }
  0xd7   :  { %5829 = vmatmul.msk.f32.gmra.mxu1 %vm9878_vm5, %v6959_v1 }
  0xdf   :  { %5830 = vmatmul.msk.f32.gmra.mxu1 %vm9878_vm5, %v6969_v4 }
  0xe7   :  { %5831 = vmatmul.msk.f32.gmra.mxu1 %vm9878_vm5, %v6979_v7 }
  0xef   :  { %5832 = vmatmul.msk.f32.gmra.mxu1 %vm9878_vm5, %v6989_v10 }
  0xf7   :  { %5833 = vmatmul.msk.f32.gmra.mxu1 %vm9878_vm5, %v6999_v15  ;;  %v7278_v15 = vld [vmem:[%s9871_s3] sm:$0xff] }
  0xf8   :  { %10021 = vst [vmem:[#allocation25_spill] sm:$0xff] %v7278_v15 }
 0x104   :  { %v304_v18 = vpop.f32.mrf.mxu1 }
 0x105   :  { %312 = vrot.lane.b32.xlu0 %v304_v18, %s6752_s2  ;;  %5797 = vmatmul.msk.f32.vlgmr.msra.gmra.mxu3 %vm9885_vm2, %v304_v18  ;;  %v391_v20 = vsel %vm9880_vm3, %v304_v18, -inf }
 0x10c   :  { %v307_v19 = vpop.f32.mrf.mxu1 }
 0x10d   :  { %314 = vrot.lane.b32.xlu0 %v307_v19, %s6752_s2  ;;  %5798 = vmatmul.msk.f32.gmra.mxu3 %vm9885_vm2, %v307_v19  ;;  %v392_v21 = vsel %vm9880_vm3, %v307_v19, -inf  ;;  %vm119_vm3 = vcmp.eq.s32.totalorder %v118_v8, %v6842_v14  ;;  %v9905_v8 = vshra.s32 %v6842_v14, 4 }
 0x10e   :  { %v393_v22 = vmax.f32 %v391_v20, %v392_v21  ;;  %v7011_v20 = vadd.s32 112, %v6842_v14 }
 0x10f   :  { %vm7261_vm0 = vcmp.eq.s32.totalorder %v9905_v8, %v6840_v13 }
 0x110   :  { %v394_v23 = vrot.slane %v393_v22, 4  ;;  %v139_v21 = vand.u32 15, %v7011_v20 }
 0x112   :  { %v395_v24 = vmax.f32 %v393_v22, %v394_v23  ;;  %v7021_v23 = vadd.s32 120, %v6842_v14 }
 0x114   :  { %v396_v25 = vrot.slane %v395_v24, 2  ;;  %v7084_v44 = vpop.f32.mrf.mxu1 }
 0x116   :  { %v397_v26 = vmax.f32 %v395_v24, %v396_v25  ;;  %v9899_v24 = vshra.s32 %v7021_v23, 4  ;;  %v140_v25 = vand.u32 15, %v7021_v23 }
 0x118   :  { %v398_v27 = vrot.slane %v397_v26, 1  ;;  %vm7028_vm11 = vcmp.eq.s32.totalorder %v9899_v24, %v6840_v13 }
 0x119   :  { %5802 = vmatpush.msk.msrb.mxu3 %vm7028_vm11, %v9923_v17  ;;  %5920 = vmatpush.msk.msra.mxu1 %vm7028_vm11, %v9923_v17 }
 0x11a   :  { %v399_v28 = vmax.f32 %v397_v26, %v398_v27  ;;  %v9900_v27 = vshra.s32 %v7011_v20, 4  ;;  %v5843_v26 = vld [vmem:[%s9869_s5 + $0x68] sm:$0xff] }
 0x11c   :  { %401 = vrot.lane.b32.xlu1 %v399_v28, %s6752_s2  ;;  %vm7048_vm13 = vcmp.eq.s32.totalorder %v9900_v27, %v6840_v13 }
 0x11d   :  { %5803 = vmatpush.msk.msrb.mxu3 %vm7048_vm13, %v9923_v17  ;;  %5921 = vmatpush.msk.msra.mxu1 %vm7048_vm13, %v9923_v17 }
 0x11f   :  { %5804 = vmatpush.msk.msrb.mxu3 %vm7062_vm14, %v9923_v17  ;;  %5922 = vmatpush.msk.msra.mxu1 %vm7062_vm14, %v9923_v17 }
 0x121   :  { %5805 = vmatpush.msk.msrb.mxu3 %vm7076_vm15, %v9923_v17  ;;  %5923 = vmatpush.msk.msra.mxu1 %vm7076_vm15, %v9923_v17 }
 0x177   :  { %v313_v34 = vpop.permute.xlu0 %312 }
 0x178   :  { %5794 = vmatmul.msk.f32.vlgmr.msra.gmra.mxu2 %vm9885_vm2, %v313_v34 }
 0x17f   :  { %v315_v40 = vpop.permute.xlu0 %314 }
 0x180   :  { %5795 = vmatmul.msk.f32.gmra.mxu2 %vm9885_vm2, %v315_v40  ;;  %v9893_v40 = vshra.s32 %v6976_v6, 4 }
 0x182   :  { %vm7092_vm4 = vcmp.eq.s32.totalorder %v9893_v40, %v6840_v13 }
 0x183   :  { %5806 = vmatpush.msk.msrb.mxu3 %vm7092_vm4, %v9923_v17  ;;  %5924 = vmatpush.msk.msra.mxu1 %vm7092_vm4, %v9923_v17 }
 0x185   :  { %5807 = vmatpush.msk.msrb.mxu3 %vm7106_vm6, %v9923_v17  ;;  %5925 = vmatpush.msk.msra.mxu1 %vm7106_vm6, %v9923_v17 }
 0x18e   :  { %v402_v47 = vpop.permute.xlu1 %401 }
 0x18f   :  { %v404_v49 = vadd.f32 %v402_v47, %v304_v18  ;;  %v405_v52 = vadd.f32 %v402_v47, %v307_v19  ;;  %v138_v18 = vand.u32 15, %v6996_v12 }
 0x191   :  { %vm406_vm10 = vcmp.gt.f32.partialorder %v404_v49, 0.0  ;;  %v408_v50 = vmul.f32 0.2, %v404_v49  ;;  %v409_v56 = vmul.f32 0.2, %v405_v52  ;;  %vm407_vm12 = vcmp.gt.f32.partialorder %v405_v52, 0.0 }
 0x192   :  { %vm154_vm9 = vcmp.eq.s32.totalorder %v138_v18, %v6840_v13  ;;  %v9883_v18 = vshra.s32 %v6904_v42, 4 }
 0x193   :  { %v410_v53 = vsel %vm406_vm10, %v404_v49, %v408_v50  ;;  %v411_v58 = vsel %vm407_vm12, %v405_v52, %v409_v56  ;;  %v7006_v19 = vsel %vm154_vm9, 1.0, %v9895_v30  ;;  %vm155_vm10 = vcmp.eq.s32.totalorder %v139_v21, %v6840_v13 }
 0x194   :  { %5800 = vmatmul.msk.f32.vlgmr.msrb.gmra.mxu2 %vm9885_vm2, %v410_v53  ;;  %9984 = vst [vmem:[#allocation20_spill] sm:$0xff] %v7006_v19  ;;  %5834 = vmatmul.msk.f32.gmra.mxu1 %vm9878_vm5, %v7006_v19  ;;  %v7016_v22 = vsel %vm155_vm10, 1.0, %v9895_v30  ;;  %vm156_vm12 = vcmp.eq.s32.totalorder %v140_v25, %v6840_v13  ;;  %v9888_v50 = vshra.s32 %v6956_v0, 4  ;;  %v9999_v52 = vmov 0 }
 0x195   :  { %9985 = vst [vmem:[#allocation21_spill] sm:$0xff] %v7016_v22  ;;  %v7038_v28 = vsel %vm156_vm12, 1.0, %v9895_v30  ;;  %v9886_v53 = vshra.s32 %v6946_v61, 4  ;;  %v10001_v56 = vmov 0  ;;  %vm7147_vm9 = vcmp.eq.s32.totalorder %v9884_v55, %v6840_v13 }
 0x196   :  { %9988 = vst [vmem:[#allocation22_spill] sm:$0xff] %v7038_v28  ;;  %vm7120_vm7 = vcmp.eq.s32.totalorder %v9888_v50, %v6840_v13  ;;  %v10004_v60 = vsel %vm7147_vm9, 4294967295, %v10003_v60  ;;  %vm7164_vm10 = vcmp.eq.s32.totalorder %v9881_v63, %v6840_v13  ;;  %vm7179_vm12 = vcmp.eq.s32.totalorder %v9879_v5, %v6840_v13 }
 0x197   :  { %v10000_v52 = vsel %vm7120_vm7, 4294967295, %v9999_v52  ;;  %5808 = vmatpush.msk.msrb.mxu3 %vm7120_vm7, %v9923_v17  ;;  %5926 = vmatpush.msk.msra.mxu1 %vm7120_vm7, %v9923_v17  ;;  %vm7135_vm8 = vcmp.eq.s32.totalorder %v9886_v53, %v6840_v13  ;;  %v10006_v2 = vsel %vm7164_vm10, 4294967295, %v10005_v2  ;;  %v10008_v11 = vsel %vm7179_vm12, 4294967295, %v10007_v11 }
 0x198   :  { %v10002_v56 = vsel %vm7135_vm8, 4294967295, %v10001_v56  ;;  %v10009_v25 = vmov 0  ;;  %v9889_v5 = vshra.s32 %v6892_v38, 4  ;;  %v9892_v55 = vshra.s32 %v6888_v36, 4 }
 0x199   :  { %5809 = vmatpush.msk.msrb.mxu3 %vm7135_vm8, %v9923_v17  ;;  %5927 = vmatpush.msk.msra.mxu1 %vm7135_vm8, %v9923_v17  ;;  %v10011_v53 = vmov 0  ;;  %v10013_v50 = vmov 0 }
 0x19b   :  { %5810 = vmatpush.msk.msrb.mxu3 %vm7147_vm9, %v9923_v17  ;;  %5928 = vmatpush.msk.msra.mxu1 %vm7147_vm9, %v9923_v17 }
 0x19c   :  { %5801 = vmatmul.msk.f32.gmra.mxu2 %vm9885_vm2, %v411_v58  ;;  %5835 = vmatmul.msk.f32.gmra.mxu1 %vm9878_vm5, %v7016_v22  ;;  %v7142_v58 = vpop.f32.mrf.mxu1  ;;  %vm7213_vm2 = vcmp.eq.s32.totalorder %v9889_v5, %v6840_v13  ;;  %v7232_v5 = vsel %vm119_vm3, 1.0, %v9895_v30 }
 0x19d   :  { %5811 = vmatpush.msk.msrb.mxu3 %vm7164_vm10, %v9923_v17  ;;  %5929 = vmatpush.msk.msra.mxu1 %vm7164_vm10, %v9923_v17  ;;  %v10012_v53 = vsel %vm7213_vm2, 4294967295, %v10011_v53  ;;  %10015 = vst [vmem:[#allocation23_spill] sm:$0xff] %v7232_v5 }
 0x19f   :  { %5812 = vmatpush.msk.msrb.mxu3 %vm7179_vm12, %v9923_v17  ;;  %5930 = vmatpush.msk.msra.mxu1 %vm7179_vm12, %v9923_v17 }
 0x1a4   :  { %5836 = vmatmul.msk.f32.gmra.mxu1 %vm9878_vm5, %v7038_v28  ;;  %vm7193_vm5 = vcmp.eq.s32.totalorder %v9883_v18, %v6840_v13  ;;  %v7202_v63 = vpop.f32.mrf.mxu1  ;;  %v9897_v18 = vshra.s32 %v6877_v32, 4 }
 0x1a5   :  { %v10010_v25 = vsel %vm7193_vm5, 4294967295, %v10009_v25  ;;  %5813 = vmatpush.msk.msrb.mxu3 %vm7193_vm5, %v9923_v17  ;;  %5931 = vmatpush.msk.msra.mxu1 %vm7193_vm5, %v9923_v17  ;;  %vm7227_vm5 = vcmp.eq.s32.totalorder %v9892_v55, %v6840_v13  ;;  %v10017_v55 = vmov 0 }
 0x1a6   :  { %v10014_v50 = vsel %vm7227_vm5, 4294967295, %v10013_v50 }
 0x1a7   :  { %5814 = vmatpush.msk.msrb.mxu3 %vm7213_vm2, %v9923_v17  ;;  %5932 = vmatpush.msk.msra.mxu1 %vm7213_vm2, %v9923_v17  ;;  %vm7246_vm2 = vcmp.eq.s32.totalorder %v9897_v18, %v6840_v13  ;;  %v10019_v18 = vmov 0 }
 0x1a8   :  { %v10018_v55 = vsel %vm7246_vm2, 4294967295, %v10017_v55  ;;  %v10020_v18 = vsel %vm7261_vm0, 4294967295, %v10019_v18 }
 0x1a9   :  { %5815 = vmatpush.msk.msrb.mxu3 %vm7227_vm5, %v9923_v17  ;;  %5933 = vmatpush.msk.msra.mxu1 %vm7227_vm5, %v9923_v17 }
 0x1ab   :  { %5816 = vmatpush.msk.msrb.mxu3 %vm7246_vm2, %v9923_v17  ;;  %5934 = vmatpush.msk.msra.mxu1 %vm7246_vm2, %v9923_v17 }
 0x1ac   :  { %v7268_v33 = vpop.f32.mrf.mxu1 }
 0x1ad   :  { %5817 = vmatpush.msk.msrb.mxu3 %vm7261_vm0, %v9923_v17  ;;  %5935 = vmatpush.msk.msra.mxu1 %vm7261_vm0, %v9923_v17  ;;  %vm9938_vm0 = vcmp.gt.f32.partialorder %v7278_v15, 0.0 }
 0x1b4   :  { %v7273_v22 = vpop.f32.mrf.mxu1 }
 0x1bc   :  { %v7280_v4 = vpop.f32.mrf.mxu1 }
 0x1fb   :  { %v338_v21 = vpop.f32.mrf.mxu2 }
 0x1fc   :  { %v344_v37 = vmul.f32 %v7232_v5, %v338_v21 }
 0x203   :  { %v341_v40 = vpop.f32.mrf.mxu2 }
 0x204   :  { %v345_v30 = vmul.f32 %v7235_v48, %v341_v40  ;;  %v374_v40 = vpop.f32.mrf.mxu3 }
 0x206   :  { %v346_v21 = vadd.f32 %v345_v30, %v344_v37 }
 0x208   :  { %v347_v24 = vrot.slane %v346_v21, 4 }
 0x20a   :  { %v348_v27 = vadd.f32 %v347_v24, %v346_v21 }
 0x20c   :  { %v349_v28 = vrot.slane %v348_v27, 2  ;;  %v377_v19 = vpop.f32.mrf.mxu3 }
 0x20e   :  { %v350_v8 = vadd.f32 %v349_v28, %v348_v27  ;;  %v7288_v28 = vld [vmem:[%s9871_s3 + $0x8] sm:$0xff] }
 0x20f   :  { %10022 = vst [vmem:[#allocation26_spill] sm:$0xff] %v7288_v28  ;;  %vm9929_vm5 = vcmp.gt.f32.partialorder %v7288_v28, 0.0  ;;  %v10026_v28 = vmov 0.0  }
 0x210   :  { %v351_v48 = vrot.slane %v350_v8, 1 }
 0x212   :  { %v352_v5 = vadd.f32 %v351_v48, %v350_v8  ;;  %v617_v8 = vpop.f32.mrf.mxu1 }
 0x214   :  { %v375_v10 = vadd.f32 %v374_v40, %v352_v5  ;;  %v378_v7 = vadd.f32 %v377_v19, %v352_v5 }
 0x216   :  { %vm380_vm3 = vcmp.gt.f32.partialorder %v375_v10, 0.0  ;;  %v382_v30 = vmul.f32 0.2, %v375_v10  ;;  %v383_v21 = vmul.f32 0.2, %v378_v7  ;;  %vm381_vm2 = vcmp.gt.f32.partialorder %v378_v7, 0.0 }
 0x217   :  { %v435_v24 = vpop.f32.mrf.mxu2 }
 0x218   :  { %v384_v37 = vsel %vm380_vm3, %v375_v10, %v382_v30  ;;  %v385_v5 = vsel %vm381_vm2, %v378_v7, %v383_v21 }
 0x219   :  { %v388_v27 = vsel %vm9938_vm0, %v384_v37, -1e+09  ;;  %v389_v10 = vsel %vm9929_vm5, %v385_v5, -1e+09  ;;  %v189_v5 = vshra.s32 %v6840_v13, 2 }
 0x21a   :  { %v441_v48 = vsub.f32 %v388_v27, %v435_v24  ;;  %v620_v15 = vpop.f32.mrf.mxu1 }
 0x21b   :  { %vm202_vm0 = vcmp.eq.s32.totalorder %v189_v5, %v10027_v54 }
 0x21c   :  { %v443_v19 = vmul.f32 1.442695, %v441_v48 }
 0x21e   :  { %6239 = vpow2.f32 %v443_v19 }
 0x21f   :  { %v438_v40 = vpop.f32.mrf.mxu2 }
 0x220   :  { %v442_v30 = vsub.f32 %v389_v10, %v438_v40  ;;  %v10023_v40 = vshra.s32 %v7011_v20, 4 }
 0x222   :  { %v445_v17 = vmul.f32 1.442695, %v442_v30  ;;  %v623_v7 = vpop.f32.mrf.mxu1  ;;  %vm204_vm2 = vcmp.eq.s32.totalorder %v189_v5, %v10023_v40  ;;  %v10024_v30 = vshra.s32 %v7021_v23, 4  ;;  %v10028_v40 = vshra.s32 %v6976_v6, 4 }
 0x223   :  { %v7307_v62 = vsel %vm204_vm2, 1.0, %v10026_v28 }
 0x224   :  { %v7293_v37 = vpop.eup %6239  ;;  %6241 = vpow2.f32 %v445_v17  ;;  %vm205_vm3 = vcmp.eq.s32.totalorder %v189_v5, %v10024_v30  ;;  %v10025_v17 = vshra.s32 %v6996_v12, 4  ;;  %vm201_vm12 = vcmp.eq.s32.totalorder %v189_v5, %v10028_v40 }
 0x225   :  { %463 = vmatmul.f32.vlgmr.msrb.gmra.mxu3 %v7293_v37  ;;  %v7310_v59 = vsel %vm205_vm3, 1.0, %v10026_v28  ;;  %v7322_v30 = vsel %vm202_vm0, 1.0, %v10026_v28  ;;  %v7328_v54 = vsel %vm201_vm12, 1.0, %v10026_v28  ;;  %v10032_v40 = vshra.s32 %v6935_v57, 4 }
 0x226   :  { %vm203_vm5 = vcmp.eq.s32.totalorder %v189_v5, %v10025_v17  ;;  %v10029_v17 = vshra.s32 %v6966_v3, 4 }
 0x227   :  { %v7315_v13 = vsel %vm203_vm5, 1.0, %v10026_v28  ;;  %vm199_vm5 = vcmp.eq.s32.totalorder %v189_v5, %v10030_v46  ;;  %vm197_vm12 = vcmp.eq.s32.totalorder %v189_v5, %v10032_v40 }
 0x228   :  { %vm200_vm2 = vcmp.eq.s32.totalorder %v189_v5, %v10029_v17  ;;  %v10036_v17 = vshra.s32 %v6892_v38, 4 }
 0x22a   :  { %v7296_v1 = vpop.eup %6241  ;;  %v626_v24 = vpop.f32.mrf.mxu1 }
 0x22d   :  { %466 = vmatmul.f32.gmra.mxu3 %v7296_v1 }
 0x232   :  { %v629_v21 = vpop.f32.mrf.mxu1 }
 0x23a   :  { %v632_v27 = vpop.f32.mrf.mxu1 }
 0x23b   :  { %v658_v3 = vmul.f32 %v7328_v54, %v632_v27  ;;  %v7352_v27 = vsel %vm197_vm12, 1.0, %v10026_v28 }
 0x242   :  { %v635_v48 = vpop.f32.mrf.mxu1 }
 0x243   :  { %v659_v6 = vmul.f32 %v7322_v30, %v635_v48  ;;  %v10033_v48 = vshra.s32 %v6924_v51, 4  ;;  %v654_v51 = vmul.f32 %v7352_v27, %v620_v15 }
 0x245   :  { %vm196_vm3 = vcmp.eq.s32.totalorder %v189_v5, %v10033_v48 }
 0x24a   :  { %v638_v19 = vpop.f32.mrf.mxu1 }
 0x24b   :  { %v660_v9 = vmul.f32 %v7315_v13, %v638_v19  ;;  %v7340_v19 = vsel %vm199_vm5, 1.0, %v10026_v28 }
 0x252   :  { %v641_v10 = vpop.f32.mrf.mxu1 }
 0x253   :  { %v661_v23 = vmul.f32 %v7307_v62, %v641_v10  ;;  %v7334_v10 = vsel %vm200_vm2, 1.0, %v10026_v28 }
 0x254   :  { %v657_v46 = vmul.f32 %v7334_v10, %v629_v21  ;;  %v7358_v21 = vsel %vm196_vm3, 1.0, %v10026_v28 }
 0x25a   :  { %v644_v20 = vpop.f32.mrf.mxu1 }
 0x25b   :  { %v662_v12 = vmul.f32 %v7310_v59, %v644_v20  ;;  %v10031_v20 = vshra.s32 %v6946_v61, 4  ;;  %v656_v61 = vmul.f32 %v7340_v19, %v626_v24 }
 0x25d   :  { %664 = vmatpush.msra.mxu2 %v662_v12  ;;  %vm198_vm0 = vcmp.eq.s32.totalorder %v189_v5, %v10031_v20  ;;  %v10035_v12 = vshra.s32 %v6904_v42, 4 }
 0x25e   :  { %v7346_v0 = vsel %vm198_vm0, 1.0, %v10026_v28  ;;  %vm193_vm0 = vcmp.eq.s32.totalorder %v189_v5, %v10036_v17 }
 0x25f   :  { %665 = vmatpush.msra.mxu2 %v661_v23  ;;  %v10034_v23 = vshra.s32 %v6914_v45, 4  ;;  %v655_v57 = vmul.f32 %v7346_v0, %v623_v7  ;;  %vm194_vm5 = vcmp.eq.s32.totalorder %v189_v5, %v10035_v12  ;;  %v7377_v15 = vsel %vm193_vm0, 1.0, %v10026_v28 }
 0x260   :  { %v7370_v7 = vsel %vm194_vm5, 1.0, %v10026_v28 }
 0x261   :  { %666 = vmatpush.msra.mxu2 %v660_v9  ;;  %vm195_vm2 = vcmp.eq.s32.totalorder %v189_v5, %v10034_v23  ;;  %v653_v9 = vmul.f32 %v7358_v21, %v617_v8  ;;  %v651_v8 = vmul.f32 %v7370_v7, %v7273_v22 }
 0x262   :  { %v7364_v24 = vsel %vm195_vm2, 1.0, %v10026_v28 }
 0x263   :  { %667 = vmatpush.msra.mxu2 %v659_v6  ;;  %v10037_v6 = vshra.s32 %v6888_v36, 4  ;;  %v652_v20 = vmul.f32 %v7364_v24, %v7280_v4  ;;  %v650_v4 = vmul.f32 %v7377_v15, %v7268_v33 }
 0x265   :  { %668 = vmatpush.msra.mxu2 %v658_v3  ;;  %vm192_vm12 = vcmp.eq.s32.totalorder %v189_v5, %v10037_v6  ;;  %v10038_v3 = vshra.s32 %v6877_v32, 4 }
 0x266   :  { %v7384_v40 = vsel %vm192_vm12, 1.0, %v10026_v28 }
 0x267   :  { %669 = vmatpush.msra.mxu2 %v657_v46  ;;  %vm191_vm3 = vcmp.eq.s32.totalorder %v189_v5, %v10038_v3  ;;  %v10039_v46 = vshra.s32 %v6842_v14, 4 }
 0x268   :  { %v7391_v48 = vsel %vm191_vm3, 1.0, %v10026_v28 }
 0x269   :  { %670 = vmatpush.msra.mxu2 %v656_v61  ;;  %vm190_vm2 = vcmp.eq.s32.totalorder %v189_v5, %v10039_v46  ;;  %v649_v61 = vmul.f32 %v7384_v40, %v7202_v63  ;;  %v648_v23 = vmul.f32 %v7391_v48, %v7142_v58 }
 0x26a   :  { %v7396_v22 = vsel %vm190_vm2, 1.0, %v10026_v28  ;;  %vm10040_vm2 = vcmask 64512  }
 0x26b   :  { %671 = vmatpush.msra.mxu2 %v655_v57  ;;  %v647_v5 = vmul.f32 %v7396_v22, %v7084_v44 }
 0x26d   :  { %672 = vmatpush.msra.mxu2 %v654_v51 }
 0x26f   :  { %673 = vmatpush.msra.mxu2 %v653_v9 }
 0x271   :  { %674 = vmatpush.msra.mxu2 %v652_v20 }
 0x273   :  { %675 = vmatpush.msra.mxu2 %v651_v8 }
 0x275   :  { %676 = vmatpush.msra.mxu2 %v650_v4 }
 0x277   :  { %677 = vmatpush.msra.mxu2 %v649_v61 }
 0x279   :  { %678 = vmatpush.msra.mxu2 %v648_v23 }
 0x27b   :  { %679 = vmatpush.msra.mxu2 %v647_v5 }
 0x2a8   :  { %v464_v33 = vpop.f32.mrf.mxu3 }
 0x2a9   :  { %v470_v57 = vmax.f32 %v464_v33, 1e-30 }
 0x2ab   :  { %6243 = vrcp.f32 %v470_v57  ;;  %v483_v6 = vand.u32 2147483648, %v470_v57  ;;  %v481_v58 = vand.u32 2147483647, %v470_v57  ;;  %vm477_vm0 = vweird.f32 %v470_v57 }
 0x2ad   :  { %v484_v44 = vor.u32 1.1754944e-38, %v483_v6  ;;  %vm482_vm3 = vcmp.eq.f32.partialorder %v481_v58, 8.507059e+37 }
 0x2b0   :  { %v467_v12 = vpop.f32.mrf.mxu3 }
 0x2b1   :  { %v6244_v51 = vpop.eup %6243  ;;  %v471_v63 = vmax.f32 %v467_v12, 1e-30 }
 0x2b2   :  { %v473_v17 = vmul.f32 %v6244_v51, %v470_v57  ;;  %vm478_vm5 = vweird.f32 %v6244_v51 }
 0x2b3   :  { %6245 = vrcp.f32 %v471_v63  ;;  %vm479_vm12 = vmor %vm477_vm0, %vm478_vm5  ;;  %v498_v5 = vand.u32 2147483648, %v471_v63  ;;  %v496_v12 = vand.u32 2147483647, %v471_v63  ;;  %vm492_vm9 = vweird.f32 %v471_v63 }
 0x2b4   :  { %v474_v9 = vsub.f32 1.0, %v473_v17  ;;  %vm10041_vm5 = vmmov %vm10040_vm2  ;;  %vm10051_vm0 = vnez %v10012_v53 }
 0x2b5   :  { %vm497_vm7 = vcmp.eq.f32.partialorder %v496_v12, 8.507059e+37 }
 0x2b6   :  { %v475_v20 = vmul.f32 %v6244_v51, %v474_v9  ;;  %v499_v9 = vor.u32 1.1754944e-38, %v498_v5 }
 0x2b8   :  { %v476_v3 = vadd.f32 %v6244_v51, %v475_v20 }
 0x2b9   :  { %v6246_v8 = vpop.eup %6245 }
 0x2ba   :  { %v480_v46 = vsel %vm479_vm12, %v6244_v51, %v476_v3  ;;  %v488_v4 = vmul.f32 %v6246_v8, %v471_v63  ;;  %vm493_vm10 = vweird.f32 %v6246_v8  ;;  %v5841_v63 = vld [vmem:[%s9869_s5 + $0x58] sm:$0xff]  ;;  %vm10052_vm12 = vnez %v10014_v50 }
 0x2bb   :  { %v485_v61 = vsel %vm482_vm3, %v484_v44, %v480_v46  ;;  %vm494_vm8 = vmor %vm492_vm9, %vm493_vm10  ;;  %v5842_v44 = vld [vmem:[%s9869_s5 + $0x60] sm:$0xff]  ;;  %vm10053_vm3 = vnez %v10018_v55 }
 0x2bc   :  { %5819 = vmatmul.msk.f32.vlgmr.msrb.gmra.mxu0 %vm10040_vm2, %v485_v61  ;;  %v489_v23 = vsub.f32 1.0, %v488_v4  ;;  %6221 = vmatpush.msrb.mxu2 %v5842_v44  ;;  %v5846_v46 = vld [vmem:[%s9869_s5 + $0x80] sm:$0xff]  ;;  %v5845_v4 = vld [vmem:[%s9869_s5 + $0x78] sm:$0xff]  ;;  %v5844_v61 = vld [vmem:[%s9869_s5 + $0x70] sm:$0xff]  ;;  %vm10054_vm2 = vnez %v10020_v18 }
 0x2bd   :  { %727 = vmatpush.msra.mxu0 %v5842_v44  ;;  %756 = vmatpush.msra.mxu3 %v5846_v46 }
 0x2be   :  { %v490_v33 = vmul.f32 %v6246_v8, %v489_v23  ;;  %6222 = vmatpush.msrb.mxu2 %v5841_v63  ;;  %v6236_v23 = vld [vmem:[%s9869_s5 + $0x40] ss:$0 sm:$0xff] }
 0x2bf   :  { %728 = vmatpush.msra.mxu0 %v5841_v63  ;;  %757 = vmatpush.msra.mxu3 %v5845_v4 }
 0x2c0   :  { %v491_v17 = vadd.f32 %v6246_v8, %v490_v33 }
 0x2c1   :  { %758 = vmatpush.msra.mxu3 %v5844_v61 }
 0x2c2   :  { %v495_v20 = vsel %vm494_vm8, %v6246_v8, %v491_v17  ;;  %v10042_v8 = vmov 1.0   ;;  %vm10043_vm8 = vcmask 261120  }
 0x2c3   :  { %v500_v57 = vsel %vm497_vm7, %v499_v9, %v495_v20  ;;  %vm10044_vm10 = vmmov %vm10043_vm8  ;;  %759 = vmatpush.msra.mxu3 %v5843_v26  ;;  %v10089_v26 = vld [vmem:[#allocation23_spill] sm:$0xff] }
 0x2c4   :  { %5820 = vmatmul.msk.f32.gmra.mxu0 %vm10041_vm5, %v500_v57  ;;  %vm10055_vm5 = vmmov %vm10043_vm8 }
 0x2c5   :  { %5858 = vmatpush.msk.msrb.mxu3 %vm6846_vm1, %v10042_v8 }
 0x339   :  { %v525_v51 = vpop.f32.mrf.mxu0 }
 0x33a   :  { %v531_v6 = vmul.f32 %v7293_v37, %v525_v51  ;;  %v5840_v37 = vld [vmem:[%s9869_s5 + $0x50] sm:$0xff] }
 0x33b   :  { %729 = vmatpush.msra.mxu0 %v5840_v37  ;;  %6223 = vmatpush.msrb.mxu2 %v5840_v37 }
 0x33c   :  { %680 = vmatmul.f32.vlgmr.msra.gmra.mxu2 %v531_v6 }
 0x341   :  { %v528_v58 = vpop.f32.mrf.mxu0 }
 0x342   :  { %v532_v3 = vmul.f32 %v7296_v1, %v528_v58  ;;  %v5839_v1 = vld [vmem:[%s9869_s5 + $0x48] sm:$0xff] }
 0x343   :  { %730 = vmatpush.msra.mxu0 %v5839_v1  ;;  %6224 = vmatpush.msrb.mxu2 %v5839_v1 }
 0x344   :  { %683 = vmatmul.f32.gmra.mxu2 %v532_v3 }
 0x345   :  { %5855 = vmatpush.msk.msra.mxu2 %vm6846_vm1, %v10042_v8  ;;  %5852 = vmatpush.msk.msrb.mxu0 %vm6846_vm1, %v10042_v8 }
 0x3bf   :  { %v681_v5 = vpop.f32.mrf.mxu2 }
 0x3c0   :  { %v682_v33 = vadd.f32 %v6236_v23, %v681_v5 }
 0x3c2   :  { %v689_v12 = vmin.f32 %v682_v33, 0.0  ;;  %vm687_vm7 = vcmp.gt.f32.partialorder %v682_v33, 0.0 }
 0x3c4   :  { %v691_v17 = vmul.f32 1.442695, %v689_v12  ;;  %v10069_v12 = vld [vmem:[#allocation11_spill] sm:$0xff] }
 0x3c6   :  { %6247 = vpow2.f32 %v691_v17  ;;  %v10071_v17 = vld [vmem:[#allocation12_spill] sm:$0xff] }
 0x3c7   :  { %v684_v9 = vpop.f32.mrf.mxu2 }
 0x3c8   :  { %v685_v20 = vadd.f32 %v6236_v23, %v684_v9  ;;  %v10073_v9 = vld [vmem:[#allocation13_spill] sm:$0xff] }
 0x3ca   :  { %v690_v57 = vmin.f32 %v685_v20, 0.0  ;;  %vm688_vm9 = vcmp.gt.f32.partialorder %v685_v20, 0.0 }
 0x3cc   :  { %v6248_v51 = vpop.eup %6247  ;;  %v693_v6 = vmul.f32 1.442695, %v690_v57  ;;  %v10077_v57 = vld [vmem:[#allocation15_spill] sm:$0xff] }
 0x3cd   :  { %v5837_v58 = vadd.f32 -1.0, %v6248_v51  ;;  %v10079_v51 = vld [vmem:[#allocation16_spill] sm:$0xff] }
 0x3ce   :  { %6249 = vpow2.f32 %v693_v6  ;;  %v10081_v6 = vld [vmem:[#allocation17_spill] sm:$0xff] }
 0x3cf   :  { %v697_v3 = vsel %vm687_vm7, %v682_v33, %v5837_v58  ;;  %vm10056_vm7 = vmmov %vm10055_vm5  ;;  %v10083_v58 = vld [vmem:[#allocation18_spill] sm:$0xff] }
 0x3d0   :  { %5848 = vmatmul.msk.f32.vlgmr.msra.gmra.mxu0 %vm10043_vm8, %v697_v3  ;;  %vm10057_vm8 = vcmask 64512   ;;  %v10085_v3 = vld [vmem:[#allocation19_spill] sm:$0xff] }
 0x3d1   :  { %5861 = vmatpush.msk.msra.mxu0 %vm7028_vm11, %v10042_v8  ;;  %vm10045_vm11 = vnez %v10000_v52 }
 0x3d3   :  { %5862 = vmatpush.msk.msra.mxu0 %vm7048_vm13, %v10042_v8  ;;  %vm10046_vm13 = vnez %v10002_v56 }
 0x3d4   :  { %v6250_v44 = vpop.eup %6249 }
 0x3d5   :  { %v5838_v63 = vadd.f32 -1.0, %v6250_v44  ;;  %5863 = vmatpush.msk.msra.mxu0 %vm7062_vm14, %v10042_v8  ;;  %vm10047_vm14 = vnez %v10004_v60 }
 0x3d7   :  { %v698_v37 = vsel %vm688_vm9, %v685_v20, %v5838_v63  ;;  %5864 = vmatpush.msk.msra.mxu0 %vm7076_vm15, %v10042_v8  ;;  %vm10048_vm15 = vnez %v10006_v2  ;;  %vm10058_vm9 = vcmask 130112   ;;  %v10075_v20 = vld [vmem:[#allocation14_spill] sm:$0xff]  ;;  %v10087_v63 = vld [vmem:[#allocation20_spill] sm:$0xff] }
 0x3d8   :  { %5849 = vmatmul.msk.f32.vlgmr.msrb.gmra.mxu2 %vm10044_vm10, %v698_v37  ;;  %vm10059_vm10 = vmmov %vm10058_vm9 }
 0x3d9   :  { %5865 = vmatpush.msk.msra.mxu0 %vm7092_vm4, %v10042_v8  ;;  %5877 = vmatpush.msk.msrb.mxu2 %vm6846_vm1, %v10042_v8  ;;  %vm10049_vm4 = vnez %v10008_v11 }
 0x3db   :  { %5866 = vmatpush.msk.msra.mxu0 %vm7106_vm6, %v10042_v8  ;;  %vm10050_vm6 = vnez %v10010_v25 }
 0x3dd   :  { %5867 = vmatpush.msk.msra.mxu0 %vm10045_vm11, %v10042_v8  ;;  %vm10060_vm11 = vmmov %vm10057_vm8 }
 0x3df   :  { %5868 = vmatpush.msk.msra.mxu0 %vm10046_vm13, %v10042_v8  ;;  %vm10061_vm13 = vmmov %vm10057_vm8 }
 0x3e1   :  { %5869 = vmatpush.msk.msra.mxu0 %vm10047_vm14, %v10042_v8 }
 0x3e3   :  { %5870 = vmatpush.msk.msra.mxu0 %vm10048_vm15, %v10042_v8  ;;  %vm10062_vm15 = vmmov %vm10057_vm8 }
 0x3e5   :  { %5871 = vmatpush.msk.msra.mxu0 %vm10049_vm4, %v10042_v8  ;;  %vm10063_vm4 = vmmov %vm10057_vm8 }
 0x3e7   :  { %5872 = vmatpush.msk.msra.mxu0 %vm10050_vm6, %v10042_v8 }
 0x3e9   :  { %5873 = vmatpush.msk.msra.mxu0 %vm10051_vm0, %v10042_v8  ;;  %vm10064_vm0 = vmmov %vm10063_vm4 }
 0x3eb   :  { %5874 = vmatpush.msk.msra.mxu0 %vm10052_vm12, %v10042_v8  ;;  %vm10065_vm12 = vcmask 130048  }
 0x3ed   :  { %5875 = vmatpush.msk.msra.mxu0 %vm10053_vm3, %v10042_v8  ;;  %vm10066_vm3 = vmmov %vm10065_vm12 }
 0x3ef   :  { %5876 = vmatpush.msk.msra.mxu0 %vm10054_vm2, %v10042_v8  ;;  %vm10067_vm2 = vmmov %vm10066_vm3 }
 0x44d   :  { %v732_v29 = vpop.f32.mrf.mxu0 }
 0x44e   :  { %5850 = vmatmul.msk.f32.vlgmr.msra.gmra.mxu3 %vm10055_vm5, %v732_v29  ;;  %vm10068_vm5 = vmmov %vm10067_vm2 }
 0x45b   :  { %v735_v34 = vpop.f32.mrf.mxu2 }
 0x45c   :  { %5851 = vmatmul.msk.f32.gmra.mxu3 %vm10056_vm7, %v735_v34  ;;  %vm10070_vm7 = vmmov %vm10067_vm2 }
 0x45d   :  { %1000 = vmatpush.msra.mxu3 %v735_v34  ;;  %v10090_v34 = vld [vmem:[#allocation24_spill] sm:$0xff] }
 0x45f   :  { %1001 = vmatpush.msra.mxu3 %v732_v29 }
 0x4d1   :  { %v761_v39 = vpop.f32.mrf.mxu3 }
 0x4d2   :  { %769 = vrot.lane.b32.xlu1 %v761_v39, %s6752_s2  ;;  %5856 = vmatmul.msk.f32.vlgmr.msra.gmra.mxu2 %vm10057_vm8, %v761_v39  ;;  %v844_v49 = vsel %vm10058_vm9, %v761_v39, -inf  ;;  %vm10072_vm8 = vmmov %vm10067_vm2 }
 0x4d3   :  { %vm10074_vm9 = vmmov %vm10067_vm2 }
 0x4df   :  { %v764_v47 = vpop.f32.mrf.mxu3 }
 0x4e0   :  { %v845_v50 = vsel %vm10059_vm10, %v764_v47, -inf  ;;  %771 = vrot.lane.b32.xlu2 %v764_v47, %s6752_s2  ;;  %5857 = vmatmul.msk.f32.gmra.mxu2 %vm10060_vm11, %v764_v47  ;;  %vm10076_vm10 = vmmov %vm10067_vm2 }
 0x4e1   :  { %v846_v52 = vmax.f32 %v844_v49, %v845_v50  ;;  %vm10078_vm11 = vmmov %vm10067_vm2  ;;  %v10091_v50 = vld [vmem:[#allocation21_spill] sm:$0xff] }
 0x4e3   :  { %v847_v53 = vrot.slane %v846_v52, 4 }
 0x4e5   :  { %v848_v55 = vmax.f32 %v846_v52, %v847_v53 }
 0x4e7   :  { %v849_v56 = vrot.slane %v848_v55, 2 }
 0x4e9   :  { %v850_v60 = vmax.f32 %v848_v55, %v849_v56 }
 0x4eb   :  { %v851_v2 = vrot.slane %v850_v60, 1 }
 0x4ed   :  { %v852_v11 = vmax.f32 %v850_v60, %v851_v2 }
 0x4ef   :  { %854 = vrot.lane.b32.xlu2 %v852_v11, %s6752_s2  ;;  %v10093_v11 = vld [vmem:[#allocation22_spill] sm:$0xff] }
 0x53a   :  { %v772_v18 = vpop.permute.xlu2 %771 }
 0x544   :  { %v770_v25 = vpop.permute.xlu1 %769 }
 0x545   :  { %5853 = vmatmul.msk.f32.vlgmr.msrb.gmra.mxu0 %vm10061_vm13, %v770_v25  ;;  %vm10080_vm13 = vmmov %vm10067_vm2 }
 0x549   :  { %v855_v1 = vpop.permute.xlu2 %854 }
 0x54a   :  { %v857_v46 = vadd.f32 %v855_v1, %v761_v39  ;;  %v858_v61 = vadd.f32 %v855_v1, %v764_v47 }
 0x54c   :  { %v861_v4 = vmul.f32 0.2, %v857_v46  ;;  %vm859_vm14 = vcmp.gt.f32.partialorder %v857_v46, 0.0  ;;  %v862_v5 = vmul.f32 0.2, %v858_v61  ;;  %vm860_vm6 = vcmp.gt.f32.partialorder %v858_v61, 0.0 }
 0x54d   :  { %5854 = vmatmul.msk.f32.gmra.mxu0 %vm10062_vm15, %v772_v18  ;;  %vm10084_vm15 = vmmov %vm10067_vm2 }
 0x54e   :  { %v863_v23 = vsel %vm859_vm14, %v857_v46, %v861_v4  ;;  %v864_v33 = vsel %vm860_vm6, %v858_v61, %v862_v5  ;;  %vm10082_vm14 = vmmov %vm10067_vm2 }
 0x54f   :  { %5859 = vmatmul.msk.f32.vlgmr.msrb.gmra.mxu3 %vm10063_vm4, %v863_v23  ;;  %vm10086_vm4 = vmmov %vm10067_vm2 }
 0x550   :  { %vm10088_vm6 = vmmov %vm10067_vm2 }
 0x555   :  { %v830_v53 = vpop.f32.mrf.mxu2 }
 0x557   :  { %5860 = vmatmul.msk.f32.gmra.mxu3 %vm10064_vm0, %v864_v33  ;;  %vm10092_vm0 = vmmov %vm10067_vm2 }
 0x55f   :  { %5880 = vmatmul.msk.f32.vlgmr.msra.gmra.mxu3 %vm10065_vm12, %v6872_v31  ;;  %vm10094_vm12 = vmmov %vm10092_vm0 }
 0x563   :  { %v833_v25 = vpop.f32.mrf.mxu2 }
 0x567   :  { %5881 = vmatmul.msk.f32.gmra.mxu3 %vm10066_vm3, %v6882_v35 }
 0x56f   :  { %5882 = vmatmul.msk.f32.gmra.mxu3 %vm10067_vm2, %v6897_v41 }
 0x577   :  { %5883 = vmatmul.msk.f32.gmra.mxu3 %vm10068_vm5, %v6907_v43 }
 0x57f   :  { %5884 = vmatmul.msk.f32.gmra.mxu3 %vm10070_vm7, %v10069_v12 }
 0x587   :  { %5885 = vmatmul.msk.f32.gmra.mxu3 %vm10072_vm8, %v10071_v17 }
 0x58f   :  { %5886 = vmatmul.msk.f32.gmra.mxu3 %vm10074_vm9, %v10073_v9 }
 0x597   :  { %5887 = vmatmul.msk.f32.gmra.mxu3 %vm10076_vm10, %v10075_v20 }
 0x59f   :  { %5888 = vmatmul.msk.f32.gmra.mxu3 %vm10078_vm11, %v10077_v57 }
 0x5a7   :  { %5889 = vmatmul.msk.f32.gmra.mxu3 %vm10080_vm13, %v10079_v51  ;;  %vm10099_vm13 = vcmask 64512  }
 0x5af   :  { %5890 = vmatmul.msk.f32.gmra.mxu3 %vm10082_vm14, %v10081_v6 }
 0x5b7   :  { %5891 = vmatmul.msk.f32.gmra.mxu3 %vm10084_vm15, %v10083_v58 }
 0x5bf   :  { %5892 = vmatmul.msk.f32.gmra.mxu3 %vm10086_vm4, %v10085_v3 }
 0x5c2   :  { %v794_v44 = vpop.f32.mrf.mxu0 }
 0x5c3   :  { %v800_v29 = vmul.f32 %v10089_v26, %v794_v44  ;;  %v10095_v44 = vld [vmem:[#allocation25_spill] sm:$0xff] }
 0x5c4   :  { %vm10096_vm5 = vcmp.gt.f32.partialorder %v10095_v44, 0.0 }
 0x5c7   :  { %5893 = vmatmul.msk.f32.gmra.mxu3 %vm10088_vm6, %v10087_v63 }
 0x5ca   :  { %v797_v37 = vpop.f32.mrf.mxu0 }
 0x5cb   :  { %v801_v39 = vmul.f32 %v10090_v34, %v797_v37 }
 0x5cd   :  { %v802_v47 = vadd.f32 %v801_v39, %v800_v29  ;;  %v10097_v39 = vld [vmem:[#allocation26_spill] sm:$0xff] }
 0x5ce   :  { %vm10098_vm7 = vcmp.gt.f32.partialorder %v10097_v39, 0.0 }
 0x5cf   :  { %v803_v49 = vrot.slane %v802_v47, 4  ;;  %5894 = vmatmul.msk.f32.gmra.mxu3 %vm10092_vm0, %v10091_v50  ;;  %vm10100_vm0 = vmmov %vm10099_vm13 }
 0x5d1   :  { %v804_v52 = vadd.f32 %v803_v49, %v802_v47 }
 0x5d2   :  { %v888_v55 = vpop.f32.mrf.mxu3 }
 0x5d3   :  { %v805_v56 = vrot.slane %v804_v52, 2 }
 0x5d5   :  { %v806_v60 = vadd.f32 %v805_v56, %v804_v52 }
 0x5d7   :  { %v807_v2 = vrot.slane %v806_v60, 1  ;;  %5895 = vmatmul.msk.f32.gmra.mxu3 %vm10094_vm12, %v10093_v11 }
 0x5d9   :  { %v808_v18 = vadd.f32 %v807_v2, %v806_v60 }
 0x5da   :  { %v891_v1 = vpop.f32.mrf.mxu3 }
 0x5db   :  { %v831_v46 = vadd.f32 %v830_v53, %v808_v18  ;;  %v834_v4 = vadd.f32 %v833_v25, %v808_v18 }
 0x5dd   :  { %vm836_vm3 = vcmp.gt.f32.partialorder %v831_v46, 0.0  ;;  %v838_v61 = vmul.f32 0.2, %v831_v46  ;;  %vm837_vm2 = vcmp.gt.f32.partialorder %v834_v4, 0.0  ;;  %v839_v23 = vmul.f32 0.2, %v834_v4 }
 0x5df   :  { %v840_v5 = vsel %vm836_vm3, %v831_v46, %v838_v61  ;;  %v841_v33 = vsel %vm837_vm2, %v834_v4, %v839_v23  ;;  %vm10101_vm3 = vcmask 261120  }
 0x5e0   :  { %v842_v37 = vsel %vm10096_vm5, %v840_v5, -1e+09  ;;  %v843_v47 = vsel %vm10098_vm7, %v841_v33, -1e+09  ;;  %vm10102_vm5 = vmmov %vm10101_vm3 }
 0x5e1   :  { %v894_v29 = vsub.f32 %v842_v37, %v888_v55  ;;  %v895_v56 = vsub.f32 %v843_v47, %v891_v1  ;;  %vm10103_vm7 = vmmov %vm10101_vm3 }
 0x5e2   :  { %v7546_v49 = vpop.f32.mrf.mxu3 }
 0x5e3   :  { %v896_v52 = vmul.f32 1.442695, %v894_v29  ;;  %v898_v53 = vmul.f32 1.442695, %v895_v56 }
 0x5e5   :  { %6251 = vpow2.f32 %v896_v52 }
 0x5e6   :  { %6253 = vpow2.f32 %v898_v53 }
 0x5ea   :  { %v1006_v60 = vpop.f32.mrf.mxu3 }
 0x5eb   :  { %v7548_v2 = vpop.eup %6251 }
 0x5ec   :  { %916 = vmatmul.f32.vlgmr.msra.gmra.mxu0 %v7548_v2  ;;  %v7551_v25 = vpop.eup %6253 }
 0x5f2   :  { %v1009_v18 = vpop.f32.mrf.mxu3 }
 0x5f4   :  { %919 = vmatmul.f32.gmra.mxu0 %v7551_v25 }
 0x5fa   :  { %v1012_v55 = vpop.f32.mrf.mxu3 }
 0x602   :  { %v1015_v46 = vpop.f32.mrf.mxu3 }
 0x60a   :  { %v1018_v4 = vpop.f32.mrf.mxu3 }
 0x612   :  { %v1021_v61 = vpop.f32.mrf.mxu3 }
 0x61a   :  { %v1024_v23 = vpop.f32.mrf.mxu3 }
 0x622   :  { %v1027_v5 = vpop.f32.mrf.mxu3 }
 0x623   :  { %v1059_v28 = vmul.f32 %v7346_v0, %v1027_v5 }
 0x62a   :  { %v1030_v33 = vpop.f32.mrf.mxu3 }
 0x62b   :  { %v1060_v38 = vmul.f32 %v7340_v19, %v1030_v33 }
 0x632   :  { %v1033_v1 = vpop.f32.mrf.mxu3 }
 0x633   :  { %v1061_v36 = vmul.f32 %v7334_v10, %v1033_v1 }
 0x63a   :  { %v1036_v37 = vpop.f32.mrf.mxu3 }
 0x63b   :  { %v1062_v32 = vmul.f32 %v7328_v54, %v1036_v37 }
 0x642   :  { %v1039_v29 = vpop.f32.mrf.mxu3 }
 0x643   :  { %v1063_v14 = vmul.f32 %v7322_v30, %v1039_v29  ;;  %v1057_v29 = vmul.f32 %v7358_v21, %v1021_v61 }
 0x64a   :  { %v1042_v47 = vpop.f32.mrf.mxu3 }
 0x64b   :  { %v1064_v45 = vmul.f32 %v7315_v13, %v1042_v47 }
 0x652   :  { %v1045_v52 = vpop.f32.mrf.mxu3 }
 0x653   :  { %v1065_v53 = vmul.f32 %v7307_v62, %v1045_v52  ;;  %v1058_v52 = vmul.f32 %v7352_v27, %v1024_v23  ;;  %v1053_v23 = vmul.f32 %v7384_v40, %v1009_v18 }
 0x65a   :  { %v1048_v56 = vpop.f32.mrf.mxu3 }
 0x65b   :  { %v1066_v42 = vmul.f32 %v7310_v59, %v1048_v56 }
 0x65d   :  { %1068 = vmatpush.msra.mxu2 %v1066_v42 }
 0x65f   :  { %1069 = vmatpush.msra.mxu2 %v1065_v53 }
 0x661   :  { %1070 = vmatpush.msra.mxu2 %v1064_v45  ;;  %v1056_v45 = vmul.f32 %v7364_v24, %v1018_v4  ;;  %v1052_v4 = vmul.f32 %v7391_v48, %v1006_v60 }
 0x663   :  { %1071 = vmatpush.msra.mxu2 %v1063_v14  ;;  %v1055_v14 = vmul.f32 %v7370_v7, %v1015_v46 }
 0x665   :  { %1072 = vmatpush.msra.mxu2 %v1062_v32  ;;  %v1054_v32 = vmul.f32 %v7377_v15, %v1012_v55  ;;  %v1051_v55 = vmul.f32 %v7396_v22, %v7546_v49 }
 0x667   :  { %1073 = vmatpush.msra.mxu2 %v1061_v36 }
 0x669   :  { %v917_v56 = vpop.f32.mrf.mxu0  ;;  %1074 = vmatpush.msra.mxu2 %v1060_v38 }
 0x66a   :  { %v923_v42 = vmax.f32 %v917_v56, 1e-30 }
 0x66b   :  { %1075 = vmatpush.msra.mxu2 %v1059_v28 }
 0x66c   :  { %6255 = vrcp.f32 %v923_v42  ;;  %v936_v28 = vand.u32 2147483648, %v923_v42  ;;  %v934_v46 = vand.u32 2147483647, %v923_v42  ;;  %vm930_vm9 = vweird.f32 %v923_v42 }
 0x66d   :  { %1076 = vmatpush.msra.mxu2 %v1058_v52 }
 0x66e   :  { %v937_v18 = vor.u32 1.1754944e-38, %v936_v28  ;;  %vm935_vm11 = vcmp.eq.f32.partialorder %v934_v46, 8.507059e+37  ;;  %v5900_v28 = vld [vmem:[%s9869_s5 + $0xa0] sm:$0xff]  ;;  %v5903_v46 = vld [vmem:[%s9869_s5 + $0xb8] sm:$0xff] }
 0x66f   :  { %1077 = vmatpush.msra.mxu2 %v1057_v29 }
 0x671   :  { %v920_v33 = vpop.f32.mrf.mxu0  ;;  %1078 = vmatpush.msra.mxu2 %v1056_v45 }
 0x672   :  { %v6256_v36 = vpop.eup %6255  ;;  %v924_v5 = vmax.f32 %v920_v33, 1e-30 }
 0x673   :  { %v926_v38 = vmul.f32 %v6256_v36, %v923_v42  ;;  %1079 = vmatpush.msra.mxu2 %v1055_v14  ;;  %vm931_vm8 = vweird.f32 %v6256_v36 }
 0x674   :  { %6257 = vrcp.f32 %v924_v5  ;;  %vm932_vm10 = vmor %vm930_vm9, %vm931_vm8  ;;  %v951_v29 = vand.u32 2147483648, %v924_v5  ;;  %v949_v45 = vand.u32 2147483647, %v924_v5  ;;  %vm945_vm15 = vweird.f32 %v924_v5 }
 0x675   :  { %v927_v61 = vsub.f32 1.0, %v926_v38  ;;  %1080 = vmatpush.msra.mxu2 %v1054_v32  ;;  %vm10104_vm8 = vmmov %vm10101_vm3 }
 0x676   :  { %v952_v14 = vor.u32 1.1754944e-38, %v951_v29  ;;  %vm950_vm6 = vcmp.eq.f32.partialorder %v949_v45, 8.507059e+37  ;;  %vm10105_vm9 = vmmov %vm10100_vm0 }
 0x677   :  { %1081 = vmatpush.msra.mxu2 %v1053_v23  ;;  %v928_v1 = vmul.f32 %v6256_v36, %v927_v61 }
 0x679   :  { %1082 = vmatpush.msra.mxu2 %v1052_v4  ;;  %v929_v37 = vadd.f32 %v6256_v36, %v928_v1  ;;  %v5905_v4 = vld [vmem:[%s9869_s5 + $0xc8] sm:$0xff]  ;;  %v5904_v1 = vld [vmem:[%s9869_s5 + $0xc0] sm:$0xff] }
 0x67a   :  { %v6258_v47 = vpop.eup %6257 }
 0x67b   :  { %1083 = vmatpush.msra.mxu2 %v1051_v55  ;;  %v933_v53 = vsel %vm932_vm10, %v6256_v36, %v929_v37  ;;  %v941_v52 = vmul.f32 %v6258_v47, %v924_v5  ;;  %vm946_vm14 = vweird.f32 %v6258_v47  ;;  %v5901_v5 = vld [vmem:[%s9869_s5 + $0xa8] sm:$0xff]  ;;  %vm10106_vm10 = vcmask 130112  }
 0x67c   :  { %v938_v56 = vsel %vm935_vm11, %v937_v18, %v933_v53  ;;  %vm947_vm4 = vmor %vm945_vm15, %vm946_vm14  ;;  %1131 = vmatpush.msrb.mxu0 %v5901_v5  ;;  %v6237_v55 = vld [vmem:[%s9869_s5 + $0x88] ss:$0 sm:$0xff] }
 0x67d   :  { %5878 = vmatmul.msk.f32.vlgmr.msrb.gmra.mxu2 %vm10099_vm13, %v938_v56  ;;  %v942_v60 = vsub.f32 1.0, %v941_v52  ;;  %vm10107_vm11 = vmmov %vm10106_vm10 }
 0x67e   :  { %5911 = vmatpush.msk.msrb.mxu2 %vm6846_vm1, %v10042_v8  ;;  %1132 = vmatpush.msrb.mxu0 %v5900_v28  ;;  %vm10108_vm13 = vmmov %vm10100_vm0 }
 0x67f   :  { %v943_v49 = vmul.f32 %v6258_v47, %v942_v60  ;;  %vm10110_vm14 = vmmov %vm10100_vm0 }
 0x681   :  { %v944_v42 = vadd.f32 %v6258_v47, %v943_v49 }
 0x683   :  { %v948_v32 = vsel %vm947_vm4, %v6258_v47, %v944_v42  ;;  %vm10111_vm4 = vmmov %vm10100_vm0 }
 0x684   :  { %v953_v33 = vsel %vm950_vm6, %v952_v14, %v948_v32 }
 0x685   :  { %5879 = vmatmul.msk.f32.gmra.mxu2 %vm10100_vm0, %v953_v33 }
 0x700   :  { %v978_v36 = vpop.f32.mrf.mxu2 }
 0x701   :  { %v984_v23 = vmul.f32 %v7548_v2, %v978_v36  ;;  %v5899_v2 = vld [vmem:[%s9869_s5 + $0x98] sm:$0xff]  ;;  %v5902_v36 = vld [vmem:[%s9869_s5 + $0xb0] sm:$0xff] }
 0x702   :  { %1133 = vmatpush.msrb.mxu0 %v5899_v2 }
 0x703   :  { %1084 = vmatmul.f32.vlgmr.msra.gmra.mxu2 %v984_v23 }
 0x704   :  { %5917 = vmatpush.msk.msra.mxu2 %vm6846_vm1, %v10042_v8 }
 0x708   :  { %v981_v38 = vpop.f32.mrf.mxu2 }
 0x709   :  { %v985_v61 = vmul.f32 %v7551_v25, %v981_v38  ;;  %v5898_v25 = vld [vmem:[%s9869_s5 + $0x90] sm:$0xff] }
 0x70a   :  { %1134 = vmatpush.msrb.mxu0 %v5898_v25 }
 0x70b   :  { %1087 = vmatmul.f32.gmra.mxu2 %v985_v61 }
 0x70c   :  { %1160 = vmatpush.msra.mxu0 %v5905_v4 }
 0x70e   :  { %1161 = vmatpush.msra.mxu0 %v5904_v1 }
 0x710   :  { %1162 = vmatpush.msra.mxu0 %v5903_v46 }
 0x712   :  { %1163 = vmatpush.msra.mxu0 %v5902_v36 }
 0x786   :  { %v1085_v37 = vpop.f32.mrf.mxu2 }
 0x787   :  { %v1086_v47 = vadd.f32 %v6237_v55, %v1085_v37 }
 0x789   :  { %v1093_v18 = vmin.f32 %v1086_v47, 0.0  ;;  %vm1091_vm12 = vcmp.gt.f32.partialorder %v1086_v47, 0.0 }
 0x78b   :  { %v1095_v53 = vmul.f32 1.442695, %v1093_v18 }
 0x78d   :  { %6259 = vpow2.f32 %v1095_v53 }
 0x78e   :  { %v1088_v52 = vpop.f32.mrf.mxu2 }
 0x78f   :  { %v1089_v56 = vadd.f32 %v6237_v55, %v1088_v52 }
 0x791   :  { %v1094_v60 = vmin.f32 %v1089_v56, 0.0  ;;  %vm1092_vm2 = vcmp.gt.f32.partialorder %v1089_v56, 0.0 }
 0x793   :  { %v6260_v29 = vpop.eup %6259  ;;  %v1097_v49 = vmul.f32 1.442695, %v1094_v60 }
 0x794   :  { %v5896_v45 = vadd.f32 -1.0, %v6260_v29 }
 0x795   :  { %6261 = vpow2.f32 %v1097_v49 }
 0x796   :  { %v1101_v42 = vsel %vm1091_vm12, %v1086_v47, %v5896_v45  ;;  %vm10112_vm12 = vcmask 130048  }
 0x797   :  { %5907 = vmatmul.msk.f32.vlgmr.msrb.gmra.mxu0 %vm10101_vm3, %v1101_v42  ;;  %vm10113_vm3 = vmmov %vm10112_vm12 }
 0x798   :  { %5914 = vmatpush.msk.msrb.mxu0 %vm6846_vm1, %v10042_v8 }
 0x79b   :  { %v6262_v14 = vpop.eup %6261 }
 0x79c   :  { %v5897_v32 = vadd.f32 -1.0, %v6262_v14 }
 0x79e   :  { %v1102_v33 = vsel %vm1092_vm2, %v1089_v56, %v5897_v32  ;;  %vm10114_vm2 = vmmov %vm10113_vm3 }
 0x79f   :  { %5908 = vmatmul.msk.f32.gmra.mxu0 %vm10102_vm5, %v1102_v33  ;;  %vm10115_vm5 = vmmov %vm10114_vm2 }
 0x814   :  { %v1136_v23 = vpop.f32.mrf.mxu0 }
 0x815   :  { %5909 = vmatmul.msk.f32.vlgmr.msra.gmra.mxu0 %vm10103_vm7, %v1136_v23  ;;  %vm10116_vm7 = vmmov %vm10114_vm2 }
 0x816   :  { %5936 = vmatpush.msk.msra.mxu0 %vm6846_vm1, %v10042_v8  ;;  %vm10109_vm1 = vmmov %vm10100_vm0 }
 0x81c   :  { %v1139_v38 = vpop.f32.mrf.mxu0 }
 0x81d   :  { %5910 = vmatmul.msk.f32.gmra.mxu0 %vm10104_vm8, %v1139_v38  ;;  %vm10117_vm8 = vmmov %vm10114_vm2 }
 0x892   :  { %v1165_v61 = vpop.f32.mrf.mxu0 }
 0x893   :  { %1173 = vrot.lane.b32.xlu0 %v1165_v61, %s6752_s2  ;;  %5915 = vmatmul.msk.f32.vlgmr.msrb.gmra.mxu0 %vm10105_vm9, %v1165_v61  ;;  %v1248_v28 = vsel %vm10106_vm10, %v1165_v61, -inf  ;;  %vm10118_vm9 = vmmov %vm10114_vm2 }
 0x894   :  { %vm10119_vm10 = vmmov %vm10114_vm2 }
 0x89a   :  { %v1168_v5 = vpop.f32.mrf.mxu0 }
 0x89b   :  { %v1249_v2 = vsel %vm10107_vm11, %v1168_v5, -inf  ;;  %1175 = vrot.lane.b32.xlu1 %v1168_v5, %s6752_s2  ;;  %5916 = vmatmul.msk.f32.gmra.mxu0 %vm10108_vm13, %v1168_v5  ;;  %vm10120_vm11 = vmmov %vm10114_vm2 }
 0x89c   :  { %v1250_v25 = vmax.f32 %v1248_v28, %v1249_v2  ;;  %vm10121_vm13 = vmmov %vm10114_vm2 }
 0x89e   :  { %v1251_v16 = vrot.slane %v1250_v25, 4 }
 0x8a0   :  { %v1252_v4 = vmax.f32 %v1250_v25, %v1251_v16 }
 0x8a2   :  { %v1253_v1 = vrot.slane %v1252_v4, 2 }
 0x8a4   :  { %v1254_v46 = vmax.f32 %v1252_v4, %v1253_v1 }
 0x8a6   :  { %v1255_v55 = vrot.slane %v1254_v46, 1 }
 0x8a8   :  { %v1256_v37 = vmax.f32 %v1254_v46, %v1255_v55 }
 0x8aa   :  { %1258 = vrot.lane.b32.xlu2 %v1256_v37, %s6752_s2 }
 0x904   :  { %v1259_v18 = vpop.permute.xlu2 %1258 }
 0x905   :  { %v1174_v47 = vpop.permute.xlu0 %1173  ;;  %v1261_v53 = vadd.f32 %v1259_v18, %v1165_v61  ;;  %v1262_v60 = vadd.f32 %v1259_v18, %v1168_v5 }
 0x906   :  { %5912 = vmatmul.msk.f32.vlgmr.msrb.gmra.mxu2 %vm10109_vm1, %v1174_v47  ;;  %vm10122_vm1 = vmmov %vm10114_vm2 }
 0x907   :  { %1404 = vmatpush.msrb.mxu2 %v1139_v38  ;;  %v1265_v56 = vmul.f32 0.2, %v1261_v53  ;;  %vm1263_vm15 = vcmp.gt.f32.partialorder %v1261_v53, 0.0  ;;  %v1266_v49 = vmul.f32 0.2, %v1262_v60  ;;  %vm1264_vm6 = vcmp.gt.f32.partialorder %v1262_v60, 0.0 }
 0x909   :  { %1405 = vmatpush.msrb.mxu2 %v1136_v23  ;;  %v1267_v29 = vsel %vm1263_vm15, %v1261_v53, %v1265_v56  ;;  %v1268_v45 = vsel %vm1264_vm6, %v1262_v60, %v1266_v49  ;;  %vm10124_vm15 = vmmov %vm10122_vm1 }
 0x90a   :  { %vm10126_vm6 = vmmov %vm10122_vm1 }
 0x90d   :  { %v1176_v52 = vpop.permute.xlu1 %1175 }
 0x90e   :  { %5913 = vmatmul.msk.f32.gmra.mxu2 %vm10110_vm14, %v1176_v52  ;;  %vm10123_vm14 = vmmov %vm10122_vm1 }
 0x916   :  { %5918 = vmatmul.msk.f32.vlgmr.msra.gmra.mxu2 %vm10111_vm4, %v1267_v29  ;;  %vm10125_vm4 = vmmov %vm10122_vm1 }
 0x91e   :  { %5919 = vmatmul.msk.f32.gmra.mxu2 %vm10100_vm0, %v1268_v45  ;;  %vm10127_vm0 = vmmov %vm10122_vm1 }
 0x926   :  { %5939 = vmatmul.msk.f32.vlgmr.msrb.gmra.mxu2 %vm10112_vm12, %v6872_v31 }
 0x92e   :  { %5940 = vmatmul.msk.f32.gmra.mxu2 %vm10113_vm3, %v6882_v35 }
 0x936   :  { %5941 = vmatmul.msk.f32.gmra.mxu2 %vm10114_vm2, %v6897_v41  ;;  %vm10128_vm2 = vcmp.gt.f32.partialorder %v10095_v44, 0.0 }
 0x93e   :  { %5942 = vmatmul.msk.f32.gmra.mxu2 %vm10115_vm5, %v6907_v43  ;;  %vm10129_vm5 = vcmp.gt.f32.partialorder %v10097_v39, 0.0 }
 0x946   :  { %5943 = vmatmul.msk.f32.gmra.mxu2 %vm10116_vm7, %v10069_v12 }
 0x94e   :  { %5944 = vmatmul.msk.f32.gmra.mxu2 %vm10117_vm8, %v10071_v17 }
 0x956   :  { %5945 = vmatmul.msk.f32.gmra.mxu2 %vm10118_vm9, %v10073_v9  ;;  %v1234_v9 = vpop.f32.mrf.mxu0 }
 0x95e   :  { %5946 = vmatmul.msk.f32.gmra.mxu2 %vm10119_vm10, %v10075_v20 }
 0x966   :  { %5947 = vmatmul.msk.f32.gmra.mxu2 %vm10120_vm11, %v10077_v57  ;;  %vm10130_vm11 = vcmask 64512  }
 0x96e   :  { %5948 = vmatmul.msk.f32.gmra.mxu2 %vm10121_vm13, %v10079_v51 }
 0x976   :  { %5949 = vmatmul.msk.f32.gmra.mxu2 %vm10122_vm1, %v10081_v6 }
 0x97e   :  { %5950 = vmatmul.msk.f32.gmra.mxu2 %vm10123_vm14, %v10083_v58 }
 0x986   :  { %5951 = vmatmul.msk.f32.gmra.mxu2 %vm10124_vm15, %v10085_v3 }
 0x989   :  { %v1198_v31 = vpop.f32.mrf.mxu2 }
 0x98a   :  { %v1204_v41 = vmul.f32 %v10089_v26, %v1198_v31 }
 0x98e   :  { %5952 = vmatmul.msk.f32.gmra.mxu2 %vm10125_vm4, %v10087_v63  ;;  %v1237_v63 = vpop.f32.mrf.mxu0  ;;  %vm10131_vm4 = vmmov %vm10130_vm11 }
 0x991   :  { %v1201_v35 = vpop.f32.mrf.mxu2 }
 0x992   :  { %v1205_v43 = vmul.f32 %v10090_v34, %v1201_v35 }
 0x994   :  { %v1206_v12 = vadd.f32 %v1205_v43, %v1204_v41 }
 0x996   :  { %v1207_v17 = vrot.slane %v1206_v12, 4  ;;  %5953 = vmatmul.msk.f32.gmra.mxu2 %vm10126_vm6, %v10091_v50  ;;  %vm1591_vm6 = vcmask 1041408  }
 0x998   :  { %v1208_v20 = vadd.f32 %v1207_v17, %v1206_v12 }
 0x999   :  { %v1292_v57 = vpop.f32.mrf.mxu2 }
 0x99a   :  { %v1209_v51 = vrot.slane %v1208_v20, 2 }
 0x99c   :  { %v1210_v6 = vadd.f32 %v1209_v51, %v1208_v20 }
 0x99e   :  { %v1211_v58 = vrot.slane %v1210_v6, 1  ;;  %5954 = vmatmul.msk.f32.gmra.mxu2 %vm10127_vm0, %v10093_v11 }
 0x9a0   :  { %v1212_v3 = vadd.f32 %v1211_v58, %v1210_v6 }
 0x9a1   :  { %v1295_v42 = vpop.f32.mrf.mxu2 }
 0x9a2   :  { %v1235_v26 = vadd.f32 %v1234_v9, %v1212_v3  ;;  %v1238_v14 = vadd.f32 %v1237_v63, %v1212_v3 }
 0x9a4   :  { %vm1240_vm12 = vcmp.gt.f32.partialorder %v1235_v26, 0.0  ;;  %v1242_v34 = vmul.f32 0.2, %v1235_v26  ;;  %vm1241_vm3 = vcmp.gt.f32.partialorder %v1238_v14, 0.0  ;;  %v1243_v32 = vmul.f32 0.2, %v1238_v14 }
 0x9a6   :  { %v1244_v33 = vsel %vm1240_vm12, %v1235_v26, %v1242_v34  ;;  %v1245_v50 = vsel %vm1241_vm3, %v1238_v14, %v1243_v32  ;;  %vm10133_vm12 = vcmask 261120  }
 0x9a7   :  { %v1246_v36 = vsel %vm10128_vm2, %v1244_v33, -1e+09  ;;  %v1247_v38 = vsel %vm10129_vm5, %v1245_v50, -1e+09  ;;  %vm10135_vm5 = vmmov %vm10133_vm12 }
 0x9a8   :  { %v1298_v23 = vsub.f32 %v1246_v36, %v1292_v57  ;;  %v1299_v5 = vsub.f32 %v1247_v38, %v1295_v42 }
 0x9a9   :  { %v7667_v61 = vpop.f32.mrf.mxu2 }
 0x9aa   :  { %v1300_v11 = vmul.f32 1.442695, %v1298_v23  ;;  %v1302_v28 = vmul.f32 1.442695, %v1299_v5  ;;  %v10132_v5 = vmov 0.0  }
 0x9ab   :  { %5719 = vst [vmem:[%s9872_s8 + $0x8] sm:$0xff] %v10132_v5 }
 0x9ac   :  { %6263 = vpow2.f32 %v1300_v11  ;;  %5718 = vst [vmem:[%s9872_s8] sm:$0xff] %v10132_v5 }
 0x9ad   :  { %6265 = vpow2.f32 %v1302_v28  ;;  %v7707_v28 = vld [vmem:[%s9873_s6 + $0x60] sm:$0x3] }
 0x9b1   :  { %v1410_v2 = vpop.f32.mrf.mxu2 }
 0x9b2   :  { %v7669_v25 = vpop.eup %6263 }
 0x9b3   :  { %1320 = vmatmul.f32.vlgmr.msra.gmra.mxu1 %v7669_v25  ;;  %v7672_v4 = vpop.eup %6265 }
 0x9b9   :  { %v1413_v16 = vpop.f32.mrf.mxu2 }
 0x9bb   :  { %1323 = vmatmul.f32.gmra.mxu1 %v7672_v4 }
 0x9c1   :  { %v1416_v44 = vpop.f32.mrf.mxu2 }
 0x9c9   :  { %v1419_v39 = vpop.f32.mrf.mxu2 }
 0x9d1   :  { %v1422_v1 = vpop.f32.mrf.mxu2 }
 0x9d9   :  { %v1425_v46 = vpop.f32.mrf.mxu2 }
 0x9e1   :  { %v1428_v55 = vpop.f32.mrf.mxu2 }
 0x9e9   :  { %v1431_v37 = vpop.f32.mrf.mxu2 }
 0x9ea   :  { %v1463_v17 = vmul.f32 %v7346_v0, %v1431_v37 }
 0x9f1   :  { %v1434_v47 = vpop.f32.mrf.mxu2 }
 0x9f2   :  { %v1464_v12 = vmul.f32 %v7340_v19, %v1434_v47  ;;  %v1458_v19 = vmul.f32 %v7377_v15, %v1416_v44  ;;  %v1455_v15 = vmul.f32 %v7396_v22, %v7667_v61 }
 0x9f9   :  { %v1437_v18 = vpop.f32.mrf.mxu2 }
 0x9fa   :  { %v1465_v43 = vmul.f32 %v7334_v10, %v1437_v18  ;;  %v1459_v10 = vmul.f32 %v7370_v7, %v1419_v39 }
 0xa01   :  { %v1440_v53 = vpop.f32.mrf.mxu2 }
 0xa02   :  { %v1466_v41 = vmul.f32 %v7328_v54, %v1440_v53  ;;  %v1460_v54 = vmul.f32 %v7364_v24, %v1422_v1  ;;  %v1456_v24 = vmul.f32 %v7391_v48, %v1410_v2  ;;  %v7714_v2 = vld [vmem:[%s9873_s6 + $0x50] sm:$0xff]  ;;  %v7734_v1 = vld [vmem:[%s9873_s6 + $0x20] sm:$0xff] }
 0xa09   :  { %v1443_v52 = vpop.f32.mrf.mxu2 }
 0xa0a   :  { %v1467_v35 = vmul.f32 %v7322_v30, %v1443_v52  ;;  %v1461_v30 = vmul.f32 %v7358_v21, %v1425_v46 }
 0xa11   :  { %v1446_v56 = vpop.f32.mrf.mxu2 }
 0xa12   :  { %v1468_v31 = vmul.f32 %v7315_v13, %v1446_v56 }
 0xa19   :  { %v1449_v60 = vpop.f32.mrf.mxu2 }
 0xa1a   :  { %v1469_v49 = vmul.f32 %v7307_v62, %v1449_v60 }
 0xa21   :  { %v1452_v29 = vpop.f32.mrf.mxu2 }
 0xa22   :  { %v1470_v45 = vmul.f32 %v7310_v59, %v1452_v29  ;;  %v1462_v59 = vmul.f32 %v7352_v27, %v1428_v55  ;;  %v1457_v27 = vmul.f32 %v7384_v40, %v1413_v16  ;;  %v7722_v16 = vld [vmem:[%s9873_s6 + $0x40] sm:$0xff]  ;;  %v7741_v55 = vld [vmem:[%s9873_s6 + $0x10] sm:$0xff] }
 0xa24   :  { %1472 = vmatpush.msrb.mxu0 %v1470_v45 }
 0xa26   :  { %1473 = vmatpush.msrb.mxu0 %v1469_v49  ;;  %v1508_v49 = vstv %s9874_s0 }
 0xa28   :  { %1474 = vmatpush.msrb.mxu0 %v1468_v31 }
 0xa2a   :  { %1475 = vmatpush.msrb.mxu0 %v1467_v35  ;;  %v10134_v35 = vld [vmem:[#allocation4_spill] sm:$0xff] }
 0xa2b   :  { %vm1509_vm3 = vcmp.eq.s32.totalorder %v10134_v35, %v1508_v49  ;;  %v7872_v49 = vld [vmem:[%s9873_s6 + $0x128] sm:$0x3] }
 0xa2c   :  { %1476 = vmatpush.msrb.mxu0 %v1466_v41 }
 0xa2e   :  { %1477 = vmatpush.msrb.mxu0 %v1465_v43  ;;  %v5957_v43 = vsel %vm1509_vm3, 1.0, %v10132_v5 }
 0xa30   :  { %v1321_v62 = vpop.f32.mrf.mxu1  ;;  %1478 = vmatpush.msrb.mxu0 %v1464_v12  ;;  %v1535_v12 = vld [vmem:[%s9873_s6] sm:$0x3] }
 0xa31   :  { %v1327_v13 = vmax.f32 %v1321_v62, 1e-30  ;;  %v7772_v62 = vld [vmem:[%s9873_s6 + $0x122] ss:$8 sm:$0x3] }
 0xa32   :  { %1479 = vmatpush.msrb.mxu0 %v1463_v17  ;;  %v1577_v17 = vld [vmem:[%s9875_s4] sm:$0xff]  ;;  %10138 = vst [vmem:[#allocation12_spill] sm:$0xff] %v7772_v62 }
 0xa33   :  { %6267 = vrcp.f32 %v1327_v13  ;;  %v1340_v51 = vand.u32 2147483648, %v1327_v13  ;;  %v1338_v7 = vand.u32 2147483647, %v1327_v13  ;;  %vm1334_vm8 = vweird.f32 %v1327_v13 }
 0xa34   :  { %1480 = vmatpush.msrb.mxu0 %v1462_v59 }
 0xa35   :  { %v1341_v40 = vor.u32 1.1754944e-38, %v1340_v51  ;;  %vm1339_vm10 = vcmp.eq.f32.partialorder %v1338_v7, 8.507059e+37  ;;  %v7790_v51 = vld [vmem:[%s9873_s6 + $0x68] sm:$0x3] }
 0xa36   :  { %1481 = vmatpush.msrb.mxu0 %v1461_v30 }
 0xa38   :  { %v1324_v9 = vpop.f32.mrf.mxu1  ;;  %1482 = vmatpush.msrb.mxu0 %v1460_v54 }
 0xa39   :  { %v6268_v0 = vpop.eup %6267  ;;  %v1328_v20 = vmax.f32 %v1324_v9, 1e-30 }
 0xa3a   :  { %v1330_v57 = vmul.f32 %v6268_v0, %v1327_v13  ;;  %1483 = vmatpush.msrb.mxu0 %v1459_v10  ;;  %vm1335_vm7 = vweird.f32 %v6268_v0  ;;  %v9961_v13 = vperm.slane %v7772_v62, 0 }
 0xa3b   :  { %6269 = vrcp.f32 %v1328_v20  ;;  %vm1336_vm9 = vmor %vm1334_vm8, %vm1335_vm7  ;;  %v1355_v14 = vand.u32 2147483648, %v1328_v20  ;;  %v1353_v32 = vand.u32 2147483647, %v1328_v20  ;;  %vm1349_vm1 = vweird.f32 %v1328_v20 }
 0xa3c   :  { %v1331_v21 = vsub.f32 1.0, %v1330_v57  ;;  %1484 = vmatpush.msrb.mxu0 %v1458_v19  ;;  %vm10136_vm7 = vcmask 130048   ;;  %vm1584_vm8 = vcmask 15360   ;;  %v1578_v57 = vld [vmem:[%s9875_s4 + $0x8] sm:$0x3f] }
 0xa3d   :  { %v1356_v22 = vor.u32 1.1754944e-38, %v1355_v14  ;;  %vm1354_vm15 = vcmp.eq.f32.partialorder %v1353_v32, 8.507059e+37 }
 0xa3e   :  { %1485 = vmatpush.msrb.mxu0 %v1457_v27  ;;  %v1332_v6 = vmul.f32 %v6268_v0, %v1331_v21  ;;  %v1536_v21 = vld [vmem:[%s9873_s6 + $0x8] sm:$0x3] }
 0xa40   :  { %1486 = vmatpush.msrb.mxu0 %v1456_v24  ;;  %v1333_v58 = vadd.f32 %v6268_v0, %v1332_v6  ;;  %v7797_v24 = vld [vmem:[%s9873_s6 + $0x58] sm:$0xff]  ;;  %v7804_v6 = vld [vmem:[%s9873_s6 + $0x48] sm:$0xff] }
 0xa41   :  { %v6270_v3 = vpop.eup %6269 }
 0xa42   :  { %1487 = vmatpush.msrb.mxu0 %v1455_v15  ;;  %v1337_v63 = vsel %vm1336_vm9, %v6268_v0, %v1333_v58  ;;  %v1345_v42 = vmul.f32 %v6270_v3, %v1328_v20  ;;  %vm1350_vm13 = vweird.f32 %v6270_v3  ;;  %v7811_v15 = vld [vmem:[%s9873_s6 + $0x38] sm:$0xff]  ;;  %v7817_v58 = vld [vmem:[%s9873_s6 + $0x28] sm:$0xff] }
 0xa43   :  { %v1342_v26 = vsel %vm1339_vm10, %v1341_v40, %v1337_v63  ;;  %vm1351_vm14 = vmor %vm1349_vm1, %vm1350_vm13  ;;  %v7823_v40 = vld [vmem:[%s9873_s6 + $0x18] sm:$0xff] }
 0xa44   :  { %5937 = vmatmul.msk.f32.vlgmr.msra.gmra.mxu0 %vm10130_vm11, %v1342_v26  ;;  %v1346_v48 = vsub.f32 1.0, %v1345_v42 }
 0xa45   :  { %5967 = vmatpush.msk.msra.mxu0 %vm1591_vm6, %v7707_v28 }
 0xa46   :  { %v1347_v34 = vmul.f32 %v6270_v3, %v1346_v48 }
 0xa47   :  { %1665 = vmatpush.msra.mxu0 %v7714_v2 }
 0xa48   :  { %v1348_v33 = vadd.f32 %v6270_v3, %v1347_v34 }
 0xa49   :  { %1666 = vmatpush.msra.mxu0 %v7722_v16 }
 0xa4a   :  { %v1352_v50 = vsel %vm1351_vm14, %v6270_v3, %v1348_v33 }
 0xa4b   :  { %v1357_v36 = vsel %vm1354_vm15, %v1356_v22, %v1352_v50 }
 0xa4c   :  { %5938 = vmatmul.msk.f32.gmra.mxu0 %vm10131_vm4, %v1357_v36  ;;  %v7836_v36 = vld [vmem:[%s9873_s6 + $0x120] sm:$0x3] }
 0xa4d   :  { %5971 = vmatpush.msk.msrb.mxu3 %vm1591_vm6, %v7836_v36 }
 0xac1   :  { %v1382_v23 = vpop.f32.mrf.mxu0 }
 0xac2   :  { %v1388_v38 = vmul.f32 %v7669_v25, %v1382_v23  ;;  %v6238_v25 = vld [vmem:[%s9869_s5 + $0xd0] ss:$0 sm:$0xff] }
 0xac4   :  { %1488 = vmatmul.f32.vlgmr.msrb.gmra.mxu0 %v1388_v38 }
 0xac9   :  { %v1385_v61 = vpop.f32.mrf.mxu0 }
 0xaca   :  { %v1389_v11 = vmul.f32 %v7672_v4, %v1385_v61  ;;  %v7728_v4 = vld [vmem:[%s9873_s6 + $0x30] sm:$0xff] }
 0xacb   :  { %1667 = vmatpush.msra.mxu0 %v7728_v4 }
 0xacc   :  { %1491 = vmatmul.f32.gmra.mxu0 %v1389_v11 }
 0xacd   :  { %1668 = vmatpush.msra.mxu0 %v7734_v1 }
 0xacf   :  { %1669 = vmatpush.msra.mxu0 %v7741_v55 }
 0xad1   :  { %5972 = vmatpush.msk.msrb.mxu0 %vm1591_vm6, %v7872_v49 }
 0xad4   :  { %1670 = vmatmul.f32.vlgmr.msra.gmra.mxu0 %v10132_v5 }
 0xb41   :  { %v1489_v44 = vpop.f32.mrf.mxu0 }
 0xb42   :  { %v1490_v39 = vadd.f32 %v6238_v25, %v1489_v44 }
 0xb44   :  { %v1497_v46 = vmin.f32 %v1490_v39, 0.0  ;;  %vm1495_vm0 = vcmp.gt.f32.partialorder %v1490_v39, 0.0 }
 0xb46   :  { %v1499_v37 = vmul.f32 1.442695, %v1497_v46  ;;  %v9960_v46 = vperm.slane %v7772_v62, 1 }
 0xb48   :  { %6271 = vpow2.f32 %v1499_v37 }
 0xb49   :  { %v1492_v47 = vpop.f32.mrf.mxu0 }
 0xb4a   :  { %v1493_v18 = vadd.f32 %v6238_v25, %v1492_v47 }
 0xb4c   :  { %v1498_v53 = vmin.f32 %v1493_v18, 0.0  ;;  %vm1496_vm2 = vcmp.gt.f32.partialorder %v1493_v18, 0.0 }
 0xb4e   :  { %v6272_v52 = vpop.eup %6271  ;;  %v1501_v56 = vmul.f32 1.442695, %v1498_v53 }
 0xb4f   :  { %v5955_v60 = vadd.f32 -1.0, %v6272_v52 }
 0xb50   :  { %6273 = vpow2.f32 %v1501_v56 }
 0xb51   :  { %v1505_v29 = vsel %vm1495_vm0, %v1490_v39, %v5955_v60  ;;  %v1671_v54 = vpop.f32.mrf.mxu0  ;;  %v7860_v60 = vld [vmem:[%s9873_s6 + $0x110] sm:$0xff]  ;;  %vm1644_vm0 = vcmask 343040  }
 0xb52   :  { %5720 = vst.msk [vmem:[%s9872_s8] sm:$0xff] %vm10133_vm12, %v1505_v29  ;;  %1770 = vmatpush.msrb.mxu3 %v7860_v60 }
 0xb56   :  { %v6274_v45 = vpop.eup %6273 }
 0xb57   :  { %v5956_v31 = vadd.f32 -1.0, %v6274_v45  ;;  %v7877_v45 = vld [vmem:[%s9873_s6 + $0x118] sm:$0xff] }
 0xb58   :  { %1790 = vmatpush.msrb.mxu0 %v7877_v45 }
 0xb59   :  { %v1506_v41 = vsel %vm1496_vm2, %v1493_v18, %v5956_v31  ;;  %v7882_v31 = vld [vmem:[%s9873_s6 + $0xf0] sm:$0xff] }
 0xb5a   :  { %1529 = vmatpush.msrb.mxu1 %v1506_v41  ;;  %5721 = vst.msk [vmem:[%s9872_s8 + $0x8] sm:$0xff] %vm10135_vm5, %v1506_v41  ;;  %v7890_v41 = vld [vmem:[%s9873_s6 + $0x108] sm:$0xff] }
 0xb5b   :  { %1791 = vmatpush.msrb.mxu0 %v7890_v41 }
 0xb5c   :  { %1530 = vmatpush.msrb.mxu1 %v1505_v29  ;;  %v7865_v29 = vld [vmem:[%s9873_s6 + $0x100] sm:$0xff] }
 0xb5d   :  { %5958 = vmatmul.msk.f32.vlgmr.msrb.gmra.mxu1 %vm10136_vm7, %v5957_v43  ;;  %1771 = vmatpush.msrb.mxu3 %v7865_v29  ;;  %v7895_v43 = vld [vmem:[%s9873_s6 + $0xc0] sm:$0x3] }
 0xb5e   :  { %5961 = vmatpush.msk.msra.mxu1 %vm1591_vm6, %v1535_v12  ;;  %v7900_v12 = vld [vmem:[%s9873_s6 + $0xe0] sm:$0xff]  ;;  %6021 = vmatpush.msk.msra.mxu2 %vm1591_vm6, %v7895_v43 }
 0xb5f   :  { %1772 = vmatpush.msrb.mxu3 %v7882_v31 }
 0xb60   :  { %5964 = vmatpush.msk.msrb.mxu1 %vm1591_vm6, %v1536_v21  ;;  %v7960_v21 = vld [vmem:[%s9873_s6 + $0xb8] sm:$0xff] }
 0xb61   :  { %1773 = vmatpush.msrb.mxu3 %v7900_v12 }
 0xb65   :  { %5962 = vmatmul.msk.f32.vlgmr.msra.gmra.mxu1 %vm1584_vm8, %v1577_v17 }
 0xb66   :  { %5968 = vmatpush.msk.msra.mxu1 %vm1591_vm6, %v7790_v51 }
 0xb68   :  { %1685 = vmatpush.msra.mxu1 %v7797_v24 }
 0xb6a   :  { %1686 = vmatpush.msra.mxu1 %v7804_v6 }
 0xb6c   :  { %1687 = vmatpush.msra.mxu1 %v7811_v15 }
 0xb6d   :  { %5963 = vmatmul.msk.f32.gmra.mxu1 %vm1584_vm8, %v1578_v57 }
 0xb6e   :  { %1688 = vmatpush.msra.mxu1 %v7817_v58 }
 0xb70   :  { %1689 = vmatpush.msra.mxu1 %v7823_v40 }
 0xb75   :  { %5965 = vmatmul.msk.f32.vlgmr.msrb.gmra.mxu1 %vm1584_vm8, %v1577_v17  ;;  %v7908_v17 = vld [vmem:[%s9873_s6 + $0xb0] sm:$0xff] }
 0xb76   :  { %5973 = vmatpush.msk.msrb.mxu1 %vm1591_vm6, %v7895_v43  ;;  %2631 = vmatpush.msra.mxu2 %v7908_v17 }
 0xb78   :  { %1825 = vmatpush.msrb.mxu1 %v7908_v17 }
 0xb7d   :  { %5966 = vmatmul.msk.f32.gmra.mxu1 %vm1584_vm8, %v1578_v57  ;;  %v7955_v57 = vld [vmem:[%s9873_s6 + $0xd8] sm:$0xff] }
 0xb85   :  { %1690 = vmatmul.f32.vlgmr.msra.gmra.mxu1 %v10132_v5 }
 0xbda   :  { %v7767_v59 = vpop.f32.mrf.mxu1 }
 0xbdb   :  { %10137 = vst [vmem:[#allocation11_spill] sm:$0xff] %v7767_v59 }
 0xbe2   :  { %v1615_v30 = vpop.f32.mrf.mxu1 }
 0xbe3   :  { %v7777_v10 = vadd.f32 %v1615_v30, %v9961_v13  ;;  %v7914_v30 = vld [vmem:[%s9873_s6 + $0xf8] sm:$0xff] }
 0xbe4   :  { %1792 = vmatpush.msrb.mxu0 %v7914_v30 }
 0xbe5   :  { %v1694_v19 = vadd.f32 %v1671_v54, %v7777_v10  ;;  %v7919_v54 = vld [vmem:[%s9873_s6 + $0xa0] sm:$0xff] }
 0xbe6   :  { %1826 = vmatpush.msrb.mxu1 %v7919_v54  ;;  %2632 = vmatpush.msra.mxu2 %v7919_v54 }
 0xbe7   :  { %6275 = vtanh.f32 %v1694_v19  ;;  %v5969_v0 = vmul.f32 -1.442695, %v1694_v19  ;;  %v7927_v19 = vld [vmem:[%s9873_s6 + $0xd0] sm:$0xff] }
 0xbe8   :  { %1774 = vmatpush.msrb.mxu3 %v7927_v19 }
 0xbe9   :  { %6277 = vpow2.f32 %v5969_v0  ;;  %v7936_v0 = vld [vmem:[%s9873_s6 + $0xe8] sm:$0xff]  ;;  %1775 = vmatmul.f32.vlgmr.msrb.gmra.mxu3 %v10132_v5 }
 0xbea   :  { %v7845_v25 = vpop.f32.mrf.mxu1  ;;  %1793 = vmatpush.msrb.mxu0 %v7936_v0 }
 0xbeb   :  { %10139 = vst [vmem:[#allocation13_spill] sm:$0xff] %v7845_v25 }
 0xbec   :  { %1794 = vmatpush.msrb.mxu0 %v7955_v57 }
 0xbed   :  { %v6276_v9 = vpop.eup %6275  ;;  %1795 = vmatmul.f32.vlgmr.msrb.gmra.mxu0 %v10132_v5 }
 0xbee   :  { %1737 = vrot.lane.b32.xlu0 %v6276_v9, %s6754_s22  ;;  %5979 = vmatpush.msk.msra.mxu0 %vm1591_vm6, %v7707_v28 }
 0xbef   :  { %v6278_v20 = vpop.eup %6277 }
 0xbf0   :  { %v1699_v27 = vadd.f32 1.0, %v6278_v20  ;;  %v7941_v20 = vld [vmem:[%s9873_s6 + $0xc8] sm:$0x3]  ;;  %1929 = vmatpush.msra.mxu0 %v7714_v2 }
 0xbf1   :  { %5975 = vmatpush.msk.msra.mxu3 %vm1591_vm6, %v7941_v20 }
 0xbf2   :  { %6279 = vrcp.f32 %v1699_v27  ;;  %v1711_v48 = vand.u32 2147483648, %v1699_v27  ;;  %vm1705_vm10 = vweird.f32 %v1699_v27  ;;  %v1709_v14 = vand.u32 2147483647, %v1699_v27  ;;  %v1638_v44 = vpop.f32.mrf.mxu1  ;;  %1930 = vmatpush.msra.mxu0 %v7722_v16 }
 0xbf3   :  { %v7852_v37 = vadd.f32 %v1638_v44, %v9960_v46  ;;  %1845 = vmatpush.msra.mxu3 %v7960_v21 }
 0xbf4   :  { %v1712_v32 = vor.u32 1.1754944e-38, %v1711_v48  ;;  %vm1710_vm13 = vcmp.eq.f32.partialorder %v1709_v14, 8.507059e+37  ;;  %v8002_v14 = vld [vmem:[%s9873_s6 + $0x88] sm:$0xff]  ;;  %1931 = vmatpush.msra.mxu0 %v7728_v4 }
 0xbf6   :  { %1932 = vmatpush.msra.mxu0 %v7734_v1 }
 0xbf8   :  { %v6280_v7 = vpop.eup %6279  ;;  %1933 = vmatpush.msra.mxu0 %v7741_v55 }
 0xbf9   :  { %v1701_v3 = vmul.f32 %v6280_v7, %v1699_v27  ;;  %vm1706_vm9 = vweird.f32 %v6280_v7  ;;  %v7949_v27 = vld [vmem:[%s9873_s6 + $0x90] sm:$0xff] }
 0xbfa   :  { %vm1707_vm11 = vmor %vm1705_vm10, %vm1706_vm9  ;;  %v7847_v39 = vpop.f32.mrf.mxu1  ;;  %1827 = vmatpush.msrb.mxu1 %v7949_v27  ;;  %2633 = vmatpush.msra.mxu2 %v7949_v27 }
 0xbfb   :  { %v1702_v63 = vsub.f32 1.0, %v1701_v3  ;;  %10140 = vst [vmem:[#allocation14_spill] sm:$0xff] %v7847_v39  ;;  %v7971_v3 = vld [vmem:[%s9873_s6 + $0x80] sm:$0xff]  ;;  %5987 = vmatpush.msk.msrb.mxu0 %vm1591_vm6, %v7872_v49 }
 0xbfc   :  { %1828 = vmatpush.msrb.mxu1 %v7971_v3  ;;  %2634 = vmatpush.msra.mxu2 %v7971_v3 }
 0xbfd   :  { %v1703_v42 = vmul.f32 %v6280_v7, %v1702_v63  ;;  %v7978_v63 = vld [vmem:[%s9873_s6 + $0xa8] sm:$0xff]  ;;  %2066 = vmatpush.msrb.mxu0 %v7877_v45 }
 0xbfe   :  { %1846 = vmatpush.msra.mxu3 %v7978_v63 }
 0xbff   :  { %v1704_v26 = vadd.f32 %v6280_v7, %v1703_v42  ;;  %v7985_v42 = vld [vmem:[%s9873_s6 + $0x70] sm:$0xff]  ;;  %2067 = vmatpush.msrb.mxu0 %v7890_v41 }
 0xc00   :  { %1829 = vmatpush.msrb.mxu1 %v7985_v42  ;;  %2635 = vmatpush.msra.mxu2 %v7985_v42 }
 0xc01   :  { %v1708_v34 = vsel %vm1707_vm11, %v6280_v7, %v1704_v26  ;;  %v7993_v26 = vld [vmem:[%s9873_s6 + $0x98] sm:$0xff]  ;;  %2068 = vmatpush.msrb.mxu0 %v7914_v30 }
 0xc02   :  { %v7829_v22 = vsel %vm1710_vm13, %v1712_v32, %v1708_v34  ;;  %v1691_v47 = vpop.f32.mrf.mxu1  ;;  %1847 = vmatpush.msra.mxu3 %v7993_v26  ;;  %5981 = vmatpush.msk.msra.mxu1 %vm1591_vm6, %v7790_v51 }
 0xc03   :  { %v1735_v23 = vmul.f32 0.0, %v7829_v22  ;;  %v1695_v18 = vadd.f32 %v1691_v47, %v7852_v37  ;;  %6033 = vmatpush.msk.msrb.mxu2 %vm1591_vm6, %v7836_v36  ;;  %2069 = vmatpush.msrb.mxu0 %v7936_v0 }
 0xc04   :  { %1848 = vmatpush.msra.mxu3 %v8002_v14  ;;  %1949 = vmatpush.msra.mxu1 %v7797_v24 }
 0xc05   :  { %v5970_v53 = vmul.f32 -1.442695, %v1695_v18  ;;  %2847 = vmatpush.msrb.mxu2 %v7860_v60  ;;  %2070 = vmatpush.msrb.mxu0 %v7955_v57 }
 0xc06   :  { %1950 = vmatpush.msra.mxu1 %v7804_v6 }
 0xc07   :  { %2848 = vmatpush.msrb.mxu2 %v7865_v29 }
 0xc08   :  { %1951 = vmatpush.msra.mxu1 %v7811_v15 }
 0xc09   :  { %2849 = vmatpush.msrb.mxu2 %v7882_v31 }
 0xc0a   :  { %1952 = vmatpush.msra.mxu1 %v7817_v58 }
 0xc0b   :  { %2850 = vmatpush.msrb.mxu2 %v7900_v12 }
 0xc0c   :  { %1953 = vmatpush.msra.mxu1 %v7823_v40 }
 0xc0d   :  { %2851 = vmatpush.msrb.mxu2 %v7927_v19 }
 0xc60   :  { %v1738_v33 = vpop.permute.xlu0 %1737 }
 0xc61   :  { %v1740_v50 = vmul.f32 %v1738_v33, %v7829_v22 }
 0xc63   :  { %1742 = vrot.lane.b32.xlu1 %v1740_v50, %s6755_s15 }
 0xcd5   :  { %v1743_v38 = vpop.permute.xlu1 %1742 }
 0xcd6   :  { %v7841_v61 = vadd.f32 %v1743_v38, %v1735_v23 }
 0xcd8   :  { %6281 = vtanh.f32 %v7841_v61 }
 0xcd9   :  { %6283 = vpow2.f32 %v5970_v53 }
 0xcde   :  { %v6282_v11 = vpop.eup %6281 }
 0xcdf   :  { %1748 = vrot.lane.b32.xlu2 %v6282_v11, %s6756_s18  ;;  %v6284_v52 = vpop.eup %6283 }
 0xce0   :  { %v7855_v56 = vadd.f32 1.0, %v6284_v52 }
 0xce2   :  { %6285 = vrcp.f32 %v7855_v56  ;;  %vm1725_vm1 = vweird.f32 %v7855_v56  ;;  %v1731_v32 = vand.u32 2147483648, %v7855_v56  ;;  %v1729_v50 = vand.u32 2147483647, %v7855_v56 }
 0xce4   :  { %v1732_v23 = vor.u32 1.1754944e-38, %v1731_v32  ;;  %vm1730_vm4 = vcmp.eq.f32.partialorder %v1729_v50, 8.507059e+37 }
 0xce8   :  { %v7930_v9 = vpop.eup %6285 }
 0xce9   :  { %v1721_v7 = vmul.f32 %v7930_v9, %v7855_v56  ;;  %vm1726_vm14 = vweird.f32 %v7930_v9 }
 0xcea   :  { %vm1727_vm15 = vmor %vm1725_vm1, %vm1726_vm14 }
 0xceb   :  { %v1722_v48 = vsub.f32 1.0, %v1721_v7  ;;  %v8095_v7 = vld [vmem:[%s9873_s6 + $0x123] ss:$8 sm:$0x3] }
 0xced   :  { %v1723_v34 = vmul.f32 %v7930_v9, %v1722_v48  ;;  %v8098_v48 = vperm.slane %v8095_v7, 0 }
 0xcef   :  { %v1724_v33 = vadd.f32 %v7930_v9, %v1723_v34  ;;  %v1776_v34 = vpop.f32.mrf.mxu3 }
 0xcf1   :  { %v1728_v38 = vsel %vm1727_vm15, %v7930_v9, %v1724_v33  ;;  %v8090_v9 = vpop.f32.mrf.mxu0 }
 0xcf2   :  { %v1733_v11 = vsel %vm1730_vm4, %v1732_v23, %v1728_v38 }
 0xd39   :  { %v1749_v44 = vpop.permute.xlu2 %1748 }
 0xd3a   :  { %v1751_v47 = vmul.f32 %v1749_v44, %v7829_v22  ;;  %v1752_v18 = vmul.f32 %v1749_v44, %v1733_v11  ;;  %v8047_v22 = vld [vmem:[%s9873_s6 + $0x78] sm:$0xff] }
 0xd3b   :  { %1849 = vmatpush.msra.mxu3 %v8047_v22 }
 0xd3c   :  { %1803 = vrot.lane.b32.xlu1 %v1752_v18, %s6757_s16  ;;  %1801 = vrot.lane.b32.xlu0 %v1751_v47, %s6757_s16 }
 0xd3d   :  { %5985 = vmatpush.msk.msrb.mxu3 %vm1591_vm6, %v7836_v36 }
 0xd3f   :  { %2046 = vmatpush.msrb.mxu3 %v7860_v60 }
 0xd41   :  { %2047 = vmatpush.msrb.mxu3 %v7865_v29 }
 0xd43   :  { %2048 = vmatpush.msrb.mxu3 %v7882_v31 }
 0xd45   :  { %2049 = vmatpush.msrb.mxu3 %v7900_v12 }
 0xd47   :  { %2050 = vmatpush.msrb.mxu3 %v7927_v19 }
 0xdae   :  { %v1804_v53 = vpop.permute.xlu1 %1803  ;;  %v1802_v52 = vpop.permute.xlu0 %1801 }
 0xdaf   :  { %v1805_v56 = vsel %vm1584_vm8, %v1802_v52, %v1804_v53 }
 0xdb0   :  { %5974 = vmatmul.msk.f32.vlgmr.msrb.gmra.mxu1 %vm1644_vm0, %v1805_v56  ;;  %5976 = vmatmul.msk.f32.vlgmr.msra.gmra.mxu3 %vm1644_vm0, %v1805_v56 }
 0xdb1   :  { %5980 = vmatmul.msk.f32.vlgmr.msra.gmra.mxu0 %vm1644_vm0, %v1805_v56  ;;  %5989 = vmatpush.msk.msrb.mxu1 %vm1591_vm6, %v7895_v43 }
 0xdb2   :  { %5991 = vmatpush.msk.msra.mxu3 %vm1591_vm6, %v7941_v20  ;;  %5995 = vmatpush.msk.msra.mxu0 %vm1591_vm6, %v7707_v28 }
 0xdb3   :  { %2097 = vmatpush.msrb.mxu1 %v7908_v17 }
 0xdb4   :  { %2117 = vmatpush.msra.mxu3 %v7960_v21  ;;  %2196 = vmatpush.msra.mxu0 %v7714_v2 }
 0xdb5   :  { %2098 = vmatpush.msrb.mxu1 %v7919_v54 }
 0xdb6   :  { %2118 = vmatpush.msra.mxu3 %v7978_v63  ;;  %2197 = vmatpush.msra.mxu0 %v7722_v16 }
 0xdb7   :  { %2099 = vmatpush.msrb.mxu1 %v7949_v27 }
 0xdb8   :  { %5982 = vmatmul.msk.f32.vlgmr.msra.gmra.mxu1 %vm1644_vm0, %v1805_v56  ;;  %2119 = vmatpush.msra.mxu3 %v7993_v26 }
 0xdb9   :  { %2100 = vmatpush.msrb.mxu1 %v7971_v3  ;;  %2198 = vmatpush.msra.mxu0 %v7728_v4 }
 0xdba   :  { %2120 = vmatpush.msra.mxu3 %v8002_v14 }
 0xdbb   :  { %2101 = vmatpush.msrb.mxu1 %v7985_v42  ;;  %2199 = vmatpush.msra.mxu0 %v7734_v1 }
 0xdbc   :  { %2121 = vmatpush.msra.mxu3 %v8047_v22 }
 0xdbd   :  { %5997 = vmatpush.msk.msra.mxu1 %vm1591_vm6, %v7790_v51  ;;  %2200 = vmatpush.msra.mxu0 %v7741_v55 }
 0xdbf   :  { %2216 = vmatpush.msra.mxu1 %v7797_v24 }
 0xdc1   :  { %2217 = vmatpush.msra.mxu1 %v7804_v6 }
 0xdc3   :  { %2218 = vmatpush.msra.mxu1 %v7811_v15 }
 0xdc5   :  { %2219 = vmatpush.msra.mxu1 %v7817_v58 }
 0xdc7   :  { %2220 = vmatpush.msra.mxu1 %v7823_v40 }
 0xe2d   :  { %v1831_v32 = vpop.f32.mrf.mxu1 }
 0xe2e   :  { %v1832_v33 = vadd.f32 %v1831_v32, %v1776_v34  ;;  %v1935_v50 = vpop.f32.mrf.mxu0 }
 0xe2f   :  { %v1960_v23 = vrot.slane %v1935_v50, 7 }
 0xe30   :  { %v1859_v38 = vadd.f32 %v8098_v48, %v1832_v33 }
 0xe31   :  { %v1964_v11 = vadd.f32 %v1960_v23, %v7777_v10 }
 0xe32   :  { %6287 = vtanh.f32 %v1859_v38  ;;  %v5977_v18 = vmul.f32 -1.442695, %v1859_v38 }
 0xe33   :  { %6289 = vtanh.f32 %v1964_v11  ;;  %v5983_v34 = vmul.f32 -1.442695, %v1964_v11 }
 0xe34   :  { %6291 = vpow2.f32 %v5977_v18 }
 0xe38   :  { %v6288_v44 = vpop.eup %6287 }
 0xe39   :  { %v6290_v47 = vpop.eup %6289  ;;  %1902 = vrot.lane.b32.xlu2 %v6288_v44, %s6754_s22 }
 0xe3a   :  { %2010 = vrot.lane.b32.xlu0 %v6290_v47, %s6754_s22  ;;  %v6292_v53 = vpop.eup %6291 }
 0xe3b   :  { %v1864_v52 = vadd.f32 1.0, %v6292_v53 }
 0xe3d   :  { %6293 = vrcp.f32 %v1864_v52  ;;  %v1876_v5 = vand.u32 2147483648, %v1864_v52  ;;  %vm1870_vm3 = vweird.f32 %v1864_v52  ;;  %v1874_v44 = vand.u32 2147483647, %v1864_v52 }
 0xe3e   :  { %6295 = vpow2.f32 %v5983_v34 }
 0xe3f   :  { %v1877_v47 = vor.u32 1.1754944e-38, %v1876_v5  ;;  %vm1875_vm5 = vcmp.eq.f32.partialorder %v1874_v44, 8.507059e+37 }
 0xe43   :  { %v6294_v56 = vpop.eup %6293 }
 0xe44   :  { %v1866_v32 = vmul.f32 %v6294_v56, %v1864_v52  ;;  %v6296_v23 = vpop.eup %6295  ;;  %vm1871_vm12 = vweird.f32 %v6294_v56 }
 0xe45   :  { %v1969_v46 = vadd.f32 1.0, %v6296_v23  ;;  %vm1872_vm2 = vmor %vm1870_vm3, %vm1871_vm12 }
 0xe46   :  { %v1867_v33 = vsub.f32 1.0, %v1866_v32 }
 0xe47   :  { %6297 = vrcp.f32 %v1969_v46  ;;  %v1981_v59 = vand.u32 2147483648, %v1969_v46  ;;  %vm1975_vm9 = vweird.f32 %v1969_v46  ;;  %v1979_v52 = vand.u32 2147483647, %v1969_v46 }
 0xe48   :  { %v1868_v50 = vmul.f32 %v6294_v56, %v1867_v33 }
 0xe49   :  { %v1982_v5 = vor.u32 1.1754944e-38, %v1981_v59  ;;  %vm1980_vm11 = vcmp.eq.f32.partialorder %v1979_v52, 8.507059e+37  ;;  %v8125_v52 = vperm.slane %v8095_v7, 1 }
 0xe4a   :  { %v1869_v13 = vadd.f32 %v6294_v56, %v1868_v50 }
 0xe4c   :  { %v1873_v38 = vsel %vm1872_vm2, %v6294_v56, %v1869_v13 }
 0xe4d   :  { %v8104_v53 = vsel %vm1875_vm5, %v1877_v47, %v1873_v38  ;;  %v6298_v34 = vpop.eup %6297  ;;  %v2006_v47 = vrot.slane %v7841_v61, 7  ;;  %v1851_v61 = vpop.f32.mrf.mxu3 }
 0xe4e   :  { %v1971_v32 = vmul.f32 %v6298_v34, %v1969_v46  ;;  %vm1976_vm7 = vweird.f32 %v6298_v34 }
 0xe4f   :  { %vm1977_vm10 = vmor %vm1975_vm9, %vm1976_vm7 }
 0xe50   :  { %v1972_v33 = vsub.f32 1.0, %v1971_v32 }
 0xe52   :  { %v1973_v50 = vmul.f32 %v6298_v34, %v1972_v33 }
 0xe54   :  { %v1974_v23 = vadd.f32 %v6298_v34, %v1973_v50 }
 0xe56   :  { %v1978_v13 = vsel %vm1977_vm10, %v6298_v34, %v1974_v23  ;;  %v1852_v23 = vadd.f32 %v1851_v61, %v8090_v9 }
 0xe57   :  { %v8108_v44 = vsel %vm1980_vm11, %v1982_v5, %v1978_v13  ;;  %v1955_v13 = vpop.f32.mrf.mxu1 }
 0xe58   :  { %v1860_v5 = vadd.f32 %v8125_v52, %v1852_v23 }
 0xe93   :  { %v1903_v18 = vpop.permute.xlu2 %1902 }
 0xe94   :  { %v1905_v11 = vmul.f32 %v1903_v18, %v8104_v53  ;;  %v1900_v18 = vmul.f32 0.0, %v8104_v53 }
 0xe96   :  { %1907 = vrot.lane.b32.xlu1 %v1905_v11, %s6755_s15  ;;  %v2008_v11 = vmul.f32 %v2006_v47, %v8108_v44 }
 0xeac   :  { %v2011_v56 = vpop.permute.xlu0 %2010 }
 0xead   :  { %v2013_v38 = vmul.f32 %v2011_v56, %v8108_v44  ;;  %v1961_v56 = vrot.slane %v1955_v13, 7 }
 0xeaf   :  { %2015 = vrot.lane.b32.xlu2 %v2013_v38, %s6755_s15  ;;  %v5978_v38 = vmul.f32 -1.442695, %v1860_v5  ;;  %v1965_v47 = vadd.f32 %v1961_v56, %v7852_v37 }
 0xf08   :  { %v1908_v32 = vpop.permute.xlu1 %1907 }
 0xf09   :  { %v2016_v33 = vpop.permute.xlu2 %2015  ;;  %v8115_v46 = vadd.f32 %v1908_v32, %v1900_v18  ;;  %v5984_v18 = vmul.f32 -1.442695, %v1965_v47 }
 0xf0a   :  { %v8117_v34 = vadd.f32 %v2016_v33, %v2008_v11 }
 0xf0b   :  { %6299 = vtanh.f32 %v8115_v46 }
 0xf0c   :  { %6301 = vtanh.f32 %v8117_v34 }
 0xf0d   :  { %6303 = vpow2.f32 %v5978_v38 }
 0xf0e   :  { %6305 = vpow2.f32 %v5984_v18 }
 0xf11   :  { %v6300_v59 = vpop.eup %6299 }
 0xf12   :  { %v6302_v50 = vpop.eup %6301  ;;  %1913 = vrot.lane.b32.xlu0 %v6300_v59, %s6756_s18 }
 0xf13   :  { %2021 = vrot.lane.b32.xlu1 %v6302_v50, %s6756_s18  ;;  %v6304_v11 = vpop.eup %6303 }
 0xf14   :  { %v1884_v32 = vadd.f32 1.0, %v6304_v11  ;;  %v6306_v33 = vpop.eup %6305 }
 0xf15   :  { %v1989_v59 = vadd.f32 1.0, %v6306_v33 }
 0xf16   :  { %6307 = vrcp.f32 %v1884_v32  ;;  %v1896_v56 = vand.u32 2147483648, %v1884_v32  ;;  %vm1890_vm1 = vweird.f32 %v1884_v32  ;;  %v1894_v38 = vand.u32 2147483647, %v1884_v32 }
 0xf17   :  { %6309 = vrcp.f32 %v1989_v59  ;;  %v2001_v11 = vand.u32 2147483648, %v1989_v59  ;;  %vm1995_vm4 = vweird.f32 %v1989_v59  ;;  %v1999_v39 = vand.u32 2147483647, %v1989_v59 }
 0xf18   :  { %v1897_v33 = vor.u32 1.1754944e-38, %v1896_v56  ;;  %vm1895_vm12 = vcmp.eq.f32.partialorder %v1894_v38, 8.507059e+37 }
 0xf19   :  { %v2002_v62 = vor.u32 1.1754944e-38, %v2001_v11  ;;  %vm2000_vm2 = vcmp.eq.f32.partialorder %v1999_v39, 8.507059e+37 }
 0xf1c   :  { %v6308_v9 = vpop.eup %6307 }
 0xf1d   :  { %v1886_v50 = vmul.f32 %v6308_v9, %v1884_v32  ;;  %v6310_v7 = vpop.eup %6309  ;;  %vm1891_vm13 = vweird.f32 %v6308_v9 }
 0xf1e   :  { %v1991_v61 = vmul.f32 %v6310_v7, %v1989_v59  ;;  %vm1892_vm14 = vmor %vm1890_vm1, %vm1891_vm13  ;;  %vm1996_vm15 = vweird.f32 %v6310_v7 }
 0xf1f   :  { %v1887_v8 = vsub.f32 1.0, %v1886_v50  ;;  %vm1997_vm3 = vmor %vm1995_vm4, %vm1996_vm15 }
 0xf20   :  { %v1992_v35 = vsub.f32 1.0, %v1991_v61 }
 0xf21   :  { %v1888_v23 = vmul.f32 %v6308_v9, %v1887_v8 }
 0xf22   :  { %v1993_v13 = vmul.f32 %v6310_v7, %v1992_v35 }
 0xf23   :  { %v1889_v5 = vadd.f32 %v6308_v9, %v1888_v23 }
 0xf24   :  { %v1994_v47 = vadd.f32 %v6310_v7, %v1993_v13 }
 0xf25   :  { %v1893_v18 = vsel %vm1892_vm14, %v6308_v9, %v1889_v5 }
 0xf26   :  { %v1898_v25 = vsel %vm1895_vm12, %v1897_v33, %v1893_v18  ;;  %v1998_v61 = vsel %vm1997_vm3, %v6310_v7, %v1994_v47 }
 0xf27   :  { %v2003_v9 = vsel %vm2000_vm2, %v2002_v62, %v1998_v61 }
 0xf84   :  { %v1914_v50 = vpop.permute.xlu0 %1913 }
 0xf85   :  { %v2022_v8 = vpop.permute.xlu1 %2021  ;;  %v1916_v35 = vmul.f32 %v1914_v50, %v8104_v53  ;;  %v1917_v23 = vmul.f32 %v1914_v50, %v1898_v25 }
 0xf86   :  { %v2024_v32 = vmul.f32 %v2022_v8, %v8108_v44  ;;  %v2025_v59 = vmul.f32 %v2022_v8, %v2003_v9 }
 0xf87   :  { %2030 = vrot.lane.b32.xlu0 %v1917_v23, %s6757_s16  ;;  %2028 = vrot.lane.b32.xlu2 %v1916_v35, %s6757_s16 }
 0xf88   :  { %v2077_v13 = vrot.slane %v2024_v32, 1  ;;  %v2078_v5 = vrot.slane %v2025_v59, 1 }
 0xf8a   :  { %2079 = vrot.lane.b32.xlu1 %v2077_v13, %s6757_s16 }
 0xf8f   :  { %2081 = vrot.lane.b32.xlu2 %v2078_v5, %s6757_s16 }
 0xfe1   :  { %v2029_v7 = vpop.permute.xlu2 %2028 }
 0xfe9   :  { %v2082_v39 = vpop.permute.xlu2 %2081 }
 0xff9   :  { %v2031_v56 = vpop.permute.xlu0 %2030 }
 0xffa   :  { %v2032_v25 = vsel %vm1584_vm8, %v2029_v7, %v2031_v56 }
 0xffb   :  { %5986 = vmatmul.msk.f32.vlgmr.msrb.gmra.mxu3 %vm1644_vm0, %v2032_v25  ;;  %5988 = vmatmul.msk.f32.vlgmr.msrb.gmra.mxu0 %vm1644_vm0, %v2032_v25 }
 0xffc   :  { %v2080_v53 = vpop.permute.xlu1 %2079  ;;  %6001 = vmatpush.msk.msrb.mxu3 %vm1591_vm6, %v7836_v36  ;;  %6003 = vmatpush.msk.msrb.mxu0 %vm1591_vm6, %v7872_v49 }
 0xffd   :  { %v2083_v62 = vsel %vm1584_vm8, %v2080_v53, %v2082_v39 }
 0xffe   :  { %5990 = vmatmul.msk.f32.vlgmr.msrb.gmra.mxu1 %vm1644_vm0, %v2083_v62  ;;  %2313 = vmatpush.msrb.mxu3 %v7860_v60 }
 0xfff   :  { %2333 = vmatpush.msrb.mxu0 %v7877_v45  ;;  %6005 = vmatpush.msk.msrb.mxu1 %vm1591_vm6, %v7895_v43 }
0x1000   :  { %2314 = vmatpush.msrb.mxu3 %v7865_v29 }
0x1001   :  { %2334 = vmatpush.msrb.mxu0 %v7890_v41  ;;  %2364 = vmatpush.msrb.mxu1 %v7908_v17 }
0x1002   :  { %2315 = vmatpush.msrb.mxu3 %v7882_v31 }
0x1003   :  { %5992 = vmatmul.msk.f32.vlgmr.msra.gmra.mxu3 %vm1644_vm0, %v2083_v62  ;;  %5996 = vmatmul.msk.f32.vlgmr.msra.gmra.mxu0 %vm1644_vm0, %v2083_v62 }
0x1004   :  { %2335 = vmatpush.msrb.mxu0 %v7914_v30  ;;  %2316 = vmatpush.msrb.mxu3 %v7900_v12 }
0x1005   :  { %2365 = vmatpush.msrb.mxu1 %v7919_v54 }
0x1006   :  { %5998 = vmatmul.msk.f32.vlgmr.msra.gmra.mxu1 %vm1644_vm0, %v2083_v62  ;;  %2336 = vmatpush.msrb.mxu0 %v7936_v0 }
0x1007   :  { %2317 = vmatpush.msrb.mxu3 %v7927_v19  ;;  %2366 = vmatpush.msrb.mxu1 %v7949_v27 }
0x1008   :  { %2337 = vmatpush.msrb.mxu0 %v7955_v57 }
0x1009   :  { %6007 = vmatpush.msk.msra.mxu3 %vm1591_vm6, %v7941_v20  ;;  %2367 = vmatpush.msrb.mxu1 %v7971_v3 }
0x100a   :  { %6011 = vmatpush.msk.msra.mxu0 %vm1591_vm6, %v7707_v28 }
0x100b   :  { %2384 = vmatpush.msra.mxu3 %v7960_v21  ;;  %2368 = vmatpush.msrb.mxu1 %v7985_v42 }
0x100c   :  { %2463 = vmatpush.msra.mxu0 %v7714_v2 }
0x100d   :  { %2385 = vmatpush.msra.mxu3 %v7978_v63  ;;  %6013 = vmatpush.msk.msra.mxu1 %vm1591_vm6, %v7790_v51 }
0x100e   :  { %2464 = vmatpush.msra.mxu0 %v7722_v16 }
0x100f   :  { %2386 = vmatpush.msra.mxu3 %v7993_v26  ;;  %2483 = vmatpush.msra.mxu1 %v7797_v24 }
0x1010   :  { %2465 = vmatpush.msra.mxu0 %v7728_v4 }
0x1011   :  { %2387 = vmatpush.msra.mxu3 %v8002_v14  ;;  %2484 = vmatpush.msra.mxu1 %v7804_v6 }
0x1012   :  { %2466 = vmatpush.msra.mxu0 %v7734_v1 }
0x1013   :  { %2388 = vmatpush.msra.mxu3 %v8047_v22  ;;  %2485 = vmatpush.msra.mxu1 %v7811_v15 }
0x1014   :  { %2467 = vmatpush.msra.mxu0 %v7741_v55 }
0x1015   :  { %2486 = vmatpush.msra.mxu1 %v7817_v58 }
0x1017   :  { %2487 = vmatpush.msra.mxu1 %v7823_v40 }
0x1078   :  { %v8185_v28 = vpop.f32.mrf.mxu0 }
0x107b   :  { %v2103_v2 = vpop.f32.mrf.mxu1 }
0x107e   :  { %v2052_v16 = vpop.f32.mrf.mxu3 }
0x107f   :  { %v2104_v4 = vadd.f32 %v2103_v2, %v2052_v16 }
0x1080   :  { %v2202_v51 = vpop.f32.mrf.mxu0 }
0x1081   :  { %v2126_v24 = vadd.f32 %v2104_v4, %v8098_v48  ;;  %v2227_v6 = vrot.slane %v2202_v51, 6 }
0x1083   :  { %6311 = vtanh.f32 %v2126_v24  ;;  %v2231_v1 = vadd.f32 %v2227_v6, %v7777_v10  ;;  %v5993_v58 = vmul.f32 -1.442695, %v2126_v24  ;;  %v2273_v24 = vrot.slane %v8117_v34, 7 }
0x1085   :  { %6313 = vtanh.f32 %v2231_v1  ;;  %v5999_v40 = vmul.f32 -1.442695, %v2231_v1 }
0x1086   :  { %6315 = vpow2.f32 %v5993_v58 }
0x1087   :  { %6317 = vpow2.f32 %v5999_v40  ;;  %v2222_v40 = vpop.f32.mrf.mxu1 }
0x1089   :  { %v6312_v15 = vpop.eup %6311 }
0x108a   :  { %2169 = vrot.lane.b32.xlu0 %v6312_v15, %s6754_s22 }
0x108b   :  { %v6314_v55 = vpop.eup %6313 }
0x108c   :  { %2277 = vrot.lane.b32.xlu1 %v6314_v55, %s6754_s22  ;;  %v6316_v43 = vpop.eup %6315 }
0x108d   :  { %v6318_v17 = vpop.eup %6317  ;;  %v2131_v54 = vadd.f32 1.0, %v6316_v43  ;;  %v2228_v43 = vrot.slane %v2222_v40, 6 }
0x108e   :  { %v2236_v27 = vadd.f32 1.0, %v6318_v17 }
0x108f   :  { %6319 = vrcp.f32 %v2131_v54  ;;  %v2143_v61 = vand.u32 2147483648, %v2131_v54  ;;  %vm2137_vm7 = vweird.f32 %v2131_v54  ;;  %v2141_v8 = vand.u32 2147483647, %v2131_v54 }
0x1090   :  { %6321 = vrcp.f32 %v2236_v27  ;;  %v2248_v32 = vand.u32 2147483648, %v2236_v27  ;;  %vm2242_vm11 = vweird.f32 %v2236_v27  ;;  %v2246_v13 = vand.u32 2147483647, %v2236_v27 }
0x1091   :  { %v2144_v9 = vor.u32 1.1754944e-38, %v2143_v61  ;;  %vm2142_vm13 = vcmp.eq.f32.partialorder %v2141_v8, 8.507059e+37 }
0x1092   :  { %v2249_v25 = vor.u32 1.1754944e-38, %v2248_v32  ;;  %vm2247_vm14 = vcmp.eq.f32.partialorder %v2246_v13, 8.507059e+37 }
0x1095   :  { %v6320_v3 = vpop.eup %6319 }
0x1096   :  { %v6322_v42 = vpop.eup %6321  ;;  %v2133_v44 = vmul.f32 %v6320_v3, %v2131_v54  ;;  %vm2138_vm5 = vweird.f32 %v6320_v3  ;;  %v2232_v54 = vadd.f32 %v2228_v43, %v7852_v37 }
0x1097   :  { %v2238_v38 = vmul.f32 %v6322_v42, %v2236_v27  ;;  %vm2139_vm9 = vmor %vm2137_vm7, %vm2138_vm5  ;;  %vm2243_vm10 = vweird.f32 %v6322_v42 }
0x1098   :  { %v2134_v47 = vsub.f32 1.0, %v2133_v44  ;;  %vm2244_vm1 = vmor %vm2242_vm11, %vm2243_vm10  ;;  %v6000_v27 = vmul.f32 -1.442695, %v2232_v54 }
0x1099   :  { %v2239_v18 = vsub.f32 1.0, %v2238_v38 }
0x109a   :  { %v2135_v11 = vmul.f32 %v6320_v3, %v2134_v47 }
0x109b   :  { %v2240_v33 = vmul.f32 %v6322_v42, %v2239_v18 }
0x109c   :  { %v2136_v50 = vadd.f32 %v6320_v3, %v2135_v11 }
0x109d   :  { %v2241_v35 = vadd.f32 %v6322_v42, %v2240_v33 }
0x109e   :  { %v2140_v23 = vsel %vm2139_vm9, %v6320_v3, %v2136_v50 }
0x109f   :  { %v8191_v5 = vsel %vm2142_vm13, %v2144_v9, %v2140_v23  ;;  %v2245_v7 = vsel %vm2244_vm1, %v6322_v42, %v2241_v35 }
0x10a0   :  { %v8194_v53 = vsel %vm2247_vm14, %v2249_v25, %v2245_v7  ;;  %v2167_v2 = vmul.f32 %v8191_v5, %v8115_v46  ;;  %v2123_v46 = vpop.f32.mrf.mxu3 }
0x10a1   :  { %v2275_v6 = vmul.f32 %v2273_v24, %v8194_v53  ;;  %v2124_v58 = vadd.f32 %v2123_v46, %v8185_v28 }
0x10a3   :  { %v2127_v17 = vadd.f32 %v2124_v58, %v8125_v52 }
0x10a5   :  { %v5994_v34 = vmul.f32 -1.442695, %v2127_v17 }
0x10fc   :  { %v2170_v59 = vpop.permute.xlu0 %2169 }
0x10fd   :  { %v2172_v56 = vmul.f32 %v2170_v59, %v8191_v5 }
0x10fe   :  { %v2278_v39 = vpop.permute.xlu1 %2277 }
0x10ff   :  { %2174 = vrot.lane.b32.xlu2 %v2172_v56, %s6755_s15  ;;  %v2280_v62 = vmul.f32 %v2278_v39, %v8194_v53 }
0x1101   :  { %2282 = vrot.lane.b32.xlu0 %v2280_v62, %s6755_s15 }
0x1159   :  { %v2175_v16 = vpop.permute.xlu2 %2174 }
0x115a   :  { %v8201_v4 = vadd.f32 %v2175_v16, %v2167_v2 }
0x115c   :  { %6323 = vtanh.f32 %v8201_v4 }
0x1162   :  { %v6324_v51 = vpop.eup %6323 }
0x1163   :  { %2180 = vrot.lane.b32.xlu1 %v6324_v51, %s6756_s18 }
0x1173   :  { %v2283_v1 = vpop.permute.xlu0 %2282 }
0x1174   :  { %v8207_v15 = vadd.f32 %v2283_v1, %v2275_v6 }
0x1176   :  { %6325 = vtanh.f32 %v8207_v15 }
0x1177   :  { %6327 = vpow2.f32 %v5994_v34  ;;  %v8322_v34 = vld [vmem:[%s9873_s6 + $0x18] sm:$0xff] }
0x1178   :  { %6329 = vpow2.f32 %v6000_v27 }
0x117c   :  { %v6326_v55 = vpop.eup %6325 }
0x117d   :  { %2288 = vrot.lane.b32.xlu2 %v6326_v55, %s6756_s18  ;;  %v6328_v3 = vpop.eup %6327 }
0x117e   :  { %v2151_v42 = vadd.f32 1.0, %v6328_v3  ;;  %v6330_v44 = vpop.eup %6329 }
0x117f   :  { %v2256_v38 = vadd.f32 1.0, %v6330_v44 }
0x1180   :  { %6331 = vrcp.f32 %v2151_v42  ;;  %v2163_v23 = vand.u32 2147483648, %v2151_v42  ;;  %vm2157_vm4 = vweird.f32 %v2151_v42  ;;  %v2161_v32 = vand.u32 2147483647, %v2151_v42 }
0x1181   :  { %6333 = vrcp.f32 %v2256_v38  ;;  %v2268_v7 = vand.u32 2147483648, %v2256_v38  ;;  %vm2262_vm5 = vweird.f32 %v2256_v38  ;;  %v2266_v56 = vand.u32 2147483647, %v2256_v38 }
0x1182   :  { %v2164_v59 = vor.u32 1.1754944e-38, %v2163_v23  ;;  %vm2162_vm2 = vcmp.eq.f32.partialorder %v2161_v32, 8.507059e+37 }
0x1183   :  { %v2269_v51 = vor.u32 1.1754944e-38, %v2268_v7  ;;  %vm2267_vm9 = vcmp.eq.f32.partialorder %v2266_v56, 8.507059e+37 }
0x1186   :  { %v6332_v47 = vpop.eup %6331 }
0x1187   :  { %v2153_v18 = vmul.f32 %v6332_v47, %v2151_v42  ;;  %v6334_v11 = vpop.eup %6333  ;;  %vm2158_vm15 = vweird.f32 %v6332_v47 }
0x1188   :  { %v2258_v33 = vmul.f32 %v6334_v11, %v2256_v38  ;;  %vm2159_vm12 = vmor %vm2157_vm4, %vm2158_vm15  ;;  %vm2263_vm3 = vweird.f32 %v6334_v11 }
0x1189   :  { %v2154_v28 = vsub.f32 1.0, %v2153_v18  ;;  %vm2264_vm7 = vmor %vm2262_vm5, %vm2263_vm3 }
0x118a   :  { %v2259_v61 = vsub.f32 1.0, %v2258_v33 }
0x118b   :  { %v2155_v50 = vmul.f32 %v6332_v47, %v2154_v28 }
0x118c   :  { %v2260_v35 = vmul.f32 %v6334_v11, %v2259_v61 }
0x118d   :  { %v2156_v8 = vadd.f32 %v6332_v47, %v2155_v50 }
0x118e   :  { %v2261_v13 = vadd.f32 %v6334_v11, %v2260_v35 }
0x118f   :  { %v2160_v9 = vsel %vm2159_vm12, %v6332_v47, %v2156_v8 }
0x1190   :  { %v2165_v25 = vsel %vm2162_vm2, %v2164_v59, %v2160_v9  ;;  %v2265_v16 = vsel %vm2264_vm7, %v6334_v11, %v2261_v13 }
0x1191   :  { %v2270_v6 = vsel %vm2267_vm9, %v2269_v51, %v2265_v16 }
0x11d5   :  { %v2181_v39 = vpop.permute.xlu1 %2180 }
0x11d6   :  { %v2183_v62 = vmul.f32 %v2181_v39, %v8191_v5  ;;  %v2184_v2 = vmul.f32 %v2181_v39, %v2165_v25 }
0x11d7   :  { %v2289_v24 = vpop.permute.xlu2 %2288 }
0x11d8   :  { %2297 = vrot.lane.b32.xlu1 %v2184_v2, %s6757_s16  ;;  %2295 = vrot.lane.b32.xlu0 %v2183_v62, %s6757_s16  ;;  %v2291_v1 = vmul.f32 %v2289_v24, %v8194_v53  ;;  %v2292_v55 = vmul.f32 %v2289_v24, %v2270_v6 }
0x11da   :  { %v2344_v46 = vrot.slane %v2291_v1, 2  ;;  %v2345_v58 = vrot.slane %v2292_v55, 2 }
0x11dc   :  { %2346 = vrot.lane.b32.xlu2 %v2344_v46, %s6757_s16 }
0x11e0   :  { %2348 = vrot.lane.b32.xlu0 %v2345_v58, %s6757_s16 }
0x1236   :  { %v2347_v53 = vpop.permute.xlu2 %2346 }
0x124a   :  { %v2298_v5 = vpop.permute.xlu1 %2297  ;;  %v2296_v40 = vpop.permute.xlu0 %2295 }
0x124b   :  { %v2299_v43 = vsel %vm1584_vm8, %v2296_v40, %v2298_v5  ;;  %v2540_v5 = vrot.slane %v8207_v15, 7 }
0x124c   :  { %6002 = vmatmul.msk.f32.vlgmr.msrb.gmra.mxu3 %vm1644_vm0, %v2299_v43  ;;  %6004 = vmatmul.msk.f32.vlgmr.msrb.gmra.mxu0 %vm1644_vm0, %v2299_v43 }
0x124d   :  { %6017 = vmatpush.msk.msrb.mxu3 %vm1591_vm6, %v7836_v36  ;;  %6019 = vmatpush.msk.msrb.mxu0 %vm1591_vm6, %v7872_v49  ;;  %v8246_v36 = vld [vmem:[%s9873_s6 + $0x60] sm:$0x3] }
0x124f   :  { %2580 = vmatpush.msrb.mxu3 %v7860_v60  ;;  %2600 = vmatpush.msrb.mxu0 %v7877_v45  ;;  %v8253_v60 = vld [vmem:[%s9873_s6 + $0x68] sm:$0x3] }
0x1251   :  { %2581 = vmatpush.msrb.mxu3 %v7865_v29  ;;  %2601 = vmatpush.msrb.mxu0 %v7890_v41  ;;  %v8261_v29 = vld [vmem:[%s9873_s6 + $0x50] sm:$0xff] }
0x1252   :  { %v2349_v17 = vpop.permute.xlu0 %2348 }
0x1253   :  { %v2350_v54 = vsel %vm1584_vm8, %v2347_v53, %v2349_v17  ;;  %2582 = vmatpush.msrb.mxu3 %v7882_v31  ;;  %2602 = vmatpush.msrb.mxu0 %v7914_v30  ;;  %v8267_v31 = vld [vmem:[%s9873_s6 + $0x58] sm:$0xff] }
0x1254   :  { %6006 = vmatmul.msk.f32.vlgmr.msrb.gmra.mxu1 %vm1644_vm0, %v2350_v54  ;;  %6008 = vmatmul.msk.f32.vlgmr.msra.gmra.mxu3 %vm1644_vm0, %v2350_v54 }
0x1255   :  { %6012 = vmatmul.msk.f32.vlgmr.msra.gmra.mxu0 %vm1644_vm0, %v2350_v54  ;;  %2583 = vmatpush.msrb.mxu3 %v7900_v12  ;;  %v8275_v12 = vld [vmem:[%s9873_s6 + $0x40] sm:$0xff] }
0x1256   :  { %2603 = vmatpush.msrb.mxu0 %v7936_v0  ;;  %6023 = vmatpush.msk.msrb.mxu1 %vm1591_vm6, %v7941_v20  ;;  %v8288_v20 = vld [vmem:[%s9873_s6 + $0x30] sm:$0xff] }
0x1257   :  { %2584 = vmatpush.msrb.mxu3 %v7927_v19  ;;  %v8281_v19 = vld [vmem:[%s9873_s6 + $0x48] sm:$0xff] }
0x1258   :  { %2604 = vmatpush.msrb.mxu0 %v7955_v57  ;;  %2651 = vmatpush.msrb.mxu1 %v7960_v21  ;;  %v8294_v21 = vld [vmem:[%s9873_s6 + $0x38] sm:$0xff] }
0x1259   :  { %6027 = vmatpush.msk.msra.mxu3 %vm1591_vm6, %v8246_v36 }
0x125a   :  { %6029 = vmatpush.msk.msra.mxu0 %vm1591_vm6, %v8253_v60  ;;  %2652 = vmatpush.msrb.mxu1 %v7978_v63  ;;  %v8301_v63 = vld [vmem:[%s9873_s6 + $0x20] sm:$0xff] }
0x125b   :  { %2730 = vmatpush.msra.mxu3 %v8261_v29 }
0x125c   :  { %2750 = vmatpush.msra.mxu0 %v8267_v31  ;;  %6014 = vmatmul.msk.f32.vlgmr.msra.gmra.mxu1 %vm1644_vm0, %v2350_v54 }
0x125d   :  { %2731 = vmatpush.msra.mxu3 %v8275_v12  ;;  %2653 = vmatpush.msrb.mxu1 %v7993_v26  ;;  %v8307_v26 = vld [vmem:[%s9873_s6 + $0x28] sm:$0xff] }
0x125e   :  { %2751 = vmatpush.msra.mxu0 %v8281_v19 }
0x125f   :  { %2732 = vmatpush.msra.mxu3 %v8288_v20  ;;  %2654 = vmatpush.msrb.mxu1 %v8002_v14  ;;  %v8314_v14 = vld [vmem:[%s9873_s6 + $0x10] sm:$0xff] }
0x1260   :  { %2752 = vmatpush.msra.mxu0 %v8294_v21 }
0x1261   :  { %2733 = vmatpush.msra.mxu3 %v8301_v63  ;;  %2655 = vmatpush.msrb.mxu1 %v8047_v22 }
0x1262   :  { %2753 = vmatpush.msra.mxu0 %v8307_v26 }
0x1263   :  { %2734 = vmatpush.msra.mxu3 %v8314_v14  ;;  %6035 = vmatpush.msk.msra.mxu1 %vm1591_vm6, %v7872_v49 }
0x1264   :  { %2754 = vmatpush.msra.mxu0 %v8322_v34 }
0x1265   :  { %2867 = vmatpush.msra.mxu1 %v7877_v45 }
0x1267   :  { %2868 = vmatpush.msra.mxu1 %v7890_v41 }
0x1269   :  { %2869 = vmatpush.msra.mxu1 %v7914_v30 }
0x126b   :  { %2870 = vmatpush.msra.mxu1 %v7936_v0 }
0x126d   :  { %2871 = vmatpush.msra.mxu1 %v7955_v57 }
0x12c9   :  { %v8330_v22 = vpop.f32.mrf.mxu0 }
0x12cf   :  { %v2319_v49 = vpop.f32.mrf.mxu3 }
0x12d1   :  { %v2370_v27 = vpop.f32.mrf.mxu1 }
0x12d2   :  { %v2371_v3 = vadd.f32 %v2370_v27, %v2319_v49  ;;  %v2469_v42 = vpop.f32.mrf.mxu0 }
0x12d3   :  { %v2494_v44 = vrot.slane %v2469_v42, 5 }
0x12d4   :  { %v2393_v38 = vadd.f32 %v2371_v3, %v8098_v48 }
0x12d5   :  { %v2498_v47 = vadd.f32 %v2494_v44, %v7777_v10 }
0x12d6   :  { %6335 = vtanh.f32 %v2393_v38  ;;  %v6009_v11 = vmul.f32 -1.442695, %v2393_v38 }
0x12d7   :  { %6337 = vtanh.f32 %v2498_v47  ;;  %v6015_v30 = vmul.f32 -1.442695, %v2498_v47  ;;  %v2390_v15 = vpop.f32.mrf.mxu3 }
0x12d8   :  { %v2391_v42 = vadd.f32 %v2390_v15, %v8330_v22  ;;  %v8386_v15 = vld [vmem:[%s9873_s6 + $0xb8] sm:$0xff] }
0x12d9   :  { %6339 = vpow2.f32 %v6015_v30  ;;  %v2489_v44 = vpop.f32.mrf.mxu1 }
0x12da   :  { %v2394_v38 = vadd.f32 %v2391_v42, %v8125_v52  ;;  %v2495_v47 = vrot.slane %v2489_v44, 5  ;;  %v8392_v42 = vld [vmem:[%s9873_s6 + $0xa0] sm:$0xff]  ;;  %v8398_v44 = vld [vmem:[%s9873_s6 + $0xa8] sm:$0xff] }
0x12dc   :  { %v6336_v45 = vpop.eup %6335 }
0x12dd   :  { %v6338_v41 = vpop.eup %6337  ;;  %2436 = vrot.lane.b32.xlu1 %v6336_v45, %s6754_s22  ;;  %v6010_v45 = vmul.f32 -1.442695, %v2394_v38 }
0x12de   :  { %2544 = vrot.lane.b32.xlu2 %v6338_v41, %s6754_s22  ;;  %v2499_v41 = vadd.f32 %v2495_v47, %v7852_v37 }
0x12df   :  { %v6340_v0 = vpop.eup %6339 }
0x12e0   :  { %v2503_v57 = vadd.f32 1.0, %v6340_v0 }
0x12e2   :  { %6341 = vrcp.f32 %v2503_v57  ;;  %v2515_v23 = vand.u32 2147483648, %v2503_v57  ;;  %vm2509_vm11 = vweird.f32 %v2503_v57  ;;  %v2513_v32 = vand.u32 2147483647, %v2503_v57 }
0x12e3   :  { %6343 = vpow2.f32 %v6009_v11 }
0x12e4   :  { %v2516_v13 = vor.u32 1.1754944e-38, %v2515_v23  ;;  %vm2514_vm1 = vcmp.eq.f32.partialorder %v2513_v32, 8.507059e+37 }
0x12e8   :  { %v6342_v18 = vpop.eup %6341 }
0x12e9   :  { %v2505_v28 = vmul.f32 %v6342_v18, %v2503_v57  ;;  %v6344_v50 = vpop.eup %6343  ;;  %vm2510_vm10 = vweird.f32 %v6342_v18 }
0x12ea   :  { %v2398_v8 = vadd.f32 1.0, %v6344_v50  ;;  %vm2511_vm13 = vmor %vm2509_vm11, %vm2510_vm10 }
0x12eb   :  { %v2506_v33 = vsub.f32 1.0, %v2505_v28 }
0x12ec   :  { %6345 = vrcp.f32 %v2398_v8  ;;  %v2410_v51 = vand.u32 2147483648, %v2398_v8  ;;  %vm2404_vm15 = vweird.f32 %v2398_v8  ;;  %v2408_v24 = vand.u32 2147483647, %v2398_v8 }
0x12ed   :  { %v2507_v61 = vmul.f32 %v6342_v18, %v2506_v33 }
0x12ee   :  { %v2411_v1 = vor.u32 1.1754944e-38, %v2410_v51  ;;  %vm2409_vm12 = vcmp.eq.f32.partialorder %v2408_v24, 8.507059e+37 }
0x12ef   :  { %v2508_v35 = vadd.f32 %v6342_v18, %v2507_v61 }
0x12f1   :  { %v2512_v9 = vsel %vm2511_vm13, %v6342_v18, %v2508_v35 }
0x12f2   :  { %v8336_v7 = vsel %vm2514_vm1, %v2516_v13, %v2512_v9  ;;  %v6346_v56 = vpop.eup %6345 }
0x12f3   :  { %v2400_v39 = vmul.f32 %v6346_v56, %v2398_v8  ;;  %vm2405_vm14 = vweird.f32 %v6346_v56  ;;  %v2542_v40 = vmul.f32 %v2540_v5, %v8336_v7 }
0x12f4   :  { %vm2406_vm4 = vmor %vm2404_vm15, %vm2405_vm14 }
0x12f5   :  { %v2401_v62 = vsub.f32 1.0, %v2400_v39 }
0x12f7   :  { %v2402_v2 = vmul.f32 %v6346_v56, %v2401_v62 }
0x12f9   :  { %v2403_v16 = vadd.f32 %v6346_v56, %v2402_v2 }
0x12fb   :  { %v2407_v6 = vsel %vm2406_vm4, %v6346_v56, %v2403_v16 }
0x12fc   :  { %v2412_v46 = vsel %vm2409_vm12, %v2411_v1, %v2407_v6 }
0x12fd   :  { %v2434_v54 = vmul.f32 %v2412_v46, %v8201_v4  ;;  %v6016_v4 = vmul.f32 -1.442695, %v2499_v41  ;;  %v8405_v41 = vld [vmem:[%s9873_s6 + $0x90] sm:$0xff] }
0x1338   :  { %v2545_v59 = vpop.permute.xlu2 %2544 }
0x1339   :  { %v2547_v25 = vmul.f32 %v2545_v59, %v8336_v7 }
0x133b   :  { %2549 = vrot.lane.b32.xlu1 %v2547_v25, %s6755_s15 }
0x134f   :  { %v2437_v55 = vpop.permute.xlu1 %2436 }
0x1350   :  { %v2439_v58 = vmul.f32 %v2437_v55, %v2412_v46 }
0x1352   :  { %2441 = vrot.lane.b32.xlu0 %v2439_v58, %s6755_s15 }
0x13ad   :  { %v2550_v43 = vpop.permute.xlu1 %2549 }
0x13ae   :  { %v8343_v53 = vadd.f32 %v2550_v43, %v2542_v40 }
0x13b0   :  { %6347 = vtanh.f32 %v8343_v53 }
0x13b6   :  { %v6348_v17 = vpop.eup %6347 }
0x13b7   :  { %2555 = vrot.lane.b32.xlu0 %v6348_v17, %s6756_s18 }
0x13c4   :  { %v2442_v49 = vpop.permute.xlu0 %2441 }
0x13c5   :  { %v8348_v27 = vadd.f32 %v2442_v49, %v2434_v54  ;;  %v8373_v49 = vld [vmem:[%s9873_s6 + $0xc8] sm:$0x3] }
0x13c7   :  { %6349 = vtanh.f32 %v8348_v27 }
0x13c8   :  { %6351 = vpow2.f32 %v6010_v45 }
0x13c9   :  { %6353 = vpow2.f32 %v6016_v4  ;;  %v8411_v4 = vld [vmem:[%s9873_s6 + $0x98] sm:$0xff] }
0x13cd   :  { %v6350_v3 = vpop.eup %6349 }
0x13ce   :  { %2447 = vrot.lane.b32.xlu2 %v6350_v3, %s6756_s18  ;;  %v6352_v30 = vpop.eup %6351  ;;  %v8380_v3 = vld [vmem:[%s9873_s6 + $0xb0] sm:$0xff] }
0x13cf   :  { %v2418_v0 = vadd.f32 1.0, %v6352_v30  ;;  %v6354_v57 = vpop.eup %6353  ;;  %v8425_v30 = vld [vmem:[%s9873_s6 + $0x80] sm:$0xff] }
0x13d0   :  { %v2523_v18 = vadd.f32 1.0, %v6354_v57  ;;  %v8439_v57 = vld [vmem:[%s9873_s6 + $0x70] sm:$0xff] }
0x13d1   :  { %6355 = vrcp.f32 %v2418_v0  ;;  %v2430_v32 = vand.u32 2147483648, %v2418_v0  ;;  %vm2424_vm2 = vweird.f32 %v2418_v0  ;;  %v2428_v9 = vand.u32 2147483647, %v2418_v0 }
0x13d2   :  { %6357 = vrcp.f32 %v2523_v18  ;;  %v2535_v56 = vand.u32 2147483648, %v2523_v18  ;;  %vm2529_vm9 = vweird.f32 %v2523_v18  ;;  %v2533_v39 = vand.u32 2147483647, %v2523_v18 }
0x13d3   :  { %v2431_v25 = vor.u32 1.1754944e-38, %v2430_v32  ;;  %vm2429_vm10 = vcmp.eq.f32.partialorder %v2428_v9, 8.507059e+37  ;;  %v8515_v32 = vld [vmem:[%s9873_s6 + $0xe8] sm:$0xff]  ;;  %v8521_v9 = vld [vmem:[%s9873_s6 + $0xd0] sm:$0xff] }
0x13d4   :  { %v2536_v1 = vor.u32 1.1754944e-38, %v2535_v56  ;;  %vm2534_vm13 = vcmp.eq.f32.partialorder %v2533_v39, 8.507059e+37 }
0x13d7   :  { %v6356_v11 = vpop.eup %6355 }
0x13d8   :  { %v2420_v28 = vmul.f32 %v6356_v11, %v2418_v0  ;;  %v6358_v33 = vpop.eup %6357  ;;  %vm2425_vm3 = vweird.f32 %v6356_v11  ;;  %v8431_v0 = vld [vmem:[%s9873_s6 + $0x88] sm:$0xff] }
0x13d9   :  { %v2525_v22 = vmul.f32 %v6358_v33, %v2523_v18  ;;  %vm2426_vm5 = vmor %vm2424_vm2, %vm2425_vm3  ;;  %vm2530_vm7 = vweird.f32 %v6358_v33  ;;  %v8445_v18 = vld [vmem:[%s9873_s6 + $0x78] sm:$0xff] }
0x13da   :  { %v2421_v50 = vsub.f32 1.0, %v2420_v28  ;;  %vm2531_vm11 = vmor %vm2529_vm9, %vm2530_vm7  ;;  %v8460_v28 = vld [vmem:[%s9873_s6 + $0x128] sm:$0x3] }
0x13db   :  { %v2526_v61 = vsub.f32 1.0, %v2525_v22  ;;  %v8475_v22 = vld [vmem:[%s9873_s6 + $0x118] sm:$0xff] }
0x13dc   :  { %v2422_v8 = vmul.f32 %v6356_v11, %v2421_v50  ;;  %v8483_v50 = vld [vmem:[%s9873_s6 + $0x100] sm:$0xff] }
0x13dd   :  { %v2527_v35 = vmul.f32 %v6358_v33, %v2526_v61  ;;  %v8489_v61 = vld [vmem:[%s9873_s6 + $0x108] sm:$0xff] }
0x13de   :  { %v2423_v23 = vadd.f32 %v6356_v11, %v2422_v8  ;;  %v8497_v8 = vld [vmem:[%s9873_s6 + $0xf0] sm:$0xff] }
0x13df   :  { %v2528_v13 = vadd.f32 %v6358_v33, %v2527_v35  ;;  %v8503_v35 = vld [vmem:[%s9873_s6 + $0xf8] sm:$0xff] }
0x13e0   :  { %v2427_v59 = vsel %vm2426_vm5, %v6356_v11, %v2423_v23  ;;  %v8453_v11 = vld [vmem:[%s9873_s6 + $0x120] sm:$0x3] }
0x13e1   :  { %v2432_v62 = vsel %vm2429_vm10, %v2431_v25, %v2427_v59  ;;  %v2532_v16 = vsel %vm2531_vm11, %v6358_v33, %v2528_v13  ;;  %v8469_v33 = vld [vmem:[%s9873_s6 + $0x110] sm:$0xff]  ;;  %v8509_v23 = vld [vmem:[%s9873_s6 + $0xe0] sm:$0xff]  ;;  %v8527_v13 = vld [vmem:[%s9873_s6 + $0xd8] sm:$0xff] }
0x13e2   :  { %v2537_v58 = vsel %vm2534_vm13, %v2536_v1, %v2532_v16 }
0x1428   :  { %v2448_v2 = vpop.permute.xlu2 %2447 }
0x1429   :  { %v2556_v51 = vpop.permute.xlu0 %2555  ;;  %v2450_v24 = vmul.f32 %v2448_v2, %v2412_v46  ;;  %v2451_v6 = vmul.f32 %v2448_v2, %v2432_v62 }
0x142a   :  { %v2558_v55 = vmul.f32 %v2556_v51, %v8336_v7  ;;  %v2559_v40 = vmul.f32 %v2556_v51, %v2537_v58  ;;  %v8366_v7 = vld [vmem:[%s9873_s6 + $0xc0] sm:$0x3] }
0x142b   :  { %2564 = vrot.lane.b32.xlu2 %v2451_v6, %s6757_s16  ;;  %2562 = vrot.lane.b32.xlu1 %v2450_v24, %s6757_s16 }
0x142c   :  { %v2611_v5 = vrot.slane %v2558_v55, 3  ;;  %v2612_v43 = vrot.slane %v2559_v40, 3 }
0x142e   :  { %2613 = vrot.lane.b32.xlu0 %v2611_v5, %s6757_s16 }
0x1433   :  { %2615 = vrot.lane.b32.xlu1 %v2612_v43, %s6757_s16 }
0x1485   :  { %v2565_v17 = vpop.permute.xlu2 %2564 }
0x149d   :  { %v2563_v54 = vpop.permute.xlu1 %2562 }
0x149e   :  { %v2566_v46 = vsel %vm1584_vm8, %v2563_v54, %v2565_v17 }
0x149f   :  { %6018 = vmatmul.msk.f32.vlgmr.msrb.gmra.mxu3 %vm1644_vm0, %v2566_v46  ;;  %6020 = vmatmul.msk.f32.vlgmr.msrb.gmra.mxu0 %vm1644_vm0, %v2566_v46 }
0x14a0   :  { %6037 = vmatpush.msk.msrb.mxu3 %vm1591_vm6, %v8366_v7  ;;  %6039 = vmatpush.msk.msrb.mxu0 %vm1591_vm6, %v8373_v49  ;;  %v2614_v38 = vpop.permute.xlu0 %2613 }
0x14a2   :  { %2898 = vmatpush.msrb.mxu3 %v8380_v3  ;;  %2918 = vmatpush.msrb.mxu0 %v8386_v15 }
0x14a4   :  { %2899 = vmatpush.msrb.mxu3 %v8392_v42  ;;  %2919 = vmatpush.msrb.mxu0 %v8398_v44 }
0x14a5   :  { %v2616_v47 = vpop.permute.xlu1 %2615 }
0x14a6   :  { %v2617_v45 = vsel %vm1584_vm8, %v2614_v38, %v2616_v47  ;;  %2900 = vmatpush.msrb.mxu3 %v8405_v41  ;;  %2920 = vmatpush.msrb.mxu0 %v8411_v4 }
0x14a7   :  { %6022 = vmatmul.msk.f32.vlgmr.msra.gmra.mxu2 %vm1644_vm0, %v2617_v45  ;;  %6024 = vmatmul.msk.f32.vlgmr.msrb.gmra.mxu1 %vm1644_vm0, %v2617_v45 }
0x14a8   :  { %6028 = vmatmul.msk.f32.vlgmr.msra.gmra.mxu3 %vm1644_vm0, %v2617_v45  ;;  %6030 = vmatmul.msk.f32.vlgmr.msra.gmra.mxu0 %vm1644_vm0, %v2617_v45 }
0x14a9   :  { %6043 = vmatpush.msk.msra.mxu2 %vm1591_vm6, %v8246_v36  ;;  %6045 = vmatpush.msk.msrb.mxu1 %vm1591_vm6, %v8253_v60 }
0x14aa   :  { %2901 = vmatpush.msrb.mxu3 %v8425_v30  ;;  %2921 = vmatpush.msrb.mxu0 %v8431_v0 }
0x14ab   :  { %2997 = vmatpush.msra.mxu2 %v8261_v29  ;;  %3017 = vmatpush.msrb.mxu1 %v8267_v31 }
0x14ac   :  { %2902 = vmatpush.msrb.mxu3 %v8439_v57  ;;  %2922 = vmatpush.msrb.mxu0 %v8445_v18 }
0x14ad   :  { %2998 = vmatpush.msra.mxu2 %v8275_v12  ;;  %3018 = vmatpush.msrb.mxu1 %v8281_v19 }
0x14ae   :  { %6049 = vmatpush.msk.msra.mxu3 %vm1591_vm6, %v8453_v11  ;;  %6051 = vmatpush.msk.msra.mxu0 %vm1591_vm6, %v8460_v28 }
0x14af   :  { %2999 = vmatpush.msra.mxu2 %v8288_v20  ;;  %3019 = vmatpush.msrb.mxu1 %v8294_v21 }
0x14b0   :  { %3114 = vmatpush.msra.mxu3 %v8469_v33  ;;  %3134 = vmatpush.msra.mxu0 %v8475_v22 }
0x14b1   :  { %3000 = vmatpush.msra.mxu2 %v8301_v63  ;;  %3020 = vmatpush.msrb.mxu1 %v8307_v26 }
0x14b2   :  { %3115 = vmatpush.msra.mxu3 %v8483_v50  ;;  %3135 = vmatpush.msra.mxu0 %v8489_v61 }
0x14b3   :  { %3001 = vmatpush.msra.mxu2 %v8314_v14  ;;  %3021 = vmatpush.msrb.mxu1 %v8322_v34 }
0x14b4   :  { %3116 = vmatpush.msra.mxu3 %v8497_v8  ;;  %3136 = vmatpush.msra.mxu0 %v8503_v35 }
0x14b6   :  { %3117 = vmatpush.msra.mxu3 %v8509_v23  ;;  %3137 = vmatpush.msra.mxu0 %v8515_v32 }
0x14b8   :  { %3118 = vmatpush.msra.mxu3 %v8521_v9  ;;  %3138 = vmatpush.msra.mxu0 %v8527_v13 }
0x1522   :  { %v2586_v59 = vpop.f32.mrf.mxu3 }
0x152a   :  { %v2637_v56 = vpop.f32.mrf.mxu2 }
0x152b   :  { %v2638_v25 = vadd.f32 %v2637_v56, %v2586_v59  ;;  %v2736_v39 = vpop.f32.mrf.mxu3 }
0x152c   :  { %v2761_v62 = vrot.slane %v2736_v39, 4 }
0x152d   :  { %v2660_v2 = vadd.f32 %v2638_v25, %v8098_v48 }
0x152e   :  { %v2765_v16 = vadd.f32 %v2761_v62, %v7777_v10 }
0x152f   :  { %6359 = vtanh.f32 %v2660_v2  ;;  %v6025_v6 = vmul.f32 -1.442695, %v2660_v2 }
0x1530   :  { %6361 = vtanh.f32 %v2765_v16  ;;  %v6031_v5 = vmul.f32 -1.442695, %v2765_v16 }
0x1531   :  { %6363 = vpow2.f32 %v6025_v6 }
0x1535   :  { %v6360_v51 = vpop.eup %6359 }
0x1536   :  { %v6362_v24 = vpop.eup %6361  ;;  %2703 = vrot.lane.b32.xlu2 %v6360_v51, %s6754_s22 }
0x1537   :  { %2811 = vrot.lane.b32.xlu0 %v6362_v24, %s6754_s22  ;;  %v6364_v1 = vpop.eup %6363 }
0x1538   :  { %v2665_v55 = vadd.f32 1.0, %v6364_v1 }
0x153a   :  { %6365 = vrcp.f32 %v2665_v55  ;;  %v2677_v47 = vand.u32 2147483648, %v2665_v55  ;;  %vm2671_vm14 = vweird.f32 %v2665_v55  ;;  %v2675_v45 = vand.u32 2147483647, %v2665_v55 }
0x153b   :  { %6367 = vpow2.f32 %v6031_v5 }
0x153c   :  { %v2678_v56 = vor.u32 1.1754944e-38, %v2677_v47  ;;  %vm2676_vm4 = vcmp.eq.f32.partialorder %v2675_v45, 8.507059e+37 }
0x1540   :  { %v6366_v58 = vpop.eup %6365 }
0x1541   :  { %v2667_v40 = vmul.f32 %v6366_v58, %v2665_v55  ;;  %v6368_v54 = vpop.eup %6367  ;;  %vm2672_vm1 = vweird.f32 %v6366_v58 }
0x1542   :  { %v2770_v46 = vadd.f32 1.0, %v6368_v54  ;;  %vm2673_vm15 = vmor %vm2671_vm14, %vm2672_vm1  ;;  %v2807_v54 = vrot.slane %v8343_v53, 7  ;;  %v2606_v53 = vpop.f32.mrf.mxu0 }
0x1543   :  { %v2668_v43 = vsub.f32 1.0, %v2667_v40 }
0x1544   :  { %6369 = vrcp.f32 %v2770_v46  ;;  %v2782_v1 = vand.u32 2147483648, %v2770_v46  ;;  %vm2776_vm3 = vweird.f32 %v2770_v46  ;;  %v2780_v55 = vand.u32 2147483647, %v2770_v46 }
0x1545   :  { %v2669_v17 = vmul.f32 %v6366_v58, %v2668_v43 }
0x1546   :  { %v2783_v5 = vor.u32 1.1754944e-38, %v2782_v1  ;;  %vm2781_vm5 = vcmp.eq.f32.partialorder %v2780_v55, 8.507059e+37 }
0x1547   :  { %v2670_v38 = vadd.f32 %v6366_v58, %v2669_v17 }
0x1549   :  { %v2674_v59 = vsel %vm2673_vm15, %v6366_v58, %v2670_v38 }
0x154a   :  { %v8534_v39 = vsel %vm2676_vm4, %v2678_v56, %v2674_v59  ;;  %v6370_v2 = vpop.eup %6369 }
0x154b   :  { %v2772_v16 = vmul.f32 %v6370_v2, %v2770_v46  ;;  %vm2777_vm12 = vweird.f32 %v6370_v2  ;;  %v2701_v38 = vmul.f32 %v8534_v39, %v8348_v27  ;;  %v2657_v27 = vpop.f32.mrf.mxu1 }
0x154c   :  { %vm2778_vm2 = vmor %vm2776_vm3, %vm2777_vm12 }
0x154d   :  { %v2773_v51 = vsub.f32 1.0, %v2772_v16  ;;  %v2756_v16 = vpop.f32.mrf.mxu0 }
0x154f   :  { %v2774_v24 = vmul.f32 %v6370_v2, %v2773_v51 }
0x1551   :  { %v2775_v6 = vadd.f32 %v6370_v2, %v2774_v24  ;;  %v2762_v24 = vrot.slane %v2756_v16, 4 }
0x1553   :  { %v2779_v58 = vsel %vm2778_vm2, %v6370_v2, %v2775_v6  ;;  %v2658_v2 = vadd.f32 %v2657_v27, %v2606_v53  ;;  %v2766_v1 = vadd.f32 %v2762_v24, %v7852_v37 }
0x1554   :  { %v8538_v43 = vsel %vm2781_vm5, %v2783_v5, %v2779_v58 }
0x1555   :  { %v2809_v47 = vmul.f32 %v2807_v54, %v8538_v43  ;;  %v2661_v51 = vadd.f32 %v2658_v2, %v8125_v52  ;;  %v6032_v55 = vmul.f32 -1.442695, %v2766_v1 }
0x1557   :  { %v6026_v6 = vmul.f32 -1.442695, %v2661_v51 }
0x1590   :  { %v2704_v25 = vpop.permute.xlu2 %2703 }
0x1591   :  { %v2706_v62 = vmul.f32 %v2704_v25, %v8534_v39 }
0x1593   :  { %2708 = vrot.lane.b32.xlu1 %v2706_v62, %s6755_s15 }
0x15a9   :  { %v2812_v40 = vpop.permute.xlu0 %2811 }
0x15aa   :  { %v2814_v17 = vmul.f32 %v2812_v40, %v8538_v43 }
0x15ac   :  { %2816 = vrot.lane.b32.xlu2 %v2814_v17, %s6755_s15 }
0x1605   :  { %v2709_v45 = vpop.permute.xlu1 %2708 }
0x1606   :  { %v2817_v46 = vpop.permute.xlu2 %2816  ;;  %v8546_v59 = vadd.f32 %v2709_v45, %v2701_v38 }
0x1607   :  { %v8548_v56 = vadd.f32 %v2817_v46, %v2809_v47 }
0x1608   :  { %6371 = vtanh.f32 %v8546_v59 }
0x1609   :  { %6373 = vtanh.f32 %v8548_v56 }
0x160a   :  { %6375 = vpow2.f32 %v6026_v6 }
0x160b   :  { %6377 = vpow2.f32 %v6032_v55 }
0x160e   :  { %v6372_v25 = vpop.eup %6371 }
0x160f   :  { %v6374_v62 = vpop.eup %6373  ;;  %2714 = vrot.lane.b32.xlu0 %v6372_v25, %s6756_s18 }
0x1610   :  { %2822 = vrot.lane.b32.xlu1 %v6374_v62, %s6756_s18  ;;  %v6376_v58 = vpop.eup %6375 }
0x1611   :  { %v2685_v5 = vadd.f32 1.0, %v6376_v58  ;;  %v6378_v40 = vpop.eup %6377 }
0x1612   :  { %v2790_v17 = vadd.f32 1.0, %v6378_v40 }
0x1613   :  { %6379 = vrcp.f32 %v2685_v5  ;;  %v2697_v2 = vand.u32 2147483648, %v2685_v5  ;;  %vm2691_vm9 = vweird.f32 %v2685_v5  ;;  %v2695_v16 = vand.u32 2147483647, %v2685_v5 }
0x1614   :  { %6381 = vrcp.f32 %v2790_v17  ;;  %v2802_v6 = vand.u32 2147483648, %v2790_v17  ;;  %vm2796_vm13 = vweird.f32 %v2790_v17  ;;  %v2800_v55 = vand.u32 2147483647, %v2790_v17 }
0x1615   :  { %v2698_v1 = vor.u32 1.1754944e-38, %v2697_v2  ;;  %vm2696_vm1 = vcmp.eq.f32.partialorder %v2695_v16, 8.507059e+37 }
0x1616   :  { %vm2801_vm15 = vcmp.eq.f32.partialorder %v2800_v55, 8.507059e+37 }
0x1619   :  { %v6380_v54 = vpop.eup %6379 }
0x161a   :  { %v2687_v38 = vmul.f32 %v6380_v54, %v2685_v5  ;;  %v6382_v47 = vpop.eup %6381  ;;  %vm2692_vm7 = vweird.f32 %v6380_v54 }
0x161b   :  { %v2792_v45 = vmul.f32 %v6382_v47, %v2790_v17  ;;  %vm2693_vm10 = vmor %vm2691_vm9, %vm2692_vm7  ;;  %vm2797_vm11 = vweird.f32 %v6382_v47 }
0x161c   :  { %v2688_v46 = vsub.f32 1.0, %v2687_v38  ;;  %vm2798_vm14 = vmor %vm2796_vm13, %vm2797_vm11 }
0x161d   :  { %v2793_v25 = vsub.f32 1.0, %v2792_v45 }
0x161e   :  { %v2689_v62 = vmul.f32 %v6380_v54, %v2688_v46 }
0x161f   :  { %v2794_v53 = vmul.f32 %v6382_v47, %v2793_v25 }
0x1620   :  { %v2690_v27 = vadd.f32 %v6380_v54, %v2689_v62  ;;  %v2803_v62 = vor.u32 1.1754944e-38, %v2802_v6 }
0x1621   :  { %v2795_v51 = vadd.f32 %v6382_v47, %v2794_v53 }
0x1622   :  { %v2694_v24 = vsel %vm2693_vm10, %v6380_v54, %v2690_v27 }
0x1623   :  { %v2699_v58 = vsel %vm2696_vm1, %v2698_v1, %v2694_v24  ;;  %v2799_v38 = vsel %vm2798_vm14, %v6382_v47, %v2795_v51 }
0x1624   :  { %v2804_v54 = vsel %vm2801_vm15, %v2803_v62, %v2799_v38 }
0x1681   :  { %v2715_v40 = vpop.permute.xlu0 %2714 }
0x1682   :  { %v2823_v45 = vpop.permute.xlu1 %2822  ;;  %v2717_v46 = vmul.f32 %v2715_v40, %v8534_v39  ;;  %v2718_v25 = vmul.f32 %v2715_v40, %v2699_v58 }
0x1683   :  { %v2825_v5 = vmul.f32 %v2823_v45, %v8538_v43  ;;  %v2826_v17 = vmul.f32 %v2823_v45, %v2804_v54 }
0x1684   :  { %2831 = vrot.lane.b32.xlu0 %v2718_v25, %s6757_s16  ;;  %2829 = vrot.lane.b32.xlu2 %v2717_v46, %s6757_s16 }
0x1685   :  { %v2878_v53 = vrot.slane %v2825_v5, 4  ;;  %v2879_v27 = vrot.slane %v2826_v17, 4 }
0x1687   :  { %2880 = vrot.lane.b32.xlu1 %v2878_v53, %s6757_s16 }
0x168c   :  { %2882 = vrot.lane.b32.xlu2 %v2879_v27, %s6757_s16 }
0x16de   :  { %v2830_v47 = vpop.permute.xlu2 %2829 }
0x16e6   :  { %v2883_v43 = vpop.permute.xlu2 %2882 }
0x16f6   :  { %v2832_v2 = vpop.permute.xlu0 %2831 }
0x16f7   :  { %v2833_v39 = vsel %vm1584_vm8, %v2830_v47, %v2832_v2 }
0x16f8   :  { %6034 = vmatmul.msk.f32.vlgmr.msrb.gmra.mxu2 %vm1644_vm0, %v2833_v39  ;;  %6036 = vmatmul.msk.f32.vlgmr.msra.gmra.mxu1 %vm1644_vm0, %v2833_v39 }
0x16f9   :  { %v2881_v16 = vpop.permute.xlu1 %2880  ;;  %6053 = vmatpush.msk.msrb.mxu2 %vm1591_vm6, %v8366_v7  ;;  %6055 = vmatpush.msk.msra.mxu1 %vm1591_vm6, %v8373_v49 }
0x16fa   :  { %v2884_v51 = vsel %vm1584_vm8, %v2881_v16, %v2883_v43 }
0x16fb   :  { %6038 = vmatmul.msk.f32.vlgmr.msrb.gmra.mxu3 %vm1644_vm0, %v2884_v51  ;;  %6040 = vmatmul.msk.f32.vlgmr.msrb.gmra.mxu0 %vm1644_vm0, %v2884_v51 }
0x16fc   :  { %6059 = vmatpush.msk.msrb.mxu3 %vm1591_vm6, %v8246_v36  ;;  %6061 = vmatpush.msk.msrb.mxu0 %vm1591_vm6, %v8253_v60 }
0x16fd   :  { %3165 = vmatpush.msrb.mxu2 %v8380_v3  ;;  %3185 = vmatpush.msra.mxu1 %v8386_v15 }
0x16fe   :  { %3264 = vmatpush.msrb.mxu3 %v8261_v29  ;;  %3284 = vmatpush.msrb.mxu0 %v8267_v31 }
0x16ff   :  { %3166 = vmatpush.msrb.mxu2 %v8392_v42  ;;  %3186 = vmatpush.msra.mxu1 %v8398_v44 }
0x1700   :  { %6044 = vmatmul.msk.f32.vlgmr.msra.gmra.mxu2 %vm1644_vm0, %v2884_v51  ;;  %6046 = vmatmul.msk.f32.vlgmr.msrb.gmra.mxu1 %vm1644_vm0, %v2884_v51 }
0x1701   :  { %3265 = vmatpush.msrb.mxu3 %v8275_v12  ;;  %3285 = vmatpush.msrb.mxu0 %v8281_v19 }
0x1702   :  { %3167 = vmatpush.msrb.mxu2 %v8405_v41  ;;  %3187 = vmatpush.msra.mxu1 %v8411_v4 }
0x1703   :  { %3266 = vmatpush.msrb.mxu3 %v8288_v20  ;;  %3286 = vmatpush.msrb.mxu0 %v8294_v21 }
0x1704   :  { %3168 = vmatpush.msrb.mxu2 %v8425_v30  ;;  %3188 = vmatpush.msra.mxu1 %v8431_v0 }
0x1705   :  { %3267 = vmatpush.msrb.mxu3 %v8301_v63  ;;  %3287 = vmatpush.msrb.mxu0 %v8307_v26 }
0x1706   :  { %3169 = vmatpush.msrb.mxu2 %v8439_v57  ;;  %3189 = vmatpush.msra.mxu1 %v8445_v18 }
0x1707   :  { %3268 = vmatpush.msrb.mxu3 %v8314_v14  ;;  %3288 = vmatpush.msrb.mxu0 %v8322_v34 }
0x1708   :  { %6065 = vmatpush.msk.msra.mxu2 %vm1591_vm6, %v8453_v11  ;;  %6067 = vmatpush.msk.msrb.mxu1 %vm1591_vm6, %v8460_v28 }
0x170a   :  { %3381 = vmatpush.msra.mxu2 %v8469_v33  ;;  %3401 = vmatpush.msrb.mxu1 %v8475_v22 }
0x170c   :  { %3382 = vmatpush.msra.mxu2 %v8483_v50  ;;  %3402 = vmatpush.msrb.mxu1 %v8489_v61 }
0x170e   :  { %3383 = vmatpush.msra.mxu2 %v8497_v8  ;;  %3403 = vmatpush.msrb.mxu1 %v8503_v35 }
0x1710   :  { %3384 = vmatpush.msra.mxu2 %v8509_v23  ;;  %3404 = vmatpush.msrb.mxu1 %v8515_v32 }
0x1712   :  { %3385 = vmatpush.msra.mxu2 %v8521_v9  ;;  %3405 = vmatpush.msrb.mxu1 %v8527_v13 }
0x177b   :  { %v2853_v36 = vpop.f32.mrf.mxu2 }
0x177e   :  { %v2904_v60 = vpop.f32.mrf.mxu3 }
0x177f   :  { %v2905_v29 = vadd.f32 %v2904_v60, %v2853_v36 }
0x1781   :  { %v2927_v31 = vadd.f32 %v2905_v29, %v8098_v48 }
0x1783   :  { %6383 = vtanh.f32 %v2927_v31  ;;  %v3003_v12 = vpop.f32.mrf.mxu2  ;;  %v6041_v26 = vmul.f32 -1.442695, %v2927_v31 }
0x1784   :  { %v3028_v19 = vrot.slane %v3003_v12, 3 }
0x1786   :  { %v3032_v20 = vadd.f32 %v3028_v19, %v7777_v10 }
0x1788   :  { %6385 = vtanh.f32 %v3032_v20  ;;  %v6047_v14 = vmul.f32 -1.442695, %v3032_v20 }
0x1789   :  { %v6384_v21 = vpop.eup %6383  ;;  %6387 = vpow2.f32 %v6041_v26  ;;  %v3074_v26 = vrot.slane %v8548_v56, 7 }
0x178a   :  { %2970 = vrot.lane.b32.xlu0 %v6384_v21, %s6754_s22  ;;  %6389 = vpow2.f32 %v6047_v14 }
0x178e   :  { %v6386_v63 = vpop.eup %6385 }
0x178f   :  { %3078 = vrot.lane.b32.xlu1 %v6386_v63, %s6754_s22  ;;  %v6388_v34 = vpop.eup %6387 }
0x1790   :  { %v2932_v24 = vadd.f32 1.0, %v6388_v34  ;;  %v6390_v6 = vpop.eup %6389 }
0x1791   :  { %v3037_v1 = vadd.f32 1.0, %v6390_v6 }
0x1792   :  { %6391 = vrcp.f32 %v2932_v24  ;;  %v2944_v5 = vand.u32 2147483648, %v2932_v24  ;;  %vm2938_vm12 = vweird.f32 %v2932_v24  ;;  %v2942_v54 = vand.u32 2147483647, %v2932_v24 }
0x1793   :  { %6393 = vrcp.f32 %v3037_v1  ;;  %v3049_v43 = vand.u32 2147483648, %v3037_v1  ;;  %vm3043_vm7 = vweird.f32 %v3037_v1  ;;  %v3047_v51 = vand.u32 2147483647, %v3037_v1 }
0x1794   :  { %v2945_v27 = vor.u32 1.1754944e-38, %v2944_v5  ;;  %vm2943_vm2 = vcmp.eq.f32.partialorder %v2942_v54, 8.507059e+37 }
0x1795   :  { %v3050_v60 = vor.u32 1.1754944e-38, %v3049_v43  ;;  %vm3048_vm10 = vcmp.eq.f32.partialorder %v3047_v51, 8.507059e+37 }
0x1798   :  { %v6392_v55 = vpop.eup %6391 }
0x1799   :  { %v2934_v58 = vmul.f32 %v6392_v55, %v2932_v24  ;;  %v6394_v40 = vpop.eup %6393  ;;  %vm2939_vm4 = vweird.f32 %v6392_v55 }
0x179a   :  { %v3039_v45 = vmul.f32 %v6394_v40, %v3037_v1  ;;  %vm2940_vm3 = vmor %vm2938_vm12, %vm2939_vm4  ;;  %vm3044_vm5 = vweird.f32 %v6394_v40  ;;  %v2924_v1 = vpop.f32.mrf.mxu0 }
0x179b   :  { %v2935_v38 = vsub.f32 1.0, %v2934_v58  ;;  %vm3045_vm9 = vmor %vm3043_vm7, %vm3044_vm5 }
0x179c   :  { %v3040_v25 = vsub.f32 1.0, %v3039_v45 }
0x179d   :  { %v2936_v46 = vmul.f32 %v6392_v55, %v2935_v38 }
0x179e   :  { %v3041_v53 = vmul.f32 %v6394_v40, %v3040_v25 }
0x179f   :  { %v2937_v62 = vadd.f32 %v6392_v55, %v2936_v46 }
0x17a0   :  { %v3042_v47 = vadd.f32 %v6394_v40, %v3041_v53 }
0x17a1   :  { %v2941_v17 = vsel %vm2940_vm3, %v6392_v55, %v2937_v62 }
0x17a2   :  { %v8616_v39 = vsel %vm2943_vm2, %v2945_v27, %v2941_v17  ;;  %v3046_v36 = vsel %vm3045_vm9, %v6394_v40, %v3042_v47 }
0x17a3   :  { %v8620_v31 = vsel %vm3048_vm10, %v3050_v60, %v3046_v36  ;;  %v2968_v19 = vmul.f32 %v8616_v39, %v8546_v59  ;;  %v2873_v59 = vpop.f32.mrf.mxu1 }
0x17a4   :  { %v3076_v14 = vmul.f32 %v3074_v26, %v8620_v31  ;;  %v2925_v55 = vadd.f32 %v2924_v1, %v2873_v59 }
0x17a6   :  { %v2928_v40 = vadd.f32 %v2925_v55, %v8125_v52 }
0x17a8   :  { %v6042_v45 = vmul.f32 -1.442695, %v2928_v40 }
0x17ab   :  { %v3023_v58 = vpop.f32.mrf.mxu1 }
0x17ac   :  { %v3029_v38 = vrot.slane %v3023_v58, 3 }
0x17ae   :  { %v3033_v56 = vadd.f32 %v3029_v38, %v7852_v37 }
0x17b0   :  { %v6048_v46 = vmul.f32 -1.442695, %v3033_v56 }
0x17fc   :  { %v2971_v2 = vpop.permute.xlu0 %2970 }
0x17fd   :  { %v2973_v16 = vmul.f32 %v2971_v2, %v8616_v39 }
0x17ff   :  { %2975 = vrot.lane.b32.xlu2 %v2973_v16, %s6755_s15 }
0x1801   :  { %v3079_v29 = vpop.permute.xlu1 %3078 }
0x1802   :  { %v3081_v12 = vmul.f32 %v3079_v29, %v8620_v31 }
0x1804   :  { %3083 = vrot.lane.b32.xlu0 %v3081_v12, %s6755_s15 }
0x1859   :  { %v2976_v20 = vpop.permute.xlu2 %2975 }
0x185a   :  { %v8626_v21 = vadd.f32 %v2976_v20, %v2968_v19 }
0x185c   :  { %6395 = vtanh.f32 %v8626_v21 }
0x1862   :  { %v6396_v63 = vpop.eup %6395 }
0x1863   :  { %2981 = vrot.lane.b32.xlu1 %v6396_v63, %s6756_s18 }
0x1876   :  { %v3084_v34 = vpop.permute.xlu0 %3083 }
0x1877   :  { %v8632_v24 = vadd.f32 %v3084_v34, %v3076_v14 }
0x1879   :  { %6397 = vtanh.f32 %v8632_v24 }
0x187a   :  { %6399 = vpow2.f32 %v6042_v45 }
0x187b   :  { %6401 = vpow2.f32 %v6048_v46 }
0x187f   :  { %v6398_v6 = vpop.eup %6397 }
0x1880   :  { %3089 = vrot.lane.b32.xlu2 %v6398_v6, %s6756_s18  ;;  %v6400_v25 = vpop.eup %6399 }
0x1881   :  { %v2952_v62 = vadd.f32 1.0, %v6400_v25  ;;  %v6402_v5 = vpop.eup %6401 }
0x1882   :  { %v3057_v54 = vadd.f32 1.0, %v6402_v5 }
0x1883   :  { %6403 = vrcp.f32 %v2952_v62  ;;  %v2964_v36 = vand.u32 2147483648, %v2952_v62  ;;  %vm2958_vm13 = vweird.f32 %v2952_v62  ;;  %v2962_v60 = vand.u32 2147483647, %v2952_v62 }
0x1884   :  { %6405 = vrcp.f32 %v3057_v54  ;;  %v3069_v14 = vand.u32 2147483648, %v3057_v54  ;;  %vm3063_vm4 = vweird.f32 %v3057_v54  ;;  %v3067_v59 = vand.u32 2147483647, %v3057_v54 }
0x1885   :  { %v2965_v19 = vor.u32 1.1754944e-38, %v2964_v36  ;;  %vm2963_vm14 = vcmp.eq.f32.partialorder %v2962_v60, 8.507059e+37 }
0x1886   :  { %v3070_v55 = vor.u32 1.1754944e-38, %v3069_v14  ;;  %vm3068_vm3 = vcmp.eq.f32.partialorder %v3067_v59, 8.507059e+37 }
0x1889   :  { %v6404_v53 = vpop.eup %6403 }
0x188a   :  { %v2954_v17 = vmul.f32 %v6404_v53, %v2952_v62  ;;  %v6406_v27 = vpop.eup %6405  ;;  %vm2959_vm11 = vweird.f32 %v6404_v53 }
0x188b   :  { %v3059_v2 = vmul.f32 %v6406_v27, %v3057_v54  ;;  %vm2960_vm1 = vmor %vm2958_vm13, %vm2959_vm11  ;;  %vm3064_vm15 = vweird.f32 %v6406_v27 }
0x188c   :  { %v2955_v47 = vsub.f32 1.0, %v2954_v17  ;;  %vm3065_vm12 = vmor %vm3063_vm4, %vm3064_vm15 }
0x188d   :  { %v3060_v16 = vsub.f32 1.0, %v3059_v2 }
0x188e   :  { %v2956_v43 = vmul.f32 %v6404_v53, %v2955_v47 }
0x188f   :  { %v3061_v29 = vmul.f32 %v6406_v27, %v3060_v16 }
0x1890   :  { %v2957_v51 = vadd.f32 %v6404_v53, %v2956_v43 }
0x1891   :  { %v3062_v20 = vadd.f32 %v6406_v27, %v3061_v29 }
0x1892   :  { %v2961_v12 = vsel %vm2960_vm1, %v6404_v53, %v2957_v51 }
0x1893   :  { %v2966_v63 = vsel %vm2963_vm14, %v2965_v19, %v2961_v12  ;;  %v3066_v1 = vsel %vm3065_vm12, %v6406_v27, %v3062_v20 }
0x1894   :  { %v3071_v58 = vsel %vm3068_vm3, %v3070_v55, %v3066_v1 }
0x18d5   :  { %v2982_v26 = vpop.permute.xlu1 %2981 }
0x18d6   :  { %v2984_v34 = vmul.f32 %v2982_v26, %v8616_v39  ;;  %v2985_v6 = vmul.f32 %v2982_v26, %v2966_v63 }
0x18d8   :  { %3098 = vrot.lane.b32.xlu1 %v2985_v6, %s6757_s16  ;;  %3096 = vrot.lane.b32.xlu0 %v2984_v34, %s6757_s16 }
0x18da   :  { %v3090_v40 = vpop.permute.xlu2 %3089 }
0x18db   :  { %v3092_v38 = vmul.f32 %v3090_v40, %v8620_v31  ;;  %v3093_v45 = vmul.f32 %v3090_v40, %v3071_v58 }
0x18dd   :  { %v3145_v56 = vrot.slane %v3092_v38, 5  ;;  %v3146_v46 = vrot.slane %v3093_v45, 5 }
0x18df   :  { %3147 = vrot.lane.b32.xlu2 %v3145_v56, %s6757_s16 }
0x18e0   :  { %3149 = vrot.lane.b32.xlu0 %v3146_v46, %s6757_s16  ;;  %v3341_v46 = vrot.slane %v8632_v24, 7 }
0x1939   :  { %v3148_v31 = vpop.permute.xlu2 %3147 }
0x194a   :  { %v3099_v39 = vpop.permute.xlu1 %3098  ;;  %v3097_v25 = vpop.permute.xlu0 %3096 }
0x194b   :  { %v3100_v62 = vsel %vm1584_vm8, %v3097_v25, %v3099_v39 }
0x194c   :  { %6050 = vmatmul.msk.f32.vlgmr.msra.gmra.mxu3 %vm1644_vm0, %v3100_v62  ;;  %6052 = vmatmul.msk.f32.vlgmr.msra.gmra.mxu0 %vm1644_vm0, %v3100_v62 }
0x194d   :  { %6069 = vmatpush.msk.msra.mxu3 %vm1591_vm6, %v8366_v7  ;;  %6071 = vmatpush.msk.msra.mxu0 %vm1591_vm6, %v8373_v49  ;;  %v8665_v7 = vld [vmem:[%s9873_s6 + $0x60] sm:$0x3]  ;;  %v8672_v49 = vld [vmem:[%s9873_s6 + $0x68] sm:$0x3] }
0x194f   :  { %3432 = vmatpush.msra.mxu3 %v8380_v3  ;;  %3452 = vmatpush.msra.mxu0 %v8386_v15  ;;  %v8681_v3 = vld [vmem:[%s9873_s6 + $0x50] sm:$0xff]  ;;  %v8687_v15 = vld [vmem:[%s9873_s6 + $0x58] sm:$0xff] }
0x1951   :  { %3433 = vmatpush.msra.mxu3 %v8392_v42  ;;  %3453 = vmatpush.msra.mxu0 %v8398_v44  ;;  %v8695_v42 = vld [vmem:[%s9873_s6 + $0x40] sm:$0xff]  ;;  %v8701_v44 = vld [vmem:[%s9873_s6 + $0x48] sm:$0xff] }
0x1952   :  { %v3150_v5 = vpop.permute.xlu0 %3149 }
0x1953   :  { %v3151_v54 = vsel %vm1584_vm8, %v3148_v31, %v3150_v5  ;;  %3434 = vmatpush.msra.mxu3 %v8405_v41  ;;  %3454 = vmatpush.msra.mxu0 %v8411_v4  ;;  %v8711_v41 = vld [vmem:[%s9873_s6 + $0x30] sm:$0xff]  ;;  %v8717_v4 = vld [vmem:[%s9873_s6 + $0x38] sm:$0xff] }
0x1954   :  { %6054 = vmatmul.msk.f32.vlgmr.msrb.gmra.mxu2 %vm1644_vm0, %v3151_v54  ;;  %6056 = vmatmul.msk.f32.vlgmr.msra.gmra.mxu1 %vm1644_vm0, %v3151_v54 }
0x1955   :  { %6060 = vmatmul.msk.f32.vlgmr.msrb.gmra.mxu3 %vm1644_vm0, %v3151_v54  ;;  %6062 = vmatmul.msk.f32.vlgmr.msrb.gmra.mxu0 %vm1644_vm0, %v3151_v54 }
0x1956   :  { %6075 = vmatpush.msk.msrb.mxu2 %vm1591_vm6, %v8665_v7  ;;  %6077 = vmatpush.msk.msra.mxu1 %vm1591_vm6, %v8672_v49 }
0x1957   :  { %3435 = vmatpush.msra.mxu3 %v8425_v30  ;;  %3455 = vmatpush.msra.mxu0 %v8431_v0  ;;  %v8725_v30 = vld [vmem:[%s9873_s6 + $0x20] sm:$0xff]  ;;  %v8731_v0 = vld [vmem:[%s9873_s6 + $0x28] sm:$0xff] }
0x1958   :  { %3531 = vmatpush.msrb.mxu2 %v8681_v3  ;;  %3551 = vmatpush.msra.mxu1 %v8687_v15 }
0x1959   :  { %3436 = vmatpush.msra.mxu3 %v8439_v57  ;;  %3456 = vmatpush.msra.mxu0 %v8445_v18  ;;  %v8739_v57 = vld [vmem:[%s9873_s6 + $0x10] sm:$0xff]  ;;  %v8745_v18 = vld [vmem:[%s9873_s6 + $0x18] sm:$0xff] }
0x195a   :  { %3532 = vmatpush.msrb.mxu2 %v8695_v42  ;;  %3552 = vmatpush.msra.mxu1 %v8701_v44 }
0x195b   :  { %6081 = vmatpush.msk.msrb.mxu3 %vm1591_vm6, %v8453_v11  ;;  %6083 = vmatpush.msk.msrb.mxu0 %vm1591_vm6, %v8460_v28 }
0x195c   :  { %3533 = vmatpush.msrb.mxu2 %v8711_v41  ;;  %3553 = vmatpush.msra.mxu1 %v8717_v4 }
0x195d   :  { %3648 = vmatpush.msrb.mxu3 %v8469_v33  ;;  %3668 = vmatpush.msrb.mxu0 %v8475_v22 }
0x195e   :  { %3534 = vmatpush.msrb.mxu2 %v8725_v30  ;;  %3554 = vmatpush.msra.mxu1 %v8731_v0 }
0x195f   :  { %3649 = vmatpush.msrb.mxu3 %v8483_v50  ;;  %3669 = vmatpush.msrb.mxu0 %v8489_v61 }
0x1960   :  { %3535 = vmatpush.msrb.mxu2 %v8739_v57  ;;  %3555 = vmatpush.msra.mxu1 %v8745_v18 }
0x1961   :  { %3650 = vmatpush.msrb.mxu3 %v8497_v8  ;;  %3670 = vmatpush.msrb.mxu0 %v8503_v35 }
0x1963   :  { %3651 = vmatpush.msrb.mxu3 %v8509_v23  ;;  %3671 = vmatpush.msrb.mxu0 %v8515_v32 }
0x1965   :  { %3652 = vmatpush.msrb.mxu3 %v8521_v9  ;;  %3672 = vmatpush.msrb.mxu0 %v8527_v13 }
0x19c9   :  { %v3140_v24 = vpop.f32.mrf.mxu0 }
0x19cf   :  { %v3120_v11 = vpop.f32.mrf.mxu3 }
0x19d7   :  { %v3171_v28 = vpop.f32.mrf.mxu2 }
0x19d8   :  { %v3172_v33 = vadd.f32 %v3171_v28, %v3120_v11  ;;  %v3270_v22 = vpop.f32.mrf.mxu3 }
0x19d9   :  { %v3295_v50 = vrot.slane %v3270_v22, 2 }
0x19da   :  { %v3194_v61 = vadd.f32 %v3172_v33, %v8098_v48  ;;  %v3191_v33 = vpop.f32.mrf.mxu1 }
0x19db   :  { %v3299_v53 = vadd.f32 %v3295_v50, %v7777_v10  ;;  %v3192_v22 = vadd.f32 %v3191_v33, %v3140_v24  ;;  %v3290_v50 = vpop.f32.mrf.mxu0  ;;  %v8801_v24 = vld [vmem:[%s9873_s6 + $0xb0] sm:$0xff]  ;;  %v8807_v33 = vld [vmem:[%s9873_s6 + $0xb8] sm:$0xff] }
0x19dc   :  { %6407 = vtanh.f32 %v3194_v61  ;;  %v6057_v17 = vmul.f32 -1.442695, %v3194_v61 }
0x19dd   :  { %6409 = vtanh.f32 %v3299_v53  ;;  %v6063_v23 = vmul.f32 -1.442695, %v3299_v53  ;;  %v3195_v61 = vadd.f32 %v3192_v22, %v8125_v52  ;;  %v3296_v53 = vrot.slane %v3290_v50, 2  ;;  %v8813_v22 = vld [vmem:[%s9873_s6 + $0xa0] sm:$0xff]  ;;  %v8819_v50 = vld [vmem:[%s9873_s6 + $0xa8] sm:$0xff] }
0x19df   :  { %6411 = vpow2.f32 %v6063_v23 }
0x19e2   :  { %v6408_v8 = vpop.eup %6407 }
0x19e3   :  { %v6410_v35 = vpop.eup %6409  ;;  %3237 = vrot.lane.b32.xlu1 %v6408_v8, %s6754_s22  ;;  %v6058_v8 = vmul.f32 -1.442695, %v3195_v61 }
0x19e4   :  { %3345 = vrot.lane.b32.xlu2 %v6410_v35, %s6754_s22  ;;  %v3300_v35 = vadd.f32 %v3296_v53, %v7852_v37 }
0x19e5   :  { %v6412_v32 = vpop.eup %6411 }
0x19e6   :  { %v3304_v9 = vadd.f32 1.0, %v6412_v32 }
0x19e8   :  { %6413 = vrcp.f32 %v3304_v9  ;;  %v3316_v36 = vand.u32 2147483648, %v3304_v9  ;;  %vm3310_vm5 = vweird.f32 %v3304_v9  ;;  %v3314_v60 = vand.u32 2147483647, %v3304_v9 }
0x19e9   :  { %6415 = vpow2.f32 %v6057_v17 }
0x19ea   :  { %v3317_v12 = vor.u32 1.1754944e-38, %v3316_v36  ;;  %vm3315_vm9 = vcmp.eq.f32.partialorder %v3314_v60, 8.507059e+37 }
0x19ee   :  { %v6414_v13 = vpop.eup %6413 }
0x19ef   :  { %v3306_v27 = vmul.f32 %v6414_v13, %v3304_v9  ;;  %v6416_v2 = vpop.eup %6415  ;;  %vm3311_vm2 = vweird.f32 %v6414_v13 }
0x19f0   :  { %v3199_v16 = vadd.f32 1.0, %v6416_v2  ;;  %vm3312_vm7 = vmor %vm3310_vm5, %vm3311_vm2 }
0x19f1   :  { %v3307_v47 = vsub.f32 1.0, %v3306_v27 }
0x19f2   :  { %6417 = vrcp.f32 %v3199_v16  ;;  %v3211_v1 = vand.u32 2147483648, %v3199_v16  ;;  %vm3205_vm11 = vweird.f32 %v3199_v16  ;;  %v3209_v55 = vand.u32 2147483647, %v3199_v16 }
0x19f3   :  { %v3308_v43 = vmul.f32 %v6414_v13, %v3307_v47 }
0x19f4   :  { %v3212_v40 = vor.u32 1.1754944e-38, %v3211_v1  ;;  %vm3210_vm1 = vcmp.eq.f32.partialorder %v3209_v55, 8.507059e+37 }
0x19f5   :  { %v3309_v51 = vadd.f32 %v6414_v13, %v3308_v43 }
0x19f7   :  { %v3313_v29 = vsel %vm3312_vm7, %v6414_v13, %v3309_v51 }
0x19f8   :  { %v8758_v20 = vsel %vm3315_vm9, %v3317_v12, %v3313_v29  ;;  %v6418_v63 = vpop.eup %6417 }
0x19f9   :  { %v3201_v14 = vmul.f32 %v6418_v63, %v3199_v16  ;;  %vm3206_vm10 = vweird.f32 %v6418_v63  ;;  %v3343_v39 = vmul.f32 %v3341_v46, %v8758_v20 }
0x19fa   :  { %vm3207_vm13 = vmor %vm3205_vm11, %vm3206_vm10 }
0x19fb   :  { %v3202_v34 = vsub.f32 1.0, %v3201_v14 }
0x19fd   :  { %v3203_v6 = vmul.f32 %v6418_v63, %v3202_v34 }
0x19ff   :  { %v3204_v59 = vadd.f32 %v6418_v63, %v3203_v6 }
0x1a01   :  { %v3208_v58 = vsel %vm3207_vm13, %v6418_v63, %v3204_v59 }
0x1a02   :  { %v3213_v45 = vsel %vm3210_vm1, %v3212_v40, %v3208_v58 }
0x1a03   :  { %v3235_v5 = vmul.f32 %v3213_v45, %v8626_v21  ;;  %v6064_v21 = vmul.f32 -1.442695, %v3300_v35  ;;  %v8826_v35 = vld [vmem:[%s9873_s6 + $0x90] sm:$0xff] }
0x1a3e   :  { %v3346_v19 = vpop.permute.xlu2 %3345 }
0x1a3f   :  { %v3348_v26 = vmul.f32 %v3346_v19, %v8758_v20 }
0x1a41   :  { %3350 = vrot.lane.b32.xlu1 %v3348_v26, %s6755_s15 }
0x1a55   :  { %v3238_v38 = vpop.permute.xlu1 %3237 }
0x1a56   :  { %v3240_v56 = vmul.f32 %v3238_v38, %v3213_v45 }
0x1a58   :  { %3242 = vrot.lane.b32.xlu0 %v3240_v56, %s6755_s15 }
0x1ab3   :  { %v3351_v25 = vpop.permute.xlu1 %3350 }
0x1ab4   :  { %v8765_v62 = vadd.f32 %v3351_v25, %v3343_v39 }
0x1ab6   :  { %6419 = vtanh.f32 %v8765_v62 }
0x1abc   :  { %v6420_v31 = vpop.eup %6419 }
0x1abd   :  { %3356 = vrot.lane.b32.xlu0 %v6420_v31, %s6756_s18 }
0x1aca   :  { %v3243_v54 = vpop.permute.xlu0 %3242 }
0x1acb   :  { %v8770_v11 = vadd.f32 %v3243_v54, %v3235_v5 }
0x1acd   :  { %6421 = vtanh.f32 %v8770_v11 }
0x1ace   :  { %6423 = vpow2.f32 %v6058_v8 }
0x1acf   :  { %6425 = vpow2.f32 %v6064_v21  ;;  %v8832_v21 = vld [vmem:[%s9873_s6 + $0x98] sm:$0xff] }
0x1ad3   :  { %v6422_v28 = vpop.eup %6421 }
0x1ad4   :  { %3248 = vrot.lane.b32.xlu2 %v6422_v28, %s6756_s18  ;;  %v6424_v23 = vpop.eup %6423  ;;  %v8794_v28 = vld [vmem:[%s9873_s6 + $0xc8] sm:$0x3] }
0x1ad5   :  { %v3219_v32 = vadd.f32 1.0, %v6424_v23  ;;  %v6426_v9 = vpop.eup %6425  ;;  %v8846_v23 = vld [vmem:[%s9873_s6 + $0x80] sm:$0xff] }
0x1ad6   :  { %v3324_v13 = vadd.f32 1.0, %v6426_v9  ;;  %v8860_v9 = vld [vmem:[%s9873_s6 + $0x70] sm:$0xff] }
0x1ad7   :  { %6427 = vrcp.f32 %v3219_v32  ;;  %v3231_v29 = vand.u32 2147483648, %v3219_v32  ;;  %vm3225_vm15 = vweird.f32 %v3219_v32  ;;  %v3229_v12 = vand.u32 2147483647, %v3219_v32 }
0x1ad8   :  { %6429 = vrcp.f32 %v3324_v13  ;;  %v3336_v26 = vand.u32 2147483648, %v3324_v13  ;;  %vm3330_vm3 = vweird.f32 %v3324_v13  ;;  %v3334_v34 = vand.u32 2147483647, %v3324_v13 }
0x1ad9   :  { %v3232_v14 = vor.u32 1.1754944e-38, %v3231_v29  ;;  %vm3230_vm2 = vcmp.eq.f32.partialorder %v3229_v12, 8.507059e+37  ;;  %v8936_v29 = vld [vmem:[%s9873_s6 + $0xe8] sm:$0xff]  ;;  %v8942_v12 = vld [vmem:[%s9873_s6 + $0xd0] sm:$0xff] }
0x1ada   :  { %v3337_v38 = vor.u32 1.1754944e-38, %v3336_v26  ;;  %vm3335_vm7 = vcmp.eq.f32.partialorder %v3334_v34, 8.507059e+37 }
0x1add   :  { %v6428_v17 = vpop.eup %6427 }
0x1ade   :  { %v3221_v27 = vmul.f32 %v6428_v17, %v3219_v32  ;;  %v6430_v47 = vpop.eup %6429  ;;  %vm3226_vm14 = vweird.f32 %v6428_v17  ;;  %v8852_v32 = vld [vmem:[%s9873_s6 + $0x88] sm:$0xff] }
0x1adf   :  { %v3326_v2 = vmul.f32 %v6430_v47, %v3324_v13  ;;  %vm3227_vm4 = vmor %vm3225_vm15, %vm3226_vm14  ;;  %vm3331_vm12 = vweird.f32 %v6430_v47  ;;  %v8866_v13 = vld [vmem:[%s9873_s6 + $0x78] sm:$0xff] }
0x1ae0   :  { %v3222_v43 = vsub.f32 1.0, %v3221_v27  ;;  %vm3332_vm5 = vmor %vm3330_vm3, %vm3331_vm12  ;;  %v8881_v27 = vld [vmem:[%s9873_s6 + $0x128] sm:$0x3] }
0x1ae1   :  { %v3327_v16 = vsub.f32 1.0, %v3326_v2  ;;  %v8896_v2 = vld [vmem:[%s9873_s6 + $0x118] sm:$0xff] }
0x1ae2   :  { %v3223_v51 = vmul.f32 %v6428_v17, %v3222_v43  ;;  %v8904_v43 = vld [vmem:[%s9873_s6 + $0x100] sm:$0xff] }
0x1ae3   :  { %v3328_v36 = vmul.f32 %v6430_v47, %v3327_v16  ;;  %v8910_v16 = vld [vmem:[%s9873_s6 + $0x108] sm:$0xff] }
0x1ae4   :  { %v3224_v60 = vadd.f32 %v6428_v17, %v3223_v51  ;;  %v8918_v51 = vld [vmem:[%s9873_s6 + $0xf0] sm:$0xff] }
0x1ae5   :  { %v3329_v19 = vadd.f32 %v6430_v47, %v3328_v36  ;;  %v8924_v36 = vld [vmem:[%s9873_s6 + $0xf8] sm:$0xff] }
0x1ae6   :  { %v3228_v63 = vsel %vm3227_vm4, %v6428_v17, %v3224_v60  ;;  %v8874_v17 = vld [vmem:[%s9873_s6 + $0x120] sm:$0x3] }
0x1ae7   :  { %v3233_v6 = vsel %vm3230_vm2, %v3232_v14, %v3228_v63  ;;  %v3333_v1 = vsel %vm3332_vm5, %v6430_v47, %v3329_v19  ;;  %v8890_v47 = vld [vmem:[%s9873_s6 + $0x110] sm:$0xff]  ;;  %v8930_v60 = vld [vmem:[%s9873_s6 + $0xe0] sm:$0xff]  ;;  %v8948_v19 = vld [vmem:[%s9873_s6 + $0xd8] sm:$0xff] }
0x1ae8   :  { %v3338_v46 = vsel %vm3335_vm7, %v3337_v38, %v3333_v1 }
0x1b2e   :  { %v3249_v59 = vpop.permute.xlu2 %3248 }
0x1b2f   :  { %v3357_v55 = vpop.permute.xlu0 %3356  ;;  %v3251_v58 = vmul.f32 %v3249_v59, %v3213_v45  ;;  %v3252_v40 = vmul.f32 %v3249_v59, %v3233_v6 }
0x1b30   :  { %v3359_v56 = vmul.f32 %v3357_v55, %v8758_v20  ;;  %v3360_v25 = vmul.f32 %v3357_v55, %v3338_v46  ;;  %v8787_v20 = vld [vmem:[%s9873_s6 + $0xc0] sm:$0x3] }
0x1b31   :  { %3365 = vrot.lane.b32.xlu2 %v3252_v40, %s6757_s16  ;;  %3363 = vrot.lane.b32.xlu1 %v3251_v58, %s6757_s16 }
0x1b32   :  { %v3412_v39 = vrot.slane %v3359_v56, 6  ;;  %v3413_v31 = vrot.slane %v3360_v25, 6 }
0x1b34   :  { %3414 = vrot.lane.b32.xlu0 %v3412_v39, %s6757_s16 }
0x1b39   :  { %3416 = vrot.lane.b32.xlu1 %v3413_v31, %s6757_s16 }
0x1b8b   :  { %v3366_v5 = vpop.permute.xlu2 %3365 }
0x1ba3   :  { %v3364_v54 = vpop.permute.xlu1 %3363 }
0x1ba4   :  { %v3367_v45 = vsel %vm1584_vm8, %v3364_v54, %v3366_v5 }
0x1ba5   :  { %6066 = vmatmul.msk.f32.vlgmr.msra.gmra.mxu2 %vm1644_vm0, %v3367_v45  ;;  %6068 = vmatmul.msk.f32.vlgmr.msrb.gmra.mxu1 %vm1644_vm0, %v3367_v45 }
0x1ba6   :  { %6085 = vmatpush.msk.msra.mxu2 %vm1591_vm6, %v8787_v20  ;;  %6087 = vmatpush.msk.msrb.mxu1 %vm1591_vm6, %v8794_v28  ;;  %v3415_v61 = vpop.permute.xlu0 %3414 }
0x1ba8   :  { %3699 = vmatpush.msra.mxu2 %v8801_v24  ;;  %3719 = vmatpush.msrb.mxu1 %v8807_v33 }
0x1baa   :  { %3700 = vmatpush.msra.mxu2 %v8813_v22  ;;  %3720 = vmatpush.msrb.mxu1 %v8819_v50 }
0x1bab   :  { %v3417_v53 = vpop.permute.xlu1 %3416 }
0x1bac   :  { %v3418_v8 = vsel %vm1584_vm8, %v3415_v61, %v3417_v53  ;;  %3701 = vmatpush.msra.mxu2 %v8826_v35  ;;  %3721 = vmatpush.msrb.mxu1 %v8832_v21 }
0x1bad   :  { %6070 = vmatmul.msk.f32.vlgmr.msra.gmra.mxu3 %vm1644_vm0, %v3418_v8  ;;  %6072 = vmatmul.msk.f32.vlgmr.msra.gmra.mxu0 %vm1644_vm0, %v3418_v8 }
0x1bae   :  { %6076 = vmatmul.msk.f32.vlgmr.msrb.gmra.mxu2 %vm1644_vm0, %v3418_v8  ;;  %6078 = vmatmul.msk.f32.vlgmr.msra.gmra.mxu1 %vm1644_vm0, %v3418_v8 }
0x1baf   :  { %6091 = vmatpush.msk.msra.mxu3 %vm1591_vm6, %v8665_v7  ;;  %6093 = vmatpush.msk.msra.mxu0 %vm1591_vm6, %v8672_v49 }
0x1bb0   :  { %3702 = vmatpush.msra.mxu2 %v8846_v23  ;;  %3722 = vmatpush.msrb.mxu1 %v8852_v32 }
0x1bb1   :  { %3798 = vmatpush.msra.mxu3 %v8681_v3  ;;  %3818 = vmatpush.msra.mxu0 %v8687_v15 }
0x1bb2   :  { %3703 = vmatpush.msra.mxu2 %v8860_v9  ;;  %3723 = vmatpush.msrb.mxu1 %v8866_v13 }
0x1bb3   :  { %3799 = vmatpush.msra.mxu3 %v8695_v42  ;;  %3819 = vmatpush.msra.mxu0 %v8701_v44 }
0x1bb4   :  { %6097 = vmatpush.msk.msrb.mxu2 %vm1591_vm6, %v8874_v17  ;;  %6099 = vmatpush.msk.msra.mxu1 %vm1591_vm6, %v8881_v27 }
0x1bb5   :  { %3800 = vmatpush.msra.mxu3 %v8711_v41  ;;  %3820 = vmatpush.msra.mxu0 %v8717_v4 }
0x1bb6   :  { %3909 = vmatpush.msrb.mxu2 %v8890_v47  ;;  %3929 = vmatpush.msra.mxu1 %v8896_v2 }
0x1bb7   :  { %3801 = vmatpush.msra.mxu3 %v8725_v30  ;;  %3821 = vmatpush.msra.mxu0 %v8731_v0 }
0x1bb8   :  { %3910 = vmatpush.msrb.mxu2 %v8904_v43  ;;  %3930 = vmatpush.msra.mxu1 %v8910_v16 }
0x1bb9   :  { %3802 = vmatpush.msra.mxu3 %v8739_v57  ;;  %3822 = vmatpush.msra.mxu0 %v8745_v18 }
0x1bba   :  { %3911 = vmatpush.msrb.mxu2 %v8918_v51  ;;  %3931 = vmatpush.msra.mxu1 %v8924_v36 }
0x1bbc   :  { %3912 = vmatpush.msrb.mxu2 %v8930_v60  ;;  %3932 = vmatpush.msra.mxu1 %v8936_v29 }
0x1bbe   :  { %3913 = vmatpush.msrb.mxu2 %v8942_v12  ;;  %3933 = vmatpush.msra.mxu1 %v8948_v19 }
0x1c28   :  { %v3387_v63 = vpop.f32.mrf.mxu2 }
0x1c30   :  { %v3438_v26 = vpop.f32.mrf.mxu3 }
0x1c31   :  { %v3439_v14 = vadd.f32 %v3438_v26, %v3387_v63  ;;  %v3537_v34 = vpop.f32.mrf.mxu2 }
0x1c32   :  { %v3562_v6 = vrot.slane %v3537_v34, 1 }
0x1c33   :  { %v3461_v59 = vadd.f32 %v3439_v14, %v8098_v48 }
0x1c34   :  { %v3566_v1 = vadd.f32 %v3562_v6, %v7777_v10 }
0x1c35   :  { %6431 = vtanh.f32 %v3461_v59  ;;  %v6073_v39 = vmul.f32 -1.442695, %v3461_v59 }
0x1c36   :  { %6433 = vtanh.f32 %v3566_v1  ;;  %v6079_v40 = vmul.f32 -1.442695, %v3566_v1 }
0x1c38   :  { %6435 = vpow2.f32 %v6079_v40 }
0x1c3b   :  { %v6432_v55 = vpop.eup %6431 }
0x1c3c   :  { %v6434_v58 = vpop.eup %6433  ;;  %3504 = vrot.lane.b32.xlu0 %v6432_v55, %s6754_s22 }
0x1c3d   :  { %3612 = vrot.lane.b32.xlu2 %v6434_v58, %s6754_s22 }
0x1c3e   :  { %v6436_v38 = vpop.eup %6435 }
0x1c3f   :  { %v3571_v56 = vadd.f32 1.0, %v6436_v38 }
0x1c41   :  { %6437 = vrcp.f32 %v3571_v56  ;;  %v3583_v61 = vand.u32 2147483648, %v3571_v56  ;;  %vm3577_vm10 = vweird.f32 %v3571_v56  ;;  %v3581_v53 = vand.u32 2147483647, %v3571_v56 }
0x1c42   :  { %6439 = vpow2.f32 %v6073_v39 }
0x1c43   :  { %v3584_v63 = vor.u32 1.1754944e-38, %v3583_v61  ;;  %vm3582_vm13 = vcmp.eq.f32.partialorder %v3581_v53, 8.507059e+37 }
0x1c47   :  { %v6438_v46 = vpop.eup %6437 }
0x1c48   :  { %v3573_v25 = vmul.f32 %v6438_v46, %v3571_v56  ;;  %v6440_v5 = vpop.eup %6439  ;;  %vm3578_vm9 = vweird.f32 %v6438_v46 }
0x1c49   :  { %v3466_v54 = vadd.f32 1.0, %v6440_v5  ;;  %vm3579_vm11 = vmor %vm3577_vm10, %vm3578_vm9  ;;  %v3608_v5 = vrot.slane %v8765_v62, 7  ;;  %v3407_v62 = vpop.f32.mrf.mxu1 }
0x1c4a   :  { %v3574_v31 = vsub.f32 1.0, %v3573_v25 }
0x1c4b   :  { %6441 = vrcp.f32 %v3466_v54  ;;  %v3478_v40 = vand.u32 2147483648, %v3466_v54  ;;  %vm3472_vm14 = vweird.f32 %v3466_v54  ;;  %v3476_v38 = vand.u32 2147483647, %v3466_v54 }
0x1c4c   :  { %v3575_v10 = vmul.f32 %v6438_v46, %v3574_v31 }
0x1c4d   :  { %vm3477_vm4 = vcmp.eq.f32.partialorder %v3476_v38, 8.507059e+37 }
0x1c4e   :  { %v3576_v45 = vadd.f32 %v6438_v46, %v3575_v10 }
0x1c50   :  { %v3580_v8 = vsel %vm3579_vm11, %v6438_v46, %v3576_v45  ;;  %v3479_v46 = vor.u32 1.1754944e-38, %v3478_v40 }
0x1c51   :  { %v8955_v14 = vsel %vm3582_vm13, %v3584_v63, %v3580_v8  ;;  %v6442_v34 = vpop.eup %6441 }
0x1c52   :  { %v3468_v59 = vmul.f32 %v6442_v34, %v3466_v54  ;;  %vm3473_vm1 = vweird.f32 %v6442_v34  ;;  %v3610_v45 = vmul.f32 %v3608_v5, %v8955_v14 }
0x1c53   :  { %vm3474_vm15 = vmor %vm3472_vm14, %vm3473_vm1 }
0x1c54   :  { %v3469_v1 = vsub.f32 1.0, %v3468_v59 }
0x1c56   :  { %v3470_v55 = vmul.f32 %v6442_v34, %v3469_v1 }
0x1c58   :  { %v3471_v58 = vadd.f32 %v6442_v34, %v3470_v55 }
0x1c5a   :  { %v3475_v56 = vsel %vm3474_vm15, %v6442_v34, %v3471_v58 }
0x1c5b   :  { %v3480_v25 = vsel %vm3477_vm4, %v3479_v46, %v3475_v56 }
0x1c5c   :  { %v3502_v10 = vmul.f32 %v3480_v25, %v8770_v11  ;;  %v3458_v11 = vpop.f32.mrf.mxu0 }
0x1c5d   :  { %v3459_v34 = vadd.f32 %v3458_v11, %v3407_v62 }
0x1c5f   :  { %v3462_v59 = vadd.f32 %v3459_v34, %v8125_v52 }
0x1c61   :  { %v6074_v55 = vmul.f32 -1.442695, %v3462_v59 }
0x1c97   :  { %v3613_v26 = vpop.permute.xlu2 %3612 }
0x1c98   :  { %v3615_v6 = vmul.f32 %v3613_v26, %v8955_v14 }
0x1c9a   :  { %3617 = vrot.lane.b32.xlu1 %v3615_v6, %s6755_s15  ;;  %v3557_v6 = vpop.f32.mrf.mxu1 }
0x1c9b   :  { %v3563_v1 = vrot.slane %v3557_v6, 1 }
0x1c9d   :  { %v3567_v58 = vadd.f32 %v3563_v1, %v7852_v37 }
0x1c9f   :  { %v6080_v40 = vmul.f32 -1.442695, %v3567_v58 }
0x1cae   :  { %v3505_v39 = vpop.permute.xlu0 %3504 }
0x1caf   :  { %v3507_v31 = vmul.f32 %v3505_v39, %v3480_v25 }
0x1cb1   :  { %3509 = vrot.lane.b32.xlu2 %v3507_v31, %s6755_s15 }
0x1d0b   :  { %v3510_v61 = vpop.permute.xlu2 %3509 }
0x1d0c   :  { %v3618_v53 = vpop.permute.xlu1 %3617  ;;  %v8963_v8 = vadd.f32 %v3510_v61, %v3502_v10 }
0x1d0d   :  { %v8965_v54 = vadd.f32 %v3618_v53, %v3610_v45 }
0x1d0e   :  { %6443 = vtanh.f32 %v8963_v8 }
0x1d0f   :  { %6445 = vtanh.f32 %v8965_v54 }
0x1d10   :  { %6447 = vpow2.f32 %v6074_v55 }
0x1d11   :  { %6449 = vpow2.f32 %v6080_v40 }
0x1d14   :  { %v6444_v63 = vpop.eup %6443 }
0x1d15   :  { %v6446_v26 = vpop.eup %6445  ;;  %3515 = vrot.lane.b32.xlu1 %v6444_v63, %s6756_s18 }
0x1d16   :  { %3623 = vrot.lane.b32.xlu0 %v6446_v26, %s6756_s18  ;;  %v6448_v38 = vpop.eup %6447 }
0x1d17   :  { %v3486_v56 = vadd.f32 1.0, %v6448_v38  ;;  %v6450_v46 = vpop.eup %6449 }
0x1d18   :  { %v3591_v39 = vadd.f32 1.0, %v6450_v46 }
0x1d19   :  { %6451 = vrcp.f32 %v3486_v56  ;;  %v3498_v37 = vand.u32 2147483648, %v3486_v56  ;;  %vm3492_vm3 = vweird.f32 %v3486_v56  ;;  %v3496_v11 = vand.u32 2147483647, %v3486_v56 }
0x1d1a   :  { %6453 = vrcp.f32 %v3591_v39  ;;  %v3603_v59 = vand.u32 2147483648, %v3591_v39  ;;  %vm3597_vm7 = vweird.f32 %v3591_v39  ;;  %v3601_v55 = vand.u32 2147483647, %v3591_v39 }
0x1d1b   :  { %v3499_v1 = vor.u32 1.1754944e-38, %v3498_v37  ;;  %vm3497_vm9 = vcmp.eq.f32.partialorder %v3496_v11, 8.507059e+37 }
0x1d1c   :  { %vm3602_vm11 = vcmp.eq.f32.partialorder %v3601_v55, 8.507059e+37 }
0x1d1f   :  { %v6452_v31 = vpop.eup %6451 }
0x1d20   :  { %v3488_v5 = vmul.f32 %v6452_v31, %v3486_v56  ;;  %v6454_v10 = vpop.eup %6453  ;;  %vm3493_vm12 = vweird.f32 %v6452_v31 }
0x1d21   :  { %v3593_v45 = vmul.f32 %v6454_v10, %v3591_v39  ;;  %vm3494_vm2 = vmor %vm3492_vm3, %vm3493_vm12  ;;  %vm3598_vm5 = vweird.f32 %v6454_v10 }
0x1d22   :  { %v3489_v61 = vsub.f32 1.0, %v3488_v5  ;;  %vm3599_vm10 = vmor %vm3597_vm7, %vm3598_vm5 }
0x1d23   :  { %v3594_v53 = vsub.f32 1.0, %v3593_v45 }
0x1d24   :  { %v3490_v63 = vmul.f32 %v6452_v31, %v3489_v61  ;;  %v3604_v61 = vor.u32 1.1754944e-38, %v3603_v59 }
0x1d25   :  { %v3595_v26 = vmul.f32 %v6454_v10, %v3594_v53 }
0x1d26   :  { %v3491_v62 = vadd.f32 %v6452_v31, %v3490_v63 }
0x1d27   :  { %v3596_v34 = vadd.f32 %v6454_v10, %v3595_v26 }
0x1d28   :  { %v3495_v6 = vsel %vm3494_vm2, %v6452_v31, %v3491_v62 }
0x1d29   :  { %v3500_v58 = vsel %vm3497_vm9, %v3499_v1, %v3495_v6  ;;  %v3600_v38 = vsel %vm3599_vm10, %v6454_v10, %v3596_v34 }
0x1d2a   :  { %v3605_v56 = vsel %vm3602_vm11, %v3604_v61, %v3600_v38 }
0x1d87   :  { %v3516_v40 = vpop.permute.xlu1 %3515 }
0x1d88   :  { %v3624_v46 = vpop.permute.xlu0 %3623  ;;  %v3518_v5 = vmul.f32 %v3516_v40, %v3480_v25  ;;  %v3519_v45 = vmul.f32 %v3516_v40, %v3500_v58 }
0x1d89   :  { %v3626_v53 = vmul.f32 %v3624_v46, %v8955_v14  ;;  %v3627_v63 = vmul.f32 %v3624_v46, %v3605_v56 }
0x1d8a   :  { %3632 = vrot.lane.b32.xlu0 %v3519_v45, %s6757_s16  ;;  %3630 = vrot.lane.b32.xlu2 %v3518_v5, %s6757_s16 }
0x1d8b   :  { %v3679_v31 = vrot.slane %v3626_v53, 7  ;;  %v3680_v39 = vrot.slane %v3627_v63, 7 }
0x1d8d   :  { %3681 = vrot.lane.b32.xlu1 %v3679_v31, %s6757_s16 }
0x1d92   :  { %3683 = vrot.lane.b32.xlu2 %v3680_v39, %s6757_s16 }
0x1de4   :  { %v3631_v10 = vpop.permute.xlu2 %3630 }
0x1dec   :  { %v3684_v14 = vpop.permute.xlu2 %3683 }
0x1dfc   :  { %v3633_v26 = vpop.permute.xlu0 %3632 }
0x1dfd   :  { %v3634_v25 = vsel %vm1584_vm8, %v3631_v10, %v3633_v26 }
0x1dfe   :  { %6082 = vmatmul.msk.f32.vlgmr.msrb.gmra.mxu3 %vm1644_vm0, %v3634_v25  ;;  %6084 = vmatmul.msk.f32.vlgmr.msrb.gmra.mxu0 %vm1644_vm0, %v3634_v25 }
0x1dff   :  { %v3682_v62 = vpop.permute.xlu1 %3681  ;;  %6101 = vmatpush.msk.msrb.mxu3 %vm1591_vm6, %v8787_v20  ;;  %6103 = vmatpush.msk.msrb.mxu0 %vm1591_vm6, %v8794_v28 }
0x1e00   :  { %v3685_v37 = vsel %vm1584_vm8, %v3682_v62, %v3684_v14 }
0x1e01   :  { %6086 = vmatmul.msk.f32.vlgmr.msra.gmra.mxu2 %vm1644_vm0, %v3685_v37  ;;  %6088 = vmatmul.msk.f32.vlgmr.msrb.gmra.mxu1 %vm1644_vm0, %v3685_v37 }
0x1e02   :  { %6107 = vmatpush.msk.msra.mxu2 %vm1591_vm6, %v8665_v7  ;;  %6109 = vmatpush.msk.msrb.mxu1 %vm1591_vm6, %v8672_v49 }
0x1e03   :  { %3958 = vmatpush.msrb.mxu3 %v8801_v24  ;;  %3978 = vmatpush.msrb.mxu0 %v8807_v33 }
0x1e04   :  { %4057 = vmatpush.msra.mxu2 %v8681_v3  ;;  %4077 = vmatpush.msrb.mxu1 %v8687_v15 }
0x1e05   :  { %3959 = vmatpush.msrb.mxu3 %v8813_v22  ;;  %3979 = vmatpush.msrb.mxu0 %v8819_v50 }
0x1e06   :  { %6092 = vmatmul.msk.f32.vlgmr.msra.gmra.mxu3 %vm1644_vm0, %v3685_v37  ;;  %6094 = vmatmul.msk.f32.vlgmr.msra.gmra.mxu0 %vm1644_vm0, %v3685_v37 }
0x1e07   :  { %4058 = vmatpush.msra.mxu2 %v8695_v42  ;;  %4078 = vmatpush.msrb.mxu1 %v8701_v44  ;;  %v10141_v42 = vld [vmem:[#allocation12_spill] sm:$0xff] }
0x1e08   :  { %3960 = vmatpush.msrb.mxu3 %v8826_v35  ;;  %3980 = vmatpush.msrb.mxu0 %v8832_v21  ;;  %v10142_v44 = vperm.slane %v10141_v42, 0 }
0x1e09   :  { %4059 = vmatpush.msra.mxu2 %v8711_v41  ;;  %4079 = vmatpush.msrb.mxu1 %v8717_v4  ;;  %v10143_v41 = vld [vmem:[#allocation13_spill] sm:$0xff] }
0x1e0a   :  { %3961 = vmatpush.msrb.mxu3 %v8846_v23  ;;  %3981 = vmatpush.msrb.mxu0 %v8852_v32  ;;  %v9032_v4 = vadd.f32 %v10143_v41, %v10142_v44 }
0x1e0b   :  { %4060 = vmatpush.msra.mxu2 %v8725_v30  ;;  %4080 = vmatpush.msrb.mxu1 %v8731_v0 }
0x1e0c   :  { %3962 = vmatpush.msrb.mxu3 %v8860_v9  ;;  %3982 = vmatpush.msrb.mxu0 %v8866_v13 }
0x1e0d   :  { %4061 = vmatpush.msra.mxu2 %v8739_v57  ;;  %4081 = vmatpush.msrb.mxu1 %v8745_v18 }
0x1e0e   :  { %6113 = vmatpush.msk.msra.mxu3 %vm1591_vm6, %v8874_v17  ;;  %6115 = vmatpush.msk.msra.mxu0 %vm1591_vm6, %v8881_v27 }
0x1e10   :  { %4174 = vmatpush.msra.mxu3 %v8890_v47  ;;  %4194 = vmatpush.msra.mxu0 %v8896_v2 }
0x1e12   :  { %4175 = vmatpush.msra.mxu3 %v8904_v43  ;;  %4195 = vmatpush.msra.mxu0 %v8910_v16 }
0x1e14   :  { %4176 = vmatpush.msra.mxu3 %v8918_v51  ;;  %4196 = vmatpush.msra.mxu0 %v8924_v36 }
0x1e16   :  { %4177 = vmatpush.msra.mxu3 %v8930_v60  ;;  %4197 = vmatpush.msra.mxu0 %v8936_v29 }
0x1e18   :  { %4178 = vmatpush.msra.mxu3 %v8942_v12  ;;  %4198 = vmatpush.msra.mxu0 %v8948_v19 }
0x1e81   :  { %v3654_v7 = vpop.f32.mrf.mxu3 }
0x1e84   :  { %v3705_v49 = vpop.f32.mrf.mxu2 }
0x1e85   :  { %v3706_v3 = vadd.f32 %v3705_v49, %v3654_v7 }
0x1e87   :  { %v3728_v15 = vadd.f32 %v3706_v3, %v8098_v48 }
0x1e89   :  { %6455 = vtanh.f32 %v3728_v15  ;;  %v3804_v30 = vpop.f32.mrf.mxu3  ;;  %v6089_v11 = vmul.f32 -1.442695, %v3728_v15 }
0x1e8a   :  { %v3827_v0 = vadd.f32 %v3804_v30, %v9032_v4 }
0x1e8c   :  { %6457 = vtanh.f32 %v3827_v0  ;;  %v6095_v34 = vmul.f32 -1.442695, %v3827_v0 }
0x1e8d   :  { %6459 = vpow2.f32 %v6089_v11  ;;  %v3869_v11 = vrot.slane %v8965_v54, 7  ;;  %v10145_v54 = vld [vmem:[#allocation14_spill] sm:$0xff] }
0x1e8e   :  { %6461 = vpow2.f32 %v6095_v34 }
0x1e8f   :  { %v6456_v57 = vpop.eup %6455 }
0x1e90   :  { %3771 = vrot.lane.b32.xlu0 %v6456_v57, %s6754_s22 }
0x1e92   :  { %v6458_v18 = vpop.eup %6457 }
0x1e93   :  { %3873 = vrot.lane.b32.xlu1 %v6458_v18, %s6754_s22  ;;  %v6460_v6 = vpop.eup %6459 }
0x1e94   :  { %v6462_v59 = vpop.eup %6461  ;;  %v3733_v1 = vadd.f32 1.0, %v6460_v6 }
0x1e95   :  { %v3832_v55 = vadd.f32 1.0, %v6462_v59 }
0x1e96   :  { %6463 = vrcp.f32 %v3733_v1  ;;  %v3745_v31 = vand.u32 2147483648, %v3733_v1  ;;  %vm3739_vm1 = vweird.f32 %v3733_v1  ;;  %v3743_v63 = vand.u32 2147483647, %v3733_v1 }
0x1e97   :  { %6465 = vrcp.f32 %v3832_v55  ;;  %v3844_v26 = vand.u32 2147483648, %v3832_v55  ;;  %vm3838_vm4 = vweird.f32 %v3832_v55  ;;  %v3842_v14 = vand.u32 2147483647, %v3832_v55 }
0x1e98   :  { %v3746_v25 = vor.u32 1.1754944e-38, %v3745_v31  ;;  %vm3744_vm12 = vcmp.eq.f32.partialorder %v3743_v63, 8.507059e+37 }
0x1e99   :  { %v3845_v3 = vor.u32 1.1754944e-38, %v3844_v26  ;;  %vm3843_vm2 = vcmp.eq.f32.partialorder %v3842_v14, 8.507059e+37 }
0x1e9c   :  { %v6464_v58 = vpop.eup %6463 }
0x1e9d   :  { %v6466_v40 = vpop.eup %6465  ;;  %v3735_v38 = vmul.f32 %v6464_v58, %v3733_v1  ;;  %vm3740_vm13 = vweird.f32 %v6464_v58 }
0x1e9e   :  { %v3834_v46 = vmul.f32 %v6466_v40, %v3832_v55  ;;  %vm3741_vm14 = vmor %vm3739_vm1, %vm3740_vm13  ;;  %vm3839_vm15 = vweird.f32 %v6466_v40  ;;  %v3674_v55 = vpop.f32.mrf.mxu0 }
0x1e9f   :  { %v3736_v5 = vsub.f32 1.0, %v3735_v38  ;;  %vm3840_vm3 = vmor %vm3838_vm4, %vm3839_vm15 }
0x1ea0   :  { %v3835_v45 = vsub.f32 1.0, %v3834_v46 }
0x1ea1   :  { %v3737_v61 = vmul.f32 %v6464_v58, %v3736_v5  ;;  %v10144_v5 = vperm.slane %v10141_v42, 1 }
0x1ea2   :  { %v3836_v53 = vmul.f32 %v6466_v40, %v3835_v45 }
0x1ea3   :  { %v3738_v56 = vadd.f32 %v6464_v58, %v3737_v61  ;;  %v9057_v45 = vadd.f32 %v10145_v54, %v10144_v5 }
0x1ea4   :  { %v3837_v39 = vadd.f32 %v6466_v40, %v3836_v53 }
0x1ea5   :  { %v3742_v10 = vsel %vm3741_vm14, %v6464_v58, %v3738_v56 }
0x1ea6   :  { %v3747_v37 = vsel %vm3744_vm12, %v3746_v25, %v3742_v10  ;;  %v3841_v7 = vsel %vm3840_vm3, %v6466_v40, %v3837_v39  ;;  %v3824_v46 = vpop.f32.mrf.mxu0 }
0x1ea7   :  { %v9038_v44 = vsel %vm3843_vm2, %v3845_v3, %v3841_v7  ;;  %v3769_v30 = vmul.f32 %v3747_v37, %v8963_v8  ;;  %v3725_v8 = vpop.f32.mrf.mxu1  ;;  %v3828_v61 = vadd.f32 %v3824_v46, %v9057_v45 }
0x1ea8   :  { %v3871_v34 = vmul.f32 %v3869_v11, %v9038_v44  ;;  %v3726_v58 = vadd.f32 %v3725_v8, %v3674_v55 }
0x1ea9   :  { %v6096_v53 = vmul.f32 -1.442695, %v3828_v61 }
0x1eaa   :  { %v3729_v40 = vadd.f32 %v3726_v58, %v8125_v52 }
0x1eac   :  { %v6090_v38 = vmul.f32 -1.442695, %v3729_v40 }
0x1f02   :  { %v3772_v62 = vpop.permute.xlu0 %3771 }
0x1f03   :  { %v3774_v49 = vmul.f32 %v3772_v62, %v3747_v37 }
0x1f05   :  { %3776 = vrot.lane.b32.xlu2 %v3774_v49, %s6755_s15  ;;  %v3874_v15 = vpop.permute.xlu1 %3873 }
0x1f06   :  { %v3876_v41 = vmul.f32 %v3874_v15, %v9038_v44 }
0x1f08   :  { %3878 = vrot.lane.b32.xlu0 %v3876_v41, %s6755_s15 }
0x1f5f   :  { %v3777_v0 = vpop.permute.xlu2 %3776 }
0x1f60   :  { %v9043_v57 = vadd.f32 %v3777_v0, %v3769_v30 }
0x1f62   :  { %6467 = vtanh.f32 %v9043_v57 }
0x1f68   :  { %v6468_v18 = vpop.eup %6467 }
0x1f69   :  { %3782 = vrot.lane.b32.xlu1 %v6468_v18, %s6756_s18 }
0x1f7a   :  { %v3879_v6 = vpop.permute.xlu0 %3878 }
0x1f7b   :  { %v9049_v59 = vadd.f32 %v3879_v6, %v3871_v34 }
0x1f7d   :  { %6469 = vtanh.f32 %v9049_v59 }
0x1f7e   :  { %6471 = vpow2.f32 %v6090_v38 }
0x1f7f   :  { %6473 = vpow2.f32 %v6096_v53 }
0x1f83   :  { %v6470_v1 = vpop.eup %6469 }
0x1f84   :  { %3884 = vrot.lane.b32.xlu2 %v6470_v1, %s6756_s18  ;;  %v6472_v56 = vpop.eup %6471 }
0x1f85   :  { %v3753_v31 = vadd.f32 1.0, %v6472_v56  ;;  %v6474_v63 = vpop.eup %6473 }
0x1f86   :  { %v3852_v39 = vadd.f32 1.0, %v6474_v63 }
0x1f87   :  { %6475 = vrcp.f32 %v3753_v31  ;;  %v3765_v3 = vand.u32 2147483648, %v3753_v31  ;;  %vm3759_vm7 = vweird.f32 %v3753_v31  ;;  %v3763_v15 = vand.u32 2147483647, %v3753_v31 }
0x1f88   :  { %6477 = vrcp.f32 %v3852_v39  ;;  %v3864_v8 = vand.u32 2147483648, %v3852_v39  ;;  %vm3858_vm13 = vweird.f32 %v3852_v39  ;;  %v3862_v55 = vand.u32 2147483647, %v3852_v39 }
0x1f89   :  { %v3766_v0 = vor.u32 1.1754944e-38, %v3765_v3  ;;  %vm3764_vm10 = vcmp.eq.f32.partialorder %v3763_v15, 8.507059e+37 }
0x1f8a   :  { %v3865_v46 = vor.u32 1.1754944e-38, %v3864_v8  ;;  %vm3863_vm14 = vcmp.eq.f32.partialorder %v3862_v55, 8.507059e+37 }
0x1f8d   :  { %v6476_v10 = vpop.eup %6475 }
0x1f8e   :  { %v3755_v26 = vmul.f32 %v6476_v10, %v3753_v31  ;;  %v6478_v14 = vpop.eup %6477  ;;  %vm3760_vm5 = vweird.f32 %v6476_v10 }
0x1f8f   :  { %v3854_v42 = vmul.f32 %v6478_v14, %v3852_v39  ;;  %vm3761_vm9 = vmor %vm3759_vm7, %vm3760_vm5  ;;  %vm3859_vm11 = vweird.f32 %v6478_v14 }
0x1f90   :  { %v3756_v25 = vsub.f32 1.0, %v3755_v26  ;;  %vm3860_vm1 = vmor %vm3858_vm13, %vm3859_vm11 }
0x1f91   :  { %v3855_v49 = vsub.f32 1.0, %v3854_v42 }
0x1f92   :  { %v3757_v62 = vmul.f32 %v6476_v10, %v3756_v25 }
0x1f93   :  { %v3856_v30 = vmul.f32 %v6478_v14, %v3855_v49 }
0x1f94   :  { %v3758_v7 = vadd.f32 %v6476_v10, %v3757_v62 }
0x1f95   :  { %v3857_v1 = vadd.f32 %v6478_v14, %v3856_v30 }
0x1f96   :  { %v3762_v41 = vsel %vm3761_vm9, %v6476_v10, %v3758_v7 }
0x1f97   :  { %v3767_v18 = vsel %vm3764_vm10, %v3766_v0, %v3762_v41  ;;  %v3861_v38 = vsel %vm3860_vm1, %v6478_v14, %v3857_v1 }
0x1fdb   :  { %v3783_v11 = vpop.permute.xlu1 %3782 }
0x1fdc   :  { %v3785_v34 = vmul.f32 %v3783_v11, %v3747_v37  ;;  %v3786_v6 = vmul.f32 %v3783_v11, %v3767_v18  ;;  %v3866_v37 = vsel %vm3863_vm14, %v3865_v46, %v3861_v38 }
0x1fde   :  { %3893 = vrot.lane.b32.xlu1 %v3786_v6, %s6757_s16  ;;  %3891 = vrot.lane.b32.xlu0 %v3785_v34, %s6757_s16  ;;  %v3885_v58 = vpop.permute.xlu2 %3884 }
0x1fdf   :  { %v3887_v40 = vmul.f32 %v3885_v58, %v9038_v44  ;;  %v3888_v5 = vmul.f32 %v3885_v58, %v3866_v37 }
0x1fe1   :  { %3940 = vrot.lane.b32.xlu2 %v3887_v40, %s6757_s16 }
0x1fe6   :  { %3942 = vrot.lane.b32.xlu0 %v3888_v5, %s6757_s16  ;;  %v4134_v5 = vrot.slane %v9049_v59, 7 }
0x203b   :  { %v3941_v44 = vpop.permute.xlu2 %3940 }
0x2050   :  { %v3894_v54 = vpop.permute.xlu1 %3893  ;;  %v3892_v61 = vpop.permute.xlu0 %3891 }
0x2051   :  { %v3895_v53 = vsel %vm1584_vm8, %v3892_v61, %v3894_v54 }
0x2052   :  { %6098 = vmatmul.msk.f32.vlgmr.msrb.gmra.mxu2 %vm1644_vm0, %v3895_v53  ;;  %6100 = vmatmul.msk.f32.vlgmr.msra.gmra.mxu1 %vm1644_vm0, %v3895_v53 }
0x2053   :  { %6117 = vmatpush.msk.msrb.mxu2 %vm1591_vm6, %v8787_v20  ;;  %6119 = vmatpush.msk.msra.mxu1 %vm1591_vm6, %v8794_v28  ;;  %v9086_v20 = vld [vmem:[%s9873_s6 + $0x60] sm:$0x3]  ;;  %v9093_v28 = vld [vmem:[%s9873_s6 + $0x68] sm:$0x3] }
0x2055   :  { %4225 = vmatpush.msrb.mxu2 %v8801_v24  ;;  %4245 = vmatpush.msra.mxu1 %v8807_v33  ;;  %v9102_v24 = vld [vmem:[%s9873_s6 + $0x50] sm:$0xff]  ;;  %v9108_v33 = vld [vmem:[%s9873_s6 + $0x58] sm:$0xff] }
0x2057   :  { %4226 = vmatpush.msrb.mxu2 %v8813_v22  ;;  %4246 = vmatpush.msra.mxu1 %v8819_v50  ;;  %v9116_v22 = vld [vmem:[%s9873_s6 + $0x40] sm:$0xff]  ;;  %v9122_v50 = vld [vmem:[%s9873_s6 + $0x48] sm:$0xff] }
0x2058   :  { %v3943_v56 = vpop.permute.xlu0 %3942 }
0x2059   :  { %v3944_v31 = vsel %vm1584_vm8, %v3941_v44, %v3943_v56  ;;  %4227 = vmatpush.msrb.mxu2 %v8826_v35  ;;  %4247 = vmatpush.msra.mxu1 %v8832_v21  ;;  %v9132_v35 = vld [vmem:[%s9873_s6 + $0x30] sm:$0xff]  ;;  %v9138_v21 = vld [vmem:[%s9873_s6 + $0x38] sm:$0xff] }
0x205a   :  { %6102 = vmatmul.msk.f32.vlgmr.msrb.gmra.mxu3 %vm1644_vm0, %v3944_v31  ;;  %6104 = vmatmul.msk.f32.vlgmr.msrb.gmra.mxu0 %vm1644_vm0, %v3944_v31 }
0x205b   :  { %6108 = vmatmul.msk.f32.vlgmr.msra.gmra.mxu2 %vm1644_vm0, %v3944_v31  ;;  %6110 = vmatmul.msk.f32.vlgmr.msrb.gmra.mxu1 %vm1644_vm0, %v3944_v31 }
0x205c   :  { %6123 = vmatpush.msk.msrb.mxu3 %vm1591_vm6, %v9086_v20  ;;  %6125 = vmatpush.msk.msrb.mxu0 %vm1591_vm6, %v9093_v28 }
0x205d   :  { %4228 = vmatpush.msrb.mxu2 %v8846_v23  ;;  %4248 = vmatpush.msra.mxu1 %v8852_v32  ;;  %v9146_v23 = vld [vmem:[%s9873_s6 + $0x20] sm:$0xff]  ;;  %v9152_v32 = vld [vmem:[%s9873_s6 + $0x28] sm:$0xff] }
0x205e   :  { %4324 = vmatpush.msrb.mxu3 %v9102_v24  ;;  %4344 = vmatpush.msrb.mxu0 %v9108_v33 }
0x205f   :  { %4229 = vmatpush.msrb.mxu2 %v8860_v9  ;;  %4249 = vmatpush.msra.mxu1 %v8866_v13  ;;  %v9160_v9 = vld [vmem:[%s9873_s6 + $0x10] sm:$0xff]  ;;  %v9166_v13 = vld [vmem:[%s9873_s6 + $0x18] sm:$0xff] }
0x2060   :  { %4325 = vmatpush.msrb.mxu3 %v9116_v22  ;;  %4345 = vmatpush.msrb.mxu0 %v9122_v50 }
0x2061   :  { %6129 = vmatpush.msk.msra.mxu2 %vm1591_vm6, %v8874_v17  ;;  %6131 = vmatpush.msk.msrb.mxu1 %vm1591_vm6, %v8881_v27 }
0x2062   :  { %4326 = vmatpush.msrb.mxu3 %v9132_v35  ;;  %4346 = vmatpush.msrb.mxu0 %v9138_v21 }
0x2063   :  { %4441 = vmatpush.msra.mxu2 %v8890_v47  ;;  %4461 = vmatpush.msrb.mxu1 %v8896_v2 }
0x2064   :  { %4327 = vmatpush.msrb.mxu3 %v9146_v23  ;;  %4347 = vmatpush.msrb.mxu0 %v9152_v32 }
0x2065   :  { %4442 = vmatpush.msra.mxu2 %v8904_v43  ;;  %4462 = vmatpush.msrb.mxu1 %v8910_v16 }
0x2066   :  { %4328 = vmatpush.msrb.mxu3 %v9160_v9  ;;  %4348 = vmatpush.msrb.mxu0 %v9166_v13 }
0x2067   :  { %4443 = vmatpush.msra.mxu2 %v8918_v51  ;;  %4463 = vmatpush.msrb.mxu1 %v8924_v36 }
0x2069   :  { %4444 = vmatpush.msra.mxu2 %v8930_v60  ;;  %4464 = vmatpush.msrb.mxu1 %v8936_v29 }
0x206b   :  { %4445 = vmatpush.msra.mxu2 %v8942_v12  ;;  %4465 = vmatpush.msrb.mxu1 %v8948_v19 }
0x20cf   :  { %v3935_v59 = vpop.f32.mrf.mxu1 }
0x20d5   :  { %v3915_v17 = vpop.f32.mrf.mxu2 }
0x20dd   :  { %v3964_v27 = vpop.f32.mrf.mxu3 }
0x20de   :  { %v3965_v47 = vadd.f32 %v3964_v27, %v3915_v17  ;;  %v4063_v2 = vpop.f32.mrf.mxu2 }
0x20df   :  { %v4088_v43 = vrot.slane %v4063_v2, 7 }
0x20e0   :  { %v3987_v16 = vadd.f32 %v3965_v47, %v8098_v48  ;;  %v3984_v47 = vpop.f32.mrf.mxu0 }
0x20e1   :  { %v4092_v63 = vadd.f32 %v4088_v43, %v9032_v4  ;;  %v3985_v2 = vadd.f32 %v3984_v47, %v3935_v59  ;;  %v4083_v43 = vpop.f32.mrf.mxu1  ;;  %v9222_v59 = vld [vmem:[%s9873_s6 + $0xb0] sm:$0xff]  ;;  %v9228_v47 = vld [vmem:[%s9873_s6 + $0xb8] sm:$0xff] }
0x20e2   :  { %6479 = vtanh.f32 %v3987_v16  ;;  %v6105_v39 = vmul.f32 -1.442695, %v3987_v16 }
0x20e3   :  { %6481 = vtanh.f32 %v4092_v63  ;;  %v6111_v60 = vmul.f32 -1.442695, %v4092_v63  ;;  %v3988_v16 = vadd.f32 %v3985_v2, %v8125_v52  ;;  %v4089_v63 = vrot.slane %v4083_v43, 7  ;;  %v9234_v2 = vld [vmem:[%s9873_s6 + $0xa0] sm:$0xff]  ;;  %v9240_v43 = vld [vmem:[%s9873_s6 + $0xa8] sm:$0xff] }
0x20e5   :  { %6483 = vpow2.f32 %v6111_v60 }
0x20e8   :  { %v6480_v51 = vpop.eup %6479 }
0x20e9   :  { %v6482_v36 = vpop.eup %6481  ;;  %4030 = vrot.lane.b32.xlu1 %v6480_v51, %s6754_s22  ;;  %v6106_v51 = vmul.f32 -1.442695, %v3988_v16 }
0x20ea   :  { %4138 = vrot.lane.b32.xlu2 %v6482_v36, %s6754_s22  ;;  %v4093_v36 = vadd.f32 %v4089_v63, %v9057_v45 }
0x20eb   :  { %v6484_v29 = vpop.eup %6483 }
0x20ec   :  { %v4097_v12 = vadd.f32 1.0, %v6484_v29 }
0x20ee   :  { %6485 = vrcp.f32 %v4097_v12  ;;  %v4109_v7 = vand.u32 2147483648, %v4097_v12  ;;  %vm4103_vm4 = vweird.f32 %v4097_v12  ;;  %v4107_v49 = vand.u32 2147483647, %v4097_v12 }
0x20ef   :  { %6487 = vpow2.f32 %v6105_v39 }
0x20f0   :  { %v4110_v15 = vor.u32 1.1754944e-38, %v4109_v7  ;;  %vm4108_vm3 = vcmp.eq.f32.partialorder %v4107_v49, 8.507059e+37 }
0x20f4   :  { %v6486_v19 = vpop.eup %6485 }
0x20f5   :  { %v4099_v10 = vmul.f32 %v6486_v19, %v4097_v12  ;;  %v6488_v25 = vpop.eup %6487  ;;  %vm4104_vm15 = vweird.f32 %v6486_v19 }
0x20f6   :  { %v3992_v62 = vadd.f32 1.0, %v6488_v25  ;;  %vm4105_vm12 = vmor %vm4103_vm4, %vm4104_vm15 }
0x20f7   :  { %v4100_v26 = vsub.f32 1.0, %v4099_v10 }
0x20f8   :  { %6489 = vrcp.f32 %v3992_v62  ;;  %v4004_v8 = vand.u32 2147483648, %v3992_v62  ;;  %vm3998_vm5 = vweird.f32 %v3992_v62  ;;  %v4002_v55 = vand.u32 2147483647, %v3992_v62 }
0x20f9   :  { %v4101_v14 = vmul.f32 %v6486_v19, %v4100_v26 }
0x20fa   :  { %v4005_v40 = vor.u32 1.1754944e-38, %v4004_v8  ;;  %vm4003_vm9 = vcmp.eq.f32.partialorder %v4002_v55, 8.507059e+37 }
0x20fb   :  { %v4102_v42 = vadd.f32 %v6486_v19, %v4101_v14 }
0x20fd   :  { %v4106_v3 = vsel %vm4105_vm12, %v6486_v19, %v4102_v42 }
0x20fe   :  { %v9179_v30 = vsel %vm4108_vm3, %v4110_v15, %v4106_v3  ;;  %v6490_v0 = vpop.eup %6489 }
0x20ff   :  { %v3994_v11 = vmul.f32 %v6490_v0, %v3992_v62  ;;  %vm3999_vm2 = vweird.f32 %v6490_v0  ;;  %v4136_v54 = vmul.f32 %v4134_v5, %v9179_v30 }
0x2100   :  { %vm4000_vm7 = vmor %vm3998_vm5, %vm3999_vm2 }
0x2101   :  { %v3995_v34 = vsub.f32 1.0, %v3994_v11 }
0x2103   :  { %v3996_v6 = vmul.f32 %v6490_v0, %v3995_v34 }
0x2105   :  { %v3997_v1 = vadd.f32 %v6490_v0, %v3996_v6 }
0x2107   :  { %v4001_v58 = vsel %vm4000_vm7, %v6490_v0, %v3997_v1 }
0x2108   :  { %v4006_v46 = vsel %vm4003_vm9, %v4005_v40, %v4001_v58 }
0x2109   :  { %v4028_v56 = vmul.f32 %v4006_v46, %v9043_v57  ;;  %v6112_v57 = vmul.f32 -1.442695, %v4093_v36  ;;  %v9247_v36 = vld [vmem:[%s9873_s6 + $0x90] sm:$0xff] }
0x2144   :  { %v4139_v41 = vpop.permute.xlu2 %4138 }
0x2145   :  { %v4141_v18 = vmul.f32 %v4139_v41, %v9179_v30 }
0x2147   :  { %4143 = vrot.lane.b32.xlu1 %v4141_v18, %s6755_s15 }
0x215b   :  { %v4031_v38 = vpop.permute.xlu1 %4030 }
0x215c   :  { %v4033_v37 = vmul.f32 %v4031_v38, %v4006_v46 }
0x215e   :  { %4035 = vrot.lane.b32.xlu0 %v4033_v37, %s6755_s15 }
0x21b9   :  { %v4144_v61 = vpop.permute.xlu1 %4143 }
0x21ba   :  { %v9186_v53 = vadd.f32 %v4144_v61, %v4136_v54 }
0x21bc   :  { %6491 = vtanh.f32 %v9186_v53 }
0x21c2   :  { %v6492_v44 = vpop.eup %6491 }
0x21c3   :  { %4149 = vrot.lane.b32.xlu0 %v6492_v44, %s6756_s18 }
0x21d0   :  { %v4036_v31 = vpop.permute.xlu0 %4035 }
0x21d1   :  { %v9191_v17 = vadd.f32 %v4036_v31, %v4028_v56 }
0x21d3   :  { %6493 = vtanh.f32 %v9191_v17 }
0x21d4   :  { %6495 = vpow2.f32 %v6106_v51 }
0x21d5   :  { %6497 = vpow2.f32 %v6112_v57  ;;  %v9253_v57 = vld [vmem:[%s9873_s6 + $0x98] sm:$0xff] }
0x21d9   :  { %v6494_v27 = vpop.eup %6493 }
0x21da   :  { %4041 = vrot.lane.b32.xlu2 %v6494_v27, %s6756_s18  ;;  %v6496_v60 = vpop.eup %6495  ;;  %v9215_v27 = vld [vmem:[%s9873_s6 + $0xc8] sm:$0x3] }
0x21db   :  { %v4012_v29 = vadd.f32 1.0, %v6496_v60  ;;  %v6498_v12 = vpop.eup %6497  ;;  %v9267_v60 = vld [vmem:[%s9873_s6 + $0x80] sm:$0xff] }
0x21dc   :  { %v4117_v19 = vadd.f32 1.0, %v6498_v12  ;;  %v9281_v12 = vld [vmem:[%s9873_s6 + $0x70] sm:$0xff] }
0x21dd   :  { %6499 = vrcp.f32 %v4012_v29  ;;  %v4024_v3 = vand.u32 2147483648, %v4012_v29  ;;  %vm4018_vm11 = vweird.f32 %v4012_v29  ;;  %v4022_v15 = vand.u32 2147483647, %v4012_v29 }
0x21de   :  { %6501 = vrcp.f32 %v4117_v19  ;;  %v4129_v18 = vand.u32 2147483648, %v4117_v19  ;;  %vm4123_vm14 = vweird.f32 %v4117_v19  ;;  %v4127_v34 = vand.u32 2147483647, %v4117_v19 }
0x21df   :  { %v4025_v11 = vor.u32 1.1754944e-38, %v4024_v3  ;;  %vm4023_vm15 = vcmp.eq.f32.partialorder %v4022_v15, 8.507059e+37  ;;  %v9357_v3 = vld [vmem:[%s9873_s6 + $0xe8] sm:$0xff]  ;;  %v9363_v15 = vld [vmem:[%s9873_s6 + $0xd0] sm:$0xff] }
0x21e0   :  { %v4130_v38 = vor.u32 1.1754944e-38, %v4129_v18  ;;  %vm4128_vm12 = vcmp.eq.f32.partialorder %v4127_v34, 8.507059e+37 }
0x21e3   :  { %v6500_v39 = vpop.eup %6499 }
0x21e4   :  { %v4014_v10 = vmul.f32 %v6500_v39, %v4012_v29  ;;  %v6502_v26 = vpop.eup %6501  ;;  %vm4019_vm10 = vweird.f32 %v6500_v39  ;;  %v9273_v29 = vld [vmem:[%s9873_s6 + $0x88] sm:$0xff] }
0x21e5   :  { %v4119_v25 = vmul.f32 %v6502_v26, %v4117_v19  ;;  %vm4020_vm13 = vmor %vm4018_vm11, %vm4019_vm10  ;;  %vm4124_vm1 = vweird.f32 %v6502_v26  ;;  %v9287_v19 = vld [vmem:[%s9873_s6 + $0x78] sm:$0xff] }
0x21e6   :  { %v4015_v14 = vsub.f32 1.0, %v4014_v10  ;;  %vm4125_vm4 = vmor %vm4123_vm14, %vm4124_vm1  ;;  %v9302_v10 = vld [vmem:[%s9873_s6 + $0x128] sm:$0x3] }
0x21e7   :  { %v4120_v62 = vsub.f32 1.0, %v4119_v25  ;;  %v9317_v25 = vld [vmem:[%s9873_s6 + $0x118] sm:$0xff] }
0x21e8   :  { %v4016_v42 = vmul.f32 %v6500_v39, %v4015_v14  ;;  %v9325_v14 = vld [vmem:[%s9873_s6 + $0x100] sm:$0xff] }
0x21e9   :  { %v4121_v7 = vmul.f32 %v6502_v26, %v4120_v62  ;;  %v9331_v62 = vld [vmem:[%s9873_s6 + $0x108] sm:$0xff] }
0x21ea   :  { %v4017_v49 = vadd.f32 %v6500_v39, %v4016_v42  ;;  %v9339_v42 = vld [vmem:[%s9873_s6 + $0xf0] sm:$0xff] }
0x21eb   :  { %v4122_v41 = vadd.f32 %v6502_v26, %v4121_v7  ;;  %v9345_v7 = vld [vmem:[%s9873_s6 + $0xf8] sm:$0xff] }
0x21ec   :  { %v4021_v0 = vsel %vm4020_vm13, %v6500_v39, %v4017_v49  ;;  %v9295_v39 = vld [vmem:[%s9873_s6 + $0x120] sm:$0x3] }
0x21ed   :  { %v4026_v6 = vsel %vm4023_vm15, %v4025_v11, %v4021_v0  ;;  %v4126_v8 = vsel %vm4125_vm4, %v6502_v26, %v4122_v41  ;;  %v9311_v26 = vld [vmem:[%s9873_s6 + $0x110] sm:$0xff]  ;;  %v9351_v49 = vld [vmem:[%s9873_s6 + $0xe0] sm:$0xff]  ;;  %v9369_v41 = vld [vmem:[%s9873_s6 + $0xd8] sm:$0xff] }
0x21ee   :  { %v4131_v5 = vsel %vm4128_vm12, %v4130_v38, %v4126_v8 }
0x2234   :  { %v4042_v1 = vpop.permute.xlu2 %4041 }
0x2235   :  { %v4150_v55 = vpop.permute.xlu0 %4149  ;;  %v4044_v58 = vmul.f32 %v4042_v1, %v4006_v46  ;;  %v4045_v40 = vmul.f32 %v4042_v1, %v4026_v6 }
0x2236   :  { %v4152_v37 = vmul.f32 %v4150_v55, %v9179_v30  ;;  %v4153_v61 = vmul.f32 %v4150_v55, %v4131_v5  ;;  %v9208_v30 = vld [vmem:[%s9873_s6 + $0xc0] sm:$0x3] }
0x2237   :  { %4158 = vrot.lane.b32.xlu2 %v4045_v40, %s6757_s16  ;;  %4156 = vrot.lane.b32.xlu1 %v4044_v58, %s6757_s16 }
0x2238   :  { %v4205_v54 = vrot.slane %v4152_v37, 1  ;;  %v4206_v44 = vrot.slane %v4153_v61, 1 }
0x223a   :  { %4207 = vrot.lane.b32.xlu0 %v4205_v54, %s6757_s16 }
0x223f   :  { %4209 = vrot.lane.b32.xlu1 %v4206_v44, %s6757_s16 }
0x2291   :  { %v4159_v56 = vpop.permute.xlu2 %4158 }
0x22a9   :  { %v4157_v31 = vpop.permute.xlu1 %4156 }
0x22aa   :  { %v4160_v46 = vsel %vm1584_vm8, %v4157_v31, %v4159_v56 }
0x22ab   :  { %6114 = vmatmul.msk.f32.vlgmr.msra.gmra.mxu3 %vm1644_vm0, %v4160_v46  ;;  %6116 = vmatmul.msk.f32.vlgmr.msra.gmra.mxu0 %vm1644_vm0, %v4160_v46 }
0x22ac   :  { %6133 = vmatpush.msk.msra.mxu3 %vm1591_vm6, %v9208_v30  ;;  %6135 = vmatpush.msk.msra.mxu0 %vm1591_vm6, %v9215_v27  ;;  %v4208_v16 = vpop.permute.xlu0 %4207 }
0x22ae   :  { %4492 = vmatpush.msra.mxu3 %v9222_v59  ;;  %4512 = vmatpush.msra.mxu0 %v9228_v47 }
0x22b0   :  { %4493 = vmatpush.msra.mxu3 %v9234_v2  ;;  %4513 = vmatpush.msra.mxu0 %v9240_v43 }
0x22b1   :  { %v4210_v63 = vpop.permute.xlu1 %4209 }
0x22b2   :  { %v4211_v51 = vsel %vm1584_vm8, %v4208_v16, %v4210_v63  ;;  %4494 = vmatpush.msra.mxu3 %v9247_v36  ;;  %4514 = vmatpush.msra.mxu0 %v9253_v57 }
0x22b3   :  { %6118 = vmatmul.msk.f32.vlgmr.msrb.gmra.mxu2 %vm1644_vm0, %v4211_v51  ;;  %6120 = vmatmul.msk.f32.vlgmr.msra.gmra.mxu1 %vm1644_vm0, %v4211_v51 }
0x22b4   :  { %6124 = vmatmul.msk.f32.vlgmr.msrb.gmra.mxu3 %vm1644_vm0, %v4211_v51  ;;  %6126 = vmatmul.msk.f32.vlgmr.msrb.gmra.mxu0 %vm1644_vm0, %v4211_v51 }
0x22b5   :  { %6139 = vmatpush.msk.msrb.mxu2 %vm1591_vm6, %v9086_v20  ;;  %6141 = vmatpush.msk.msra.mxu1 %vm1591_vm6, %v9093_v28 }
0x22b6   :  { %4495 = vmatpush.msra.mxu3 %v9267_v60  ;;  %4515 = vmatpush.msra.mxu0 %v9273_v29 }
0x22b7   :  { %4591 = vmatpush.msrb.mxu2 %v9102_v24  ;;  %4611 = vmatpush.msra.mxu1 %v9108_v33 }
0x22b8   :  { %4496 = vmatpush.msra.mxu3 %v9281_v12  ;;  %4516 = vmatpush.msra.mxu0 %v9287_v19 }
0x22b9   :  { %4592 = vmatpush.msrb.mxu2 %v9116_v22  ;;  %4612 = vmatpush.msra.mxu1 %v9122_v50 }
0x22ba   :  { %6145 = vmatpush.msk.msrb.mxu3 %vm1591_vm6, %v9295_v39  ;;  %6147 = vmatpush.msk.msrb.mxu0 %vm1591_vm6, %v9302_v10 }
0x22bb   :  { %4593 = vmatpush.msrb.mxu2 %v9132_v35  ;;  %4613 = vmatpush.msra.mxu1 %v9138_v21 }
0x22bc   :  { %4708 = vmatpush.msrb.mxu3 %v9311_v26  ;;  %4728 = vmatpush.msrb.mxu0 %v9317_v25 }
0x22bd   :  { %4594 = vmatpush.msrb.mxu2 %v9146_v23  ;;  %4614 = vmatpush.msra.mxu1 %v9152_v32 }
0x22be   :  { %4709 = vmatpush.msrb.mxu3 %v9325_v14  ;;  %4729 = vmatpush.msrb.mxu0 %v9331_v62 }
0x22bf   :  { %4595 = vmatpush.msrb.mxu2 %v9160_v9  ;;  %4615 = vmatpush.msra.mxu1 %v9166_v13 }
0x22c0   :  { %4710 = vmatpush.msrb.mxu3 %v9339_v42  ;;  %4730 = vmatpush.msrb.mxu0 %v9345_v7 }
0x22c2   :  { %4711 = vmatpush.msrb.mxu3 %v9351_v49  ;;  %4731 = vmatpush.msrb.mxu0 %v9357_v3 }
0x22c4   :  { %4712 = vmatpush.msrb.mxu3 %v9363_v15  ;;  %4732 = vmatpush.msrb.mxu0 %v9369_v41 }
0x232e   :  { %v4180_v0 = vpop.f32.mrf.mxu3 }
0x2336   :  { %v4231_v18 = vpop.f32.mrf.mxu2 }
0x2337   :  { %v4232_v11 = vadd.f32 %v4231_v18, %v4180_v0  ;;  %v4330_v34 = vpop.f32.mrf.mxu3 }
0x2338   :  { %v4355_v6 = vrot.slane %v4330_v34, 6 }
0x2339   :  { %v4254_v1 = vadd.f32 %v4232_v11, %v8098_v48 }
0x233a   :  { %v4359_v8 = vadd.f32 %v4355_v6, %v9032_v4 }
0x233b   :  { %6503 = vtanh.f32 %v4254_v1  ;;  %v6121_v40 = vmul.f32 -1.442695, %v4254_v1 }
0x233c   :  { %6505 = vtanh.f32 %v4359_v8  ;;  %v6127_v54 = vmul.f32 -1.442695, %v4359_v8 }
0x233d   :  { %6507 = vpow2.f32 %v6121_v40 }
0x2341   :  { %v6504_v55 = vpop.eup %6503 }
0x2342   :  { %v6506_v58 = vpop.eup %6505  ;;  %4297 = vrot.lane.b32.xlu2 %v6504_v55, %s6754_s22 }
0x2343   :  { %4405 = vrot.lane.b32.xlu0 %v6506_v58, %s6754_s22  ;;  %v6508_v38 = vpop.eup %6507 }
0x2344   :  { %v4259_v37 = vadd.f32 1.0, %v6508_v38 }
0x2346   :  { %6509 = vrcp.f32 %v4259_v37  ;;  %v4271_v63 = vand.u32 2147483648, %v4259_v37  ;;  %vm4265_vm2 = vweird.f32 %v4259_v37  ;;  %v4269_v51 = vand.u32 2147483647, %v4259_v37 }
0x2347   :  { %6511 = vpow2.f32 %v6127_v54 }
0x2348   :  { %v4272_v18 = vor.u32 1.1754944e-38, %v4271_v63  ;;  %vm4270_vm7 = vcmp.eq.f32.partialorder %v4269_v51, 8.507059e+37 }
0x234c   :  { %v6510_v5 = vpop.eup %6509 }
0x234d   :  { %v4261_v61 = vmul.f32 %v6510_v5, %v4259_v37  ;;  %v6512_v31 = vpop.eup %6511  ;;  %vm4266_vm3 = vweird.f32 %v6510_v5 }
0x234e   :  { %v4364_v46 = vadd.f32 1.0, %v6512_v31  ;;  %vm4267_vm5 = vmor %vm4265_vm2, %vm4266_vm3  ;;  %v4401_v31 = vrot.slane %v9186_v53, 7  ;;  %v4200_v53 = vpop.f32.mrf.mxu0 }
0x234f   :  { %v4262_v44 = vsub.f32 1.0, %v4261_v61 }
0x2350   :  { %6513 = vrcp.f32 %v4364_v46  ;;  %v4376_v38 = vand.u32 2147483648, %v4364_v46  ;;  %vm4370_vm10 = vweird.f32 %v4364_v46  ;;  %v4374_v37 = vand.u32 2147483647, %v4364_v46 }
0x2351   :  { %v4263_v56 = vmul.f32 %v6510_v5, %v4262_v44 }
0x2352   :  { %v4377_v54 = vor.u32 1.1754944e-38, %v4376_v38  ;;  %vm4375_vm13 = vcmp.eq.f32.partialorder %v4374_v37, 8.507059e+37 }
0x2353   :  { %v4264_v16 = vadd.f32 %v6510_v5, %v4263_v56 }
0x2355   :  { %v4268_v0 = vsel %vm4267_vm5, %v6510_v5, %v4264_v16 }
0x2356   :  { %v9376_v34 = vsel %vm4270_vm7, %v4272_v18, %v4268_v0  ;;  %v6514_v1 = vpop.eup %6513 }
0x2357   :  { %v4366_v8 = vmul.f32 %v6514_v1, %v4364_v46  ;;  %vm4371_vm9 = vweird.f32 %v6514_v1  ;;  %v4295_v16 = vmul.f32 %v9376_v34, %v9191_v17  ;;  %v4251_v17 = vpop.f32.mrf.mxu1 }
0x2358   :  { %vm4372_vm11 = vmor %vm4370_vm10, %vm4371_vm9 }
0x2359   :  { %v4367_v55 = vsub.f32 1.0, %v4366_v8  ;;  %v4350_v8 = vpop.f32.mrf.mxu0 }
0x235b   :  { %v4368_v58 = vmul.f32 %v6514_v1, %v4367_v55 }
0x235d   :  { %v4369_v40 = vadd.f32 %v6514_v1, %v4368_v58  ;;  %v4356_v58 = vrot.slane %v4350_v8, 6 }
0x235f   :  { %v4373_v5 = vsel %vm4372_vm11, %v6514_v1, %v4369_v40  ;;  %v4252_v1 = vadd.f32 %v4251_v17, %v4200_v53  ;;  %v4360_v38 = vadd.f32 %v4356_v58, %v9057_v45 }
0x2360   :  { %v9380_v44 = vsel %vm4375_vm13, %v4377_v54, %v4373_v5 }
0x2361   :  { %v4403_v63 = vmul.f32 %v4401_v31, %v9380_v44  ;;  %v4255_v55 = vadd.f32 %v4252_v1, %v8125_v52  ;;  %v6128_v37 = vmul.f32 -1.442695, %v4360_v38 }
0x2363   :  { %v6122_v40 = vmul.f32 -1.442695, %v4255_v55 }
0x239c   :  { %v4298_v11 = vpop.permute.xlu2 %4297 }
0x239d   :  { %v4300_v6 = vmul.f32 %v4298_v11, %v9376_v34 }
0x239f   :  { %4302 = vrot.lane.b32.xlu1 %v4300_v6, %s6755_s15 }
0x23b5   :  { %v4406_v61 = vpop.permute.xlu0 %4405 }
0x23b6   :  { %v4408_v56 = vmul.f32 %v4406_v61, %v9380_v44 }
0x23b8   :  { %4410 = vrot.lane.b32.xlu2 %v4408_v56, %s6755_s15 }
0x2411   :  { %v4303_v51 = vpop.permute.xlu1 %4302 }
0x2412   :  { %v4411_v46 = vpop.permute.xlu2 %4410  ;;  %v9388_v0 = vadd.f32 %v4303_v51, %v4295_v16 }
0x2413   :  { %v9390_v18 = vadd.f32 %v4411_v46, %v4403_v63 }
0x2414   :  { %6515 = vtanh.f32 %v9388_v0 }
0x2415   :  { %6517 = vtanh.f32 %v9390_v18 }
0x2416   :  { %6519 = vpow2.f32 %v6122_v40 }
0x2417   :  { %6521 = vpow2.f32 %v6128_v37 }
0x241a   :  { %v6516_v11 = vpop.eup %6515 }
0x241b   :  { %v6518_v6 = vpop.eup %6517  ;;  %4308 = vrot.lane.b32.xlu0 %v6516_v11, %s6756_s18 }
0x241c   :  { %4416 = vrot.lane.b32.xlu1 %v6518_v6, %s6756_s18  ;;  %v6520_v5 = vpop.eup %6519 }
0x241d   :  { %v4279_v54 = vadd.f32 1.0, %v6520_v5  ;;  %v6522_v61 = vpop.eup %6521 }
0x241e   :  { %v4384_v56 = vadd.f32 1.0, %v6522_v61 }
0x241f   :  { %6523 = vrcp.f32 %v4279_v54  ;;  %v4291_v1 = vand.u32 2147483648, %v4279_v54  ;;  %vm4285_vm14 = vweird.f32 %v4279_v54  ;;  %v4289_v8 = vand.u32 2147483647, %v4279_v54 }
0x2420   :  { %6525 = vrcp.f32 %v4384_v56  ;;  %v4396_v40 = vand.u32 2147483648, %v4384_v56  ;;  %vm4390_vm12 = vweird.f32 %v4384_v56  ;;  %v4394_v37 = vand.u32 2147483647, %v4384_v56 }
0x2421   :  { %v4292_v38 = vor.u32 1.1754944e-38, %v4291_v1  ;;  %vm4290_vm3 = vcmp.eq.f32.partialorder %v4289_v8, 8.507059e+37 }
0x2422   :  { %vm4395_vm5 = vcmp.eq.f32.partialorder %v4394_v37, 8.507059e+37 }
0x2425   :  { %v6524_v31 = vpop.eup %6523 }
0x2426   :  { %v4281_v16 = vmul.f32 %v6524_v31, %v4279_v54  ;;  %v6526_v63 = vpop.eup %6525  ;;  %vm4286_vm1 = vweird.f32 %v6524_v31 }
0x2427   :  { %v4386_v51 = vmul.f32 %v6526_v63, %v4384_v56  ;;  %vm4287_vm15 = vmor %vm4285_vm14, %vm4286_vm1  ;;  %vm4391_vm4 = vweird.f32 %v6526_v63 }
0x2428   :  { %v4282_v46 = vsub.f32 1.0, %v4281_v16  ;;  %vm4392_vm2 = vmor %vm4390_vm12, %vm4391_vm4 }
0x2429   :  { %v4387_v11 = vsub.f32 1.0, %v4386_v51 }
0x242a   :  { %v4283_v6 = vmul.f32 %v6524_v31, %v4282_v46 }
0x242b   :  { %v4388_v53 = vmul.f32 %v6526_v63, %v4387_v11 }
0x242c   :  { %v4284_v17 = vadd.f32 %v6524_v31, %v4283_v6  ;;  %v4397_v6 = vor.u32 1.1754944e-38, %v4396_v40 }
0x242d   :  { %v4389_v55 = vadd.f32 %v6526_v63, %v4388_v53 }
0x242e   :  { %v4288_v58 = vsel %vm4287_vm15, %v6524_v31, %v4284_v17 }
0x242f   :  { %v4293_v5 = vsel %vm4290_vm3, %v4292_v38, %v4288_v58  ;;  %v4393_v16 = vsel %vm4392_vm2, %v6526_v63, %v4389_v55 }
0x2430   :  { %v4398_v31 = vsel %vm4395_vm5, %v4397_v6, %v4393_v16 }
0x248d   :  { %v4309_v61 = vpop.permute.xlu0 %4308 }
0x248e   :  { %v4417_v51 = vpop.permute.xlu1 %4416  ;;  %v4311_v46 = vmul.f32 %v4309_v61, %v9376_v34  ;;  %v4312_v11 = vmul.f32 %v4309_v61, %v4293_v5 }
0x248f   :  { %v4419_v54 = vmul.f32 %v4417_v51, %v9380_v44  ;;  %v4420_v56 = vmul.f32 %v4417_v51, %v4398_v31 }
0x2490   :  { %4425 = vrot.lane.b32.xlu0 %v4312_v11, %s6757_s16  ;;  %4423 = vrot.lane.b32.xlu2 %v4311_v46, %s6757_s16 }
0x2491   :  { %v4472_v53 = vrot.slane %v4419_v54, 2  ;;  %v4473_v17 = vrot.slane %v4420_v56, 2 }
0x2493   :  { %4474 = vrot.lane.b32.xlu1 %v4472_v53, %s6757_s16 }
0x2498   :  { %4476 = vrot.lane.b32.xlu2 %v4473_v17, %s6757_s16 }
0x24ea   :  { %v4424_v63 = vpop.permute.xlu2 %4423 }
0x24f2   :  { %v4477_v44 = vpop.permute.xlu2 %4476 }
0x2502   :  { %v4426_v1 = vpop.permute.xlu0 %4425 }
0x2503   :  { %v4427_v34 = vsel %vm1584_vm8, %v4424_v63, %v4426_v1 }
0x2504   :  { %6130 = vmatmul.msk.f32.vlgmr.msra.gmra.mxu2 %vm1644_vm0, %v4427_v34  ;;  %6132 = vmatmul.msk.f32.vlgmr.msrb.gmra.mxu1 %vm1644_vm0, %v4427_v34 }
0x2505   :  { %v4475_v8 = vpop.permute.xlu1 %4474  ;;  %6149 = vmatpush.msk.msra.mxu2 %vm1591_vm6, %v9208_v30  ;;  %6151 = vmatpush.msk.msrb.mxu1 %vm1591_vm6, %v9215_v27 }
0x2506   :  { %v4478_v55 = vsel %vm1584_vm8, %v4475_v8, %v4477_v44 }
0x2507   :  { %6134 = vmatmul.msk.f32.vlgmr.msra.gmra.mxu3 %vm1644_vm0, %v4478_v55  ;;  %6136 = vmatmul.msk.f32.vlgmr.msra.gmra.mxu0 %vm1644_vm0, %v4478_v55 }
0x2508   :  { %6155 = vmatpush.msk.msra.mxu3 %vm1591_vm6, %v9086_v20  ;;  %6157 = vmatpush.msk.msra.mxu0 %vm1591_vm6, %v9093_v28 }
0x2509   :  { %4759 = vmatpush.msra.mxu2 %v9222_v59  ;;  %4779 = vmatpush.msrb.mxu1 %v9228_v47 }
0x250a   :  { %4858 = vmatpush.msra.mxu3 %v9102_v24  ;;  %4878 = vmatpush.msra.mxu0 %v9108_v33 }
0x250b   :  { %4760 = vmatpush.msra.mxu2 %v9234_v2  ;;  %4780 = vmatpush.msrb.mxu1 %v9240_v43 }
0x250c   :  { %6140 = vmatmul.msk.f32.vlgmr.msrb.gmra.mxu2 %vm1644_vm0, %v4478_v55  ;;  %6142 = vmatmul.msk.f32.vlgmr.msra.gmra.mxu1 %vm1644_vm0, %v4478_v55 }
0x250d   :  { %4859 = vmatpush.msra.mxu3 %v9116_v22  ;;  %4879 = vmatpush.msra.mxu0 %v9122_v50 }
0x250e   :  { %4761 = vmatpush.msra.mxu2 %v9247_v36  ;;  %4781 = vmatpush.msrb.mxu1 %v9253_v57 }
0x250f   :  { %4860 = vmatpush.msra.mxu3 %v9132_v35  ;;  %4880 = vmatpush.msra.mxu0 %v9138_v21 }
0x2510   :  { %4762 = vmatpush.msra.mxu2 %v9267_v60  ;;  %4782 = vmatpush.msrb.mxu1 %v9273_v29 }
0x2511   :  { %4861 = vmatpush.msra.mxu3 %v9146_v23  ;;  %4881 = vmatpush.msra.mxu0 %v9152_v32 }
0x2512   :  { %4763 = vmatpush.msra.mxu2 %v9281_v12  ;;  %4783 = vmatpush.msrb.mxu1 %v9287_v19 }
0x2513   :  { %4862 = vmatpush.msra.mxu3 %v9160_v9  ;;  %4882 = vmatpush.msra.mxu0 %v9166_v13 }
0x2514   :  { %6161 = vmatpush.msk.msrb.mxu2 %vm1591_vm6, %v9295_v39  ;;  %6163 = vmatpush.msk.msra.mxu1 %vm1591_vm6, %v9302_v10 }
0x2516   :  { %4975 = vmatpush.msrb.mxu2 %v9311_v26  ;;  %4995 = vmatpush.msra.mxu1 %v9317_v25 }
0x2518   :  { %4976 = vmatpush.msrb.mxu2 %v9325_v14  ;;  %4996 = vmatpush.msra.mxu1 %v9331_v62 }
0x251a   :  { %4977 = vmatpush.msrb.mxu2 %v9339_v42  ;;  %4997 = vmatpush.msra.mxu1 %v9345_v7 }
0x251c   :  { %4978 = vmatpush.msrb.mxu2 %v9351_v49  ;;  %4998 = vmatpush.msra.mxu1 %v9357_v3 }
0x251e   :  { %4979 = vmatpush.msrb.mxu2 %v9363_v15  ;;  %4999 = vmatpush.msra.mxu1 %v9369_v41 }
0x2587   :  { %v4447_v20 = vpop.f32.mrf.mxu2 }
0x258a   :  { %v4498_v28 = vpop.f32.mrf.mxu3 }
0x258b   :  { %v4499_v24 = vadd.f32 %v4498_v28, %v4447_v20 }
0x258d   :  { %v4521_v33 = vadd.f32 %v4499_v24, %v8098_v48 }
0x258f   :  { %6527 = vtanh.f32 %v4521_v33  ;;  %v4597_v22 = vpop.f32.mrf.mxu2  ;;  %v6137_v32 = vmul.f32 -1.442695, %v4521_v33 }
0x2590   :  { %v4622_v50 = vrot.slane %v4597_v22, 5 }
0x2592   :  { %v4626_v35 = vadd.f32 %v4622_v50, %v9032_v4 }
0x2594   :  { %6529 = vtanh.f32 %v4626_v35  ;;  %v6143_v9 = vmul.f32 -1.442695, %v4626_v35 }
0x2595   :  { %v6528_v21 = vpop.eup %6527  ;;  %6531 = vpow2.f32 %v6137_v32  ;;  %v4668_v32 = vrot.slane %v9390_v18, 7 }
0x2596   :  { %4564 = vrot.lane.b32.xlu0 %v6528_v21, %s6754_s22  ;;  %6533 = vpow2.f32 %v6143_v9 }
0x259a   :  { %v6530_v23 = vpop.eup %6529 }
0x259b   :  { %4672 = vrot.lane.b32.xlu1 %v6530_v23, %s6754_s22  ;;  %v6532_v13 = vpop.eup %6531 }
0x259c   :  { %v4526_v58 = vadd.f32 1.0, %v6532_v13  ;;  %v6534_v40 = vpop.eup %6533 }
0x259d   :  { %v4631_v38 = vadd.f32 1.0, %v6534_v40 }
0x259e   :  { %6535 = vrcp.f32 %v4526_v58  ;;  %v4538_v54 = vand.u32 2147483648, %v4526_v58  ;;  %vm4532_vm9 = vweird.f32 %v4526_v58  ;;  %v4536_v31 = vand.u32 2147483647, %v4526_v58 }
0x259f   :  { %6537 = vrcp.f32 %v4631_v38  ;;  %v4643_v44 = vand.u32 2147483648, %v4631_v38  ;;  %vm4637_vm1 = vweird.f32 %v4631_v38  ;;  %v4641_v55 = vand.u32 2147483647, %v4631_v38 }
0x25a0   :  { %v4539_v17 = vor.u32 1.1754944e-38, %v4538_v54  ;;  %vm4537_vm11 = vcmp.eq.f32.partialorder %v4536_v31, 8.507059e+37 }
0x25a1   :  { %v4644_v28 = vor.u32 1.1754944e-38, %v4643_v44  ;;  %vm4642_vm15 = vcmp.eq.f32.partialorder %v4641_v55, 8.507059e+37 }
0x25a4   :  { %v6536_v37 = vpop.eup %6535 }
0x25a5   :  { %v4528_v5 = vmul.f32 %v6536_v37, %v4526_v58  ;;  %v6538_v61 = vpop.eup %6537  ;;  %vm4533_vm7 = vweird.f32 %v6536_v37 }
0x25a6   :  { %v4633_v51 = vmul.f32 %v6538_v61, %v4631_v38  ;;  %vm4534_vm10 = vmor %vm4532_vm9, %vm4533_vm7  ;;  %vm4638_vm13 = vweird.f32 %v6538_v61  ;;  %v4518_v38 = vpop.f32.mrf.mxu0 }
0x25a7   :  { %v4529_v16 = vsub.f32 1.0, %v4528_v5  ;;  %vm4639_vm14 = vmor %vm4637_vm1, %vm4638_vm13 }
0x25a8   :  { %v4634_v11 = vsub.f32 1.0, %v4633_v51 }
0x25a9   :  { %v4530_v46 = vmul.f32 %v6536_v37, %v4529_v16 }
0x25aa   :  { %v4635_v53 = vmul.f32 %v6538_v61, %v4634_v11 }
0x25ab   :  { %v4531_v6 = vadd.f32 %v6536_v37, %v4530_v46 }
0x25ac   :  { %v4636_v63 = vadd.f32 %v6538_v61, %v4635_v53 }
0x25ad   :  { %v4535_v56 = vsel %vm4534_vm10, %v6536_v37, %v4531_v6 }
0x25ae   :  { %v9458_v34 = vsel %vm4537_vm11, %v4539_v17, %v4535_v56  ;;  %v4640_v20 = vsel %vm4639_vm14, %v6538_v61, %v4636_v63 }
0x25af   :  { %v9462_v33 = vsel %vm4642_vm15, %v4644_v28, %v4640_v20  ;;  %v4562_v50 = vmul.f32 %v9458_v34, %v9388_v0  ;;  %v4467_v0 = vpop.f32.mrf.mxu1 }
0x25b0   :  { %v4670_v9 = vmul.f32 %v4668_v32, %v9462_v33  ;;  %v4519_v37 = vadd.f32 %v4518_v38, %v4467_v0 }
0x25b2   :  { %v4522_v61 = vadd.f32 %v4519_v37, %v8125_v52 }
0x25b4   :  { %v6138_v51 = vmul.f32 -1.442695, %v4522_v61 }
0x25b7   :  { %v4617_v5 = vpop.f32.mrf.mxu1 }
0x25b8   :  { %v4623_v16 = vrot.slane %v4617_v5, 5 }
0x25ba   :  { %v4627_v18 = vadd.f32 %v4623_v16, %v9057_v45 }
0x25bc   :  { %v6144_v46 = vmul.f32 -1.442695, %v4627_v18 }
0x2608   :  { %v4565_v1 = vpop.permute.xlu0 %4564 }
0x2609   :  { %v4567_v8 = vmul.f32 %v4565_v1, %v9458_v34 }
0x260b   :  { %4569 = vrot.lane.b32.xlu2 %v4567_v8, %s6755_s15 }
0x260d   :  { %v4673_v24 = vpop.permute.xlu1 %4672 }
0x260e   :  { %v4675_v22 = vmul.f32 %v4673_v24, %v9462_v33 }
0x2610   :  { %4677 = vrot.lane.b32.xlu0 %v4675_v22, %s6755_s15 }
0x2665   :  { %v4570_v35 = vpop.permute.xlu2 %4569 }
0x2666   :  { %v9468_v21 = vadd.f32 %v4570_v35, %v4562_v50 }
0x2668   :  { %6539 = vtanh.f32 %v9468_v21 }
0x266e   :  { %v6540_v23 = vpop.eup %6539 }
0x266f   :  { %4575 = vrot.lane.b32.xlu1 %v6540_v23, %s6756_s18 }
0x2682   :  { %v4678_v13 = vpop.permute.xlu0 %4677 }
0x2683   :  { %v9474_v58 = vadd.f32 %v4678_v13, %v4670_v9 }
0x2685   :  { %6541 = vtanh.f32 %v9474_v58 }
0x2686   :  { %6543 = vpow2.f32 %v6138_v51 }
0x2687   :  { %6545 = vpow2.f32 %v6144_v46 }
0x268b   :  { %v6542_v40 = vpop.eup %6541 }
0x268c   :  { %4683 = vrot.lane.b32.xlu2 %v6542_v40, %s6756_s18  ;;  %v6544_v11 = vpop.eup %6543 }
0x268d   :  { %v4546_v6 = vadd.f32 1.0, %v6544_v11  ;;  %v6546_v54 = vpop.eup %6545 }
0x268e   :  { %v4651_v31 = vadd.f32 1.0, %v6546_v54 }
0x268f   :  { %6547 = vrcp.f32 %v4546_v6  ;;  %v4558_v20 = vand.u32 2147483648, %v4546_v6  ;;  %vm4552_vm12 = vweird.f32 %v4546_v6  ;;  %v4556_v28 = vand.u32 2147483647, %v4546_v6 }
0x2690   :  { %6549 = vrcp.f32 %v4651_v31  ;;  %v4663_v9 = vand.u32 2147483648, %v4651_v31  ;;  %vm4657_vm7 = vweird.f32 %v4651_v31  ;;  %v4661_v0 = vand.u32 2147483647, %v4651_v31 }
0x2691   :  { %v4559_v50 = vor.u32 1.1754944e-38, %v4558_v20  ;;  %vm4557_vm2 = vcmp.eq.f32.partialorder %v4556_v28, 8.507059e+37 }
0x2692   :  { %v4664_v37 = vor.u32 1.1754944e-38, %v4663_v9  ;;  %vm4662_vm10 = vcmp.eq.f32.partialorder %v4661_v0, 8.507059e+37 }
0x2695   :  { %v6548_v53 = vpop.eup %6547 }
0x2696   :  { %v4548_v56 = vmul.f32 %v6548_v53, %v4546_v6  ;;  %v6550_v17 = vpop.eup %6549  ;;  %vm4553_vm4 = vweird.f32 %v6548_v53 }
0x2697   :  { %v4653_v1 = vmul.f32 %v6550_v17, %v4651_v31  ;;  %vm4554_vm3 = vmor %vm4552_vm12, %vm4553_vm4  ;;  %vm4658_vm5 = vweird.f32 %v6550_v17 }
0x2698   :  { %v4549_v63 = vsub.f32 1.0, %v4548_v56  ;;  %vm4659_vm9 = vmor %vm4657_vm7, %vm4658_vm5 }
0x2699   :  { %v4654_v8 = vsub.f32 1.0, %v4653_v1 }
0x269a   :  { %v4550_v44 = vmul.f32 %v6548_v53, %v4549_v63 }
0x269b   :  { %v4655_v24 = vmul.f32 %v6550_v17, %v4654_v8 }
0x269c   :  { %v4551_v55 = vadd.f32 %v6548_v53, %v4550_v44 }
0x269d   :  { %v4656_v35 = vadd.f32 %v6550_v17, %v4655_v24 }
0x269e   :  { %v4555_v22 = vsel %vm4554_vm3, %v6548_v53, %v4551_v55 }
0x269f   :  { %v4560_v23 = vsel %vm4557_vm2, %v4559_v50, %v4555_v22  ;;  %v4660_v38 = vsel %vm4659_vm9, %v6550_v17, %v4656_v35 }
0x26a0   :  { %v4665_v5 = vsel %vm4662_vm10, %v4664_v37, %v4660_v38 }
0x26e1   :  { %v4576_v32 = vpop.permute.xlu1 %4575 }
0x26e2   :  { %v4578_v13 = vmul.f32 %v4576_v32, %v9458_v34  ;;  %v4579_v40 = vmul.f32 %v4576_v32, %v4560_v23 }
0x26e4   :  { %4692 = vrot.lane.b32.xlu1 %v4579_v40, %s6757_s16  ;;  %4690 = vrot.lane.b32.xlu0 %v4578_v13, %s6757_s16 }
0x26e6   :  { %v4684_v61 = vpop.permute.xlu2 %4683 }
0x26e7   :  { %v4686_v16 = vmul.f32 %v4684_v61, %v9462_v33  ;;  %v4687_v51 = vmul.f32 %v4684_v61, %v4665_v5 }
0x26e9   :  { %v4739_v18 = vrot.slane %v4686_v16, 3  ;;  %v4740_v46 = vrot.slane %v4687_v51, 3 }
0x26eb   :  { %4741 = vrot.lane.b32.xlu2 %v4739_v18, %s6757_s16 }
0x26ec   :  { %4743 = vrot.lane.b32.xlu0 %v4740_v46, %s6757_s16  ;;  %v4935_v46 = vrot.slane %v9474_v58, 7 }
0x2745   :  { %v4742_v33 = vpop.permute.xlu2 %4741 }
0x2756   :  { %v4693_v34 = vpop.permute.xlu1 %4692  ;;  %v4691_v11 = vpop.permute.xlu0 %4690 }
0x2757   :  { %v4694_v6 = vsel %vm1584_vm8, %v4691_v11, %v4693_v34 }
0x2758   :  { %6146 = vmatmul.msk.f32.vlgmr.msrb.gmra.mxu3 %vm1644_vm0, %v4694_v6  ;;  %6148 = vmatmul.msk.f32.vlgmr.msrb.gmra.mxu0 %vm1644_vm0, %v4694_v6 }
0x2759   :  { %6165 = vmatpush.msk.msrb.mxu3 %vm1591_vm6, %v9208_v30  ;;  %6167 = vmatpush.msk.msrb.mxu0 %vm1591_vm6, %v9215_v27  ;;  %v6727_v30 = vld [vmem:[%s9873_s6 + $0x60] sm:$0x3]  ;;  %v6728_v27 = vld [vmem:[%s9873_s6 + $0x68] sm:$0x3] }
0x275b   :  { %5026 = vmatpush.msrb.mxu3 %v9222_v59  ;;  %5046 = vmatpush.msrb.mxu0 %v9228_v47  ;;  %v6729_v59 = vld [vmem:[%s9873_s6 + $0x50] sm:$0xff]  ;;  %v6730_v47 = vld [vmem:[%s9873_s6 + $0x58] sm:$0xff] }
0x275d   :  { %5027 = vmatpush.msrb.mxu3 %v9234_v2  ;;  %5047 = vmatpush.msrb.mxu0 %v9240_v43  ;;  %v6731_v2 = vld [vmem:[%s9873_s6 + $0x40] sm:$0xff]  ;;  %v6732_v43 = vld [vmem:[%s9873_s6 + $0x48] sm:$0xff] }
0x275e   :  { %v4744_v54 = vpop.permute.xlu0 %4743 }
0x275f   :  { %v4745_v31 = vsel %vm1584_vm8, %v4742_v33, %v4744_v54  ;;  %5028 = vmatpush.msrb.mxu3 %v9247_v36  ;;  %5048 = vmatpush.msrb.mxu0 %v9253_v57  ;;  %v6733_v36 = vld [vmem:[%s9873_s6 + $0x30] sm:$0xff]  ;;  %v6734_v57 = vld [vmem:[%s9873_s6 + $0x38] sm:$0xff] }
0x2760   :  { %6150 = vmatmul.msk.f32.vlgmr.msra.gmra.mxu2 %vm1644_vm0, %v4745_v31  ;;  %6152 = vmatmul.msk.f32.vlgmr.msrb.gmra.mxu1 %vm1644_vm0, %v4745_v31 }
0x2761   :  { %6156 = vmatmul.msk.f32.vlgmr.msra.gmra.mxu3 %vm1644_vm0, %v4745_v31  ;;  %6158 = vmatmul.msk.f32.vlgmr.msra.gmra.mxu0 %vm1644_vm0, %v4745_v31 }
0x2762   :  { %6171 = vmatpush.msk.msra.mxu2 %vm1591_vm6, %v6727_v30  ;;  %6173 = vmatpush.msk.msrb.mxu1 %vm1591_vm6, %v6728_v27 }
0x2763   :  { %5029 = vmatpush.msrb.mxu3 %v9267_v60  ;;  %5049 = vmatpush.msrb.mxu0 %v9273_v29  ;;  %v6735_v60 = vld [vmem:[%s9873_s6 + $0x20] sm:$0xff]  ;;  %v6736_v29 = vld [vmem:[%s9873_s6 + $0x28] sm:$0xff] }
0x2764   :  { %5125 = vmatpush.msra.mxu2 %v6729_v59  ;;  %5145 = vmatpush.msrb.mxu1 %v6730_v47 }
0x2765   :  { %5030 = vmatpush.msrb.mxu3 %v9281_v12  ;;  %5050 = vmatpush.msrb.mxu0 %v9287_v19  ;;  %v6737_v12 = vld [vmem:[%s9873_s6 + $0x10] sm:$0xff]  ;;  %v6738_v19 = vld [vmem:[%s9873_s6 + $0x18] sm:$0xff] }
0x2766   :  { %5126 = vmatpush.msra.mxu2 %v6731_v2  ;;  %5146 = vmatpush.msrb.mxu1 %v6732_v43 }
0x2767   :  { %6177 = vmatpush.msk.msra.mxu3 %vm1591_vm6, %v9295_v39  ;;  %6179 = vmatpush.msk.msra.mxu0 %vm1591_vm6, %v9302_v10 }
0x2768   :  { %5127 = vmatpush.msra.mxu2 %v6733_v36  ;;  %5147 = vmatpush.msrb.mxu1 %v6734_v57 }
0x2769   :  { %5242 = vmatpush.msra.mxu3 %v9311_v26  ;;  %5262 = vmatpush.msra.mxu0 %v9317_v25 }
0x276a   :  { %5128 = vmatpush.msra.mxu2 %v6735_v60  ;;  %5148 = vmatpush.msrb.mxu1 %v6736_v29 }
0x276b   :  { %5243 = vmatpush.msra.mxu3 %v9325_v14  ;;  %5263 = vmatpush.msra.mxu0 %v9331_v62 }
0x276c   :  { %5129 = vmatpush.msra.mxu2 %v6737_v12  ;;  %5149 = vmatpush.msrb.mxu1 %v6738_v19 }
0x276d   :  { %5244 = vmatpush.msra.mxu3 %v9339_v42  ;;  %5264 = vmatpush.msra.mxu0 %v9345_v7 }
0x276f   :  { %5245 = vmatpush.msra.mxu3 %v9351_v49  ;;  %5265 = vmatpush.msra.mxu0 %v9357_v3 }
0x2771   :  { %5246 = vmatpush.msra.mxu3 %v9363_v15  ;;  %5266 = vmatpush.msra.mxu0 %v9369_v41 }
0x27d5   :  { %v4734_v58 = vpop.f32.mrf.mxu0 }
0x27db   :  { %v4714_v39 = vpop.f32.mrf.mxu3 }
0x27dd   :  { %v4785_v59 = vpop.f32.mrf.mxu1 }
0x27de   :  { %v4786_v47 = vadd.f32 %v4785_v59, %v4734_v58  ;;  %v4884_v2 = vpop.f32.mrf.mxu0  ;;  %v6750_v58 = vld [vmem:[%s9873_s6 + $0x78] sm:$0xff] }
0x27df   :  { %v4890_v36 = vrot.slane %v4884_v2, 4 }
0x27e0   :  { %v4789_v43 = vadd.f32 %v4786_v47, %v8125_v52 }
0x27e1   :  { %v4894_v60 = vadd.f32 %v4890_v36, %v9057_v45 }
0x27e2   :  { %v6154_v57 = vmul.f32 -1.442695, %v4789_v43 }
0x27e3   :  { %v4765_v10 = vpop.f32.mrf.mxu2 }
0x27e4   :  { %v4766_v26 = vadd.f32 %v4765_v10, %v4714_v39  ;;  %v4864_v25 = vpop.f32.mrf.mxu3 }
0x27e5   :  { %v4889_v14 = vrot.slane %v4864_v25, 4 }
0x27e6   :  { %v4788_v62 = vadd.f32 %v4766_v26, %v8098_v48 }
0x27e7   :  { %v4893_v53 = vadd.f32 %v4889_v14, %v9032_v4 }
0x27e8   :  { %6551 = vtanh.f32 %v4788_v62  ;;  %v6153_v56 = vmul.f32 -1.442695, %v4788_v62 }
0x27e9   :  { %6553 = vtanh.f32 %v4893_v53  ;;  %v6159_v49 = vmul.f32 -1.442695, %v4893_v53 }
0x27eb   :  { %6555 = vpow2.f32 %v6159_v49 }
0x27ee   :  { %v6552_v42 = vpop.eup %6551 }
0x27ef   :  { %v6554_v7 = vpop.eup %6553  ;;  %4831 = vrot.lane.b32.xlu1 %v6552_v42, %s6754_s22 }
0x27f0   :  { %4939 = vrot.lane.b32.xlu2 %v6554_v7, %s6754_s22 }
0x27f1   :  { %v6556_v3 = vpop.eup %6555 }
0x27f2   :  { %v4898_v15 = vadd.f32 1.0, %v6556_v3 }
0x27f4   :  { %6557 = vrcp.f32 %v4898_v15  ;;  %v4910_v20 = vand.u32 2147483648, %v4898_v15  ;;  %vm4904_vm13 = vweird.f32 %v4898_v15  ;;  %v4908_v28 = vand.u32 2147483647, %v4898_v15 }
0x27f5   :  { %6559 = vpow2.f32 %v6153_v56 }
0x27f6   :  { %v4911_v22 = vor.u32 1.1754944e-38, %v4910_v20  ;;  %vm4909_vm14 = vcmp.eq.f32.partialorder %v4908_v28, 8.507059e+37 }
0x27fa   :  { %v6558_v41 = vpop.eup %6557 }
0x27fb   :  { %v4900_v17 = vmul.f32 %v6558_v41, %v4898_v15  ;;  %v6560_v1 = vpop.eup %6559  ;;  %vm4905_vm11 = vweird.f32 %v6558_v41 }
0x27fc   :  { %v4793_v8 = vadd.f32 1.0, %v6560_v1  ;;  %vm4906_vm1 = vmor %vm4904_vm13, %vm4905_vm11 }
0x27fd   :  { %v4901_v63 = vsub.f32 1.0, %v4900_v17 }
0x27fe   :  { %6561 = vrcp.f32 %v4793_v8  ;;  %v4805_v38 = vand.u32 2147483648, %v4793_v8  ;;  %vm4799_vm4 = vweird.f32 %v4793_v8  ;;  %v4803_v37 = vand.u32 2147483647, %v4793_v8 }
0x27ff   :  { %v4902_v44 = vmul.f32 %v6558_v41, %v4901_v63 }
0x2800   :  { %v4806_v61 = vor.u32 1.1754944e-38, %v4805_v38  ;;  %vm4804_vm3 = vcmp.eq.f32.partialorder %v4803_v37, 8.507059e+37  ;;  %v6740_v37 = vld [vmem:[%s9873_s6 + $0xc8] sm:$0x3] }
0x2801   :  { %v4903_v55 = vadd.f32 %v6558_v41, %v4902_v44 }
0x2803   :  { %v4907_v24 = vsel %vm4906_vm1, %v6558_v41, %v4903_v55 }
0x2804   :  { %v9564_v35 = vsel %vm4909_vm14, %v4911_v22, %v4907_v24  ;;  %v6562_v23 = vpop.eup %6561 }
0x2805   :  { %v4795_v9 = vmul.f32 %v6562_v23, %v4793_v8  ;;  %vm4800_vm15 = vweird.f32 %v6562_v23  ;;  %v4937_v34 = vmul.f32 %v4935_v46, %v9564_v35 }
0x2806   :  { %vm4801_vm12 = vmor %vm4799_vm4, %vm4800_vm15 }
0x2807   :  { %v4796_v13 = vsub.f32 1.0, %v4795_v9 }
0x2809   :  { %v4797_v40 = vmul.f32 %v6562_v23, %v4796_v13 }
0x280b   :  { %v4798_v0 = vadd.f32 %v6562_v23, %v4797_v40 }
0x280d   :  { %v4802_v5 = vsel %vm4801_vm12, %v6562_v23, %v4798_v0 }
0x280e   :  { %v4807_v51 = vsel %vm4804_vm3, %v4806_v61, %v4802_v5  ;;  %v6741_v5 = vld [vmem:[%s9873_s6 + $0xb0] sm:$0xff]  ;;  %v6742_v61 = vld [vmem:[%s9873_s6 + $0xb8] sm:$0xff] }
0x280f   :  { %v4829_v54 = vmul.f32 %v4807_v51, %v9468_v21  ;;  %v6160_v21 = vmul.f32 -1.442695, %v4894_v60 }
0x284a   :  { %v4940_v50 = vpop.permute.xlu2 %4939 }
0x284b   :  { %v4942_v32 = vmul.f32 %v4940_v50, %v9564_v35 }
0x284d   :  { %4944 = vrot.lane.b32.xlu1 %v4942_v32, %s6755_s15 }
0x2861   :  { %v4832_v16 = vpop.permute.xlu1 %4831 }
0x2862   :  { %v4834_v18 = vmul.f32 %v4832_v16, %v4807_v51  ;;  %v6743_v16 = vld [vmem:[%s9873_s6 + $0xa0] sm:$0xff] }
0x2864   :  { %4836 = vrot.lane.b32.xlu0 %v4834_v18, %s6755_s15 }
0x28bf   :  { %v4945_v11 = vpop.permute.xlu1 %4944 }
0x28c0   :  { %v9571_v6 = vadd.f32 %v4945_v11, %v4937_v34  ;;  %v6745_v11 = vld [vmem:[%s9873_s6 + $0x90] sm:$0xff] }
0x28c2   :  { %6563 = vtanh.f32 %v9571_v6 }
0x28c8   :  { %v6564_v33 = vpop.eup %6563 }
0x28c9   :  { %4950 = vrot.lane.b32.xlu0 %v6564_v33, %s6756_s18  ;;  %v6746_v33 = vld [vmem:[%s9873_s6 + $0x98] sm:$0xff] }
0x28d6   :  { %v4837_v31 = vpop.permute.xlu0 %4836 }
0x28d7   :  { %v9576_v30 = vadd.f32 %v4837_v31, %v4829_v54  ;;  %v6747_v54 = vld [vmem:[%s9873_s6 + $0x80] sm:$0xff]  ;;  %v6748_v31 = vld [vmem:[%s9873_s6 + $0x88] sm:$0xff] }
0x28d9   :  { %6565 = vtanh.f32 %v9576_v30 }
0x28da   :  { %6567 = vpow2.f32 %v6154_v57 }
0x28db   :  { %6569 = vpow2.f32 %v6160_v21 }
0x28df   :  { %v6566_v27 = vpop.eup %6565 }
0x28e0   :  { %4842 = vrot.lane.b32.xlu2 %v6566_v27, %s6756_s18  ;;  %v6568_v29 = vpop.eup %6567  ;;  %v6749_v27 = vld [vmem:[%s9873_s6 + $0x70] sm:$0xff] }
0x28e1   :  { %v4813_v12 = vadd.f32 1.0, %v6568_v29  ;;  %v6570_v19 = vpop.eup %6569 }
0x28e2   :  { %v4918_v39 = vadd.f32 1.0, %v6570_v19 }
0x28e3   :  { %6571 = vrcp.f32 %v4813_v12  ;;  %v4825_v3 = vand.u32 2147483648, %v4813_v12  ;;  %vm4819_vm5 = vweird.f32 %v4813_v12  ;;  %v4823_v15 = vand.u32 2147483647, %v4813_v12 }
0x28e4   :  { %6573 = vrcp.f32 %v4918_v39  ;;  %v4930_v17 = vand.u32 2147483648, %v4918_v39  ;;  %vm4924_vm10 = vweird.f32 %v4918_v39  ;;  %v4928_v1 = vand.u32 2147483647, %v4918_v39 }
0x28e5   :  { %v4826_v63 = vor.u32 1.1754944e-38, %v4825_v3  ;;  %vm4824_vm11 = vcmp.eq.f32.partialorder %v4823_v15, 8.507059e+37 }
0x28e6   :  { %v4931_v22 = vor.u32 1.1754944e-38, %v4930_v17  ;;  %vm4929_vm1 = vcmp.eq.f32.partialorder %v4928_v1, 8.507059e+37 }
0x28e9   :  { %v6572_v10 = vpop.eup %6571 }
0x28ea   :  { %v4815_v26 = vmul.f32 %v6572_v10, %v4813_v12  ;;  %v6574_v25 = vpop.eup %6573  ;;  %vm4820_vm2 = vweird.f32 %v6572_v10 }
0x28eb   :  { %v4920_v14 = vmul.f32 %v6574_v25, %v4918_v39  ;;  %vm4821_vm7 = vmor %vm4819_vm5, %vm4820_vm2  ;;  %vm4925_vm9 = vweird.f32 %v6574_v25 }
0x28ec   :  { %v4816_v62 = vsub.f32 1.0, %v4815_v26  ;;  %vm4926_vm13 = vmor %vm4924_vm10, %vm4925_vm9 }
0x28ed   :  { %v4921_v53 = vsub.f32 1.0, %v4920_v14 }
0x28ee   :  { %v4817_v42 = vmul.f32 %v6572_v10, %v4816_v62 }
0x28ef   :  { %v4922_v7 = vmul.f32 %v6574_v25, %v4921_v53 }
0x28f0   :  { %v4818_v49 = vadd.f32 %v6572_v10, %v4817_v42 }
0x28f1   :  { %v4923_v41 = vadd.f32 %v6574_v25, %v4922_v7 }
0x28f2   :  { %v4822_v56 = vsel %vm4821_vm7, %v6572_v10, %v4818_v49 }
0x28f3   :  { %v4827_v44 = vsel %vm4824_vm11, %v4826_v63, %v4822_v56  ;;  %v4927_v55 = vsel %vm4926_vm13, %v6574_v25, %v4923_v41 }
0x28f4   :  { %v4932_v23 = vsel %vm4929_vm1, %v4931_v22, %v4927_v55 }
0x293a   :  { %v4843_v8 = vpop.permute.xlu2 %4842 }
0x293b   :  { %v4951_v20 = vpop.permute.xlu0 %4950  ;;  %v4845_v28 = vmul.f32 %v4843_v8, %v4807_v51  ;;  %v4846_v24 = vmul.f32 %v4843_v8, %v4827_v44  ;;  %v6744_v51 = vld [vmem:[%s9873_s6 + $0xa8] sm:$0xff] }
0x293c   :  { %v4953_v50 = vmul.f32 %v4951_v20, %v9564_v35  ;;  %v4954_v9 = vmul.f32 %v4951_v20, %v4932_v23  ;;  %v6739_v35 = vld [vmem:[%s9873_s6 + $0xc0] sm:$0x3] }
0x293d   :  { %4959 = vrot.lane.b32.xlu2 %v4846_v24, %s6757_s16  ;;  %4957 = vrot.lane.b32.xlu1 %v4845_v28, %s6757_s16 }
0x293e   :  { %v5006_v32 = vrot.slane %v4953_v50, 4  ;;  %v5007_v13 = vrot.slane %v4954_v9, 4  ;;  %v5202_v9 = vrot.slane %v9571_v6, 7 }
0x2940   :  { %5008 = vrot.lane.b32.xlu0 %v5006_v32, %s6757_s16 }
0x2945   :  { %5010 = vrot.lane.b32.xlu1 %v5007_v13, %s6757_s16 }
0x2997   :  { %v4960_v40 = vpop.permute.xlu2 %4959 }
0x29af   :  { %v4958_v0 = vpop.permute.xlu1 %4957 }
0x29b0   :  { %v4961_v38 = vsel %vm1584_vm8, %v4958_v0, %v4960_v40 }
0x29b1   :  { %6162 = vmatmul.msk.f32.vlgmr.msrb.gmra.mxu2 %vm1644_vm0, %v4961_v38  ;;  %6164 = vmatmul.msk.f32.vlgmr.msra.gmra.mxu1 %vm1644_vm0, %v4961_v38 }
0x29b2   :  { %6181 = vmatpush.msk.msrb.mxu2 %vm1591_vm6, %v6739_v35  ;;  %6183 = vmatpush.msk.msra.mxu1 %vm1591_vm6, %v6740_v37  ;;  %v5009_v18 = vpop.permute.xlu0 %5008 }
0x29b4   :  { %5293 = vmatpush.msrb.mxu2 %v6741_v5  ;;  %5313 = vmatpush.msra.mxu1 %v6742_v61 }
0x29b6   :  { %5294 = vmatpush.msrb.mxu2 %v6743_v16  ;;  %5314 = vmatpush.msra.mxu1 %v6744_v51 }
0x29b7   :  { %v5011_v46 = vpop.permute.xlu1 %5010 }
0x29b8   :  { %v5012_v34 = vsel %vm1584_vm8, %v5009_v18, %v5011_v46  ;;  %5295 = vmatpush.msrb.mxu2 %v6745_v11  ;;  %5315 = vmatpush.msra.mxu1 %v6746_v33 }
0x29b9   :  { %6166 = vmatmul.msk.f32.vlgmr.msrb.gmra.mxu3 %vm1644_vm0, %v5012_v34  ;;  %6168 = vmatmul.msk.f32.vlgmr.msrb.gmra.mxu0 %vm1644_vm0, %v5012_v34 }
0x29ba   :  { %6172 = vmatmul.msk.f32.vlgmr.msra.gmra.mxu2 %vm1644_vm0, %v5012_v34  ;;  %6174 = vmatmul.msk.f32.vlgmr.msrb.gmra.mxu1 %vm1644_vm0, %v5012_v34 }
0x29bb   :  { %5296 = vmatpush.msrb.mxu2 %v6747_v54  ;;  %5316 = vmatpush.msra.mxu1 %v6748_v31 }
0x29bd   :  { %5297 = vmatpush.msrb.mxu2 %v6749_v27  ;;  %5317 = vmatpush.msra.mxu1 %v6750_v58 }
0x2a2e   :  { %v5001_v16 = vpop.f32.mrf.mxu1 }
0x2a34   :  { %v4981_v59 = vpop.f32.mrf.mxu2 }
0x2a36   :  { %v5052_v6 = vpop.f32.mrf.mxu0 }
0x2a37   :  { %v5053_v51 = vadd.f32 %v5052_v6, %v5001_v16 }
0x2a39   :  { %v5056_v18 = vadd.f32 %v5053_v51, %v8125_v52 }
0x2a3b   :  { %v6170_v34 = vmul.f32 -1.442695, %v5056_v18 }
0x2a3c   :  { %v5032_v47 = vpop.f32.mrf.mxu3 }
0x2a3d   :  { %v5033_v2 = vadd.f32 %v5032_v47, %v4981_v59  ;;  %v5131_v43 = vpop.f32.mrf.mxu2 }
0x2a3e   :  { %v5156_v36 = vrot.slane %v5131_v43, 3 }
0x2a3f   :  { %v5055_v57 = vadd.f32 %v5033_v2, %v8098_v48 }
0x2a40   :  { %v5160_v60 = vadd.f32 %v5156_v36, %v9032_v4 }
0x2a41   :  { %6575 = vtanh.f32 %v5055_v57  ;;  %v6169_v26 = vmul.f32 -1.442695, %v5055_v57 }
0x2a42   :  { %6577 = vtanh.f32 %v5160_v60  ;;  %v6175_v12 = vmul.f32 -1.442695, %v5160_v60 }
0x2a44   :  { %6579 = vpow2.f32 %v6175_v12 }
0x2a47   :  { %v6576_v21 = vpop.eup %6575 }
0x2a48   :  { %v6578_v29 = vpop.eup %6577  ;;  %5098 = vrot.lane.b32.xlu0 %v6576_v21, %s6754_s22 }
0x2a49   :  { %5206 = vrot.lane.b32.xlu2 %v6578_v29, %s6754_s22 }
0x2a4a   :  { %v6580_v19 = vpop.eup %6579 }
0x2a4b   :  { %v5165_v39 = vadd.f32 1.0, %v6580_v19 }
0x2a4d   :  { %6581 = vrcp.f32 %v5165_v39  ;;  %v5177_v7 = vand.u32 2147483648, %v5165_v39  ;;  %vm5171_vm15 = vweird.f32 %v5165_v39  ;;  %v5175_v49 = vand.u32 2147483647, %v5165_v39 }
0x2a4e   :  { %6583 = vpow2.f32 %v6169_v26 }
0x2a4f   :  { %v5178_v15 = vor.u32 1.1754944e-38, %v5177_v7  ;;  %vm5176_vm12 = vcmp.eq.f32.partialorder %v5175_v49, 8.507059e+37 }
0x2a53   :  { %v6582_v10 = vpop.eup %6581 }
0x2a54   :  { %v5167_v25 = vmul.f32 %v6582_v10, %v5165_v39  ;;  %v6584_v62 = vpop.eup %6583  ;;  %vm5172_vm14 = vweird.f32 %v6582_v10 }
0x2a55   :  { %v5060_v53 = vadd.f32 1.0, %v6584_v62  ;;  %vm5173_vm4 = vmor %vm5171_vm15, %vm5172_vm14 }
0x2a56   :  { %v5168_v14 = vsub.f32 1.0, %v5167_v25 }
0x2a57   :  { %6585 = vrcp.f32 %v5060_v53  ;;  %v5072_v20 = vand.u32 2147483648, %v5060_v53  ;;  %vm5066_vm2 = vweird.f32 %v5060_v53  ;;  %v5070_v28 = vand.u32 2147483647, %v5060_v53 }
0x2a58   :  { %v5169_v4 = vmul.f32 %v6582_v10, %v5168_v14 }
0x2a59   :  { %v5073_v22 = vor.u32 1.1754944e-38, %v5072_v20  ;;  %vm5071_vm7 = vcmp.eq.f32.partialorder %v5070_v28, 8.507059e+37  ;;  %v10151_v20 = vld [vmem:[#allocation5_spill] sm:$0xff] }
0x2a5a   :  { %v5170_v42 = vadd.f32 %v6582_v10, %v5169_v4 }
0x2a5c   :  { %v5174_v3 = vsel %vm5173_vm4, %v6582_v10, %v5170_v42 }
0x2a5d   :  { %v9637_v56 = vsel %vm5176_vm12, %v5178_v15, %v5174_v3  ;;  %v6586_v17 = vpop.eup %6585 }
0x2a5e   :  { %v5062_v1 = vmul.f32 %v6586_v17, %v5060_v53  ;;  %vm5067_vm3 = vweird.f32 %v6586_v17  ;;  %v5204_v40 = vmul.f32 %v5202_v9, %v9637_v56  ;;  %v10152_v9 = vld [vmem:[#allocation11_spill] sm:$0xff] }
0x2a5f   :  { %vm5068_vm5 = vmor %vm5066_vm2, %vm5067_vm3 }
0x2a60   :  { %v5063_v44 = vsub.f32 1.0, %v5062_v1  ;;  %v10146_v1 = vld [vmem:[#allocation8_spill] sm:$0xff] }
0x2a62   :  { %v5064_v8 = vmul.f32 %v6586_v17, %v5063_v44  ;;  %v10147_v44 = vld [vmem:[#allocation4_spill] sm:$0xff] }
0x2a63   :  { %vm5395_vm12 = vcmp.eq.s32.totalorder %v10147_v44, %v10146_v1 }
0x2a64   :  { %v5065_v55 = vadd.f32 %v6586_v17, %v5064_v8  ;;  %v10148_v8 = vmov 1.0  }
0x2a65   :  { %6204 = vmatpush.msk.msrb.mxu0 %vm5395_vm12, %v10148_v8 }
0x2a66   :  { %v5069_v24 = vsel %vm5068_vm5, %v6586_v17, %v5065_v55  ;;  %v10149_v55 = vld [vmem:[#allocation7_spill] sm:$0xff]  ;;  %vm5392_vm5 = vcmp.eq.s32.totalorder %v10147_v44, %v10151_v20 }
0x2a67   :  { %v5074_v23 = vsel %vm5071_vm7, %v5073_v22, %v5069_v24  ;;  %vm5394_vm3 = vcmp.eq.s32.totalorder %v10147_v44, %v10149_v55  ;;  %vm10153_vm7 = vcmask 261120  }
0x2a68   :  { %v5096_v13 = vmul.f32 %v5074_v23, %v9576_v30  ;;  %v5151_v30 = vpop.f32.mrf.mxu1  ;;  %6205 = vmatpush.msk.msrb.mxu0 %vm5394_vm3, %v10148_v8  ;;  %vm5498_vm3 = vcmask 1045504  }
0x2a69   :  { %v5157_v46 = vrot.slane %v5151_v30, 3 }
0x2a6b   :  { %v5161_v11 = vadd.f32 %v5157_v46, %v9057_v45 }
0x2a6d   :  { %v6176_v33 = vmul.f32 -1.442695, %v5161_v11 }
0x2aa3   :  { %v5207_v41 = vpop.permute.xlu2 %5206 }
0x2aa4   :  { %v5209_v63 = vmul.f32 %v5207_v41, %v9637_v56 }
0x2aa6   :  { %5211 = vrot.lane.b32.xlu1 %v5209_v63, %s6755_s15 }
0x2aba   :  { %v5099_v50 = vpop.permute.xlu0 %5098 }
0x2abb   :  { %v5101_v32 = vmul.f32 %v5099_v50, %v5074_v23 }
0x2abd   :  { %5103 = vrot.lane.b32.xlu2 %v5101_v32, %s6755_s15 }
0x2b17   :  { %v5104_v0 = vpop.permute.xlu2 %5103 }
0x2b18   :  { %v5212_v38 = vpop.permute.xlu1 %5211  ;;  %v9645_v35 = vadd.f32 %v5104_v0, %v5096_v13 }
0x2b19   :  { %v5214_v37 = vadd.f32 %v5212_v38, %v5204_v40 }
0x2b1a   :  { %6587 = vtanh.f32 %v9645_v35 }
0x2b1b   :  { %6589 = vtanh.f32 %v5214_v37 }
0x2b1c   :  { %6591 = vpow2.f32 %v6170_v34 }
0x2b1d   :  { %6593 = vpow2.f32 %v6176_v33 }
0x2b20   :  { %v6588_v5 = vpop.eup %6587 }
0x2b21   :  { %v6590_v61 = vpop.eup %6589  ;;  %5109 = vrot.lane.b32.xlu1 %v6588_v5, %s6756_s18 }
0x2b22   :  { %5217 = vrot.lane.b32.xlu0 %v6590_v61, %s6756_s18  ;;  %v6592_v54 = vpop.eup %6591 }
0x2b23   :  { %v5080_v31 = vadd.f32 1.0, %v6592_v54  ;;  %v6594_v27 = vpop.eup %6593 }
0x2b24   :  { %v5185_v58 = vadd.f32 1.0, %v6594_v27 }
0x2b25   :  { %6595 = vrcp.f32 %v5080_v31  ;;  %v5092_v45 = vand.u32 2147483648, %v5080_v31  ;;  %vm5086_vm10 = vweird.f32 %v5080_v31  ;;  %v5090_v12 = vand.u32 2147483647, %v5080_v31 }
0x2b26   :  { %6597 = vrcp.f32 %v5185_v58  ;;  %v5197_v10 = vand.u32 2147483648, %v5185_v58  ;;  %vm5191_vm1 = vweird.f32 %v5185_v58  ;;  %v5195_v25 = vand.u32 2147483647, %v5185_v58 }
0x2b27   :  { %v5093_v26 = vor.u32 1.1754944e-38, %v5092_v45  ;;  %vm5091_vm14 = vcmp.eq.f32.partialorder %v5090_v12, 8.507059e+37 }
0x2b28   :  { %v5198_v49 = vor.u32 1.1754944e-38, %v5197_v10  ;;  %vm5196_vm4 = vcmp.eq.f32.partialorder %v5195_v25, 8.507059e+37 }
0x2b2b   :  { %v6596_v59 = vpop.eup %6595 }
0x2b2c   :  { %v5082_v47 = vmul.f32 %v6596_v59, %v5080_v31  ;;  %v6598_v2 = vpop.eup %6597  ;;  %vm5087_vm9 = vweird.f32 %v6596_v59 }
0x2b2d   :  { %v5187_v43 = vmul.f32 %v6598_v2, %v5185_v58  ;;  %vm5088_vm11 = vmor %vm5086_vm10, %vm5087_vm9  ;;  %vm5192_vm13 = vweird.f32 %v6598_v2  ;;  %v5383_v58 = vld [vmem:[%s9875_s4 + $0xd] sm:$0x1] }
0x2b2e   :  { %v5083_v36 = vsub.f32 1.0, %v5082_v47  ;;  %vm5193_vm15 = vmor %vm5191_vm1, %vm5192_vm13 }
0x2b2f   :  { %v5188_v57 = vsub.f32 1.0, %v5187_v43 }
0x2b30   :  { %v5084_v60 = vmul.f32 %v6596_v59, %v5083_v36 }
0x2b31   :  { %v5189_v21 = vmul.f32 %v6598_v2, %v5188_v57 }
0x2b32   :  { %v5085_v29 = vadd.f32 %v6596_v59, %v5084_v60 }
0x2b33   :  { %v5190_v19 = vadd.f32 %v6598_v2, %v5189_v21 }
0x2b34   :  { %v5089_v39 = vsel %vm5088_vm11, %v6596_v59, %v5085_v29  ;;  %v6758_v59 = vmov 2  }
0x2b35   :  { %v5094_v14 = vsel %vm5091_vm14, %v5093_v26, %v5089_v39  ;;  %v5194_v4 = vsel %vm5193_vm15, %v6598_v2, %v5190_v19  ;;  %6235 = vset.pattern.permute.xlu0 %v6758_v59  ;;  %v5546_v59 = vld [vmem:[%s9876_s7 + $0xb8] sm:$0xff] }
0x2b36   :  { %v5199_v15 = vsel %vm5196_vm4, %v5198_v49, %v5194_v4  ;;  %5621 = vmatpush.msrb.mxu1 %v5546_v59 }
0x2b93   :  { %v5110_v62 = vpop.permute.xlu1 %5109 }
0x2b94   :  { %v5218_v53 = vpop.permute.xlu0 %5217  ;;  %v5112_v42 = vmul.f32 %v5110_v62, %v5074_v23  ;;  %v5113_v7 = vmul.f32 %v5110_v62, %v5094_v14 }
0x2b95   :  { %v5220_v3 = vmul.f32 %v5218_v53, %v9637_v56  ;;  %v5221_v17 = vmul.f32 %v5218_v53, %v5199_v15  ;;  %v10150_v56 = vld [vmem:[#allocation6_spill] sm:$0xff] }
0x2b96   :  { %5226 = vrot.lane.b32.xlu0 %v5113_v7, %s6757_s16  ;;  %5224 = vrot.lane.b32.xlu2 %v5112_v42, %s6757_s16  ;;  %vm5393_vm2 = vcmp.eq.s32.totalorder %v10147_v44, %v10150_v56 }
0x2b97   :  { %v5273_v41 = vrot.slane %v5220_v3, 5  ;;  %v5274_v63 = vrot.slane %v5221_v17, 5  ;;  %6206 = vmatpush.msk.msrb.mxu0 %vm5393_vm2, %v10148_v8  ;;  %v10154_v3 = vld [vmem:[#allocation10_spill] sm:$0xff] }
0x2b98   :  { %v5408_v15 = vadd.s32 32, %v10154_v3 }
0x2b99   :  { %5275 = vrot.lane.b32.xlu1 %v5273_v41, %s6757_s16  ;;  %6207 = vmatpush.msk.msrb.mxu0 %vm5392_vm5, %v10148_v8  ;;  %v10155_v41 = vld [vmem:[#allocation9_spill] sm:$0xff] }
0x2b9a   :  { %v5407_v17 = vadd.s32 32, %v10155_v41  ;;  %vm5414_vm12 = vcmp.eq.s32.totalorder %v10147_v44, %v5408_v15 }
0x2b9c   :  { %vm5413_vm2 = vcmp.eq.s32.totalorder %v10147_v44, %v5407_v17 }
0x2b9e   :  { %5277 = vrot.lane.b32.xlu2 %v5274_v63, %s6757_s16  ;;  %v5406_v63 = vadd.s32 32, %v10146_v1  ;;  %v5404_v1 = vadd.s32 32, %v10150_v56 }
0x2bf0   :  { %v5225_v28 = vpop.permute.xlu2 %5224 }
0x2bf8   :  { %v5278_v50 = vpop.permute.xlu2 %5277 }
0x2c08   :  { %v5227_v24 = vpop.permute.xlu0 %5226 }
0x2c09   :  { %v5228_v22 = vsel %vm1584_vm8, %v5225_v28, %v5227_v24  ;;  %v5484_v28 = vadd.s32 74, %v10149_v55  ;;  %v10156_v24 = vmov 0.0  }
0x2c0a   :  { %6178 = vmatmul.msk.f32.vlgmr.msra.gmra.mxu3 %vm1644_vm0, %v5228_v22  ;;  %6180 = vmatmul.msk.f32.vlgmr.msra.gmra.mxu0 %vm1644_vm0, %v5228_v22  ;;  %v6196_v22 = vsel %vm5414_vm12, 1.0, %v10156_v24  ;;  %vm5726_vm12 = vcmask 1040640  }
0x2c0b   :  { %v5276_v23 = vpop.permute.xlu1 %5275  ;;  %vm5487_vm5 = vcmp.eq.s32.totalorder %v10147_v44, %v5484_v28  ;;  %6197 = vmatpush.msk.msrb.mxu3 %vm1591_vm6, %v6196_v22  ;;  %vm5409_vm6 = vcmp.eq.s32.totalorder %v10147_v44, %v10155_v41 }
0x2c0c   :  { %v5279_v32 = vsel %vm1584_vm8, %v5276_v23, %v5278_v50  ;;  %v5405_v50 = vadd.s32 32, %v10149_v55  ;;  %v6211_v23 = vsel %vm5487_vm5, 1.0, %v10156_v24  ;;  %v5381_v55 = vld [vmem:[%s9876_s7 + $0x127] sm:$0x1] }
0x2c0d   :  { %6182 = vmatmul.msk.f32.vlgmr.msrb.gmra.mxu2 %vm1644_vm0, %v5279_v32  ;;  %6184 = vmatmul.msk.f32.vlgmr.msra.gmra.mxu1 %vm1644_vm0, %v5279_v32 }
0x2c0e   :  { %6212 = vmatpush.msk.msra.mxu2 %vm5498_vm3, %v6211_v23  ;;  %6198 = vmatpush.msk.msrb.mxu3 %vm5413_vm2, %v10148_v8  ;;  %v5561_v23 = vld [vmem:[%s9876_s7 + $0x122] sm:$0x1]  ;;  %vm5637_vm3 = vcmask 516096  }
0x2c12   :  { %6208 = vmatmul.msk.f32.vlgmr.msrb.gmra.mxu0 %vm10153_vm7, %v10152_v9  ;;  %vm5412_vm7 = vcmp.eq.s32.totalorder %v10147_v44, %v5406_v63 }
0x2c13   :  { %6199 = vmatpush.msk.msrb.mxu3 %vm5412_vm7, %v10148_v8 }
0x2c87   :  { %v5268_v60 = vpop.f32.mrf.mxu0 }
0x2c8a   :  { %v5319_v57 = vpop.f32.mrf.mxu1 }
0x2c8b   :  { %v5320_v21 = vadd.f32 %v5319_v57, %v5268_v60  ;;  %v5541_v57 = vld [vmem:[%s9876_s7 + $0x90] sm:$0xff]  ;;  %v5540_v60 = vld [vmem:[%s9876_s7 + $0x88] sm:$0xff] }
0x2c8d   :  { %v5248_v13 = vpop.f32.mrf.mxu3  ;;  %v5323_v29 = vadd.f32 %v5320_v21, %v8125_v52  ;;  %v5539_v21 = vld [vmem:[%s9876_s7 + $0x80] sm:$0xff] }
0x2c8f   :  { %v6186_v45 = vmul.f32 -1.442695, %v5323_v29  ;;  %v5559_v29 = vld [vmem:[%s9876_s7 + $0x120] sm:$0x1] }
0x2c90   :  { %v5299_v40 = vpop.f32.mrf.mxu2 }
0x2c91   :  { %v5300_v0 = vadd.f32 %v5299_v40, %v5248_v13  ;;  %v5382_v13 = vld [vmem:[%s9876_s7 + $0x128] sm:$0x1] }
0x2c93   :  { %v5322_v38 = vadd.f32 %v5300_v0, %v8098_v48  ;;  %v5483_v0 = vadd.s32 74, %v10150_v56  ;;  %v5533_v56 = vld [vmem:[%s9876_s7 + $0x50] sm:$0xff] }
0x2c95   :  { %6599 = vtanh.f32 %v5322_v38  ;;  %v6185_v5 = vmul.f32 -1.442695, %v5322_v38 }
0x2c97   :  { %6601 = vpow2.f32 %v6185_v5  ;;  %v5534_v5 = vld [vmem:[%s9876_s7 + $0x58] sm:$0xff] }
0x2c98   :  { %5577 = vmatpush.msra.mxu0 %v5534_v5 }
0x2c9a   :  { %5578 = vmatpush.msra.mxu0 %v5533_v56 }
0x2c9b   :  { %v6600_v37 = vpop.eup %6599 }
0x2c9c   :  { %5365 = vrot.lane.b32.xlu0 %v6600_v37, %s6754_s22  ;;  %v5482_v37 = vadd.s32 74, %v10151_v20  ;;  %v5532_v20 = vld [vmem:[%s9876_s7 + $0x48] sm:$0xff] }
0x2c9d   :  { %v6602_v61 = vpop.eup %6601  ;;  %5579 = vmatpush.msra.mxu0 %v5532_v20 }
0x2c9e   :  { %v5327_v16 = vadd.f32 1.0, %v6602_v61  ;;  %v5531_v61 = vld [vmem:[%s9876_s7 + $0x40] sm:$0xff] }
0x2c9f   :  { %5580 = vmatpush.msra.mxu0 %v5531_v61 }
0x2ca0   :  { %6603 = vrcp.f32 %v5327_v16  ;;  %v5339_v34 = vand.u32 2147483648, %v5327_v16  ;;  %vm5333_vm10 = vweird.f32 %v5327_v16  ;;  %v5337_v11 = vand.u32 2147483647, %v5327_v16 }
0x2ca2   :  { %v5340_v33 = vor.u32 1.1754944e-38, %v5339_v34  ;;  %vm5338_vm13 = vcmp.eq.f32.partialorder %v5337_v11, 8.507059e+37  ;;  %v5525_v34 = vld [vmem:[%s9876_s7 + $0x10] sm:$0xff]  ;;  %v5524_v11 = vld [vmem:[%s9876_s7 + $0x8] sm:$0xff] }
0x2ca4   :  { %5386 = vperm.xlu0 %6235, %v5383_v58  }
0x2ca6   :  { %v6604_v6 = vpop.eup %6603 }
0x2ca7   :  { %v5329_v51 = vmul.f32 %v6604_v6, %v5327_v16  ;;  %vm5334_vm9 = vweird.f32 %v6604_v6  ;;  %v5530_v16 = vld [vmem:[%s9876_s7 + $0x38] sm:$0xff] }
0x2ca8   :  { %vm5335_vm11 = vmor %vm5333_vm10, %vm5334_vm9  ;;  %vm5411_vm9 = vcmp.eq.s32.totalorder %v10147_v44, %v5405_v50  ;;  %vm5410_vm10 = vcmp.eq.s32.totalorder %v10147_v44, %v5404_v1  ;;  %5581 = vmatpush.msra.mxu0 %v5530_v16 }
0x2ca9   :  { %v5330_v30 = vsub.f32 1.0, %v5329_v51  ;;  %6200 = vmatpush.msk.msrb.mxu3 %vm5411_vm9, %v10148_v8  ;;  %v5526_v51 = vld [vmem:[%s9876_s7 + $0x18] sm:$0xff] }
0x2cab   :  { %v5331_v18 = vmul.f32 %v6604_v6, %v5330_v30  ;;  %6201 = vmatpush.msk.msrb.mxu3 %vm5410_vm10, %v10148_v8  ;;  %vm5670_vm10 = vcmask 523264  }
0x2cad   :  { %v5332_v46 = vadd.f32 %v6604_v6, %v5331_v18  ;;  %6202 = vmatpush.msk.msrb.mxu3 %vm5409_vm6, %v10148_v8  ;;  %vm10157_vm6 = vcmask 261120  }
0x2caf   :  { %v5336_v48 = vsel %vm5335_vm11, %v6604_v6, %v5332_v46  ;;  %vm5486_vm11 = vcmp.eq.s32.totalorder %v10147_v44, %v5483_v0  ;;  %v5527_v6 = vld [vmem:[%s9876_s7 + $0x20] sm:$0xff] }
0x2cb0   :  { %v5341_v31 = vsel %vm5338_vm13, %v5340_v33, %v5336_v48  ;;  %6213 = vmatpush.msk.msra.mxu2 %vm5486_vm11, %v10148_v8  ;;  %vm5494_vm13 = vcmask 179200   ;;  %v5523_v48 = vld [vmem:[%s9876_s7] sm:$0xff]  ;;  %v5479_v33 = vpop.f32.mrf.mxu0  ;;  %vm5732_vm11 = vcmask 368896  }
0x2cb1   :  { %v5363_v47 = vmul.f32 %v5341_v31, %v9645_v35 }
0x2d0e   :  { %v5366_v54 = vpop.permute.xlu0 %5365 }
0x2d0f   :  { %v5368_v27 = vmul.f32 %v5366_v54, %v5341_v31 }
0x2d11   :  { %5370 = vrot.lane.b32.xlu1 %v5368_v27, %s6755_s15  ;;  %s6759_s15 = smov 32  }
0x2d16   :  { %v5387_v32 = vpop.permute.xlu0 %5386 }
0x2d17   :  { %v5389_v9 = vmul.f32 %v5387_v32, %v5381_v55 }
0x2d19   :  { %v5390_v40 = vadd.f32 %v5389_v9, %v5382_v13  ;;  %v6760_v9 = vmov 64.0  }
0x2d1b   :  { %v5391_v38 = vmax.f32 %v5390_v40, 0.0 }
0x2d83   :  { %v5371_v2 = vpop.permute.xlu1 %5370 }
0x2d84   :  { %v5373_v43 = vadd.f32 %v5371_v2, %v5363_v47  ;;  %v5545_v47 = vld [vmem:[%s9876_s7 + $0xb0] sm:$0xff]  ;;  %v5544_v2 = vld [vmem:[%s9876_s7 + $0xa8] sm:$0xff] }
0x2d85   :  { %5622 = vmatpush.msrb.mxu1 %v5545_v47 }
0x2d86   :  { %6605 = vtanh.f32 %v5373_v43  ;;  %v5543_v43 = vld [vmem:[%s9876_s7 + $0xa0] sm:$0xff] }
0x2d87   :  { %6607 = vpow2.f32 %v6186_v45  ;;  %5623 = vmatpush.msrb.mxu1 %v5544_v2  ;;  %v5567_v45 = vstv %s9877_s1 }
0x2d89   :  { %5624 = vmatpush.msrb.mxu1 %v5543_v43 }
0x2d8c   :  { %v6606_v36 = vpop.eup %6605 }
0x2d8d   :  { %5376 = vrot.lane.b32.xlu2 %v6606_v36, %s6756_s18  ;;  %v6608_v12 = vpop.eup %6607  ;;  %v5542_v36 = vld [vmem:[%s9876_s7 + $0x98] sm:$0xff] }
0x2d8e   :  { %v5347_v19 = vadd.f32 1.0, %v6608_v12  ;;  %5625 = vmatpush.msrb.mxu1 %v5542_v36  ;;  %v5538_v12 = vld [vmem:[%s9876_s7 + $0x78] sm:$0xff]  ;;  %v5562_v36 = vld [vmem:[%s9876_s7 + $0x123] sm:$0x1] }
0x2d90   :  { %6609 = vrcp.f32 %v5347_v19  ;;  %v5359_v14 = vand.u32 2147483648, %v5347_v19  ;;  %vm5353_vm14 = vweird.f32 %v5347_v19  ;;  %v5357_v62 = vand.u32 2147483647, %v5347_v19  ;;  %5626 = vmatpush.msrb.mxu1 %v5541_v57 }
0x2d92   :  { %v5360_v53 = vor.u32 1.1754944e-38, %v5359_v14  ;;  %vm5358_vm4 = vcmp.eq.f32.partialorder %v5357_v62, 8.507059e+37  ;;  %5627 = vmatpush.msrb.mxu1 %v5540_v60  ;;  %v5535_v14 = vld [vmem:[%s9876_s7 + $0x60] sm:$0xff] }
0x2d94   :  { %5628 = vmatpush.msrb.mxu1 %v5539_v21  ;;  %v5563_v21 = vld [vmem:[%s9876_s7 + $0x124] sm:$0x1] }
0x2d96   :  { %v6610_v39 = vpop.eup %6609  ;;  %5629 = vmatpush.msrb.mxu1 %v5538_v12 }
0x2d97   :  { %v5349_v10 = vmul.f32 %v6610_v39, %v5347_v19  ;;  %vm5354_vm1 = vweird.f32 %v6610_v39  ;;  %v5537_v19 = vld [vmem:[%s9876_s7 + $0x70] sm:$0xff] }
0x2d98   :  { %vm5355_vm15 = vmor %vm5353_vm14, %vm5354_vm1  ;;  %vm5485_vm1 = vcmp.eq.s32.totalorder %v10147_v44, %v5482_v37  ;;  %v5529_v44 = vld [vmem:[%s9876_s7 + $0x30] sm:$0xff]  ;;  %5630 = vmatpush.msrb.mxu1 %v5537_v19 }
0x2d99   :  { %v5350_v26 = vsub.f32 1.0, %v5349_v10  ;;  %6214 = vmatpush.msk.msra.mxu2 %vm5485_vm1, %v10148_v8  ;;  %v5528_v8 = vld [vmem:[%s9876_s7 + $0x28] sm:$0xff]  ;;  %5582 = vmatpush.msra.mxu0 %v5529_v44  ;;  %v5557_v19 = vld [vmem:[%s9876_s7 + $0x110] sm:$0xff] }
0x2d9a   :  { %6215 = vmatmul.msk.f32.vlgmr.msra.gmra.mxu2 %vm5494_vm13, %v5391_v38  ;;  %v5536_v10 = vld [vmem:[%s9876_s7 + $0x68] sm:$0xff] }
0x2d9b   :  { %v5351_v35 = vmul.f32 %v6610_v39, %v5350_v26  ;;  %5583 = vmatpush.msra.mxu0 %v5528_v8  ;;  %v5560_v26 = vld [vmem:[%s9876_s7 + $0x121] sm:$0x1]  ;;  %5631 = vmatpush.msrb.mxu1 %v5536_v10  ;;  %v5554_v8 = vld [vmem:[%s9876_s7 + $0xf8] sm:$0xff] }
0x2d9c   :  { %5682 = vmatpush.msra.mxu3 %v5554_v8  ;;  %v5555_v10 = vld [vmem:[%s9876_s7 + $0x100] sm:$0xff] }
0x2d9d   :  { %v5352_v25 = vadd.f32 %v6610_v39, %v5351_v35  ;;  %5584 = vmatpush.msra.mxu0 %v5527_v6  ;;  %5632 = vmatpush.msrb.mxu1 %v5535_v14  ;;  %v5553_v6 = vld [vmem:[%s9876_s7 + $0xf0] sm:$0xff] }
0x2d9e   :  { %5683 = vmatpush.msra.mxu3 %v5553_v6 }
0x2d9f   :  { %v5356_v4 = vsel %vm5355_vm15, %v6610_v39, %v5352_v25  ;;  %5585 = vmatpush.msra.mxu0 %v5526_v51  ;;  %v5568_v39 = vmul.f32 %v5567_v45, %v5559_v29  ;;  %v5552_v51 = vld [vmem:[%s9876_s7 + $0xe8] sm:$0xff] }
0x2da0   :  { %v5361_v42 = vsel %vm5358_vm4, %v5360_v53, %v5356_v4  ;;  %5684 = vmatpush.msra.mxu3 %v5552_v51 }
0x2da1   :  { %5586 = vmatpush.msra.mxu0 %v5525_v34  ;;  %v5548_v34 = vld [vmem:[%s9876_s7 + $0xc8] sm:$0xff] }
0x2da3   :  { %5587 = vmatpush.msra.mxu0 %v5524_v11  ;;  %v5547_v11 = vld [vmem:[%s9876_s7 + $0xc0] sm:$0xff] }
0x2da5   :  { %5588 = vmatpush.msra.mxu0 %v5523_v48  ;;  %v5558_v48 = vld [vmem:[%s9876_s7 + $0x118] sm:$0xff] }
0x2da6   :  { %5710 = vmatpush.msrb.mxu2 %v5558_v48 }
0x2da8   :  { %5711 = vmatpush.msrb.mxu2 %v5557_v19 }
0x2de7   :  { %v5377_v52 = vpop.permute.xlu2 %5376 }
0x2de8   :  { %v5379_v7 = vmul.f32 %v5377_v52, %v5341_v31  ;;  %v5380_v49 = vmul.f32 %v5377_v52, %v5361_v42 }
0x2dea   :  { %5431 = vrot.lane.b32.xlu2 %v5380_v49, %s6757_s16  ;;  %5429 = vrot.lane.b32.xlu1 %v5379_v7, %s6757_s16 }
0x2e1d   :  { %v5519_v31 = vpop.f32.mrf.mxu2 }
0x2e44   :  { %v5432_v30 = vpop.permute.xlu2 %5431 }
0x2e5c   :  { %v5430_v18 = vpop.permute.xlu1 %5429 }
0x2e5d   :  { %v5433_v46 = vsel %vm1584_vm8, %v5430_v18, %v5432_v30  ;;  %vm5569_vm8 = vcmask 785408   ;;  %v5551_v30 = vld [vmem:[%s9876_s7 + $0xe0] sm:$0xff]  ;;  %v5550_v18 = vld [vmem:[%s9876_s7 + $0xd8] sm:$0xff] }
0x2e5e   :  { %6203 = vmatmul.msk.f32.vlgmr.msrb.gmra.mxu3 %vm1644_vm0, %v5433_v46  ;;  %v5549_v46 = vld [vmem:[%s9876_s7 + $0xd0] sm:$0xff] }
0x2e5f   :  { %5685 = vmatpush.msra.mxu3 %v5551_v30 }
0x2e61   :  { %5686 = vmatpush.msra.mxu3 %v5550_v18 }
0x2e63   :  { %5687 = vmatpush.msra.mxu3 %v5549_v46 }
0x2e65   :  { %5688 = vmatpush.msra.mxu3 %v5548_v34 }
0x2e67   :  { %5689 = vmatpush.msra.mxu3 %v5547_v11 }
0x2ee1   :  { %v5456_v54 = vpop.f32.mrf.mxu3 }
0x2ee2   :  { %v5480_v27 = vadd.f32 %v5479_v33, %v5456_v54 }
0x2ee4   :  { %v5522_v58 = vadd.f32 %v5519_v31, %v5480_v27 }
0x2ee6   :  { %6216 = vmatmul.msk.f32.vlgmr.msra.gmra.mxu0 %vm5569_vm8, %v5522_v58 }
0x2f63   :  { %v5590_v35 = vpop.f32.mrf.mxu0 }
0x2f64   :  { %v5591_v25 = vadd.f32 %v5590_v35, %v5568_v39  ;;  %v5556_v39 = vld [vmem:[%s9876_s7 + $0x108] sm:$0xff] }
0x2f65   :  { %5712 = vmatpush.msrb.mxu2 %v5556_v39 }
0x2f66   :  { %v5593_v62 = vadd.f32 %v5591_v25, %v5560_v26  ;;  %v5564_v26 = vld [vmem:[%s9876_s7 + $0x125] sm:$0x1] }
0x2f67   :  { %5713 = vmatpush.msrb.mxu2 %v5555_v10 }
0x2f68   :  { %v6217_v4 = vmul.f32 -1.442695, %v5593_v62  ;;  %v5565_v62 = vld [vmem:[%s9876_s7 + $0x126] sm:$0x1] }
0x2f6a   :  { %6611 = vpow2.f32 %v6217_v4 }
0x2f70   :  { %v6612_v53 = vpop.eup %6611 }
0x2f71   :  { %v5597_v42 = vadd.f32 1.0, %v6612_v53 }
0x2f73   :  { %6613 = vrcp.f32 %v5597_v42  ;;  %v5609_v3 = vand.u32 2147483648, %v5597_v42  ;;  %v5607_v41 = vand.u32 2147483647, %v5597_v42  ;;  %vm5603_vm14 = vweird.f32 %v5597_v42 }
0x2f74   :  { %6615 = vrcp.f32 %v6760_v9 }
0x2f75   :  { %v5610_v63 = vor.u32 1.1754944e-38, %v5609_v3  ;;  %vm5608_vm4 = vcmp.eq.f32.partialorder %v5607_v41, 8.507059e+37 }
0x2f79   :  { %v6614_v52 = vpop.eup %6613 }
0x2f7a   :  { %v5599_v7 = vmul.f32 %v6614_v52, %v5597_v42  ;;  %vm5604_vm0 = vweird.f32 %v6614_v52  ;;  %v6616_v13 = vpop.eup %6615 }
0x2f7b   :  { %vm5605_vm15 = vmor %vm5603_vm14, %vm5604_vm0  ;;  %v5642_v40 = vmul.f32 64.0, %v6616_v13  ;;  %vm5646_vm2 = vweird.f32 %v6616_v13 }
0x2f7c   :  { %v5600_v49 = vsub.f32 1.0, %v5599_v7 }
0x2f7d   :  { %v5643_v0 = vsub.f32 1.0, %v5642_v40 }
0x2f7e   :  { %v5601_v15 = vmul.f32 %v6614_v52, %v5600_v49 }
0x2f7f   :  { %v5644_v38 = vmul.f32 %v6616_v13, %v5643_v0 }
0x2f80   :  { %v5602_v17 = vadd.f32 %v6614_v52, %v5601_v15 }
0x2f81   :  { %v5645_v37 = vadd.f32 %v6616_v13, %v5644_v38 }
0x2f82   :  { %v5606_v28 = vsel %vm5605_vm15, %v6614_v52, %v5602_v17 }
0x2f83   :  { %v5611_v24 = vsel %vm5608_vm4, %v5610_v63, %v5606_v28  ;;  %v5647_v5 = vsel %vm5646_vm2, %v6616_v13, %v5645_v37 }
0x2f84   :  { %5723 = vrot.lane.b32.xlu0 %v5611_v24, %s6759_s15  ;;  %v5613_v22 = vmul.f32 %v5611_v24, %v5522_v58 }
0x2f86   :  { %6218 = vmatmul.msk.f32.vlgmr.msrb.gmra.mxu1 %vm5569_vm8, %v5613_v22 }
0x2ff6   :  { %v5724_v50 = vpop.permute.xlu0 %5723 }
0x2ff7   :  { %5727 = vst.msk [vmem:[%s9872_s8] sm:$0x1] %vm5726_vm12, %v5724_v50 }
0x3003   :  { %v5634_v1 = vpop.f32.mrf.mxu1 }
0x3004   :  { %v5635_v55 = vadd.f32 %v5634_v1, %v5561_v23 }
0x3006   :  { %v5638_v32 = vsel %vm5637_vm3, %v5635_v55, 0.0 }
0x3007   :  { %5639 = vadd.xlane.f32.xlu1 %v5638_v32 }
0x307a   :  { %v5640_v56 = vpop.xlane.xlu1 %5639 }
0x307b   :  { %v5648_v20 = vmul.f32 %v5647_v5, %v5640_v56 }
0x307d   :  { %v5649_v61 = vsub.f32 %v5635_v55, %v5648_v20 }
0x307f   :  { %v5650_v16 = vmul.f32 %v5649_v61, %v5649_v61 }
0x3081   :  { %v5651_v44 = vsel %vm5637_vm3, %v5650_v16, 0.0 }
0x3082   :  { %5652 = vadd.xlane.f32.xlu2 %v5651_v44 }
0x30f5   :  { %v5653_v33 = vpop.xlane.xlu2 %5652 }
0x30f6   :  { %v5654_v54 = vmul.f32 %v5653_v33, %v5647_v5 }
0x30f8   :  { %v5655_v31 = vadd.f32 1e-05, %v5654_v54 }
0x30fa   :  { %6617 = vrsqrt.f32 %v5655_v31  ;;  %vm5662_vm7 = vweird.f32 %v5655_v31 }
0x3100   :  { %v6618_v27 = vpop.eup %6617 }
0x3101   :  { %v5657_v58 = vmul.f32 %v6618_v27, %v5655_v31  ;;  %vm5663_vm5 = vweird.f32 %v6618_v27 }
0x3102   :  { %vm5664_vm9 = vmor %vm5662_vm7, %vm5663_vm5 }
0x3103   :  { %v5658_v59 = vmul.f32 %v6618_v27, %v5657_v58 }
0x3105   :  { %v5659_v47 = vmul.f32 0.5, %v5658_v59 }
0x3107   :  { %v5660_v2 = vsub.f32 1.5, %v5659_v47 }
0x3109   :  { %v5661_v43 = vmul.f32 %v6618_v27, %v5660_v2 }
0x310b   :  { %v5665_v57 = vsel %vm5664_vm9, %v6618_v27, %v5661_v43 }
0x310c   :  { %v5666_v60 = vmul.f32 %v5665_v57, %v5649_v61 }
0x310e   :  { %v5667_v29 = vmul.f32 %v5666_v60, %v5562_v36 }
0x3110   :  { %v5668_v45 = vadd.f32 %v5667_v29, %v5563_v21 }
0x3112   :  { %v5669_v12 = vmax.f32 %v5668_v45, 0.0 }
0x3114   :  { %6219 = vmatmul.msk.f32.vlgmr.msra.gmra.mxu3 %vm5670_vm10, %v5669_v12 }
0x3197   :  { %v5691_v35 = vpop.f32.mrf.mxu3 }
0x3198   :  { %v5692_v25 = vadd.f32 %v5691_v35, %v5564_v26 }
0x319a   :  { %v5694_v14 = vmax.f32 %v5692_v25, 0.0 }
0x319c   :  { %6220 = vmatmul.msk.f32.vlgmr.msrb.gmra.mxu2 %vm10157_vm6, %v5694_v14 }
0x321f   :  { %v5715_v4 = vpop.f32.mrf.mxu2 }
0x3220   :  { %v5716_v53 = vadd.f32 %v5715_v4, %v5565_v62 }
0x3222   :  { %5729 = vrot.lane.b32.xlu0 %v5716_v53, %s6759_s15 }
0x3294   :  { %v5730_v42 = vpop.permute.xlu0 %5729 }
0x3295   :  { %5733 = vst.msk [vmem:[%s9872_s8 + $0x1] sm:$0x1] %vm5732_vm11, %v5730_v42 }

</bundles_post_ra>
